<compile_context>
chip_gen: v6e
topology: v6e:2x2x1
jax: 0.10.0
libtpu: 0.0.40
codegen_flags: <defaults>
</compile_context>

<pallas_src>
import functools

import jax
import jax.numpy as jnp
from jax.experimental import pallas as pl
from jax.experimental.pallas import tpu as pltpu


_SQRT_2_OVER_PI = 0.7978845608028654


# ----------------------------------------------------------------------------
# Generation-aware budgets / tiling helpers
# ----------------------------------------------------------------------------
@functools.lru_cache(maxsize=None)
def _vmem_capacity_bytes():
    try:
        return int(pltpu.get_tpu_info().vmem_capacity_bytes)
    except Exception:
        return 128 * 1024 * 1024     # v5e/v6e default if the query is unavailable


def _vmem_budget():
    cap = _vmem_capacity_bytes()
    # 64-96 MiB on 128 MiB parts (v5e/v6e), ~48 MiB on v7x (64 MiB physical).
    return max(32 * 1024 * 1024, min(96 * 1024 * 1024, (cap * 3) // 4))


def _default_block_k():
    # Bigger contraction tiles when VMEM is plentiful (v5e/v6e), smaller on v7x.
    return 1024 if _vmem_capacity_bytes() >= 100 * 1024 * 1024 else 512


def _fit_block(dim, pref, align):
    """Largest block <= pref that divides dim and is align-aligned, else full dim."""
    if dim <= pref:
        return dim
    t = (pref // align) * align
    while t >= align:
        if dim % t == 0:
            return t
        t -= align
    return dim


def _gelu_tanh_f32(y):
    # gelu_pytorch_tanh, computed in f32 on the accumulator (v5e has no bf16 VPU).
    return 0.5 * y * (1.0 + jnp.tanh(_SQRT_2_OVER_PI * (y + 0.044715 * y * y * y)))


# ----------------------------------------------------------------------------
# Fused LayerNorm + Linear (LN cached in VMEM scratch across the N axis)
# ----------------------------------------------------------------------------
def _ln_linear_kernel(x_ref, g_ref, be_ref, w_ref, b_ref, o_ref, xn_ref,
                      *, eps, activation):
    @pl.when(pl.program_id(1) == 0)
    def _():
        # LayerNorm statistics in f32, computed once per row tile (j == 0 only).
        x = x_ref[...].astype(jnp.float32)
        mean = jnp.mean(x, axis=-1, keepdims=True)
        xc = x - mean
        var = jnp.mean(xc * xc, axis=-1, keepdims=True)
        xn = xc * jax.lax.rsqrt(var + eps)
        xn = xn * g_ref[...].astype(jnp.float32) + be_ref[...].astype(jnp.float32)
        xn_ref[...] = xn.astype(xn_ref.dtype)

    # bf16 x bf16 matmul on the MXU, f32 accumulation.
    y = jnp.dot(xn_ref[...], w_ref[...], preferred_element_type=jnp.float32)
    y = y + b_ref[...].astype(jnp.float32)
    if activation == "gelu_tanh":
        y = _gelu_tanh_f32(y)
    o_ref[...] = y.astype(o_ref.dtype)


def ln_linear(x, ln_w, ln_b, w, b, *, eps, activation="none",
              block_m=256, block_n=256):
    """LayerNorm(x) @ w + b (optionally GELU).  x:[T,K], w:[K,N] -> [T,N]."""
    T, K = x.shape
    N = w.shape[1]
    tm = _fit_block(T, block_m, 16)     # bf16 sublane alignment
    tn = _fit_block(N, block_n, 128)    # lane alignment
    grid = (T // tm, N // tn)
    kern = functools.partial(_ln_linear_kernel, eps=eps, activation=activation)
    return pl.pallas_call(
        kern,
        out_shape=jax.ShapeDtypeStruct((T, N), x.dtype),
        grid=grid,
        in_specs=[
            pl.BlockSpec((tm, K), lambda i, j: (i, 0)),
            pl.BlockSpec((1, K), lambda i, j: (0, 0)),
            pl.BlockSpec((1, K), lambda i, j: (0, 0)),
            pl.BlockSpec((K, tn), lambda i, j: (0, j)),
            pl.BlockSpec((1, tn), lambda i, j: (0, j)),
        ],
        out_specs=pl.BlockSpec((tm, tn), lambda i, j: (i, j)),
        scratch_shapes=[pltpu.VMEM((tm, K), x.dtype)],     # cached LN output
        compiler_params=pltpu.CompilerParams(
            # N axis is "arbitrary": the xn scratch carries state across j.
            dimension_semantics=("parallel", "arbitrary"),
            vmem_limit_bytes=_vmem_budget()),
    )(x, ln_w.reshape(1, K), ln_b.reshape(1, K), w, b.reshape(1, N))


# ----------------------------------------------------------------------------
# Tiled Linear with fused bias + residual (accumulator seeded with bias+residual)
# ----------------------------------------------------------------------------
def _linear_residual_kernel(x_ref, w_ref, b_ref, r_ref, o_ref, acc_ref):
    k = pl.program_id(2)

    @pl.when(k == 0)
    def _():
        acc_ref[...] = r_ref[...].astype(jnp.float32) + b_ref[...].astype(jnp.float32)

    acc_ref[...] += jnp.dot(x_ref[...], w_ref[...],
                            preferred_element_type=jnp.float32)

    @pl.when(k == pl.num_programs(2) - 1)
    def _():
        o_ref[...] = acc_ref[...].astype(o_ref.dtype)


def linear_residual(x, w, b, residual, *, block_m=256, block_n=256, block_k=None):
    """x @ w + b + residual.  x:[T,K], w:[K,N], residual:[T,N] -> [T,N]."""
    T, K = x.shape
    N = w.shape[1]
    if block_k is None:
        block_k = _default_block_k()
    tm = _fit_block(T, block_m, 16)
    tn = _fit_block(N, block_n, 128)
    tk = _fit_block(K, block_k, 128)
    grid = (T // tm, N // tn, K // tk)
    return pl.pallas_call(
        _linear_residual_kernel,
        out_shape=jax.ShapeDtypeStruct((T, N), x.dtype),
        grid=grid,
        in_specs=[
            pl.BlockSpec((tm, tk), lambda i, j, k: (i, k)),
            pl.BlockSpec((tk, tn), lambda i, j, k: (k, j)),
            pl.BlockSpec((1, tn), lambda i, j, k: (0, j)),
            pl.BlockSpec((tm, tn), lambda i, j, k: (i, j)),
        ],
        out_specs=pl.BlockSpec((tm, tn), lambda i, j, k: (i, j)),
        scratch_shapes=[pltpu.VMEM((tm, tn), jnp.float32)],
        compiler_params=pltpu.CompilerParams(
            dimension_semantics=("parallel", "parallel", "arbitrary"),
            vmem_limit_bytes=_vmem_budget()),
    )(x, w, b.reshape(1, N), residual)


# ----------------------------------------------------------------------------
# Fused MLP: ln_2 + c_fc + GELU + c_proj + bias + residual in ONE kernel.
# The (T, 4H) intermediate lives only as a (tm, tc) tile in VMEM.
# ----------------------------------------------------------------------------
def _mlp_fused_kernel(x_ref, g_ref, be_ref, wfc_ref, bfc_ref, wproj_ref,
                      bproj_ref, r_ref, o_ref, xn_ref, acc_ref, *, eps):
    c = pl.program_id(1)

    @pl.when(c == 0)
    def _():
        x = x_ref[...].astype(jnp.float32)
        mean = jnp.mean(x, axis=-1, keepdims=True)
        xc = x - mean
        var = jnp.mean(xc * xc, axis=-1, keepdims=True)
        xn = xc * jax.lax.rsqrt(var + eps)
        xn = xn * g_ref[...].astype(jnp.float32) + be_ref[...].astype(jnp.float32)
        xn_ref[...] = xn.astype(xn_ref.dtype)
        # Seed the c_proj accumulator with residual + bias (free epilogue).
        acc_ref[...] = r_ref[...].astype(jnp.float32) + bproj_ref[...].astype(jnp.float32)

    h = jnp.dot(xn_ref[...], wfc_ref[...], preferred_element_type=jnp.float32)
    h = h + bfc_ref[...].astype(jnp.float32)
    h = _gelu_tanh_f32(h)
    acc_ref[...] += jnp.dot(h.astype(wproj_ref.dtype), wproj_ref[...],
                            preferred_element_type=jnp.float32)

    @pl.when(c == pl.num_programs(1) - 1)
    def _():
        o_ref[...] = acc_ref[...].astype(o_ref.dtype)


def mlp_fused(x, ln_w, ln_b, w_fc, b_fc, w_proj, b_proj, residual, *,
              eps, block_m=256, block_c=None):
    """residual + c_proj(GELU(c_fc(LN(x)))).  x/residual:[T,H] -> [T,H]."""
    T, K = x.shape
    inner = w_fc.shape[1]
    H = w_proj.shape[1]
    if block_c is None:
        block_c = _default_block_k()
    tm = _fit_block(T, block_m, 16)
    tc = _fit_block(inner, block_c, 128)
    grid = (T // tm, inner // tc)
    return pl.pallas_call(
        functools.partial(_mlp_fused_kernel, eps=eps),
        out_shape=jax.ShapeDtypeStruct((T, H), x.dtype),
        grid=grid,
        in_specs=[
            pl.BlockSpec((tm, K), lambda i, c: (i, 0)),    # x
            pl.BlockSpec((1, K), lambda i, c: (0, 0)),     # ln_2 weight
            pl.BlockSpec((1, K), lambda i, c: (0, 0)),     # ln_2 bias
            pl.BlockSpec((K, tc), lambda i, c: (0, c)),    # c_fc weight chunk
            pl.BlockSpec((1, tc), lambda i, c: (0, c)),    # c_fc bias chunk
            pl.BlockSpec((tc, H), lambda i, c: (c, 0)),    # c_proj weight chunk
            pl.BlockSpec((1, H), lambda i, c: (0, 0)),     # c_proj bias
            pl.BlockSpec((tm, H), lambda i, c: (i, 0)),    # residual
        ],
        out_specs=pl.BlockSpec((tm, H), lambda i, c: (i, 0)),
        scratch_shapes=[pltpu.VMEM((tm, K), x.dtype),       # cached LN output
                        pltpu.VMEM((tm, H), jnp.float32)],  # c_proj accumulator
        compiler_params=pltpu.CompilerParams(
            dimension_semantics=("parallel", "arbitrary"),
            vmem_limit_bytes=_vmem_budget()),
    )(x, ln_w.reshape(1, K), ln_b.reshape(1, K), w_fc, b_fc.reshape(1, inner),
      w_proj, b_proj.reshape(1, H), residual)


# ----------------------------------------------------------------------------
# Flash-style multi-query causal attention.
#   qkv view: (B, S, nh+2, hd)  (heads pre-split by a free HBM reshape; the
#             BlockSpec picks the nh query heads directly, no XLA Q slice)
#   Scale is already folded into the Q projection weights (prepare_params).
# ----------------------------------------------------------------------------
def _mqa_flash_kernel(q_ref, k_ref, v_ref, o_ref, m_ref, l_ref, acc_ref):
    _, tq, nh, hd = q_ref.shape
    tk = k_ref.shape[1]
    qi = pl.program_id(1)
    ki = pl.program_id(2)
    q_start = qi * tq
    kv_start = ki * tk

    @pl.when(ki == 0)
    def _():
        m_ref[...] = jnp.full(m_ref.shape, -jnp.inf, jnp.float32)
        l_ref[...] = jnp.zeros(l_ref.shape, jnp.float32)
        acc_ref[...] = jnp.zeros(acc_ref.shape, jnp.float32)

    # Causal: skip kv blocks that lie entirely above the diagonal of this q block.
    @pl.when(kv_start <= q_start + tq - 1)
    def _():
        # (tq, nh, hd) -> (tq*nh, hd): leading-dim merge only (layout-free for nh=8).
        q2 = q_ref[0].reshape(tq * nh, hd)
        kb = k_ref[0]                                      # (tk, hd)
        vb = v_ref[0]                                      # (tk, hd)

        # One QK^T for all heads (MQA shares the single KV head).
        s = jax.lax.dot_general(q2, kb, (((1,), (1,)), ((), ())),
                                preferred_element_type=jnp.float32)
        s = s.reshape(tq, nh, tk)                          # leading split (free)

        # Single (tq,1,tk) iota compare, broadcast over heads.
        rows = jax.lax.broadcasted_iota(jnp.int32, (tq, 1, tk), 0) + q_start
        cols = jax.lax.broadcasted_iota(jnp.int32, (tq, 1, tk), 2) + kv_start
        s = jnp.where(cols <= rows, s, -1e30)

        # Online softmax update.
        m_prev = m_ref[...]
        m_new = jnp.maximum(m_prev, jnp.max(s, axis=-1, keepdims=True))
        alpha = jnp.exp(m_prev - m_new)
        p = jnp.exp(s - m_new)
        l_ref[...] = alpha * l_ref[...] + jnp.sum(p, axis=-1, keepdims=True)
        pv = jnp.dot(p.reshape(tq * nh, tk).astype(vb.dtype), vb,
                     preferred_element_type=jnp.float32)
        acc_ref[...] = alpha * acc_ref[...] + pv.reshape(tq, nh, hd)
        m_ref[...] = m_new

    @pl.when(ki == pl.num_programs(2) - 1)
    def _():
        # approx reciprocal runs on the EUP; ~1e-3 rel error, fine for bf16 output.
        o_ref[0] = (acc_ref[...] *
                    pl.reciprocal(l_ref[...], approx=True)).astype(o_ref.dtype)


def mqa_attention(qkv4, k, v, *, num_heads, head_dim, block_q=256, block_kv=256):
    """qkv4:[B,S,nh+2,hd] (head-split view), k/v:[B,S,hd] -> [B,S,nh,hd] causal MQA."""
    B, S, _, _ = qkv4.shape
    nh, hd = num_heads, head_dim
    tq = _fit_block(S, block_q, 8)
    tk = _fit_block(S, block_kv, 8)
    return pl.pallas_call(
        _mqa_flash_kernel,
        out_shape=jax.ShapeDtypeStruct((B, S, nh, hd), qkv4.dtype),
        grid=(B, S // tq, S // tk),
        in_specs=[
            # Picks only the nh query heads (block index 0 along the head axis).
            pl.BlockSpec((1, tq, nh, hd), lambda b, qi, ki: (b, qi, 0, 0)),
            pl.BlockSpec((1, tk, hd), lambda b, qi, ki: (b, ki, 0)),
            pl.BlockSpec((1, tk, hd), lambda b, qi, ki: (b, ki, 0)),
        ],
        out_specs=pl.BlockSpec((1, tq, nh, hd), lambda b, qi, ki: (b, qi, 0, 0)),
        scratch_shapes=[
            pltpu.VMEM((tq, nh, 1), jnp.float32),    # running max
            pltpu.VMEM((tq, nh, 1), jnp.float32),    # running denom
            pltpu.VMEM((tq, nh, hd), jnp.float32),   # running context
        ],
        compiler_params=pltpu.CompilerParams(
            dimension_semantics=("parallel", "parallel", "arbitrary"),
            vmem_limit_bytes=_vmem_budget()),
    )(qkv4, k, v)


# ----------------------------------------------------------------------------
# GPTBigCodeBlock forward (multi_query=True, tensor-parallel world size = 1)
# ----------------------------------------------------------------------------
class Config:
    hidden_size = 256
    num_attention_heads = 8
    n_inner = None                     # -> 4 * hidden_size
    layer_norm_epsilon = 1e-5
    multi_query = True
    activation_function = "gelu_pytorch_tanh"


def init_params(cfg, key):
    H = cfg.hidden_size
    nh = cfg.num_attention_heads
    hd = H // nh
    kv_dim = hd if cfg.multi_query else H
    inner = cfg.n_inner if cfg.n_inner is not None else 4 * H
    std = 0.02

    def w_bf16(k, shape):
        return (std * jax.random.normal(k, shape, jnp.float32)).astype(jnp.bfloat16)

    def b_f32(k, shape):
        return std * jax.random.normal(k, shape, jnp.float32)

    keys = jax.random.split(key, 12)
    return {
        "ln1_w": jnp.ones((H,), jnp.float32) + 0.1 * jax.random.normal(keys[0], (H,)),
        "ln1_b": 0.02 * jax.random.normal(keys[1], (H,)),
        "c_attn_w": w_bf16(keys[2], (H, H + 2 * kv_dim)),     # QKVParallelLinear
        "c_attn_b": b_f32(keys[3], (H + 2 * kv_dim,)),
        "c_proj_w": w_bf16(keys[4], (H, H)),                  # RowParallelLinear
        "c_proj_b": b_f32(keys[5], (H,)),
        "ln2_w": jnp.ones((H,), jnp.float32) + 0.1 * jax.random.normal(keys[6], (H,)),
        "ln2_b": 0.02 * jax.random.normal(keys[7], (H,)),
        "c_fc_w": w_bf16(keys[8], (H, inner)),                # ColumnParallelLinear
        "c_fc_b": b_f32(keys[9], (inner,)),
        "mlp_proj_w": w_bf16(keys[10], (inner, H)),           # RowParallelLinear
        "mlp_proj_b": b_f32(keys[11], (H,)),
    }


def prepare_params(params, cfg):
    """Fold the 1/sqrt(head_dim) attention scale into the Q columns of c_attn.

    Zero runtime cost: the kernels then never multiply the score matrix by scale.
    """
    H = cfg.hidden_size
    hd = H // cfg.num_attention_heads
    scale = float(hd) ** -0.5
    w = params["c_attn_w"]
    b = params["c_attn_b"]
    wq = (w[:, :H].astype(jnp.float32) * scale).astype(w.dtype)
    p = dict(params)
    p["c_attn_w"] = jnp.concatenate([wq, w[:, H:]], axis=1)
    p["c_attn_b"] = jnp.concatenate([b[:H] * scale, b[H:]], axis=0)
    return p


def gpt_bigcode_block_forward(params, cfg, hidden_states):
    """hidden_states: [B, S, H] -> [B, S, H].  `params` must come from prepare_params."""
    B, S, H = hidden_states.shape
    nh = cfg.num_attention_heads
    hd = H // nh
    eps = cfg.layer_norm_epsilon
    T = B * S
    h_flat = hidden_states.reshape(T, H)

    # --- attention block: ln_1 fused into c_attn; residual fused into c_proj ---
    residual = h_flat
    qkv = ln_linear(h_flat, params["ln1_w"], params["ln1_b"],
                    params["c_attn_w"], params["c_attn_b"], eps=eps)   # (T, H+2hd)
    # Free (metadata-only) head-split view: (B, S, nh+2, hd); no XLA slice of Q.
    qkv4 = qkv.reshape(B, S, nh + 2, hd)
    k = qkv4[:, :, nh, :]          # (B, S, hd) — tiny XLA slices for the shared KV head
    v = qkv4[:, :, nh + 1, :]
    attn = mqa_attention(qkv4, k, v, num_heads=nh, head_dim=hd)        # (B, S, nh, hd)
    h_flat = linear_residual(attn.reshape(T, H), params["c_proj_w"],
                             params["c_proj_b"], residual)

    # --- MLP block: ln_2 + c_fc + GELU + c_proj + residual in one fused kernel ---
    residual = h_flat
    h_flat = mlp_fused(h_flat, params["ln2_w"], params["ln2_b"],
                       params["c_fc_w"], params["c_fc_b"],
                       params["mlp_proj_w"], params["mlp_proj_b"],
                       residual, eps=eps)

    return h_flat.reshape(B, S, H)


# ----------------------------------------------------------------------------
# Pure-JAX reference (f32) for correctness checking — uses the RAW params.
# ----------------------------------------------------------------------------
def _reference_block(params, cfg, hidden_states):
    f32 = jnp.float32
    p = {name: val.astype(f32) for name, val in params.items()}
    x = hidden_states.astype(f32)
    B, S, H = x.shape
    nh = cfg.num_attention_heads
    hd = H // nh
    eps = cfg.layer_norm_epsilon

    def ln(t, w, b):
        m = t.mean(-1, keepdims=True)
        var = ((t - m) ** 2).mean(-1, keepdims=True)
        return (t - m) * jax.lax.rsqrt(var + eps) * w + b

    residual = x
    h = ln(x, p["ln1_w"], p["ln1_b"])
    qkv = h @ p["c_attn_w"] + p["c_attn_b"]
    q = qkv[..., :H].reshape(B, S, nh, hd)
    k = qkv[..., H:H + hd]
    v = qkv[..., H + hd:]
    scores = jnp.einsum("bqhd,bkd->bhqk", q, k) * (hd ** -0.5)
    causal = jnp.tril(jnp.ones((S, S), bool))
    scores = jnp.where(causal[None, None], scores, -1e30)
    probs = jax.nn.softmax(scores, axis=-1)
    ctx = jnp.einsum("bhqk,bkd->bqhd", probs, v).reshape(B, S, H)
    attn_out = ctx @ p["c_proj_w"] + p["c_proj_b"]
    h = residual + attn_out

    residual = h
    h2 = ln(h, p["ln2_w"], p["ln2_b"])
    inner = h2 @ p["c_fc_w"] + p["c_fc_b"]
    inner = _gelu_tanh_f32(inner)
    ff = inner @ p["mlp_proj_w"] + p["mlp_proj_b"]
    return residual + ff


if __name__ == "__main__":
    cfg = Config()
    key = jax.random.PRNGKey(0)
    pkey, xkey = jax.random.split(key)

    params = init_params(cfg, pkey)
    prepared = prepare_params(params, cfg)     # fold attention scale into Q weights

    B, S = 2, 32
    hidden_states = jax.random.normal(
        xkey, (B, S, cfg.hidden_size), jnp.float32).astype(jnp.bfloat16)

    fwd = jax.jit(lambda p, h: gpt_bigcode_block_forward(p, cfg, h))
    out = fwd(prepared, hidden_states)
    jax.block_until_ready(out)

    ref = _reference_block(params, cfg, hidden_states)
    out_f32 = out.astype(jnp.float32)
    err = float(jnp.max(jnp.abs(out_f32 - ref)))

    assert out.shape == (B, S, cfg.hidden_size)
    assert bool(jnp.all(jnp.isfinite(out_f32)))
    assert err < 5e-2, f"max abs err vs reference = {err}"
    print("KERNEL_OK")
</pallas_src>

<mosaic_0001>
module attributes {stable_mosaic.version = 11 : i64} {
  func.func @_ln_linear_kernel(%arg0: i32, %arg1: i32, %arg2: memref<64x256xbf16, #tpu.memory_space<vmem>>, %arg3: memref<1x256xf32, #tpu.memory_space<vmem>>, %arg4: memref<1x256xf32, #tpu.memory_space<vmem>>, %arg5: memref<256x320xbf16, #tpu.memory_space<vmem>>, %arg6: memref<1x320xf32, #tpu.memory_space<vmem>>, %arg7: memref<64x320xbf16, #tpu.memory_space<vmem>>, %arg8: memref<64x256xbf16, #tpu.memory_space<vmem>>) attributes {dimension_semantics = [#tpu.dimension_semantics<parallel>, #tpu.dimension_semantics<arbitrary>], iteration_bounds = array<i64: 1, 1>, scalar_prefetch = 0 : i64, scratch_operands = 1 : i64, tpu.core_type = #tpu.core_type<tc>, window_params = [{transform_indices = @transform_0, window_bounds = array<i64: 64, 256>}, {pipeline_mode = #tpu.pipeline_mode<synchronous>, transform_indices = @transform_1, window_bounds = array<i64: 1, 256>}, {pipeline_mode = #tpu.pipeline_mode<synchronous>, transform_indices = @transform_2, window_bounds = array<i64: 1, 256>}, {transform_indices = @transform_3, window_bounds = array<i64: 256, 320>}, {transform_indices = @transform_4, window_bounds = array<i64: 1, 320>}, {transform_indices = @transform_5, window_bounds = array<i64: 64, 320>}]} {
    %c0_i32 = arith.constant 0 : i32
    %0 = arith.cmpi eq, %arg1, %c0_i32 : i32
    %1 = arith.extui %0 : i1 to i32
    %c0_i32_0 = arith.constant 0 : i32
    %2 = arith.cmpi ne, %1, %c0_i32_0 : i32
    scf.if %2 {
      %c0_8 = arith.constant 0 : index
      %c0_9 = arith.constant 0 : index
      %11 = vector.load %arg2[%c0_8, %c0_9] : memref<64x256xbf16, #tpu.memory_space<vmem>>, vector<64x256xbf16>
      %12 = arith.extf %11 : vector<64x256xbf16> to vector<64x256xf32>
      %cst_10 = arith.constant dense<0.000000e+00> : vector<64xf32>
      %13 = vector.multi_reduction <add>, %12, %cst_10 [1] : vector<64x256xf32> to vector<64xf32>
      %14 = vector.shape_cast %13 : vector<64xf32> to vector<64x1xf32>
      %cst_11 = arith.constant 2.560000e+02 : f32
      %15 = vector.broadcast %cst_11 : f32 to vector<64x1xf32>
      %16 = arith.divf %14, %15 : vector<64x1xf32>
      %17 = vector.broadcast %16 : vector<64x1xf32> to vector<64x256xf32>
      %18 = arith.subf %12, %17 : vector<64x256xf32>
      %19 = arith.mulf %18, %18 : vector<64x256xf32>
      %cst_12 = arith.constant dense<0.000000e+00> : vector<64xf32>
      %20 = vector.multi_reduction <add>, %19, %cst_12 [1] : vector<64x256xf32> to vector<64xf32>
      %21 = vector.shape_cast %20 : vector<64xf32> to vector<64x1xf32>
      %cst_13 = arith.constant 2.560000e+02 : f32
      %22 = vector.broadcast %cst_13 : f32 to vector<64x1xf32>
      %23 = arith.divf %21, %22 : vector<64x1xf32>
      %cst_14 = arith.constant 9.99999974E-6 : f32
      %24 = vector.broadcast %cst_14 : f32 to vector<64x1xf32>
      %25 = arith.addf %23, %24 : vector<64x1xf32>
      %26 = math.rsqrt %25 : vector<64x1xf32>
      %27 = vector.broadcast %26 : vector<64x1xf32> to vector<64x256xf32>
      %28 = arith.mulf %18, %27 : vector<64x256xf32>
      %c0_15 = arith.constant 0 : index
      %c0_16 = arith.constant 0 : index
      %29 = vector.load %arg3[%c0_15, %c0_16] : memref<1x256xf32, #tpu.memory_space<vmem>>, vector<1x256xf32>
      %30 = vector.broadcast %29 : vector<1x256xf32> to vector<64x256xf32>
      %31 = arith.mulf %28, %30 : vector<64x256xf32>
      %c0_17 = arith.constant 0 : index
      %c0_18 = arith.constant 0 : index
      %32 = vector.load %arg4[%c0_17, %c0_18] : memref<1x256xf32, #tpu.memory_space<vmem>>, vector<1x256xf32>
      %33 = vector.broadcast %32 : vector<1x256xf32> to vector<64x256xf32>
      %34 = arith.addf %31, %33 : vector<64x256xf32>
      %35 = arith.truncf %34 : vector<64x256xf32> to vector<64x256xbf16>
      %c0_19 = arith.constant 0 : index
      %c0_20 = arith.constant 0 : index
      %36 = vector.load %arg8[%c0_19, %c0_20] : memref<64x256xbf16, #tpu.memory_space<vmem>>, vector<64x256xbf16>
      tpu.vector_store %arg8[%c0_19, %c0_20], %35 {strides = array<i32>} : memref<64x256xbf16, #tpu.memory_space<vmem>>, vector<64x256xbf16>,
    } else {
    }
    %c0 = arith.constant 0 : index
    %c0_1 = arith.constant 0 : index
    %3 = vector.load %arg8[%c0, %c0_1] : memref<64x256xbf16, #tpu.memory_space<vmem>>, vector<64x256xbf16>
    %c0_2 = arith.constant 0 : index
    %c0_3 = arith.constant 0 : index
    %4 = vector.load %arg5[%c0_2, %c0_3] : memref<256x320xbf16, #tpu.memory_space<vmem>>, vector<256x320xbf16>
    %cst = arith.constant dense<0.000000e+00> : vector<64x320xf32>
    %5 = tpu.matmul %3, %4, %cst {dimension_numbers = #tpu.dot_dimension_numbers<[1], [0], [0], [1], [0, 0, 1, 1], [], []>} : vector<64x256xbf16>, vector<256x320xbf16>, vector<64x320xf32> -> vector<64x320xf32>
    %c0_4 = arith.constant 0 : index
    %c0_5 = arith.constant 0 : index
    %6 = vector.load %arg6[%c0_4, %c0_5] : memref<1x320xf32, #tpu.memory_space<vmem>>, vector<1x320xf32>
    %7 = vector.broadcast %6 : vector<1x320xf32> to vector<64x320xf32>
    %8 = arith.addf %5, %7 : vector<64x320xf32>
    %9 = arith.truncf %8 : vector<64x320xf32> to vector<64x320xbf16>
    %c0_6 = arith.constant 0 : index
    %c0_7 = arith.constant 0 : index
    %10 = vector.load %arg7[%c0_6, %c0_7] : memref<64x320xbf16, #tpu.memory_space<vmem>>, vector<64x320xbf16>
    tpu.vector_store %arg7[%c0_6, %c0_7], %9 {strides = array<i32>} : memref<64x320xbf16, #tpu.memory_space<vmem>>, vector<64x320xbf16>,
    return
  }
  func.func @transform_0(%arg0: i32, %arg1: i32) -> (i32, i32) {
    %c0_i32 = arith.constant 0 : i32
    %c0_i32_0 = arith.constant 0 : i32
    return %arg0, %c0_i32 : i32, i32
  }
  func.func @transform_1(%arg0: i32, %arg1: i32) -> (i32, i32) {
    %c0_i32 = arith.constant 0 : i32
    %c0_i32_0 = arith.constant 0 : i32
    %c0_i32_1 = arith.constant 0 : i32
    return %c0_i32, %c0_i32_0 : i32, i32
  }
  func.func @transform_2(%arg0: i32, %arg1: i32) -> (i32, i32) {
    %c0_i32 = arith.constant 0 : i32
    %c0_i32_0 = arith.constant 0 : i32
    %c0_i32_1 = arith.constant 0 : i32
    return %c0_i32, %c0_i32_0 : i32, i32
  }
  func.func @transform_3(%arg0: i32, %arg1: i32) -> (i32, i32) {
    %c0_i32 = arith.constant 0 : i32
    %c0_i32_0 = arith.constant 0 : i32
    return %c0_i32, %arg1 : i32, i32
  }
  func.func @transform_4(%arg0: i32, %arg1: i32) -> (i32, i32) {
    %c0_i32 = arith.constant 0 : i32
    %c0_i32_0 = arith.constant 0 : i32
    return %c0_i32, %arg1 : i32, i32
  }
  func.func @transform_5(%arg0: i32, %arg1: i32) -> (i32, i32) {
    %c0_i32 = arith.constant 0 : i32
    return %arg0, %arg1 : i32, i32
  }
}

module attributes {stable_mosaic.version = 11 : i64} {
  func.func @_mqa_flash_kernel(%arg0: i32, %arg1: i32, %arg2: i32, %arg3: memref<1x32x8x32xbf16, #tpu.memory_space<vmem>>, %arg4: memref<1x32x32xbf16, #tpu.memory_space<vmem>>, %arg5: memref<1x32x32xbf16, #tpu.memory_space<vmem>>, %arg6: memref<1x32x8x32xbf16, #tpu.memory_space<vmem>>, %arg7: memref<32x8x1xf32, #tpu.memory_space<vmem>>, %arg8: memref<32x8x1xf32, #tpu.memory_space<vmem>>, %arg9: memref<32x8x32xf32, #tpu.memory_space<vmem>>) attributes {dimension_semantics = [#tpu.dimension_semantics<parallel>, #tpu.dimension_semantics<parallel>, #tpu.dimension_semantics<arbitrary>], iteration_bounds = array<i64: 2, 1, 1>, scalar_prefetch = 0 : i64, scratch_operands = 3 : i64, tpu.core_type = #tpu.core_type<tc>, window_params = [{transform_indices = @transform_0, window_bounds = array<i64: 1, 32, 8, 32>}, {transform_indices = @transform_1, window_bounds = array<i64: 1, 32, 32>}, {transform_indices = @transform_2, window_bounds = array<i64: 1, 32, 32>}, {transform_indices = @transform_3, window_bounds = array<i64: 1, 32, 8, 32>}]} {
    %c32_i32 = arith.constant 32 : i32
    %0 = arith.muli %arg1, %c32_i32 : i32
    %c32_i32_0 = arith.constant 32 : i32
    %1 = arith.muli %arg2, %c32_i32_0 : i32
    %c0_i32 = arith.constant 0 : i32
    %2 = arith.cmpi eq, %arg2, %c0_i32 : i32
    %3 = arith.extui %2 : i1 to i32
    %c0_i32_1 = arith.constant 0 : i32
    %4 = arith.cmpi ne, %3, %c0_i32_1 : i32
    scf.if %4 {
      %cst = arith.constant 0xFF800000 : f32
      %13 = vector.broadcast %cst : f32 to vector<32x8x1xf32>
      %c0 = arith.constant 0 : index
      %c0_6 = arith.constant 0 : index
      %c0_7 = arith.constant 0 : index
      %14 = vector.load %arg7[%c0, %c0_6, %c0_7] : memref<32x8x1xf32, #tpu.memory_space<vmem>>, vector<32x8x1xf32>
      tpu.vector_store %arg7[%c0, %c0_6, %c0_7], %13 {strides = array<i32>} : memref<32x8x1xf32, #tpu.memory_space<vmem>>, vector<32x8x1xf32>,
      %cst_8 = arith.constant 0.000000e+00 : f32
      %15 = vector.broadcast %cst_8 : f32 to vector<32x8x1xf32>
      %c0_9 = arith.constant 0 : index
      %c0_10 = arith.constant 0 : index
      %c0_11 = arith.constant 0 : index
      %16 = vector.load %arg8[%c0_9, %c0_10, %c0_11] : memref<32x8x1xf32, #tpu.memory_space<vmem>>, vector<32x8x1xf32>
      tpu.vector_store %arg8[%c0_9, %c0_10, %c0_11], %15 {strides = array<i32>} : memref<32x8x1xf32, #tpu.memory_space<vmem>>, vector<32x8x1xf32>,
      %cst_12 = arith.constant 0.000000e+00 : f32
      %17 = vector.broadcast %cst_12 : f32 to vector<32x8x32xf32>
      %c0_13 = arith.constant 0 : index
      %c0_14 = arith.constant 0 : index
      %c0_15 = arith.constant 0 : index
      %18 = vector.load %arg9[%c0_13, %c0_14, %c0_15] : memref<32x8x32xf32, #tpu.memory_space<vmem>>, vector<32x8x32xf32>
      tpu.vector_store %arg9[%c0_13, %c0_14, %c0_15], %17 {strides = array<i32>} : memref<32x8x32xf32, #tpu.memory_space<vmem>>, vector<32x8x32xf32>,
    } else {
    }
    %c32_i32_2 = arith.constant 32 : i32
    %5 = arith.addi %0, %c32_i32_2 : i32
    %c1_i32 = arith.constant 1 : i32
    %6 = arith.subi %5, %c1_i32 : i32
    %7 = arith.cmpi sle, %1, %6 : i32
    %8 = arith.extui %7 : i1 to i32
    %c0_i32_3 = arith.constant 0 : i32
    %9 = arith.cmpi ne, %8, %c0_i32_3 : i32
    scf.if %9 {
      %c0 = arith.constant 0 : index
      %c0_6 = arith.constant 0 : index
      %c0_7 = arith.constant 0 : index
      %c0_8 = arith.constant 0 : index
      %13 = vector.load %arg3[%c0, %c0_6, %c0_7, %c0_8] : memref<1x32x8x32xbf16, #tpu.memory_space<vmem>>, vector<1x32x8x32xbf16>
      %14 = vector.shape_cast %13 : vector<1x32x8x32xbf16> to vector<32x8x32xbf16>
      %15 = vector.shape_cast %14 : vector<32x8x32xbf16> to vector<256x32xbf16>
      %c0_9 = arith.constant 0 : index
      %c0_10 = arith.constant 0 : index
      %c0_11 = arith.constant 0 : index
      %16 = vector.load %arg4[%c0_9, %c0_10, %c0_11] : memref<1x32x32xbf16, #tpu.memory_space<vmem>>, vector<1x32x32xbf16>
      %17 = vector.shape_cast %16 : vector<1x32x32xbf16> to vector<32x32xbf16>
      %c0_12 = arith.constant 0 : index
      %c0_13 = arith.constant 0 : index
      %c0_14 = arith.constant 0 : index
      %18 = vector.load %arg5[%c0_12, %c0_13, %c0_14] : memref<1x32x32xbf16, #tpu.memory_space<vmem>>, vector<1x32x32xbf16>
      %19 = vector.shape_cast %18 : vector<1x32x32xbf16> to vector<32x32xbf16>
      %cst = arith.constant dense<0.000000e+00> : vector<256x32xf32>
      %20 = tpu.matmul %15, %17, %cst {dimension_numbers = #tpu.dot_dimension_numbers<[1], [1], [0], [0], [0, 0, 1, 0], [], []>} : vector<256x32xbf16>, vector<32x32xbf16>, vector<256x32xf32> -> vector<256x32xf32>
      %21 = vector.shape_cast %20 : vector<256x32xf32> to vector<32x8x32xf32>
      %22 = tpu.iota {dimensions = array<i32: 0>} : vector<32x1x32xi32>
      %23 = vector.broadcast %0 : i32 to vector<32x1x32xi32>
      %24 = arith.addi %22, %23 : vector<32x1x32xi32>
      %25 = tpu.iota {dimensions = array<i32: 2>} : vector<32x1x32xi32>
      %26 = vector.broadcast %1 : i32 to vector<32x1x32xi32>
      %27 = arith.addi %25, %26 : vector<32x1x32xi32>
      %28 = arith.cmpi sle, %27, %24 : vector<32x1x32xi32>
      %cst_15 = arith.constant -1.000000e+30 : f32
      %29 = vector.shape_cast %28 : vector<32x1x32xi1> to vector<32x1x32xi1>
      %30 = vector.broadcast %29 : vector<32x1x32xi1> to vector<32x8x32xi1>
      %31 = vector.broadcast %cst_15 : f32 to vector<32x8x32xf32>
      %32 = arith.select %30, %21, %31 : vector<32x8x32xi1>, vector<32x8x32xf32>
      %c0_16 = arith.constant 0 : index
      %c0_17 = arith.constant 0 : index
      %c0_18 = arith.constant 0 : index
      %33 = vector.load %arg7[%c0_16, %c0_17, %c0_18] : memref<32x8x1xf32, #tpu.memory_space<vmem>>, vector<32x8x1xf32>
      %cst_19 = arith.constant dense<0xFF800000> : vector<32x8xf32>
      %34 = vector.multi_reduction <maximumf>, %32, %cst_19 [2] : vector<32x8x32xf32> to vector<32x8xf32>
      %35 = vector.shape_cast %34 : vector<32x8xf32> to vector<32x8x1xf32>
      %36 = arith.maximumf %33, %35 : vector<32x8x1xf32>
      %37 = arith.subf %33, %36 : vector<32x8x1xf32>
      %38 = math.exp %37 : vector<32x8x1xf32>
      %39 = vector.broadcast %36 : vector<32x8x1xf32> to vector<32x8x32xf32>
      %40 = arith.subf %32, %39 : vector<32x8x32xf32>
      %41 = math.exp %40 : vector<32x8x32xf32>
      %c0_20 = arith.constant 0 : index
      %c0_21 = arith.constant 0 : index
      %c0_22 = arith.constant 0 : index
      %42 = vector.load %arg8[%c0_20, %c0_21, %c0_22] : memref<32x8x1xf32, #tpu.memory_space<vmem>>, vector<32x8x1xf32>
      %43 = arith.mulf %38, %42 : vector<32x8x1xf32>
      %cst_23 = arith.constant dense<0.000000e+00> : vector<32x8xf32>
      %44 = vector.multi_reduction <add>, %41, %cst_23 [2] : vector<32x8x32xf32> to vector<32x8xf32>
      %45 = vector.shape_cast %44 : vector<32x8xf32> to vector<32x8x1xf32>
      %46 = arith.addf %43, %45 : vector<32x8x1xf32>
      %c0_24 = arith.constant 0 : index
      %c0_25 = arith.constant 0 : index
      %c0_26 = arith.constant 0 : index
      %47 = vector.load %arg8[%c0_24, %c0_25, %c0_26] : memref<32x8x1xf32, #tpu.memory_space<vmem>>, vector<32x8x1xf32>
      tpu.vector_store %arg8[%c0_24, %c0_25, %c0_26], %46 {strides = array<i32>} : memref<32x8x1xf32, #tpu.memory_space<vmem>>, vector<32x8x1xf32>,
      %48 = vector.shape_cast %41 : vector<32x8x32xf32> to vector<256x32xf32>
      %49 = arith.truncf %48 : vector<256x32xf32> to vector<256x32xbf16>
      %cst_27 = arith.constant dense<0.000000e+00> : vector<256x32xf32>
      %50 = tpu.matmul %49, %19, %cst_27 {dimension_numbers = #tpu.dot_dimension_numbers<[1], [0], [0], [1], [0, 0, 1, 1], [], []>} : vector<256x32xbf16>, vector<32x32xbf16>, vector<256x32xf32> -> vector<256x32xf32>
      %c0_28 = arith.constant 0 : index
      %c0_29 = arith.constant 0 : index
      %c0_30 = arith.constant 0 : index
      %51 = vector.load %arg9[%c0_28, %c0_29, %c0_30] : memref<32x8x32xf32, #tpu.memory_space<vmem>>, vector<32x8x32xf32>
      %52 = vector.broadcast %38 : vector<32x8x1xf32> to vector<32x8x32xf32>
      %53 = arith.mulf %52, %51 : vector<32x8x32xf32>
      %54 = vector.shape_cast %50 : vector<256x32xf32> to vector<32x8x32xf32>
      %55 = arith.addf %53, %54 : vector<32x8x32xf32>
      %c0_31 = arith.constant 0 : index
      %c0_32 = arith.constant 0 : index
      %c0_33 = arith.constant 0 : index
      %56 = vector.load %arg9[%c0_31, %c0_32, %c0_33] : memref<32x8x32xf32, #tpu.memory_space<vmem>>, vector<32x8x32xf32>
      tpu.vector_store %arg9[%c0_31, %c0_32, %c0_33], %55 {strides = array<i32>} : memref<32x8x32xf32, #tpu.memory_space<vmem>>, vector<32x8x32xf32>,
      %c0_34 = arith.constant 0 : index
      %c0_35 = arith.constant 0 : index
      %c0_36 = arith.constant 0 : index
      %57 = vector.load %arg7[%c0_34, %c0_35, %c0_36] : memref<32x8x1xf32, #tpu.memory_space<vmem>>, vector<32x8x1xf32>
      tpu.vector_store %arg7[%c0_34, %c0_35, %c0_36], %36 {strides = array<i32>} : memref<32x8x1xf32, #tpu.memory_space<vmem>>, vector<32x8x1xf32>,
    } else {
    }
    %c0_i32_4 = arith.constant 0 : i32
    %10 = arith.cmpi eq, %arg2, %c0_i32_4 : i32
    %11 = arith.extui %10 : i1 to i32
    %c0_i32_5 = arith.constant 0 : i32
    %12 = arith.cmpi ne, %11, %c0_i32_5 : i32
    scf.if %12 {
      %c0 = arith.constant 0 : index
      %c0_6 = arith.constant 0 : index
      %c0_7 = arith.constant 0 : index
      %13 = vector.load %arg9[%c0, %c0_6, %c0_7] : memref<32x8x32xf32, #tpu.memory_space<vmem>>, vector<32x8x32xf32>
      %c0_8 = arith.constant 0 : index
      %c0_9 = arith.constant 0 : index
      %c0_10 = arith.constant 0 : index
      %14 = vector.load %arg8[%c0_8, %c0_9, %c0_10] : memref<32x8x1xf32, #tpu.memory_space<vmem>>, vector<32x8x1xf32>
      %15 = tpu.reciprocal %14 {approx = true} : vector<32x8x1xf32> -> vector<32x8x1xf32>
      %16 = vector.broadcast %15 : vector<32x8x1xf32> to vector<32x8x32xf32>
      %17 = arith.mulf %13, %16 : vector<32x8x32xf32>
      %18 = arith.truncf %17 : vector<32x8x32xf32> to vector<32x8x32xbf16>
      %c0_11 = arith.constant 0 : index
      %c0_12 = arith.constant 0 : index
      %c0_13 = arith.constant 0 : index
      %c0_14 = arith.constant 0 : index
      %19 = vector.load %arg6[%c0_11, %c0_12, %c0_13, %c0_14] : memref<1x32x8x32xbf16, #tpu.memory_space<vmem>>, vector<1x32x8x32xbf16>
      %20 = vector.shape_cast %19 : vector<1x32x8x32xbf16> to vector<32x8x32xbf16>
      %21 = vector.shape_cast %18 : vector<32x8x32xbf16> to vector<1x32x8x32xbf16>
      tpu.vector_store %arg6[%c0_11, %c0_12, %c0_13, %c0_14], %21 {strides = array<i32>} : memref<1x32x8x32xbf16, #tpu.memory_space<vmem>>, vector<1x32x8x32xbf16>,
    } else {
    }
    return
  }
  func.func @transform_0(%arg0: i32, %arg1: i32, %arg2: i32) -> (i32, i32, i32, i32) {
    %c0_i32 = arith.constant 0 : i32
    %c0_i32_0 = arith.constant 0 : i32
    %c0_i32_1 = arith.constant 0 : i32
    return %arg0, %arg1, %c0_i32, %c0_i32_0 : i32, i32, i32, i32
  }
  func.func @transform_1(%arg0: i32, %arg1: i32, %arg2: i32) -> (i32, i32, i32) {
    %c0_i32 = arith.constant 0 : i32
    %c0_i32_0 = arith.constant 0 : i32
    return %arg0, %arg2, %c0_i32 : i32, i32, i32
  }
  func.func @transform_2(%arg0: i32, %arg1: i32, %arg2: i32) -> (i32, i32, i32) {
    %c0_i32 = arith.constant 0 : i32
    %c0_i32_0 = arith.constant 0 : i32
    return %arg0, %arg2, %c0_i32 : i32, i32, i32
  }
  func.func @transform_3(%arg0: i32, %arg1: i32, %arg2: i32) -> (i32, i32, i32, i32) {
    %c0_i32 = arith.constant 0 : i32
    %c0_i32_0 = arith.constant 0 : i32
    %c0_i32_1 = arith.constant 0 : i32
    return %arg0, %arg1, %c0_i32, %c0_i32_0 : i32, i32, i32, i32
  }
}

module attributes {stable_mosaic.version = 11 : i64} {
  func.func @_linear_residual_kernel(%arg0: i32, %arg1: i32, %arg2: i32, %arg3: memref<64x256xbf16, #tpu.memory_space<vmem>>, %arg4: memref<256x256xbf16, #tpu.memory_space<vmem>>, %arg5: memref<1x256xf32, #tpu.memory_space<vmem>>, %arg6: memref<64x256xbf16, #tpu.memory_space<vmem>>, %arg7: memref<64x256xbf16, #tpu.memory_space<vmem>>, %arg8: memref<64x256xf32, #tpu.memory_space<vmem>>) attributes {dimension_semantics = [#tpu.dimension_semantics<parallel>, #tpu.dimension_semantics<parallel>, #tpu.dimension_semantics<arbitrary>], iteration_bounds = array<i64: 1, 1, 1>, scalar_prefetch = 0 : i64, scratch_operands = 1 : i64, tpu.core_type = #tpu.core_type<tc>, window_params = [{transform_indices = @transform_0, window_bounds = array<i64: 64, 256>}, {transform_indices = @transform_1, window_bounds = array<i64: 256, 256>}, {transform_indices = @transform_2, window_bounds = array<i64: 1, 256>}, {transform_indices = @transform_3, window_bounds = array<i64: 64, 256>}, {transform_indices = @transform_4, window_bounds = array<i64: 64, 256>}]} {
    %c0_i32 = arith.constant 0 : i32
    %0 = arith.cmpi eq, %arg2, %c0_i32 : i32
    %1 = arith.extui %0 : i1 to i32
    %c0_i32_0 = arith.constant 0 : i32
    %2 = arith.cmpi ne, %1, %c0_i32_0 : i32
    scf.if %2 {
      %c0_10 = arith.constant 0 : index
      %c0_11 = arith.constant 0 : index
      %12 = vector.load %arg6[%c0_10, %c0_11] : memref<64x256xbf16, #tpu.memory_space<vmem>>, vector<64x256xbf16>
      %13 = arith.extf %12 : vector<64x256xbf16> to vector<64x256xf32>
      %c0_12 = arith.constant 0 : index
      %c0_13 = arith.constant 0 : index
      %14 = vector.load %arg5[%c0_12, %c0_13] : memref<1x256xf32, #tpu.memory_space<vmem>>, vector<1x256xf32>
      %15 = vector.broadcast %14 : vector<1x256xf32> to vector<64x256xf32>
      %16 = arith.addf %13, %15 : vector<64x256xf32>
      %c0_14 = arith.constant 0 : index
      %c0_15 = arith.constant 0 : index
      %17 = vector.load %arg8[%c0_14, %c0_15] : memref<64x256xf32, #tpu.memory_space<vmem>>, vector<64x256xf32>
      tpu.vector_store %arg8[%c0_14, %c0_15], %16 {strides = array<i32>} : memref<64x256xf32, #tpu.memory_space<vmem>>, vector<64x256xf32>,
    } else {
    }
    %c0 = arith.constant 0 : index
    %c0_1 = arith.constant 0 : index
    %3 = vector.load %arg8[%c0, %c0_1] : memref<64x256xf32, #tpu.memory_space<vmem>>, vector<64x256xf32>
    %c0_2 = arith.constant 0 : index
    %c0_3 = arith.constant 0 : index
    %4 = vector.load %arg3[%c0_2, %c0_3] : memref<64x256xbf16, #tpu.memory_space<vmem>>, vector<64x256xbf16>
    %c0_4 = arith.constant 0 : index
    %c0_5 = arith.constant 0 : index
    %5 = vector.load %arg4[%c0_4, %c0_5] : memref<256x256xbf16, #tpu.memory_space<vmem>>, vector<256x256xbf16>
    %cst = arith.constant dense<0.000000e+00> : vector<64x256xf32>
    %6 = tpu.matmul %4, %5, %cst {dimension_numbers = #tpu.dot_dimension_numbers<[1], [0], [0], [1], [0, 0, 1, 1], [], []>} : vector<64x256xbf16>, vector<256x256xbf16>, vector<64x256xf32> -> vector<64x256xf32>
    %7 = arith.addf %3, %6 : vector<64x256xf32>
    %c0_6 = arith.constant 0 : index
    %c0_7 = arith.constant 0 : index
    %8 = vector.load %arg8[%c0_6, %c0_7] : memref<64x256xf32, #tpu.memory_space<vmem>>, vector<64x256xf32>
    tpu.vector_store %arg8[%c0_6, %c0_7], %7 {strides = array<i32>} : memref<64x256xf32, #tpu.memory_space<vmem>>, vector<64x256xf32>,
    %c0_i32_8 = arith.constant 0 : i32
    %9 = arith.cmpi eq, %arg2, %c0_i32_8 : i32
    %10 = arith.extui %9 : i1 to i32
    %c0_i32_9 = arith.constant 0 : i32
    %11 = arith.cmpi ne, %10, %c0_i32_9 : i32
    scf.if %11 {
      %c0_10 = arith.constant 0 : index
      %c0_11 = arith.constant 0 : index
      %12 = vector.load %arg8[%c0_10, %c0_11] : memref<64x256xf32, #tpu.memory_space<vmem>>, vector<64x256xf32>
      %13 = arith.truncf %12 : vector<64x256xf32> to vector<64x256xbf16>
      %c0_12 = arith.constant 0 : index
      %c0_13 = arith.constant 0 : index
      %14 = vector.load %arg7[%c0_12, %c0_13] : memref<64x256xbf16, #tpu.memory_space<vmem>>, vector<64x256xbf16>
      tpu.vector_store %arg7[%c0_12, %c0_13], %13 {strides = array<i32>} : memref<64x256xbf16, #tpu.memory_space<vmem>>, vector<64x256xbf16>,
    } else {
    }
    return
  }
  func.func @transform_0(%arg0: i32, %arg1: i32, %arg2: i32) -> (i32, i32) {
    %c0_i32 = arith.constant 0 : i32
    return %arg0, %arg2 : i32, i32
  }
  func.func @transform_1(%arg0: i32, %arg1: i32, %arg2: i32) -> (i32, i32) {
    %c0_i32 = arith.constant 0 : i32
    return %arg2, %arg1 : i32, i32
  }
  func.func @transform_2(%arg0: i32, %arg1: i32, %arg2: i32) -> (i32, i32) {
    %c0_i32 = arith.constant 0 : i32
    %c0_i32_0 = arith.constant 0 : i32
    return %c0_i32, %arg1 : i32, i32
  }
  func.func @transform_3(%arg0: i32, %arg1: i32, %arg2: i32) -> (i32, i32) {
    %c0_i32 = arith.constant 0 : i32
    return %arg0, %arg1 : i32, i32
  }
  func.func @transform_4(%arg0: i32, %arg1: i32, %arg2: i32) -> (i32, i32) {
    %c0_i32 = arith.constant 0 : i32
    return %arg0, %arg1 : i32, i32
  }
}

module attributes {stable_mosaic.version = 11 : i64} {
  func.func @_mlp_fused_kernel(%arg0: i32, %arg1: i32, %arg2: memref<64x256xbf16, #tpu.memory_space<vmem>>, %arg3: memref<1x256xf32, #tpu.memory_space<vmem>>, %arg4: memref<1x256xf32, #tpu.memory_space<vmem>>, %arg5: memref<256x1024xbf16, #tpu.memory_space<vmem>>, %arg6: memref<1x1024xf32, #tpu.memory_space<vmem>>, %arg7: memref<1024x256xbf16, #tpu.memory_space<vmem>>, %arg8: memref<1x256xf32, #tpu.memory_space<vmem>>, %arg9: memref<64x256xbf16, #tpu.memory_space<vmem>>, %arg10: memref<64x256xbf16, #tpu.memory_space<vmem>>, %arg11: memref<64x256xbf16, #tpu.memory_space<vmem>>, %arg12: memref<64x256xf32, #tpu.memory_space<vmem>>) attributes {dimension_semantics = [#tpu.dimension_semantics<parallel>, #tpu.dimension_semantics<arbitrary>], iteration_bounds = array<i64: 1, 1>, scalar_prefetch = 0 : i64, scratch_operands = 2 : i64, tpu.core_type = #tpu.core_type<tc>, window_params = [{transform_indices = @transform_0, window_bounds = array<i64: 64, 256>}, {pipeline_mode = #tpu.pipeline_mode<synchronous>, transform_indices = @transform_1, window_bounds = array<i64: 1, 256>}, {pipeline_mode = #tpu.pipeline_mode<synchronous>, transform_indices = @transform_2, window_bounds = array<i64: 1, 256>}, {transform_indices = @transform_3, window_bounds = array<i64: 256, 1024>}, {transform_indices = @transform_4, window_bounds = array<i64: 1, 1024>}, {transform_indices = @transform_5, window_bounds = array<i64: 1024, 256>}, {pipeline_mode = #tpu.pipeline_mode<synchronous>, transform_indices = @transform_6, window_bounds = array<i64: 1, 256>}, {transform_indices = @transform_7, window_bounds = array<i64: 64, 256>}, {transform_indices = @transform_8, window_bounds = array<i64: 64, 256>}]} {
    %c0_i32 = arith.constant 0 : i32
    %0 = arith.cmpi eq, %arg1, %c0_i32 : i32
    %1 = arith.extui %0 : i1 to i32
    %c0_i32_0 = arith.constant 0 : i32
    %2 = arith.cmpi ne, %1, %c0_i32_0 : i32
    scf.if %2 {
      %c0_19 = arith.constant 0 : index
      %c0_20 = arith.constant 0 : index
      %31 = vector.load %arg2[%c0_19, %c0_20] : memref<64x256xbf16, #tpu.memory_space<vmem>>, vector<64x256xbf16>
      %32 = arith.extf %31 : vector<64x256xbf16> to vector<64x256xf32>
      %cst_21 = arith.constant dense<0.000000e+00> : vector<64xf32>
      %33 = vector.multi_reduction <add>, %32, %cst_21 [1] : vector<64x256xf32> to vector<64xf32>
      %34 = vector.shape_cast %33 : vector<64xf32> to vector<64x1xf32>
      %cst_22 = arith.constant 2.560000e+02 : f32
      %35 = vector.broadcast %cst_22 : f32 to vector<64x1xf32>
      %36 = arith.divf %34, %35 : vector<64x1xf32>
      %37 = vector.broadcast %36 : vector<64x1xf32> to vector<64x256xf32>
      %38 = arith.subf %32, %37 : vector<64x256xf32>
      %39 = arith.mulf %38, %38 : vector<64x256xf32>
      %cst_23 = arith.constant dense<0.000000e+00> : vector<64xf32>
      %40 = vector.multi_reduction <add>, %39, %cst_23 [1] : vector<64x256xf32> to vector<64xf32>
      %41 = vector.shape_cast %40 : vector<64xf32> to vector<64x1xf32>
      %cst_24 = arith.constant 2.560000e+02 : f32
      %42 = vector.broadcast %cst_24 : f32 to vector<64x1xf32>
      %43 = arith.divf %41, %42 : vector<64x1xf32>
      %cst_25 = arith.constant 9.99999974E-6 : f32
      %44 = vector.broadcast %cst_25 : f32 to vector<64x1xf32>
      %45 = arith.addf %43, %44 : vector<64x1xf32>
      %46 = math.rsqrt %45 : vector<64x1xf32>
      %47 = vector.broadcast %46 : vector<64x1xf32> to vector<64x256xf32>
      %48 = arith.mulf %38, %47 : vector<64x256xf32>
      %c0_26 = arith.constant 0 : index
      %c0_27 = arith.constant 0 : index
      %49 = vector.load %arg3[%c0_26, %c0_27] : memref<1x256xf32, #tpu.memory_space<vmem>>, vector<1x256xf32>
      %50 = vector.broadcast %49 : vector<1x256xf32> to vector<64x256xf32>
      %51 = arith.mulf %48, %50 : vector<64x256xf32>
      %c0_28 = arith.constant 0 : index
      %c0_29 = arith.constant 0 : index
      %52 = vector.load %arg4[%c0_28, %c0_29] : memref<1x256xf32, #tpu.memory_space<vmem>>, vector<1x256xf32>
      %53 = vector.broadcast %52 : vector<1x256xf32> to vector<64x256xf32>
      %54 = arith.addf %51, %53 : vector<64x256xf32>
      %55 = arith.truncf %54 : vector<64x256xf32> to vector<64x256xbf16>
      %c0_30 = arith.constant 0 : index
      %c0_31 = arith.constant 0 : index
      %56 = vector.load %arg11[%c0_30, %c0_31] : memref<64x256xbf16, #tpu.memory_space<vmem>>, vector<64x256xbf16>
      tpu.vector_store %arg11[%c0_30, %c0_31], %55 {strides = array<i32>} : memref<64x256xbf16, #tpu.memory_space<vmem>>, vector<64x256xbf16>,
      %c0_32 = arith.constant 0 : index
      %c0_33 = arith.constant 0 : index
      %57 = vector.load %arg9[%c0_32, %c0_33] : memref<64x256xbf16, #tpu.memory_space<vmem>>, vector<64x256xbf16>
      %58 = arith.extf %57 : vector<64x256xbf16> to vector<64x256xf32>
      %c0_34 = arith.constant 0 : index
      %c0_35 = arith.constant 0 : index
      %59 = vector.load %arg8[%c0_34, %c0_35] : memref<1x256xf32, #tpu.memory_space<vmem>>, vector<1x256xf32>
      %60 = vector.broadcast %59 : vector<1x256xf32> to vector<64x256xf32>
      %61 = arith.addf %58, %60 : vector<64x256xf32>
      %c0_36 = arith.constant 0 : index
      %c0_37 = arith.constant 0 : index
      %62 = vector.load %arg12[%c0_36, %c0_37] : memref<64x256xf32, #tpu.memory_space<vmem>>, vector<64x256xf32>
      tpu.vector_store %arg12[%c0_36, %c0_37], %61 {strides = array<i32>} : memref<64x256xf32, #tpu.memory_space<vmem>>, vector<64x256xf32>,
    } else {
    }
    %c0 = arith.constant 0 : index
    %c0_1 = arith.constant 0 : index
    %3 = vector.load %arg11[%c0, %c0_1] : memref<64x256xbf16, #tpu.memory_space<vmem>>, vector<64x256xbf16>
    %c0_2 = arith.constant 0 : index
    %c0_3 = arith.constant 0 : index
    %4 = vector.load %arg5[%c0_2, %c0_3] : memref<256x1024xbf16, #tpu.memory_space<vmem>>, vector<256x1024xbf16>
    %cst = arith.constant dense<0.000000e+00> : vector<64x1024xf32>
    %5 = tpu.matmul %3, %4, %cst {dimension_numbers = #tpu.dot_dimension_numbers<[1], [0], [0], [1], [0, 0, 1, 1], [], []>} : vector<64x256xbf16>, vector<256x1024xbf16>, vector<64x1024xf32> -> vector<64x1024xf32>
    %c0_4 = arith.constant 0 : index
    %c0_5 = arith.constant 0 : index
    %6 = vector.load %arg6[%c0_4, %c0_5] : memref<1x1024xf32, #tpu.memory_space<vmem>>, vector<1x1024xf32>
    %7 = vector.broadcast %6 : vector<1x1024xf32> to vector<64x1024xf32>
    %8 = arith.addf %5, %7 : vector<64x1024xf32>
    %cst_6 = arith.constant 5.000000e-01 : f32
    %9 = vector.broadcast %cst_6 : f32 to vector<64x1024xf32>
    %10 = arith.mulf %9, %8 : vector<64x1024xf32>
    %cst_7 = arith.constant 4.471500e-02 : f32
    %11 = vector.broadcast %cst_7 : f32 to vector<64x1024xf32>
    %12 = arith.mulf %11, %8 : vector<64x1024xf32>
    %13 = arith.mulf %12, %8 : vector<64x1024xf32>
    %14 = arith.mulf %13, %8 : vector<64x1024xf32>
    %15 = arith.addf %8, %14 : vector<64x1024xf32>
    %cst_8 = arith.constant 0.797884583 : f32
    %16 = vector.broadcast %cst_8 : f32 to vector<64x1024xf32>
    %17 = arith.mulf %16, %15 : vector<64x1024xf32>
    %18 = math.tanh %17 : vector<64x1024xf32>
    %cst_9 = arith.constant 1.000000e+00 : f32
    %19 = vector.broadcast %cst_9 : f32 to vector<64x1024xf32>
    %20 = arith.addf %19, %18 : vector<64x1024xf32>
    %21 = arith.mulf %10, %20 : vector<64x1024xf32>
    %c0_10 = arith.constant 0 : index
    %c0_11 = arith.constant 0 : index
    %22 = vector.load %arg12[%c0_10, %c0_11] : memref<64x256xf32, #tpu.memory_space<vmem>>, vector<64x256xf32>
    %23 = arith.truncf %21 : vector<64x1024xf32> to vector<64x1024xbf16>
    %c0_12 = arith.constant 0 : index
    %c0_13 = arith.constant 0 : index
    %24 = vector.load %arg7[%c0_12, %c0_13] : memref<1024x256xbf16, #tpu.memory_space<vmem>>, vector<1024x256xbf16>
    %cst_14 = arith.constant dense<0.000000e+00> : vector<64x256xf32>
    %25 = tpu.matmul %23, %24, %cst_14 {dimension_numbers = #tpu.dot_dimension_numbers<[1], [0], [0], [1], [0, 0, 1, 1], [], []>} : vector<64x1024xbf16>, vector<1024x256xbf16>, vector<64x256xf32> -> vector<64x256xf32>
    %26 = arith.addf %22, %25 : vector<64x256xf32>
    %c0_15 = arith.constant 0 : index
    %c0_16 = arith.constant 0 : index
    %27 = vector.load %arg12[%c0_15, %c0_16] : memref<64x256xf32, #tpu.memory_space<vmem>>, vector<64x256xf32>
    tpu.vector_store %arg12[%c0_15, %c0_16], %26 {strides = array<i32>} : memref<64x256xf32, #tpu.memory_space<vmem>>, vector<64x256xf32>,
    %c0_i32_17 = arith.constant 0 : i32
    %28 = arith.cmpi eq, %arg1, %c0_i32_17 : i32
    %29 = arith.extui %28 : i1 to i32
    %c0_i32_18 = arith.constant 0 : i32
    %30 = arith.cmpi ne, %29, %c0_i32_18 : i32
    scf.if %30 {
      %c0_19 = arith.constant 0 : index
      %c0_20 = arith.constant 0 : index
      %31 = vector.load %arg12[%c0_19, %c0_20] : memref<64x256xf32, #tpu.memory_space<vmem>>, vector<64x256xf32>
      %32 = arith.truncf %31 : vector<64x256xf32> to vector<64x256xbf16>
      %c0_21 = arith.constant 0 : index
      %c0_22 = arith.constant 0 : index
      %33 = vector.load %arg10[%c0_21, %c0_22] : memref<64x256xbf16, #tpu.memory_space<vmem>>, vector<64x256xbf16>
      tpu.vector_store %arg10[%c0_21, %c0_22], %32 {strides = array<i32>} : memref<64x256xbf16, #tpu.memory_space<vmem>>, vector<64x256xbf16>,
    } else {
    }
    return
  }
  func.func @transform_0(%arg0: i32, %arg1: i32) -> (i32, i32) {
    %c0_i32 = arith.constant 0 : i32
    %c0_i32_0 = arith.constant 0 : i32
    return %arg0, %c0_i32 : i32, i32
  }
  func.func @transform_1(%arg0: i32, %arg1: i32) -> (i32, i32) {
    %c0_i32 = arith.constant 0 : i32
    %c0_i32_0 = arith.constant 0 : i32
    %c0_i32_1 = arith.constant 0 : i32
    return %c0_i32, %c0_i32_0 : i32, i32
  }
  func.func @transform_2(%arg0: i32, %arg1: i32) -> (i32, i32) {
    %c0_i32 = arith.constant 0 : i32
    %c0_i32_0 = arith.constant 0 : i32
    %c0_i32_1 = arith.constant 0 : i32
    return %c0_i32, %c0_i32_0 : i32, i32
  }
  func.func @transform_3(%arg0: i32, %arg1: i32) -> (i32, i32) {
    %c0_i32 = arith.constant 0 : i32
    %c0_i32_0 = arith.constant 0 : i32
    return %c0_i32, %arg1 : i32, i32
  }
  func.func @transform_4(%arg0: i32, %arg1: i32) -> (i32, i32) {
    %c0_i32 = arith.constant 0 : i32
    %c0_i32_0 = arith.constant 0 : i32
    return %c0_i32, %arg1 : i32, i32
  }
  func.func @transform_5(%arg0: i32, %arg1: i32) -> (i32, i32) {
    %c0_i32 = arith.constant 0 : i32
    %c0_i32_0 = arith.constant 0 : i32
    return %arg1, %c0_i32 : i32, i32
  }
  func.func @transform_6(%arg0: i32, %arg1: i32) -> (i32, i32) {
    %c0_i32 = arith.constant 0 : i32
    %c0_i32_0 = arith.constant 0 : i32
    %c0_i32_1 = arith.constant 0 : i32
    return %c0_i32, %c0_i32_0 : i32, i32
  }
  func.func @transform_7(%arg0: i32, %arg1: i32) -> (i32, i32) {
    %c0_i32 = arith.constant 0 : i32
    %c0_i32_0 = arith.constant 0 : i32
    return %arg0, %c0_i32 : i32, i32
  }
  func.func @transform_8(%arg0: i32, %arg1: i32) -> (i32, i32) {
    %c0_i32 = arith.constant 0 : i32
    %c0_i32_0 = arith.constant 0 : i32
    return %arg0, %c0_i32 : i32, i32
  }
}

</mosaic_0001>

<bundles_post_ra>
// kernel: _lambda_.4
= control target key start
LH: loop header
LB: loop body
LE: loop exit
PB: predicated region body
PF: predicated region fallthrough
CT: control target
= control target key end

     0   :  { %vm894_vm0 = vcmask 519168   ;;  %s1660_s0 = inlined_call_operand.vmem [shape: bf16[64,256], index: 0, kind: input, shape index: {}]   ;;  %s1661_s3 = inlined_call_operand.vmem [shape: bf16[256,320], index: 3, kind: input, shape index: {}]   ;;  %s1662_s1 = inlined_call_operand.vmem [shape: f32[1,256], index: 1, kind: input, shape index: {}]   ;;  %s1663_s2 = inlined_call_operand.vmem [shape: f32[1,256], index: 2, kind: input, shape index: {}]   ;;  %s1664_s4 = inlined_call_operand.vmem [shape: f32[1,320], index: 4, kind: input, shape index: {}]   ;;  %s1665_s5 = inlined_call_operand.vmem [shape: bf16[64,320], index: 5, kind: output, shape index: {}]  }
   0x1   :  { %v1179_v0 = vld [vmem:[%s1660_s0] sm:$0xff]  ;;  %v1184_v1 = vld [vmem:[%s1660_s0 + $0x10] sm:$0xff]  ;;  %v1189_v2 = vld [vmem:[%s1660_s0 + $0x8] sm:$0xff] }
   0x2   :  { %v33_v3 = vunpack.c.l.bf16 %v1179_v0  ;;  %v34_v4 = vunpack.c.h.bf16 %v1179_v0  ;;  %v37_v5 = vunpack.c.l.bf16 %v1184_v1  ;;  %v38_v6 = vunpack.c.h.bf16 %v1184_v1  ;;  %v1198_v7 = vld [vmem:[%s1660_s0 + $0x18] sm:$0xff]  ;;  %v1203_v8 = vld [vmem:[%s1660_s0 + $0x20] sm:$0xff]  ;;  %v1212_v13 = vld [vmem:[%s1660_s0 + $0x28] sm:$0xff] }
   0x3   :  { %v35_v9 = vunpack.c.l.bf16 %v1189_v2  ;;  %v36_v10 = vunpack.c.h.bf16 %v1189_v2  ;;  %v39_v11 = vunpack.c.l.bf16 %v1198_v7  ;;  %v40_v12 = vunpack.c.h.bf16 %v1198_v7  ;;  %v1237_v22 = vld [vmem:[%s1660_s0 + $0x30] sm:$0xff]  ;;  %v1242_v23 = vld [vmem:[%s1660_s0 + $0x38] sm:$0xff]  ;;  %v1077_v39 = vld [vmem:[%s1661_s3 + $0x60] ss:$12 sps:$4 sm:$0xff]  }
   0x4   :  { %v49_v14 = vadd.f32 %v34_v4, %v33_v3  ;;  %v55_v15 = vadd.f32 %v38_v6, %v37_v5  ;;  %v41_v16 = vunpack.c.l.bf16 %v1203_v8  ;;  %v42_v17 = vunpack.c.h.bf16 %v1203_v8  ;;  %v1066_v32 = vld [vmem:[%s1661_s3 + $0xac] ss:$12 sps:$4 sm:$0xff]   ;;  %v1068_v33 = vld [vmem:[%s1661_s3 + $0xa8] ss:$12 sps:$4 sm:$0xff]   ;;  %v1071_v35 = vld [vmem:[%s1661_s3 + $0x90] ss:$12 sps:$4 sm:$0xff]  }
   0x5   :  { %v52_v18 = vadd.f32 %v36_v10, %v35_v9  ;;  %v58_v19 = vadd.f32 %v40_v12, %v39_v11  ;;  %v43_v20 = vunpack.c.l.bf16 %v1212_v13  ;;  %v44_v21 = vunpack.c.h.bf16 %v1212_v13  ;;  %675 = vmatprep.subr.bf16.mxu0 %v1066_v32  ;;  %v1069_v34 = vld [vmem:[%s1661_s3 + $0x94] ss:$12 sps:$4 sm:$0xff]   ;;  %v1072_v36 = vld [vmem:[%s1661_s3 + $0x7c] ss:$12 sps:$4 sm:$0xff]   ;;  %v1074_v37 = vld [vmem:[%s1661_s3 + $0x78] ss:$12 sps:$4 sm:$0xff]  }
   0x6   :  { %50 = vadd.xlane.f32.xlu0 %v49_v14  ;;  %56 = vadd.xlane.f32.xlu1 %v55_v15  ;;  %v61_v24 = vadd.f32 %v42_v17, %v41_v16  ;;  %v45_v25 = vunpack.c.l.bf16 %v1237_v22  ;;  %v46_v27 = vunpack.c.h.bf16 %v1237_v22  ;;  %v47_v28 = vunpack.c.l.bf16 %v1242_v23  ;;  %v1075_v38 = vld [vmem:[%s1661_s3 + $0x64] ss:$12 sps:$4 sm:$0xff]   ;;  %v1078_v40 = vld [vmem:[%s1661_s3 + $0x4c] ss:$12 sps:$4 sm:$0xff]   ;;  %v1080_v42 = vld [vmem:[%s1661_s3 + $0x48] ss:$12 sps:$4 sm:$0xff]  }
   0x7   :  { %v64_v26 = vadd.f32 %v44_v21, %v43_v20  ;;  %v48_v29 = vunpack.c.h.bf16 %v1242_v23  ;;  %676 = vmatpush1.bf16.msra.mxu0 %v1068_v33  ;;  %v1092_v41 = vld [vmem:[%s1661_s3 + $0x170] ss:$12 sps:$4 sm:$0xff]   ;;  %v1081_v43 = vld [vmem:[%s1661_s3 + $0x34] ss:$12 sps:$4 sm:$0xff]   ;;  %v1086_v46 = vld [vmem:[%s1661_s3 + $0x18] ss:$12 sps:$4 sm:$0xff]  }
   0x8   :  { %v67_v30 = vadd.f32 %v46_v27, %v45_v25  ;;  %677 = vmatprep.subr.bf16.mxu0 %v1069_v34  ;;  %1026 = vmatprep.subr.bf16.mxu1 %v1092_v41  ;;  %v1083_v44 = vld [vmem:[%s1661_s3 + $0x30] ss:$12 sps:$4 sm:$0xff]   ;;  %v1089_v48 = vld [vmem:[%s1661_s3] ss:$12 sps:$4 sm:$0xff]   ;;  %v1093_v23 = vld [vmem:[%s1661_s3 + $0x168] ss:$12 sps:$4 sm:$0xff]  }
   0x9   :  { %v70_v31 = vadd.f32 %v48_v29, %v47_v28  ;;  %v1084_v45 = vld [vmem:[%s1661_s3 + $0x1c] ss:$12 sps:$4 sm:$0xff]   ;;  %v1087_v47 = vld [vmem:[%s1661_s3 + $0x4] ss:$12 sps:$4 sm:$0xff]   ;;  %v1090_v49 = vld [vmem:[%s1661_s3 + $0x16c] ss:$12 sps:$4 sm:$0xff]  }
   0xa   :  { %53 = vadd.xlane.f32.xlu0 %v52_v18  ;;  %59 = vadd.xlane.f32.xlu1 %v58_v19 }
   0xb   :  { %678 = vmatpush1.bf16.msra.mxu0 %v1071_v35 }
   0xc   :  { %679 = vmatprep.subr.bf16.mxu0 %v1072_v36 }
   0xe   :  { %62 = vadd.xlane.f32.xlu0 %v61_v24  ;;  %65 = vadd.xlane.f32.xlu1 %v64_v26 }
   0xf   :  { %680 = vmatpush1.bf16.msra.mxu0 %v1074_v37 }
  0x10   :  { %681 = vmatprep.subr.bf16.mxu0 %v1075_v38 }
  0x12   :  { %68 = vadd.xlane.f32.xlu0 %v67_v30  ;;  %71 = vadd.xlane.f32.xlu1 %v70_v31 }
  0x13   :  { %682 = vmatpush1.bf16.msra.mxu0 %v1077_v39 }
  0x14   :  { %683 = vmatprep.subr.bf16.mxu0 %v1078_v40 }
  0x17   :  { %684 = vmatpush1.bf16.msra.mxu0 %v1080_v42 }
  0x18   :  { %685 = vmatprep.subr.bf16.mxu0 %v1081_v43  ;;  %v1095_v43 = vld [vmem:[%s1661_s3 + $0x154] ss:$12 sps:$4 sm:$0xff]  }
  0x1b   :  { %686 = vmatpush1.bf16.msra.mxu0 %v1083_v44  ;;  %v1097_v44 = vld [vmem:[%s1661_s3 + $0x158] ss:$12 sps:$4 sm:$0xff]  }
  0x1c   :  { %687 = vmatprep.subr.bf16.mxu0 %v1084_v45 }
  0x1f   :  { %688 = vmatpush1.bf16.msra.mxu0 %v1086_v46  ;;  %v1098_v46 = vld [vmem:[%s1661_s3 + $0x150] ss:$12 sps:$4 sm:$0xff]  }
  0x20   :  { %689 = vmatprep.subr.bf16.mxu0 %v1087_v47  ;;  %v1099_v47 = vld [vmem:[%s1661_s3 + $0x98] ss:$12 sps:$4 sm:$0xff]  }
  0x23   :  { %690 = vmatpush1.bf16.msra.mxu0 %v1089_v48  ;;  %v1100_v48 = vld [vmem:[%s1661_s3 + $0x13c] ss:$12 sps:$4 sm:$0xff]  }
  0x24   :  { %691 = vmatprep.subr.bf16.mxu0 %v1090_v49  ;;  %v1102_v49 = vld [vmem:[%s1661_s3 + $0x140] ss:$12 sps:$4 sm:$0xff]  }
  0x27   :  { %692 = vmatpush2.bf16.msra.mxu0 %v1093_v23 }
  0x28   :  { %693 = vmatprep.subr.bf16.mxu0 %v1095_v43 }
  0x2b   :  { %694 = vmatpush2.bf16.msra.mxu0 %v1098_v46 }
  0x2c   :  { %695 = vmatprep.subr.bf16.mxu0 %v1100_v48  ;;  %v178_v48 = vld [vmem:[%s1662_s1] sm:$0x3] }
  0x8f   :  { %v51_v50 = vpop.xlane.xlu0 %50  ;;  %v57_v51 = vpop.xlane.xlu1 %56 }
  0x90   :  { %v74_v52 = vmul.f32 0.00390625, %v51_v50  ;;  %v76_v53 = vmul.f32 0.00390625, %v57_v51  ;;  %v1103_v50 = vld [vmem:[%s1661_s3 + $0x138] ss:$12 sps:$4 sm:$0xff]   ;;  %v1104_v51 = vld [vmem:[%s1661_s3 + $0x80] ss:$12 sps:$4 sm:$0xff]  }
  0x91   :  { %696 = vmatpush2.bf16.msra.mxu0 %v1103_v50 }
  0x92   :  { %v1320_v54 = vsub.f32 %v33_v3, %v74_v52  ;;  %v1324_v55 = vsub.f32 %v34_v4, %v74_v52  ;;  %v1328_v56 = vsub.f32 %v37_v5, %v76_v53  ;;  %v1332_v57 = vsub.f32 %v38_v6, %v76_v53  ;;  %v1105_v52 = vld [vmem:[%s1661_s3 + $0x124] ss:$12 sps:$4 sm:$0xff]   ;;  %v1107_v53 = vld [vmem:[%s1661_s3 + $0x128] ss:$12 sps:$4 sm:$0xff]  }
  0x93   :  { %v54_v58 = vpop.xlane.xlu0 %53  ;;  %v60_v59 = vpop.xlane.xlu1 %59  ;;  %697 = vmatprep.subr.bf16.mxu0 %v1105_v52 }
  0x94   :  { %v75_v60 = vmul.f32 0.00390625, %v54_v58  ;;  %v77_v61 = vmul.f32 0.00390625, %v60_v59  ;;  %v98_v62 = vmul.f32 %v1320_v54, %v1320_v54  ;;  %v99_v63 = vmul.f32 %v1324_v55, %v1324_v55  ;;  %v1108_v58 = vld [vmem:[%s1661_s3 + $0x120] ss:$12 sps:$4 sm:$0xff]   ;;  %v1109_v59 = vld [vmem:[%s1661_s3 + $0x68] ss:$12 sps:$4 sm:$0xff]  }
  0x95   :  { %v102_v0 = vmul.f32 %v1328_v56, %v1328_v56  ;;  %v103_v3 = vmul.f32 %v1332_v57, %v1332_v57  ;;  %698 = vmatpush2.bf16.msra.mxu0 %v1108_v58 }
  0x96   :  { %v1344_v1 = vsub.f32 %v35_v9, %v75_v60  ;;  %v1348_v4 = vsub.f32 %v36_v10, %v75_v60  ;;  %v1352_v5 = vsub.f32 %v39_v11, %v77_v61  ;;  %v1356_v6 = vsub.f32 %v40_v12, %v77_v61  ;;  %v1110_v60 = vld [vmem:[%s1661_s3 + $0x10c] ss:$12 sps:$4 sm:$0xff]   ;;  %v1112_v61 = vld [vmem:[%s1661_s3 + $0x110] ss:$12 sps:$4 sm:$0xff]  }
  0x97   :  { %v63_v14 = vpop.xlane.xlu0 %62  ;;  %v114_v15 = vadd.f32 %v99_v63, %v98_v62  ;;  %v66_v18 = vpop.xlane.xlu1 %65  ;;  %v120_v10 = vadd.f32 %v103_v3, %v102_v0  ;;  %v1113_v62 = vld [vmem:[%s1661_s3 + $0x108] ss:$12 sps:$4 sm:$0xff]   ;;  %v1114_v63 = vld [vmem:[%s1661_s3 + $0x50] ss:$12 sps:$4 sm:$0xff]   ;;  %699 = vmatprep.subr.bf16.mxu0 %v1110_v60  ;;  %v1117_v3 = vld [vmem:[%s1661_s3 + $0xf8] ss:$12 sps:$4 sm:$0xff]  }
  0x98   :  { %v78_v19 = vmul.f32 0.00390625, %v63_v14  ;;  %v79_v24 = vmul.f32 0.00390625, %v66_v18  ;;  %v100_v9 = vmul.f32 %v1344_v1, %v1344_v1  ;;  %v101_v2 = vmul.f32 %v1348_v4, %v1348_v4  ;;  %v1115_v0 = vld [vmem:[%s1661_s3 + $0xf4] ss:$12 sps:$4 sm:$0xff]   ;;  %v1118_v14 = vld [vmem:[%s1661_s3 + $0xf0] ss:$12 sps:$4 sm:$0xff]  }
  0x99   :  { %115 = vadd.xlane.f32.xlu0 %v114_v15  ;;  %v104_v11 = vmul.f32 %v1352_v5, %v1352_v5  ;;  %v105_v7 = vmul.f32 %v1356_v6, %v1356_v6  ;;  %700 = vmatpush2.bf16.msra.mxu0 %v1113_v62  ;;  %v1119_v15 = vld [vmem:[%s1661_s3 + $0x38] ss:$12 sps:$4 sm:$0xff]   ;;  %v1120_v18 = vld [vmem:[%s1661_s3 + $0xdc] ss:$12 sps:$4 sm:$0xff]  }
  0x9a   :  { %v1368_v12 = vsub.f32 %v41_v16, %v78_v19  ;;  %v1372_v26 = vsub.f32 %v42_v17, %v78_v19  ;;  %v1376_v30 = vsub.f32 %v43_v20, %v79_v24  ;;  %v1380_v31 = vsub.f32 %v44_v21, %v79_v24  ;;  %701 = vmatprep.subr.bf16.mxu0 %v1115_v0  ;;  %v1122_v19 = vld [vmem:[%s1661_s3 + $0xe0] ss:$12 sps:$4 sm:$0xff]   ;;  %v1123_v24 = vld [vmem:[%s1661_s3 + $0xd8] ss:$12 sps:$4 sm:$0xff]  }
  0x9b   :  { %v69_v32 = vpop.xlane.xlu0 %68  ;;  %v117_v33 = vadd.f32 %v101_v2, %v100_v9  ;;  %v72_v34 = vpop.xlane.xlu1 %71  ;;  %v123_v17 = vadd.f32 %v105_v7, %v104_v11  ;;  %v1124_v9 = vld [vmem:[%s1661_s3 + $0x20] ss:$12 sps:$4 sm:$0xff]   ;;  %v1125_v2 = vld [vmem:[%s1661_s3 + $0xc4] ss:$12 sps:$4 sm:$0xff]   ;;  %v1129_v7 = vld [vmem:[%s1661_s3 + $0x8] ss:$12 sps:$4 sm:$0xff]  }
  0x9c   :  { %v80_v35 = vmul.f32 0.00390625, %v69_v32  ;;  %v81_v36 = vmul.f32 0.00390625, %v72_v34  ;;  %v106_v16 = vmul.f32 %v1368_v12, %v1368_v12  ;;  %v107_v8 = vmul.f32 %v1372_v26, %v1372_v26  ;;  %v1128_v11 = vld [vmem:[%s1661_s3 + $0xc0] ss:$12 sps:$4 sm:$0xff]  }
  0x9d   :  { %121 = vadd.xlane.f32.xlu0 %v120_v10  ;;  %118 = vadd.xlane.f32.xlu1 %v117_v33  ;;  %v108_v20 = vmul.f32 %v1376_v30, %v1376_v30  ;;  %v109_v13 = vmul.f32 %v1380_v31, %v1380_v31  ;;  %v1127_v10 = vld [vmem:[%s1661_s3 + $0xc8] ss:$12 sps:$4 sm:$0xff]  }
  0x9e   :  { %v1392_v21 = vsub.f32 %v45_v25, %v80_v35  ;;  %v1396_v37 = vsub.f32 %v46_v27, %v80_v35  ;;  %v1400_v38 = vsub.f32 %v47_v28, %v81_v36  ;;  %v1404_v39 = vsub.f32 %v48_v29, %v81_v36  ;;  %v1094_v29 = vld [vmem:[%s1661_s3 + $0xb0] ss:$12 sps:$4 sm:$0xff]   ;;  %702 = vmatpush2.bf16.msra.mxu0 %v1118_v14 }
  0x9f   :  { %v126_v40 = vadd.f32 %v107_v8, %v106_v16  ;;  %v129_v22 = vadd.f32 %v109_v13, %v108_v20  ;;  %1027 = vmatpush3.bf16.msra.mxu1 %v1094_v29  ;;  %703 = vmatprep.subr.bf16.mxu0 %v1120_v18 }
  0xa0   :  { %v110_v41 = vmul.f32 %v1392_v21, %v1392_v21  ;;  %v111_v25 = vmul.f32 %v1396_v37, %v1396_v37  ;;  %v112_v27 = vmul.f32 %v1400_v38, %v1400_v38  ;;  %v113_v28 = vmul.f32 %v1404_v39, %v1404_v39  ;;  %1028 = vmatprep.subr.bf16.mxu1 %v1097_v44 }
  0xa1   :  { %124 = vadd.xlane.f32.xlu1 %v123_v17  ;;  %127 = vadd.xlane.f32.xlu0 %v126_v40  ;;  %v180_v17 = vlaneseq }
  0xa2   :  { %v132_v42 = vadd.f32 %v111_v25, %v110_v41  ;;  %v135_v45 = vadd.f32 %v113_v28, %v112_v27  ;;  %704 = vmatpush2.bf16.msra.mxu0 %v1123_v24 }
  0xa3   :  { %1029 = vmatpush3.bf16.msra.mxu1 %v1099_v47  ;;  %705 = vmatprep.subr.bf16.mxu0 %v1125_v2  ;;  %v1504_v27 = vshrl.u32 %v180_v17, 7 }
  0xa4   :  { %1030 = vmatprep.subr.bf16.mxu1 %v1102_v49 }
  0xa5   :  { %130 = vadd.xlane.f32.xlu1 %v129_v22  ;;  %133 = vadd.xlane.f32.xlu0 %v132_v42  ;;  %v1510_v46 = vsub.s32 1, %v1504_v27 }
  0xa6   :  { %706 = vmatpush2.bf16.msra.mxu0 %v1128_v11 }
  0xa7   :  { %1031 = vmatpush3.bf16.msra.mxu1 %v1104_v51  ;;  %v1519_v58 = vrot.slane %v178_v48, %v1510_v46 }
  0xa8   :  { %1032 = vmatprep.subr.bf16.mxu1 %v1107_v53 }
  0xa9   :  { %136 = vadd.xlane.f32.xlu1 %v135_v45  ;;  %v1507_v45 = vsub.s32 0, %v1504_v27 }
  0xab   :  { %1033 = vmatpush3.bf16.msra.mxu1 %v1109_v59  ;;  %v1516_v53 = vrot.slane %v178_v48, %v1507_v45 }
  0xac   :  { %1034 = vmatprep.subr.bf16.mxu1 %v1112_v61  ;;  %v206_v61 = vld [vmem:[%s1663_s2] sm:$0x3] }
  0xad   :  { %v215_v14 = vrot.slane %v206_v61, %v1510_v46 }
  0xaf   :  { %1035 = vmatpush3.bf16.msra.mxu1 %v1114_v63 }
  0xb0   :  { %1036 = vmatprep.subr.bf16.mxu1 %v1117_v3  ;;  %v1528_v3 = vrot.slane %v206_v61, %v1507_v45 }
  0xb3   :  { %1037 = vmatpush3.bf16.msra.mxu1 %v1119_v15 }
  0xb4   :  { %1038 = vmatprep.subr.bf16.mxu1 %v1122_v19 }
  0xb7   :  { %1039 = vmatpush3.bf16.msra.mxu1 %v1124_v9 }
  0xb8   :  { %1040 = vmatprep.subr.bf16.mxu1 %v1127_v10 }
  0xbb   :  { %1041 = vmatpush3.bf16.msra.mxu1 %v1129_v7 }
 0x122   :  { %v116_v32 = vpop.xlane.xlu0 %115 }
 0x123   :  { %v138_v33 = vmul.f32 0.00390625, %v116_v32 }
 0x125   :  { %v146_v34 = vadd.f32 1e-05, %v138_v33 }
 0x126   :  { %v119_v35 = vpop.xlane.xlu1 %118  ;;  %v122_v36 = vpop.xlane.xlu0 %121 }
 0x127   :  { %1130 = vrsqrt.f32 %v146_v34  ;;  %v139_v16 = vmul.f32 0.00390625, %v119_v35  ;;  %v140_v8 = vmul.f32 0.00390625, %v122_v36 }
 0x129   :  { %v147_v20 = vadd.f32 1e-05, %v139_v16  ;;  %v148_v13 = vadd.f32 1e-05, %v140_v8 }
 0x12a   :  { %v125_v40 = vpop.xlane.xlu1 %124  ;;  %v128_v41 = vpop.xlane.xlu0 %127 }
 0x12b   :  { %1132 = vrsqrt.f32 %v147_v20  ;;  %v141_v25 = vmul.f32 0.00390625, %v125_v40  ;;  %v142_v22 = vmul.f32 0.00390625, %v128_v41 }
 0x12c   :  { %1134 = vrsqrt.f32 %v148_v13 }
 0x12d   :  { %v149_v28 = vadd.f32 1e-05, %v141_v25  ;;  %v150_v23 = vadd.f32 1e-05, %v142_v22 }
 0x12e   :  { %v131_v29 = vpop.xlane.xlu1 %130  ;;  %v134_v42 = vpop.xlane.xlu0 %133 }
 0x12f   :  { %1136 = vrsqrt.f32 %v149_v28  ;;  %v143_v43 = vmul.f32 0.00390625, %v131_v29  ;;  %v144_v44 = vmul.f32 0.00390625, %v134_v42 }
 0x130   :  { %1138 = vrsqrt.f32 %v150_v23 }
 0x131   :  { %v151_v47 = vadd.f32 1e-05, %v143_v43  ;;  %v152_v49 = vadd.f32 1e-05, %v144_v44 }
 0x132   :  { %v137_v50 = vpop.xlane.xlu1 %136 }
 0x133   :  { %1140 = vrsqrt.f32 %v151_v47  ;;  %v145_v51 = vmul.f32 0.00390625, %v137_v50 }
 0x134   :  { %v1131_v52 = vpop.eup %1130  ;;  %1142 = vrsqrt.f32 %v152_v49 }
 0x135   :  { %v153_v59 = vadd.f32 1e-05, %v145_v51  ;;  %v163_v60 = vmul.f32 %v1131_v52, %v1324_v55  ;;  %v162_v62 = vmul.f32 %v1131_v52, %v1320_v54 }
 0x137   :  { %1144 = vrsqrt.f32 %v153_v59  ;;  %v191_v0 = vmul.f32 %v1519_v58, %v163_v60  ;;  %v190_v15 = vmul.f32 %v1516_v53, %v162_v62 }
 0x138   :  { %v1133_v63 = vpop.eup %1132 }
 0x139   :  { %v1135_v18 = vpop.eup %1134  ;;  %v165_v55 = vmul.f32 %v1133_v63, %v1348_v4  ;;  %v164_v19 = vmul.f32 %v1133_v63, %v1344_v1  ;;  %v219_v10 = vadd.f32 %v215_v14, %v191_v0  ;;  %v218_v11 = vadd.f32 %v1528_v3, %v190_v15 }
 0x13a   :  { %v167_v24 = vmul.f32 %v1135_v18, %v1332_v57  ;;  %v166_v57 = vmul.f32 %v1135_v18, %v1328_v56 }
 0x13b   :  { %v193_v54 = vmul.f32 %v1519_v58, %v165_v55  ;;  %v192_v9 = vmul.f32 %v1516_v53, %v164_v19 }
 0x13c   :  { %v1137_v2 = vpop.eup %1136  ;;  %v195_v7 = vmul.f32 %v1519_v58, %v167_v24 }
 0x13d   :  { %v1139_v32 = vpop.eup %1138  ;;  %v221_v33 = vadd.f32 %v215_v14, %v193_v54  ;;  %v220_v34 = vadd.f32 %v1528_v3, %v192_v9  ;;  %v169_v4 = vmul.f32 %v1137_v2, %v1356_v6  ;;  %v168_v1 = vmul.f32 %v1137_v2, %v1352_v5 }
 0x13e   :  { %v171_v8 = vmul.f32 %v1139_v32, %v1372_v26  ;;  %v223_v13 = vadd.f32 %v215_v14, %v195_v7  ;;  %v194_v5 = vmul.f32 %v1516_v53, %v166_v57  ;;  %v170_v43 = vmul.f32 %v1139_v32, %v1368_v12 }
 0x13f   :  { %v1019_v35 = vpack.c.bf16 %v221_v33, %v219_v10  ;;  %v1018_v36 = vpack.c.bf16 %v220_v34, %v218_v11  ;;  %v197_v16 = vmul.f32 %v1519_v58, %v169_v4  ;;  %v196_v20 = vmul.f32 %v1516_v53, %v168_v1 }
 0x140   :  { %v1141_v17 = vpop.eup %1140  ;;  %v199_v25 = vmul.f32 %v1519_v58, %v171_v8  ;;  %v222_v42 = vadd.f32 %v1528_v3, %v194_v5 }
 0x141   :  { %707 = vmatprep.mubr.bf16.mxu0 %v1019_v35  ;;  %780 = vmatprep.mubr.bf16.mxu1 %v1019_v35  ;;  %v225_v40 = vadd.f32 %v215_v14, %v197_v16  ;;  %v173_v41 = vmul.f32 %v1141_v17, %v1380_v31  ;;  %v1143_v56 = vpop.eup %1142  ;;  %v224_v28 = vadd.f32 %v1528_v3, %v196_v20 }
 0x142   :  { %708 = vmatmul.mubr.bf16.vlgmr.msra.gmra.mxu0 %v1018_v36  ;;  %781 = vmatmul.mubr.bf16.vlgmr.msra.gmra.mxu1 %v1018_v36  ;;  %v172_v23 = vmul.f32 %v1141_v17, %v1376_v30  ;;  %v227_v44 = vadd.f32 %v215_v14, %v199_v25  ;;  %v175_v47 = vmul.f32 %v1143_v56, %v1396_v37 }
 0x143   :  { %v1021_v6 = vpack.c.bf16 %v225_v40, %v223_v13  ;;  %v201_v22 = vmul.f32 %v1519_v58, %v173_v41  ;;  %v1020_v48 = vpack.c.bf16 %v224_v28, %v222_v42  ;;  %v198_v30 = vmul.f32 %v1516_v53, %v170_v43 }
 0x144   :  { %v1145_v26 = vpop.eup %1144  ;;  %v200_v49 = vmul.f32 %v1516_v53, %v172_v23  ;;  %v174_v60 = vmul.f32 %v1143_v56, %v1392_v21  ;;  %v362_v21 = vld [vmem:[%s1664_s4] sm:$0x7] }
 0x145   :  { %717 = vmatprep.mubr.bf16.mxu0 %v1021_v6  ;;  %788 = vmatprep.mubr.bf16.mxu1 %v1021_v6  ;;  %v229_v29 = vadd.f32 %v215_v14, %v201_v22  ;;  %v177_v31 = vmul.f32 %v1145_v26, %v1404_v39  ;;  %v203_v39 = vmul.f32 %v1519_v58, %v175_v47 }
 0x146   :  { %v228_v52 = vadd.f32 %v1528_v3, %v200_v49  ;;  %v176_v12 = vmul.f32 %v1145_v26, %v1400_v38  ;;  %v226_v37 = vadd.f32 %v1528_v3, %v198_v30  ;;  %v202_v15 = vmul.f32 %v1516_v53, %v174_v60 }
 0x147   :  { %v1023_v50 = vpack.c.bf16 %v229_v29, %v227_v44  ;;  %v205_v51 = vmul.f32 %v1519_v58, %v177_v31  ;;  %v231_v61 = vadd.f32 %v215_v14, %v203_v39  ;;  %v1573_v55 = vrot.slane %v362_v21, %v1507_v45 }
 0x148   :  { %v1022_v62 = vpack.c.bf16 %v228_v52, %v226_v37  ;;  %v204_v63 = vmul.f32 %v1516_v53, %v176_v12  ;;  %v230_v38 = vadd.f32 %v1528_v3, %v202_v15  ;;  %v1576_v53 = vrot.slane %v362_v21, %v1510_v46 }
 0x149   :  { %v233_v59 = vadd.f32 %v215_v14, %v205_v51  ;;  %v374_v14 = vsub.s32 2, %v1504_v27 }
 0x14a   :  { %718 = vmatmul.mubr.bf16.gmra.mxu0 %v1020_v48  ;;  %789 = vmatmul.mubr.bf16.gmra.mxu1 %v1020_v48  ;;  %v232_v58 = vadd.f32 %v1528_v3, %v204_v63 }
 0x14b   :  { %727 = vmatprep.mubr.bf16.mxu0 %v1023_v50  ;;  %796 = vmatprep.mubr.bf16.mxu1 %v1023_v50  ;;  %v1025_v0 = vpack.c.bf16 %v233_v59, %v231_v61  ;;  %v1578_v54 = vrot.slane %v362_v21, %v374_v14 }
 0x14c   :  { %v1024_v18 = vpack.c.bf16 %v232_v58, %v230_v38 }
 0x152   :  { %728 = vmatmul.mubr.bf16.gmra.mxu0 %v1022_v62  ;;  %797 = vmatmul.mubr.bf16.gmra.mxu1 %v1022_v62 }
 0x153   :  { %737 = vmatprep.mubr.bf16.mxu0 %v1025_v0  ;;  %804 = vmatprep.mubr.bf16.mxu1 %v1025_v0 }
 0x15a   :  { %738 = vmatmul.mubr.bf16.gmra.mxu0 %v1024_v18  ;;  %805 = vmatmul.mubr.bf16.gmra.mxu1 %v1024_v18 }
 0x202   :  { %v709_v19 = vpop.f32.mrf.mxu0  ;;  %v1042_v24 = vpop.f32.mrf.mxu1 }
 0x203   :  { %v710_v2 = vadd.f32 %v709_v19, %v1573_v55 }
 0x204   :  { %v711_v3 = vpop.f32.mrf.mxu0  ;;  %v1043_v9 = vpop.f32.mrf.mxu1 }
 0x205   :  { %v712_v10 = vadd.f32 %v711_v3, %v1576_v53  ;;  %v1044_v11 = vadd.f32 %v1043_v9, %v1042_v24 }
 0x206   :  { %v713_v7 = vpop.f32.mrf.mxu0  ;;  %v1045_v32 = vpop.f32.mrf.mxu1 }
 0x207   :  { %v1002_v27 = vpack.c.bf16 %v712_v10, %v710_v2  ;;  %v783_v45 = vadd.f32 %v1044_v11, %v1578_v54  ;;  %v714_v4 = vadd.f32 %v713_v7, %v1573_v55 }
 0x208   :  { %v715_v33 = vpop.f32.mrf.mxu0  ;;  %v1046_v46 = vpop.f32.mrf.mxu1 }
 0x209   :  { %893 = vst [vmem:[%s1665_s5] sm:$0xff] %v1002_v27  ;;  %v1003_v34 = vpack.c.bf16 %v783_v45, %v783_v45  ;;  %v716_v1 = vadd.f32 %v715_v33, %v1576_v53  ;;  %v1047_v57 = vadd.f32 %v1046_v46, %v1045_v32 }
 0x20a   :  { %v719_v35 = vpop.f32.mrf.mxu0  ;;  %v1048_v36 = vpop.f32.mrf.mxu1 }
 0x20b   :  { %895 = vst.msk [vmem:[%s1665_s5 + $0x8] sm:$0xf] %vm894_vm0, %v1003_v34  ;;  %v1004_v16 = vpack.c.bf16 %v716_v1, %v714_v4  ;;  %v786_v8 = vadd.f32 %v1047_v57, %v1578_v54  ;;  %v720_v40 = vadd.f32 %v719_v35, %v1573_v55 }
 0x20c   :  { %v721_v17 = vpop.f32.mrf.mxu0  ;;  %v1049_v20 = vpop.f32.mrf.mxu1 }
 0x20d   :  { %896 = vst [vmem:[%s1665_s5 + $0xc] sm:$0xff] %v1004_v16  ;;  %v1005_v13 = vpack.c.bf16 %v786_v8, %v786_v8  ;;  %v722_v41 = vadd.f32 %v721_v17, %v1576_v53  ;;  %v1050_v5 = vadd.f32 %v1049_v20, %v1048_v36 }
 0x20e   :  { %v723_v56 = vpop.f32.mrf.mxu0  ;;  %v1051_v6 = vpop.f32.mrf.mxu1 }
 0x20f   :  { %897 = vst.msk [vmem:[%s1665_s5 + $0x14] sm:$0xf] %vm894_vm0, %v1005_v13  ;;  %v1006_v25 = vpack.c.bf16 %v722_v41, %v720_v40  ;;  %v791_v22 = vadd.f32 %v1050_v5, %v1578_v54  ;;  %v724_v29 = vadd.f32 %v723_v56, %v1573_v55 }
 0x210   :  { %v725_v26 = vpop.f32.mrf.mxu0  ;;  %v1052_v28 = vpop.f32.mrf.mxu1 }
 0x211   :  { %898 = vst [vmem:[%s1665_s5 + $0x18] sm:$0xff] %v1006_v25  ;;  %v1007_v23 = vpack.c.bf16 %v791_v22, %v791_v22  ;;  %v726_v31 = vadd.f32 %v725_v26, %v1576_v53  ;;  %v1053_v42 = vadd.f32 %v1052_v28, %v1051_v6 }
 0x212   :  { %v729_v43 = vpop.f32.mrf.mxu0  ;;  %v1054_v44 = vpop.f32.mrf.mxu1 }
 0x213   :  { %899 = vst.msk [vmem:[%s1665_s5 + $0x20] sm:$0xf] %vm894_vm0, %v1007_v23  ;;  %v1008_v47 = vpack.c.bf16 %v726_v31, %v724_v29  ;;  %v794_v48 = vadd.f32 %v1053_v42, %v1578_v54  ;;  %v730_v30 = vadd.f32 %v729_v43, %v1573_v55 }
 0x214   :  { %v731_v49 = vpop.f32.mrf.mxu0  ;;  %v1055_v50 = vpop.f32.mrf.mxu1 }
 0x215   :  { %900 = vst [vmem:[%s1665_s5 + $0x24] sm:$0xff] %v1008_v47  ;;  %v1009_v51 = vpack.c.bf16 %v794_v48, %v794_v48  ;;  %v732_v39 = vadd.f32 %v731_v49, %v1576_v53  ;;  %v1056_v52 = vadd.f32 %v1055_v50, %v1054_v44 }
 0x216   :  { %v733_v12 = vpop.f32.mrf.mxu0  ;;  %v1057_v59 = vpop.f32.mrf.mxu1 }
 0x217   :  { %901 = vst.msk [vmem:[%s1665_s5 + $0x2c] sm:$0xf] %vm894_vm0, %v1009_v51  ;;  %v1010_v37 = vpack.c.bf16 %v732_v39, %v730_v30  ;;  %v799_v60 = vadd.f32 %v1056_v52, %v1578_v54  ;;  %v734_v0 = vadd.f32 %v733_v12, %v1573_v55 }
 0x218   :  { %v735_v61 = vpop.f32.mrf.mxu0  ;;  %v1058_v62 = vpop.f32.mrf.mxu1 }
 0x219   :  { %902 = vst [vmem:[%s1665_s5 + $0x30] sm:$0xff] %v1010_v37  ;;  %v1011_v63 = vpack.c.bf16 %v799_v60, %v799_v60  ;;  %v736_v15 = vadd.f32 %v735_v61, %v1576_v53  ;;  %v1059_v58 = vadd.f32 %v1058_v62, %v1057_v59 }
 0x21a   :  { %v739_v38 = vpop.f32.mrf.mxu0  ;;  %v1060_v18 = vpop.f32.mrf.mxu1 }
 0x21b   :  { %903 = vst.msk [vmem:[%s1665_s5 + $0x38] sm:$0xf] %vm894_vm0, %v1011_v63  ;;  %v1012_v21 = vpack.c.bf16 %v736_v15, %v734_v0  ;;  %v802_v14 = vadd.f32 %v1059_v58, %v1578_v54  ;;  %v740_v9 = vadd.f32 %v739_v38, %v1573_v55 }
 0x21c   :  { %v741_v19 = vpop.f32.mrf.mxu0  ;;  %v1061_v24 = vpop.f32.mrf.mxu1 }
 0x21d   :  { %904 = vst [vmem:[%s1665_s5 + $0x3c] sm:$0xff] %v1012_v21  ;;  %v1013_v3 = vpack.c.bf16 %v802_v14, %v802_v14  ;;  %v742_v2 = vadd.f32 %v741_v19, %v1576_v53  ;;  %v1062_v10 = vadd.f32 %v1061_v24, %v1060_v18 }
 0x21e   :  { %v743_v11 = vpop.f32.mrf.mxu0  ;;  %v1063_v7 = vpop.f32.mrf.mxu1 }
 0x21f   :  { %905 = vst.msk [vmem:[%s1665_s5 + $0x44] sm:$0xf] %vm894_vm0, %v1013_v3  ;;  %v1014_v32 = vpack.c.bf16 %v742_v2, %v740_v9  ;;  %v807_v27 = vadd.f32 %v1062_v10, %v1578_v54  ;;  %v744_v34 = vadd.f32 %v743_v11, %v1573_v55 }
 0x220   :  { %v745_v45 = vpop.f32.mrf.mxu0  ;;  %v1064_v33 = vpop.f32.mrf.mxu1 }
 0x221   :  { %906 = vst [vmem:[%s1665_s5 + $0x48] sm:$0xff] %v1014_v32  ;;  %v1015_v46 = vpack.c.bf16 %v807_v27, %v807_v27  ;;  %v746_v4 = vadd.f32 %v745_v45, %v1576_v53  ;;  %v1065_v1 = vadd.f32 %v1064_v33, %v1063_v7 }
 0x223   :  { %907 = vst.msk [vmem:[%s1665_s5 + $0x50] sm:$0xf] %vm894_vm0, %v1015_v46  ;;  %v1016_v57 = vpack.c.bf16 %v746_v4, %v744_v34  ;;  %v810_v35 = vadd.f32 %v1065_v1, %v1578_v54 }
 0x225   :  { %908 = vst [vmem:[%s1665_s5 + $0x54] sm:$0xff] %v1016_v57  ;;  %v1017_v36 = vpack.c.bf16 %v810_v35, %v810_v35 }
 0x227   :  { %909 = vst.msk [vmem:[%s1665_s5 + $0x5c] sm:$0xf] %vm894_vm0, %v1017_v36 }

// kernel: _lambda_.6
= control target key start
LH: loop header
LB: loop body
LE: loop exit
PB: predicated region body
PF: predicated region fallthrough
CT: control target
= control target key end

     0   :  { %v47_v40 = vlaneseq  ;;  %s883_s1 = inlined_call_operand.vmem [shape: bf16[256,256], index: 1, kind: input, shape index: {}]   ;;  %s884_s0 = inlined_call_operand.vmem [shape: bf16[64,256], index: 0, kind: input, shape index: {}]   ;;  %s885_s2 = inlined_call_operand.vmem [shape: f32[1,256], index: 2, kind: input, shape index: {}]   ;;  %s886_s3 = inlined_call_operand.vmem [shape: bf16[64,256], index: 3, kind: input, shape index: {}]   ;;  %s887_s4 = inlined_call_operand.vmem [shape: bf16[64,256], index: 4, kind: output, shape index: {}]  }
   0x1   :  { %v617_v0 = vld [vmem:[%s883_s1 + $0x74] ss:$8 sps:$4 sm:$0xff]   ;;  %v619_v1 = vld [vmem:[%s883_s1 + $0x70] ss:$8 sps:$4 sm:$0xff]   ;;  %v620_v2 = vld [vmem:[%s883_s1 + $0x64] ss:$8 sps:$4 sm:$0xff]  }
   0x2   :  { %345 = vmatprep.subr.bf16.mxu0 %v617_v0  ;;  %585 = vmatprep.subr.bf16.mxu1 %v617_v0  ;;  %v622_v3 = vld [vmem:[%s883_s1 + $0x60] ss:$8 sps:$4 sm:$0xff]   ;;  %v623_v4 = vld [vmem:[%s883_s1 + $0x54] ss:$8 sps:$4 sm:$0xff]   ;;  %v625_v5 = vld [vmem:[%s883_s1 + $0x50] ss:$8 sps:$4 sm:$0xff]  }
   0x3   :  { %346 = vmatpush1.bf16.msra.mxu0 %v619_v1  ;;  %601 = vmatpush1.bf16.msra.mxu1 %v619_v1  ;;  %v626_v6 = vld [vmem:[%s883_s1 + $0x44] ss:$8 sps:$4 sm:$0xff]   ;;  %v628_v7 = vld [vmem:[%s883_s1 + $0x40] ss:$8 sps:$4 sm:$0xff]   ;;  %v629_v8 = vld [vmem:[%s883_s1 + $0x34] ss:$8 sps:$4 sm:$0xff]  }
   0x4   :  { %347 = vmatprep.subr.bf16.mxu0 %v620_v2  ;;  %586 = vmatprep.subr.bf16.mxu1 %v620_v2  ;;  %v631_v9 = vld [vmem:[%s883_s1 + $0x30] ss:$8 sps:$4 sm:$0xff]   ;;  %v632_v10 = vld [vmem:[%s883_s1 + $0x24] ss:$8 sps:$4 sm:$0xff]   ;;  %v634_v11 = vld [vmem:[%s883_s1 + $0x20] ss:$8 sps:$4 sm:$0xff]  }
   0x5   :  { %v635_v12 = vld [vmem:[%s883_s1 + $0x14] ss:$8 sps:$4 sm:$0xff]   ;;  %v667_v13 = vld [vmem:[%s884_s0 + $0x4] ss:$8 sps:$4 sm:$0xff]   ;;  %v637_v14 = vld [vmem:[%s883_s1 + $0x10] ss:$8 sps:$4 sm:$0xff]  }
   0x6   :  { %v670_v15 = vld [vmem:[%s884_s0 + $0x24] ss:$8 sps:$4 sm:$0xff]   ;;  %377 = vmatprep.mubr.bf16.mxu0 %v667_v13  ;;  %v640_v17 = vld [vmem:[%s883_s1] ss:$8 sps:$4 sm:$0xff]   ;;  %v641_v18 = vld [vmem:[%s883_s1 + $0xf4] ss:$8 sps:$4 sm:$0xff]  }
   0x7   :  { %348 = vmatpush1.bf16.msra.mxu0 %v622_v3  ;;  %602 = vmatpush1.bf16.msra.mxu1 %v622_v3  ;;  %v638_v16 = vld [vmem:[%s883_s1 + $0x4] ss:$8 sps:$4 sm:$0xff]   ;;  %v643_v19 = vld [vmem:[%s883_s1 + $0xf0] ss:$8 sps:$4 sm:$0xff]   ;;  %v646_v21 = vld [vmem:[%s883_s1 + $0xe0] ss:$8 sps:$4 sm:$0xff]  }
   0x8   :  { %349 = vmatprep.subr.bf16.mxu0 %v623_v4  ;;  %587 = vmatprep.subr.bf16.mxu1 %v623_v4  ;;  %v644_v20 = vld [vmem:[%s883_s1 + $0xe4] ss:$8 sps:$4 sm:$0xff]   ;;  %v647_v22 = vld [vmem:[%s883_s1 + $0xd4] ss:$8 sps:$4 sm:$0xff]   ;;  %v649_v23 = vld [vmem:[%s883_s1 + $0xd0] ss:$8 sps:$4 sm:$0xff]  }
   0x9   :  { %397 = vmatprep.mubr.bf16.mxu1 %v670_v15  ;;  %v650_v24 = vld [vmem:[%s883_s1 + $0xc4] ss:$8 sps:$4 sm:$0xff]   ;;  %v652_v25 = vld [vmem:[%s883_s1 + $0xc0] ss:$8 sps:$4 sm:$0xff]   ;;  %v653_v26 = vld [vmem:[%s883_s1 + $0xb4] ss:$8 sps:$4 sm:$0xff]  }
   0xa   :  { %v655_v27 = vld [vmem:[%s883_s1 + $0xb0] ss:$8 sps:$4 sm:$0xff]   ;;  %v656_v28 = vld [vmem:[%s883_s1 + $0xa4] ss:$8 sps:$4 sm:$0xff]   ;;  %v658_v29 = vld [vmem:[%s883_s1 + $0xa0] ss:$8 sps:$4 sm:$0xff]  }
   0xb   :  { %350 = vmatpush1.bf16.msra.mxu0 %v625_v5  ;;  %603 = vmatpush1.bf16.msra.mxu1 %v625_v5  ;;  %v659_v30 = vld [vmem:[%s883_s1 + $0x94] ss:$8 sps:$4 sm:$0xff]   ;;  %v661_v31 = vld [vmem:[%s883_s1 + $0x90] ss:$8 sps:$4 sm:$0xff]   ;;  %v662_v32 = vld [vmem:[%s883_s1 + $0x84] ss:$8 sps:$4 sm:$0xff]  }
   0xc   :  { %351 = vmatprep.subr.bf16.mxu0 %v626_v6  ;;  %588 = vmatprep.subr.bf16.mxu1 %v626_v6  ;;  %v664_v33 = vld [vmem:[%s883_s1 + $0x80] ss:$8 sps:$4 sm:$0xff]   ;;  %v671_v36 = vld [vmem:[%s884_s0 + $0x14] ss:$8 sps:$4 sm:$0xff]   ;;  %v675_v38 = vld [vmem:[%s884_s0 + $0x10] ss:$8 sps:$4 sm:$0xff]  }
   0xd   :  { %v665_v34 = vld [vmem:[%s884_s0] ss:$8 sps:$4 sm:$0xff]   ;;  %v673_v37 = vld [vmem:[%s884_s0 + $0x34] ss:$8 sps:$4 sm:$0xff]   ;;  %v676_v39 = vld [vmem:[%s884_s0 + $0x30] ss:$8 sps:$4 sm:$0xff]  }
   0xe   :  { %v668_v35 = vld [vmem:[%s884_s0 + $0x20] ss:$8 sps:$4 sm:$0xff]   ;;  %v48_v41 = vshrl.u32 %v47_v40, 7  ;;  %v23_v55 = vld [vmem:[%s886_s3 + $0x10] sm:$0xff] }
   0xf   :  { %352 = vmatpush1.bf16.msra.mxu0 %v628_v7  ;;  %604 = vmatpush1.bf16.msra.mxu1 %v628_v7  ;;  %v21_v43 = vld [vmem:[%s886_s3] sm:$0xff]  ;;  %v22_v53 = vld [vmem:[%s886_s3 + $0x8] sm:$0xff]  ;;  %v27_v56 = vld [vmem:[%s886_s3 + $0x30] sm:$0xff]  ;;  %v33_v3 = vunpack.c.l.bf16 %v23_v55  ;;  %v34_v5 = vunpack.c.h.bf16 %v23_v55 }
  0x10   :  { %353 = vmatprep.subr.bf16.mxu0 %v629_v8  ;;  %589 = vmatprep.subr.bf16.mxu1 %v629_v8  ;;  %v49_v42 = vsub.s32 0, %v48_v41  ;;  %v45_v44 = vld [vmem:[%s885_s2] sm:$0x3]  ;;  %v53_v45 = vsub.s32 1, %v48_v41  ;;  %v29_v47 = vunpack.c.l.bf16 %v21_v43  ;;  %v30_v50 = vunpack.c.h.bf16 %v21_v43  ;;  %v26_v54 = vld [vmem:[%s886_s3 + $0x28] sm:$0xff] }
  0x11   :  { %v25_v46 = vld [vmem:[%s886_s3 + $0x20] sm:$0xff]  ;;  %v31_v57 = vunpack.c.l.bf16 %v22_v53  ;;  %v39_v58 = vunpack.c.l.bf16 %v26_v54  ;;  %v32_v59 = vunpack.c.h.bf16 %v22_v53  ;;  %v40_v60 = vunpack.c.h.bf16 %v26_v54 }
  0x12   :  { %v831_v48 = vrot.slane %v45_v44, %v49_v42  ;;  %v37_v49 = vunpack.c.l.bf16 %v25_v46  ;;  %v54_v51 = vrot.slane %v45_v44, %v53_v45  ;;  %v38_v52 = vunpack.c.h.bf16 %v25_v46 }
  0x13   :  { %354 = vmatpush1.bf16.msra.mxu0 %v631_v9  ;;  %605 = vmatpush1.bf16.msra.mxu1 %v631_v9  ;;  %v41_v4 = vunpack.c.l.bf16 %v27_v56  ;;  %v42_v6 = vunpack.c.h.bf16 %v27_v56 }
  0x14   :  { %355 = vmatprep.subr.bf16.mxu0 %v632_v10  ;;  %590 = vmatprep.subr.bf16.mxu1 %v632_v10  ;;  %v57_v61 = vadd.f32 %v831_v48, %v29_v47  ;;  %v65_v62 = vadd.f32 %v831_v48, %v37_v49  ;;  %v58_v63 = vadd.f32 %v54_v51, %v30_v50 }
  0x15   :  { %v66_v0 = vadd.f32 %v54_v51, %v38_v52  ;;  %v59_v9 = vadd.f32 %v831_v48, %v31_v57  ;;  %v67_v10 = vadd.f32 %v831_v48, %v39_v58 }
  0x17   :  { %356 = vmatpush1.bf16.msra.mxu0 %v634_v11  ;;  %606 = vmatpush1.bf16.msra.mxu1 %v634_v11  ;;  %v60_v11 = vadd.f32 %v54_v51, %v32_v59 }
  0x18   :  { %357 = vmatprep.subr.bf16.mxu0 %v635_v12  ;;  %591 = vmatprep.subr.bf16.mxu1 %v635_v12  ;;  %v68_v12 = vadd.f32 %v54_v51, %v40_v60 }
  0x1b   :  { %358 = vmatpush1.bf16.msra.mxu0 %v637_v14  ;;  %607 = vmatpush1.bf16.msra.mxu1 %v637_v14 }
  0x1c   :  { %359 = vmatprep.subr.bf16.mxu0 %v638_v16  ;;  %592 = vmatprep.subr.bf16.mxu1 %v638_v16 }
  0x1f   :  { %360 = vmatpush1.bf16.msra.mxu0 %v640_v17  ;;  %608 = vmatpush1.bf16.msra.mxu1 %v640_v17  ;;  %v24_v17 = vld [vmem:[%s886_s3 + $0x18] sm:$0xff] }
  0x20   :  { %361 = vmatprep.subr.bf16.mxu0 %v641_v18  ;;  %593 = vmatprep.subr.bf16.mxu1 %v641_v18  ;;  %v28_v18 = vld [vmem:[%s886_s3 + $0x38] sm:$0xff] }
  0x23   :  { %362 = vmatpush2.bf16.msra.mxu0 %v643_v19  ;;  %609 = vmatpush2.bf16.msra.mxu1 %v643_v19 }
  0x24   :  { %363 = vmatprep.subr.bf16.mxu0 %v644_v20  ;;  %594 = vmatprep.subr.bf16.mxu1 %v644_v20 }
  0x27   :  { %364 = vmatpush2.bf16.msra.mxu0 %v646_v21  ;;  %610 = vmatpush2.bf16.msra.mxu1 %v646_v21  ;;  %v61_v21 = vadd.f32 %v831_v48, %v33_v3 }
  0x28   :  { %365 = vmatprep.subr.bf16.mxu0 %v647_v22  ;;  %595 = vmatprep.subr.bf16.mxu1 %v647_v22  ;;  %v69_v22 = vadd.f32 %v831_v48, %v41_v4 }
  0x2b   :  { %366 = vmatpush2.bf16.msra.mxu0 %v649_v23  ;;  %611 = vmatpush2.bf16.msra.mxu1 %v649_v23 }
  0x2c   :  { %367 = vmatprep.subr.bf16.mxu0 %v650_v24  ;;  %596 = vmatprep.subr.bf16.mxu1 %v650_v24 }
  0x2f   :  { %368 = vmatpush2.bf16.msra.mxu0 %v652_v25  ;;  %612 = vmatpush2.bf16.msra.mxu1 %v652_v25  ;;  %v62_v25 = vadd.f32 %v54_v51, %v34_v5 }
  0x30   :  { %369 = vmatprep.subr.bf16.mxu0 %v653_v26  ;;  %597 = vmatprep.subr.bf16.mxu1 %v653_v26  ;;  %v70_v26 = vadd.f32 %v54_v51, %v42_v6 }
  0x33   :  { %370 = vmatpush2.bf16.msra.mxu0 %v655_v27  ;;  %613 = vmatpush2.bf16.msra.mxu1 %v655_v27 }
  0x34   :  { %371 = vmatprep.subr.bf16.mxu0 %v656_v28  ;;  %598 = vmatprep.subr.bf16.mxu1 %v656_v28 }
  0x37   :  { %372 = vmatpush2.bf16.msra.mxu0 %v658_v29  ;;  %614 = vmatpush2.bf16.msra.mxu1 %v658_v29  ;;  %v35_v29 = vunpack.c.l.bf16 %v24_v17 }
  0x38   :  { %373 = vmatprep.subr.bf16.mxu0 %v659_v30  ;;  %599 = vmatprep.subr.bf16.mxu1 %v659_v30  ;;  %v43_v30 = vunpack.c.l.bf16 %v28_v18 }
  0x39   :  { %v63_v43 = vadd.f32 %v831_v48, %v35_v29 }
  0x3a   :  { %v71_v44 = vadd.f32 %v831_v48, %v43_v30 }
  0x3b   :  { %374 = vmatpush2.bf16.msra.mxu0 %v661_v31  ;;  %615 = vmatpush2.bf16.msra.mxu1 %v661_v31  ;;  %v36_v31 = vunpack.c.h.bf16 %v24_v17 }
  0x3c   :  { %375 = vmatprep.subr.bf16.mxu0 %v662_v32  ;;  %600 = vmatprep.subr.bf16.mxu1 %v662_v32  ;;  %v44_v32 = vunpack.c.h.bf16 %v28_v18 }
  0x3d   :  { %v64_v45 = vadd.f32 %v54_v51, %v36_v31 }
  0x3e   :  { %v72_v46 = vadd.f32 %v54_v51, %v44_v32 }
  0x3f   :  { %376 = vmatpush2.bf16.msra.mxu0 %v664_v33  ;;  %616 = vmatpush2.bf16.msra.mxu1 %v664_v33 }
  0x42   :  { %378 = vmatmul.mubr.bf16.vlgmr.msra.gmra.mxu0 %v665_v34  ;;  %398 = vmatmul.mubr.bf16.vlgmr.msra.gmra.mxu1 %v668_v35 }
  0x43   :  { %387 = vmatprep.mubr.bf16.mxu0 %v671_v36  ;;  %407 = vmatprep.mubr.bf16.mxu1 %v673_v37 }
  0x4a   :  { %388 = vmatmul.mubr.bf16.gmra.mxu0 %v675_v38  ;;  %408 = vmatmul.mubr.bf16.gmra.mxu1 %v676_v39 }
 0x102   :  { %v379_v1 = vpop.f32.mrf.mxu0  ;;  %v399_v2 = vpop.f32.mrf.mxu1 }
 0x103   :  { %v418_v13 = vadd.f32 %v379_v1, %v57_v61  ;;  %v426_v14 = vadd.f32 %v399_v2, %v65_v62 }
 0x104   :  { %v381_v7 = vpop.f32.mrf.mxu0  ;;  %v401_v8 = vpop.f32.mrf.mxu1 }
 0x105   :  { %v419_v15 = vadd.f32 %v381_v7, %v58_v63  ;;  %v427_v16 = vadd.f32 %v401_v8, %v66_v0 }
 0x106   :  { %v383_v19 = vpop.f32.mrf.mxu0  ;;  %v403_v20 = vpop.f32.mrf.mxu1 }
 0x107   :  { %v577_v23 = vpack.c.bf16 %v419_v15, %v418_v13  ;;  %v581_v24 = vpack.c.bf16 %v427_v16, %v426_v14  ;;  %v420_v33 = vadd.f32 %v383_v19, %v59_v9  ;;  %v428_v34 = vadd.f32 %v403_v20, %v67_v10 }
 0x108   :  { %v385_v27 = vpop.f32.mrf.mxu0  ;;  %v405_v28 = vpop.f32.mrf.mxu1 }
 0x109   :  { %517 = vst [vmem:[%s887_s4] sm:$0xff] %v577_v23  ;;  %521 = vst [vmem:[%s887_s4 + $0x20] sm:$0xff] %v581_v24  ;;  %v421_v35 = vadd.f32 %v385_v27, %v60_v11  ;;  %v429_v36 = vadd.f32 %v405_v28, %v68_v12 }
 0x10a   :  { %v389_v37 = vpop.f32.mrf.mxu0  ;;  %v409_v38 = vpop.f32.mrf.mxu1 }
 0x10b   :  { %v578_v39 = vpack.c.bf16 %v421_v35, %v420_v33  ;;  %v582_v40 = vpack.c.bf16 %v429_v36, %v428_v34  ;;  %v422_v47 = vadd.f32 %v389_v37, %v61_v21  ;;  %v430_v49 = vadd.f32 %v409_v38, %v69_v22 }
 0x10c   :  { %v391_v41 = vpop.f32.mrf.mxu0  ;;  %v411_v42 = vpop.f32.mrf.mxu1 }
 0x10d   :  { %518 = vst [vmem:[%s887_s4 + $0x8] sm:$0xff] %v578_v39  ;;  %522 = vst [vmem:[%s887_s4 + $0x28] sm:$0xff] %v582_v40  ;;  %v423_v50 = vadd.f32 %v391_v41, %v62_v25  ;;  %v431_v52 = vadd.f32 %v411_v42, %v70_v26 }
 0x10e   :  { %v393_v53 = vpop.f32.mrf.mxu0  ;;  %v413_v54 = vpop.f32.mrf.mxu1 }
 0x10f   :  { %v579_v55 = vpack.c.bf16 %v423_v50, %v422_v47  ;;  %v583_v56 = vpack.c.bf16 %v431_v52, %v430_v49  ;;  %v424_v51 = vadd.f32 %v393_v53, %v63_v43  ;;  %v432_v58 = vadd.f32 %v413_v54, %v71_v44 }
 0x110   :  { %v395_v57 = vpop.f32.mrf.mxu0  ;;  %v415_v48 = vpop.f32.mrf.mxu1 }
 0x111   :  { %519 = vst [vmem:[%s887_s4 + $0x10] sm:$0xff] %v579_v55  ;;  %523 = vst [vmem:[%s887_s4 + $0x30] sm:$0xff] %v583_v56  ;;  %v425_v59 = vadd.f32 %v395_v57, %v64_v45  ;;  %v433_v60 = vadd.f32 %v415_v48, %v72_v46 }
 0x113   :  { %v580_v61 = vpack.c.bf16 %v425_v59, %v424_v51  ;;  %v584_v62 = vpack.c.bf16 %v433_v60, %v432_v58 }
 0x115   :  { %520 = vst [vmem:[%s887_s4 + $0x18] sm:$0xff] %v580_v61  ;;  %524 = vst [vmem:[%s887_s4 + $0x38] sm:$0xff] %v584_v62 }

// kernel: _lambda_.5
= control target key start
LH: loop header
LB: loop body
LE: loop exit
PB: predicated region body
PF: predicated region fallthrough
CT: control target
= control target key end

     0   :  { %s3349_s12 = smov 0   ;;  %s3351_s13 = smov 0   ;;  %s4622_s0 = inlined_call_operand.vmem [shape: bf16[2,32,10,32], index: 0, kind: input, shape index: {}]   ;;  %s4623_s1 = inlined_call_operand.vmem [shape: bf16[2,32,32], index: 1, kind: input, shape index: {}]   ;;  %s4624_s2 = inlined_call_operand.vmem [shape: bf16[2,32,32], index: 2, kind: input, shape index: {}]   ;;  %s4625_s3 = inlined_call_operand.vmem [shape: bf16[2,32,8,32], index: 3, kind: output, shape index: {}]  }
   0x1   :  { %s3353_s14 = smov 0   ;;  %s3355_s15 = smov 0  }
   0x2   :  { %s3357_s16 = smov 0  }
   0x3 LB: > { %s32_s17 = sadd.s32 1, %s3320_s15  ;;  %p48_p1 = scmp.ne.s32.totalorder %s3312_s13, %s3308_s12  ;;  %s3324_s16 = sphi %s3357_s16, %s13_s16   ;;  %s3320_s15 = sphi %s3355_s15, %s4745_s15   ;;  %s3316_s14 = sphi %s3353_s14, %s4744_s14   ;;  %s3312_s13 = sphi %s3351_s13, %s4743_s13   ;;  %s3308_s12 = sphi %s3349_s12, %s4742_s12  }
   0x4   : > { %p34_p0 = scmp.ge.s32.totalorder %s32_s17, 2  ;;  %p49_p2 = scmp.eq.s32.totalorder %s3324_s16, 0 }
   0x5   : > { %s41_s19 = sadd.s32 1, %s3312_s13  ;;  %p2849_p5 = scmp.ge.s32.totalorder %s3324_s16, 2 }
   0x6   : > { %s4747_s17 = smov (%p34_p0, %s32_s17), 0  ;;  %p50_p3 = por %p49_p2, %p48_p1 }
   0x7   : > { %s36_s18 = ssub.s32 %s3320_s15, %s4747_s17  ;;  %158 = sbr.rel (%p2849_p5) target bundleno = 37 (0x25), region = 16 }
   0x8   : > { %p39_p4 = scmp.eq.s32.totalorder %s36_s18, 0 }
   0xa   : > { %s3384_s20 = scalar_select %p39_p4, %s3312_s13, %s41_s19  }
   0xc   : > { %161 = sbr.rel (!%p50_p3) target bundleno = 37 (0x25), region = 20  ;;  %s163_s21 = sand.u32 (%p50_p3), 1, %s3312_s13  }
   0xd   : > { %s2915_s22 = sshll.u32 (%p50_p3), %s3320_s15, 8  ;;  %s2850_s23 = sshll.u32 (%p50_p3), %s163_s21, 7 }
   0xe   : > { %s3392_s26 = scalar_lea.vmem (%p50_p3), %s4622_s0, %s2915_s22  ;;  %s3396_s27 = scalar_lea.vmem (%p50_p3), [#allocation5], %s2850_s23 }
   0xf   : > { %v188_v0 = vld [vmem:[%s3392_s26] sm:$0xf] (%p50_p3)  ;;  %v190_v1 = vld [vmem:[%s3392_s26 + $0x8] sm:$0xf] (%p50_p3)  ;;  %v192_v2 = vld [vmem:[%s3392_s26 + $0x10] sm:$0xf] (%p50_p3) }
  0x10   : > { %189 = vst [vmem:[%s3396_s27] sm:$0xf] (%p50_p3), %v188_v0  ;;  %191 = vst [vmem:[%s3396_s27 + $0x4] sm:$0xf] (%p50_p3), %v190_v1  ;;  %v194_v3 = vld [vmem:[%s3392_s26 + $0x18] sm:$0xf] (%p50_p3) }
  0x11   : > { %v196_v4 = vld [vmem:[%s3392_s26 + $0x20] sm:$0xf]  ;;  %193 = vst [vmem:[%s3396_s27 + $0x8] sm:$0xf] %v192_v2  ;;  %195 = vst [vmem:[%s3396_s27 + $0xc] sm:$0xf] %v194_v3 }
  0x12   : > { %197 = vst [vmem:[%s3396_s27 + $0x10] sm:$0xf] %v196_v4  ;;  %v198_v5 = vld [vmem:[%s3392_s26 + $0x28] sm:$0xf]  ;;  %v200_v6 = vld [vmem:[%s3392_s26 + $0x30] sm:$0xf] }
  0x13   : > { %v202_v7 = vld [vmem:[%s3392_s26 + $0x38] sm:$0xf]  ;;  %199 = vst [vmem:[%s3396_s27 + $0x14] sm:$0xf] %v198_v5  ;;  %201 = vst [vmem:[%s3396_s27 + $0x18] sm:$0xf] %v200_v6 }
  0x14   : > { %203 = vst [vmem:[%s3396_s27 + $0x1c] sm:$0xf] %v202_v7  ;;  %v204_v8 = vld [vmem:[%s3392_s26 + $0x40] sm:$0xf]  ;;  %v206_v9 = vld [vmem:[%s3392_s26 + $0x48] sm:$0xf] }
  0x15   : > { %v208_v10 = vld [vmem:[%s3392_s26 + $0x50] sm:$0xf]  ;;  %205 = vst [vmem:[%s3396_s27 + $0x20] sm:$0xf] %v204_v8  ;;  %207 = vst [vmem:[%s3396_s27 + $0x24] sm:$0xf] %v206_v9 }
  0x16   : > { %209 = vst [vmem:[%s3396_s27 + $0x28] sm:$0xf] %v208_v10  ;;  %v210_v11 = vld [vmem:[%s3392_s26 + $0x58] sm:$0xf]  ;;  %v212_v12 = vld [vmem:[%s3392_s26 + $0x60] sm:$0xf] }
  0x17   : > { %v214_v13 = vld [vmem:[%s3392_s26 + $0x68] sm:$0xf]  ;;  %211 = vst [vmem:[%s3396_s27 + $0x2c] sm:$0xf] %v210_v11  ;;  %213 = vst [vmem:[%s3396_s27 + $0x30] sm:$0xf] %v212_v12 }
  0x18   : > { %215 = vst [vmem:[%s3396_s27 + $0x34] sm:$0xf] %v214_v13  ;;  %v216_v14 = vld [vmem:[%s3392_s26 + $0x70] sm:$0xf]  ;;  %v218_v15 = vld [vmem:[%s3392_s26 + $0x78] sm:$0xf] }
  0x19   : > { %v220_v16 = vld [vmem:[%s3392_s26 + $0x80] sm:$0xf]  ;;  %217 = vst [vmem:[%s3396_s27 + $0x38] sm:$0xf] %v216_v14  ;;  %219 = vst [vmem:[%s3396_s27 + $0x3c] sm:$0xf] %v218_v15 }
  0x1a   : > { %221 = vst [vmem:[%s3396_s27 + $0x40] sm:$0xf] %v220_v16  ;;  %v222_v17 = vld [vmem:[%s3392_s26 + $0x88] sm:$0xf]  ;;  %v224_v18 = vld [vmem:[%s3392_s26 + $0x90] sm:$0xf] }
  0x1b   : > { %v226_v19 = vld [vmem:[%s3392_s26 + $0x98] sm:$0xf]  ;;  %223 = vst [vmem:[%s3396_s27 + $0x44] sm:$0xf] %v222_v17  ;;  %225 = vst [vmem:[%s3396_s27 + $0x48] sm:$0xf] %v224_v18 }
  0x1c   : > { %227 = vst [vmem:[%s3396_s27 + $0x4c] sm:$0xf] %v226_v19  ;;  %v228_v20 = vld [vmem:[%s3392_s26 + $0xa0] sm:$0xf]  ;;  %v230_v21 = vld [vmem:[%s3392_s26 + $0xa8] sm:$0xf] }
  0x1d   : > { %v232_v22 = vld [vmem:[%s3392_s26 + $0xb0] sm:$0xf]  ;;  %229 = vst [vmem:[%s3396_s27 + $0x50] sm:$0xf] %v228_v20  ;;  %231 = vst [vmem:[%s3396_s27 + $0x54] sm:$0xf] %v230_v21 }
  0x1e   : > { %233 = vst [vmem:[%s3396_s27 + $0x58] sm:$0xf] %v232_v22  ;;  %v234_v23 = vld [vmem:[%s3392_s26 + $0xb8] sm:$0xf]  ;;  %v236_v24 = vld [vmem:[%s3392_s26 + $0xc0] sm:$0xf] }
  0x1f   : > { %v238_v25 = vld [vmem:[%s3392_s26 + $0xc8] sm:$0xf]  ;;  %235 = vst [vmem:[%s3396_s27 + $0x5c] sm:$0xf] %v234_v23  ;;  %237 = vst [vmem:[%s3396_s27 + $0x60] sm:$0xf] %v236_v24 }
  0x20   : > { %239 = vst [vmem:[%s3396_s27 + $0x64] sm:$0xf] %v238_v25  ;;  %v240_v26 = vld [vmem:[%s3392_s26 + $0xd0] sm:$0xf]  ;;  %v242_v27 = vld [vmem:[%s3392_s26 + $0xd8] sm:$0xf] }
  0x21   : > { %v244_v28 = vld [vmem:[%s3392_s26 + $0xe0] sm:$0xf]  ;;  %241 = vst [vmem:[%s3396_s27 + $0x68] sm:$0xf] %v240_v26  ;;  %243 = vst [vmem:[%s3396_s27 + $0x6c] sm:$0xf] %v242_v27 }
  0x22   : > { %245 = vst [vmem:[%s3396_s27 + $0x70] sm:$0xf] %v244_v28  ;;  %v246_v29 = vld [vmem:[%s3392_s26 + $0xe8] sm:$0xf]  ;;  %v248_v30 = vld [vmem:[%s3392_s26 + $0xf0] sm:$0xf] }
  0x23   : > { %v250_v31 = vld [vmem:[%s3392_s26 + $0xf8] sm:$0xf]  ;;  %247 = vst [vmem:[%s3396_s27 + $0x74] sm:$0xf] %v246_v29  ;;  %249 = vst [vmem:[%s3396_s27 + $0x78] sm:$0xf] %v248_v30 }
  0x24   : > { %251 = vst [vmem:[%s3396_s27 + $0x7c] sm:$0xf] %v250_v31 }
  0x25 PF: > { %p2853_p6 = scmp.ge.s32.totalorder %s3324_s16, 1  ;;  %p364_p7 = scmp.lt.s32.totalorder %s3324_s16, 3 }
  0x27   : > { %p365_p8 = pnand %p2853_p6, %p364_p7 }
  0x29   : > { %368 = sbr.rel (%p365_p8) target bundleno = 931 (0x3a3), region = 69 }
  0x2e   : > { %p418_p9 = scmp.lt.s32.totalorder %s3316_s14, 1  ;;  %s371_s28 = sand.u32 1, %s3308_s12   ;;  %vm519_vm0 = vcmask 261120   ;;  %vm454_vm1 = vcmask 7168   ;;  %v3326_v52 = vmov -inf   ;;  %v935_v53 = vlaneseq }
  0x2f   : > { %s2854_s29 = sshll.u32 %s371_s28, 7  ;;  %457 = vst.msk [vmem:[#allocation2 + $0x10] sm:$0xff] %vm454_vm1, %v3326_v52  ;;  %455 = vst.msk [vmem:[#allocation2] sm:$0xff] %vm454_vm1, %v3326_v52  ;;  %v3327_v12 = vmov 0  }
  0x30   : > { %s4749_s14 = smov (!%p418_p9, %s3316_s14), 1  ;;  %s3468_s4 = scalar_lea.vmem [#allocation5], %s2854_s29  ;;  %456 = vst.msk [vmem:[#allocation2 + $0x8] sm:$0xff] %vm454_vm1, %v3326_v52  ;;  %458 = vst.msk [vmem:[#allocation2 + $0x18] sm:$0xff] %vm454_vm1, %v3326_v52  ;;  %v3543_v54 = vand.u32 127, %v935_v53  ;;  %3073 = vset.pattern.permute.xlu1 %v3327_v12  ;;  %3072 = vset.pattern.permute.xlu0 %v3327_v12 }
  0x31   : > { %s2916_s30 = sshll.u32 %s4749_s14, 4  ;;  %v3076_v32 = vld [vmem:[%s3468_s4] sm:$0xff]   ;;  %v3077_v37 = vld [vmem:[%s3468_s4 + $0x8] sm:$0xff]   ;;  %v3078_v38 = vld [vmem:[%s3468_s4 + $0x10] sm:$0xff]   ;;  %459 = vst.msk [vmem:[#allocation2 + $0x20] sm:$0xff] %vm454_vm1, %v3326_v52  ;;  %s2918_s11 = sshll.u32 %s4749_s14, 7 }
  0x32   : > { %s425_s7 = scalar_lea.vmem %s4623_s1, %s2916_s30  ;;  %2959 = vmatprep.mubr.msk.bf16.mxu0 %vm519_vm0, %v3076_v32  ;;  %v3079_v39 = vld [vmem:[%s3468_s4 + $0x18] sm:$0xff]   ;;  %v3080_v40 = vld [vmem:[%s3468_s4 + $0x20] sm:$0xff]   ;;  %v3081_v41 = vld [vmem:[%s3468_s4 + $0x28] sm:$0xff]   ;;  %460 = vst.msk [vmem:[#allocation2 + $0x28] sm:$0xff] %vm454_vm1, %v3326_v52  ;;  %vm941_vm2 = vcmp.le.s32.totalorder %v3543_v54, 2  ;;  %vm939_vm3 = vcmp.le.s32.totalorder %v3543_v54, 0  ;;  %s435_s10 = scalar_lea.vmem %s4624_s2, %s2916_s30 }
  0x33   : > { %v3074_v33 = vld [vmem:[%s425_s7 + $0x8] sm:$0xff]   ;;  %v3075_v34 = vld [vmem:[%s425_s7] sm:$0xff]   ;;  %v3082_v42 = vld [vmem:[%s3468_s4 + $0x30] sm:$0xff]   ;;  %461 = vst.msk [vmem:[#allocation2 + $0x30] sm:$0xff] %vm454_vm1, %v3326_v52  ;;  %vm942_vm4 = vcmp.le.s32.totalorder %v3543_v54, 3  ;;  %vm940_vm5 = vcmp.le.s32.totalorder %v3543_v54, 1  ;;  %s4541_s19 = scalar_lea.vmem %s4625_s3, %s2918_s11 }
  0x34   : > { %3027 = vmatprep.subr.msk.bf16.mxu0 %vm519_vm0, %v3074_v33  ;;  %v740_v35 = vsel %vm519_vm0, %v3074_v33, 0  ;;  %v737_v36 = vsel %vm519_vm0, %v3075_v34, 0  ;;  %v3083_v43 = vld [vmem:[%s3468_s4 + $0x38] sm:$0xff]   ;;  %v3084_v44 = vld [vmem:[%s3468_s4 + $0x40] sm:$0xff]   ;;  %v3085_v45 = vld [vmem:[%s3468_s4 + $0x48] sm:$0xff]   ;;  %462 = vst.msk [vmem:[#allocation2 + $0x38] sm:$0xff] %vm454_vm1, %v3326_v52 }
  0x35   : > { %2956 = vmatpush3.bf16.xpose.msra.mxu0 %v740_v35  ;;  %v3086_v46 = vld [vmem:[%s3468_s4 + $0x50] sm:$0xff]   ;;  %v3087_v47 = vld [vmem:[%s3468_s4 + $0x58] sm:$0xff]   ;;  %v3088_v48 = vld [vmem:[%s3468_s4 + $0x60] sm:$0xff]   ;;  %463 = vst.msk [vmem:[#allocation2 + $0x40] sm:$0xff] %vm454_vm1, %v3326_v52  ;;  %vm945_vm6 = vcmp.le.s32.totalorder %v3543_v54, 6  ;;  %vm943_vm7 = vcmp.le.s32.totalorder %v3543_v54, 4 }
  0x36   : > { %3028 = vmatprep.subr.msk.bf16.mxu0 %vm519_vm0, %v3075_v34  ;;  %v3089_v49 = vld [vmem:[%s3468_s4 + $0x68] sm:$0xff]   ;;  %v3090_v50 = vld [vmem:[%s3468_s4 + $0x70] sm:$0xff]   ;;  %v3091_v51 = vld [vmem:[%s3468_s4 + $0x78] sm:$0xff]   ;;  %464 = vst.msk [vmem:[#allocation2 + $0x48] sm:$0xff] %vm454_vm1, %v3326_v52  ;;  %vm946_vm8 = vcmp.le.s32.totalorder %v3543_v54, 7  ;;  %vm944_vm9 = vcmp.le.s32.totalorder %v3543_v54, 5 }
  0x37   : > { %465 = vst.msk [vmem:[#allocation2 + $0x50] sm:$0xff] %vm454_vm1, %v3326_v52  ;;  %466 = vst.msk [vmem:[#allocation2 + $0x58] sm:$0xff] %vm454_vm1, %v3326_v52  ;;  %vm949_vm10 = vcmp.le.s32.totalorder %v3543_v54, 10  ;;  %vm947_vm11 = vcmp.le.s32.totalorder %v3543_v54, 8  ;;  %vm950_vm12 = vcmp.le.s32.totalorder %v3543_v54, 11  ;;  %vm948_vm13 = vcmp.le.s32.totalorder %v3543_v54, 9 }
  0x38   : > { %467 = vst.msk [vmem:[#allocation2 + $0x60] sm:$0xff] %vm454_vm1, %v3326_v52  ;;  %468 = vst.msk [vmem:[#allocation2 + $0x68] sm:$0xff] %vm454_vm1, %v3326_v52  ;;  %vm953_vm14 = vcmp.le.s32.totalorder %v3543_v54, 14  ;;  %vm951_vm15 = vcmp.le.s32.totalorder %v3543_v54, 12  ;;  %v3328_v32 = vmov 0.0  }
  0x39   : > { %469 = vst.msk [vmem:[#allocation2 + $0x70] sm:$0xff] %vm454_vm1, %v3326_v52  ;;  %470 = vst.msk [vmem:[#allocation2 + $0x78] sm:$0xff] %vm454_vm1, %v3326_v52 }
  0x3a   : > { %471 = vst.msk [vmem:[#allocation2 + $0x80] sm:$0xff] %vm454_vm1, %v3326_v52  ;;  %472 = vst.msk [vmem:[#allocation2 + $0x88] sm:$0xff] %vm454_vm1, %v3326_v52 }
  0x3b   : > { %473 = vst.msk [vmem:[#allocation2 + $0x90] sm:$0xff] %vm454_vm1, %v3326_v52  ;;  %474 = vst.msk [vmem:[#allocation2 + $0x98] sm:$0xff] %vm454_vm1, %v3326_v52 }
  0x3c   : > { %475 = vst.msk [vmem:[#allocation2 + $0xa0] sm:$0xff] %vm454_vm1, %v3326_v52  ;;  %476 = vst.msk [vmem:[#allocation2 + $0xa8] sm:$0xff] %vm454_vm1, %v3326_v52 }
  0x3d   : > { %2958 = vmatpush3.bf16.xpose.msra.mxu0 %v737_v36  ;;  %477 = vst.msk [vmem:[#allocation2 + $0xb0] sm:$0xff] %vm454_vm1, %v3326_v52  ;;  %478 = vst.msk [vmem:[#allocation2 + $0xb8] sm:$0xff] %vm454_vm1, %v3326_v52 }
  0x3e   : > { %479 = vst.msk [vmem:[#allocation2 + $0xc0] sm:$0xff] %vm454_vm1, %v3326_v52  ;;  %480 = vst.msk [vmem:[#allocation2 + $0xc8] sm:$0xff] %vm454_vm1, %v3326_v52 }
  0x3f   : > { %481 = vst.msk [vmem:[#allocation2 + $0xd0] sm:$0xff] %vm454_vm1, %v3326_v52  ;;  %482 = vst.msk [vmem:[#allocation2 + $0xd8] sm:$0xff] %vm454_vm1, %v3326_v52 }
  0x40   : > { %483 = vst.msk [vmem:[#allocation2 + $0xe0] sm:$0xff] %vm454_vm1, %v3326_v52  ;;  %484 = vst.msk [vmem:[#allocation2 + $0xe8] sm:$0xff] %vm454_vm1, %v3326_v52 }
  0x41   : > { %485 = vst.msk [vmem:[#allocation2 + $0xf0] sm:$0xff] %vm454_vm1, %v3326_v52  ;;  %486 = vst.msk [vmem:[#allocation2 + $0xf8] sm:$0xff] %vm454_vm1, %v3326_v52 }
  0x42   : > { %520 = vst.msk [vmem:[#allocation4] sm:$0xff] %vm519_vm0, %v3328_v32  ;;  %521 = vst.msk [vmem:[#allocation4 + $0x8] sm:$0xff] %vm519_vm0, %v3328_v32 }
  0x43   : > { %487 = vst.msk [vmem:[#allocation3] sm:$0xff] %vm454_vm1, %v3328_v32  ;;  %488 = vst.msk [vmem:[#allocation3 + $0x8] sm:$0xff] %vm454_vm1, %v3328_v32 }
  0x44   : > { %2960 = vmatmul.mubr.msk.bf16.vlgmr.msra.gmra.mxu0 %vm519_vm0, %v3077_v37  ;;  %489 = vst.msk [vmem:[#allocation3 + $0x10] sm:$0xff] %vm454_vm1, %v3328_v32  ;;  %490 = vst.msk [vmem:[#allocation3 + $0x18] sm:$0xff] %vm454_vm1, %v3328_v32 }
  0x45   : > { %2963 = vmatprep.mubr.msk.bf16.mxu0 %vm519_vm0, %v3078_v38  ;;  %491 = vst.msk [vmem:[#allocation3 + $0x20] sm:$0xff] %vm454_vm1, %v3328_v32  ;;  %492 = vst.msk [vmem:[#allocation3 + $0x28] sm:$0xff] %vm454_vm1, %v3328_v32 }
  0x46   : > { %493 = vst.msk [vmem:[#allocation3 + $0x30] sm:$0xff] %vm454_vm1, %v3328_v32  ;;  %494 = vst.msk [vmem:[#allocation3 + $0x38] sm:$0xff] %vm454_vm1, %v3328_v32 }
  0x47   : > { %495 = vst.msk [vmem:[#allocation3 + $0x40] sm:$0xff] %vm454_vm1, %v3328_v32  ;;  %496 = vst.msk [vmem:[#allocation3 + $0x48] sm:$0xff] %vm454_vm1, %v3328_v32 }
  0x48   : > { %497 = vst.msk [vmem:[#allocation3 + $0x50] sm:$0xff] %vm454_vm1, %v3328_v32  ;;  %498 = vst.msk [vmem:[#allocation3 + $0x58] sm:$0xff] %vm454_vm1, %v3328_v32 }
  0x49   : > { %499 = vst.msk [vmem:[#allocation3 + $0x60] sm:$0xff] %vm454_vm1, %v3328_v32  ;;  %500 = vst.msk [vmem:[#allocation3 + $0x68] sm:$0xff] %vm454_vm1, %v3328_v32 }
  0x4a   : > { %501 = vst.msk [vmem:[#allocation3 + $0x70] sm:$0xff] %vm454_vm1, %v3328_v32  ;;  %502 = vst.msk [vmem:[#allocation3 + $0x78] sm:$0xff] %vm454_vm1, %v3328_v32 }
  0x4b   : > { %503 = vst.msk [vmem:[#allocation3 + $0x80] sm:$0xff] %vm454_vm1, %v3328_v32  ;;  %504 = vst.msk [vmem:[#allocation3 + $0x88] sm:$0xff] %vm454_vm1, %v3328_v32 }
  0x4c   : > { %2964 = vmatmul.mubr.msk.bf16.gmra.mxu0 %vm519_vm0, %v3079_v39  ;;  %505 = vst.msk [vmem:[#allocation3 + $0x90] sm:$0xff] %vm454_vm1, %v3328_v32  ;;  %506 = vst.msk [vmem:[#allocation3 + $0x98] sm:$0xff] %vm454_vm1, %v3328_v32 }
  0x4d   : > { %2967 = vmatprep.mubr.msk.bf16.mxu0 %vm519_vm0, %v3080_v40  ;;  %507 = vst.msk [vmem:[#allocation3 + $0xa0] sm:$0xff] %vm454_vm1, %v3328_v32  ;;  %508 = vst.msk [vmem:[#allocation3 + $0xa8] sm:$0xff] %vm454_vm1, %v3328_v32 }
  0x4e   : > { %509 = vst.msk [vmem:[#allocation3 + $0xb0] sm:$0xff] %vm454_vm1, %v3328_v32  ;;  %510 = vst.msk [vmem:[#allocation3 + $0xb8] sm:$0xff] %vm454_vm1, %v3328_v32 }
  0x4f   : > { %511 = vst.msk [vmem:[#allocation3 + $0xc0] sm:$0xff] %vm454_vm1, %v3328_v32  ;;  %512 = vst.msk [vmem:[#allocation3 + $0xc8] sm:$0xff] %vm454_vm1, %v3328_v32 }
  0x50   : > { %513 = vst.msk [vmem:[#allocation3 + $0xd0] sm:$0xff] %vm454_vm1, %v3328_v32  ;;  %514 = vst.msk [vmem:[#allocation3 + $0xd8] sm:$0xff] %vm454_vm1, %v3328_v32 }
  0x51   : > { %515 = vst.msk [vmem:[#allocation3 + $0xe0] sm:$0xff] %vm454_vm1, %v3328_v32  ;;  %516 = vst.msk [vmem:[#allocation3 + $0xe8] sm:$0xff] %vm454_vm1, %v3328_v32 }
  0x52   : > { %517 = vst.msk [vmem:[#allocation3 + $0xf0] sm:$0xff] %vm454_vm1, %v3328_v32  ;;  %518 = vst.msk [vmem:[#allocation3 + $0xf8] sm:$0xff] %vm454_vm1, %v3328_v32 }
  0x53   : > { %522 = vst.msk [vmem:[#allocation4 + $0x10] sm:$0xff] %vm519_vm0, %v3328_v32  ;;  %523 = vst.msk [vmem:[#allocation4 + $0x18] sm:$0xff] %vm519_vm0, %v3328_v32 }
  0x54   : > { %2968 = vmatmul.mubr.msk.bf16.gmra.mxu0 %vm519_vm0, %v3081_v41  ;;  %524 = vst.msk [vmem:[#allocation4 + $0x20] sm:$0xff] %vm519_vm0, %v3328_v32  ;;  %525 = vst.msk [vmem:[#allocation4 + $0x28] sm:$0xff] %vm519_vm0, %v3328_v32 }
  0x55   : > { %2971 = vmatprep.mubr.msk.bf16.mxu0 %vm519_vm0, %v3082_v42  ;;  %526 = vst.msk [vmem:[#allocation4 + $0x30] sm:$0xff] %vm519_vm0, %v3328_v32  ;;  %527 = vst.msk [vmem:[#allocation4 + $0x38] sm:$0xff] %vm519_vm0, %v3328_v32 }
  0x56   : > { %528 = vst.msk [vmem:[#allocation4 + $0x40] sm:$0xff] %vm519_vm0, %v3328_v32  ;;  %529 = vst.msk [vmem:[#allocation4 + $0x48] sm:$0xff] %vm519_vm0, %v3328_v32 }
  0x57   : > { %530 = vst.msk [vmem:[#allocation4 + $0x50] sm:$0xff] %vm519_vm0, %v3328_v32  ;;  %531 = vst.msk [vmem:[#allocation4 + $0x58] sm:$0xff] %vm519_vm0, %v3328_v32 }
  0x58   : > { %532 = vst.msk [vmem:[#allocation4 + $0x60] sm:$0xff] %vm519_vm0, %v3328_v32  ;;  %533 = vst.msk [vmem:[#allocation4 + $0x68] sm:$0xff] %vm519_vm0, %v3328_v32 }
  0x59   : > { %534 = vst.msk [vmem:[#allocation4 + $0x70] sm:$0xff] %vm519_vm0, %v3328_v32  ;;  %535 = vst.msk [vmem:[#allocation4 + $0x78] sm:$0xff] %vm519_vm0, %v3328_v32 }
  0x5a   : > { %536 = vst.msk [vmem:[#allocation4 + $0x80] sm:$0xff] %vm519_vm0, %v3328_v32  ;;  %537 = vst.msk [vmem:[#allocation4 + $0x88] sm:$0xff] %vm519_vm0, %v3328_v32 }
  0x5b   : > { %538 = vst.msk [vmem:[#allocation4 + $0x90] sm:$0xff] %vm519_vm0, %v3328_v32  ;;  %539 = vst.msk [vmem:[#allocation4 + $0x98] sm:$0xff] %vm519_vm0, %v3328_v32 }
  0x5c   : > { %2972 = vmatmul.mubr.msk.bf16.gmra.mxu0 %vm519_vm0, %v3083_v43  ;;  %540 = vst.msk [vmem:[#allocation4 + $0xa0] sm:$0xff] %vm519_vm0, %v3328_v32  ;;  %541 = vst.msk [vmem:[#allocation4 + $0xa8] sm:$0xff] %vm519_vm0, %v3328_v32 }
  0x5d   : > { %2975 = vmatprep.mubr.msk.bf16.mxu0 %vm519_vm0, %v3084_v44  ;;  %542 = vst.msk [vmem:[#allocation4 + $0xb0] sm:$0xff] %vm519_vm0, %v3328_v32  ;;  %543 = vst.msk [vmem:[#allocation4 + $0xb8] sm:$0xff] %vm519_vm0, %v3328_v32 }
  0x5e   : > { %544 = vst.msk [vmem:[#allocation4 + $0xc0] sm:$0xff] %vm519_vm0, %v3328_v32  ;;  %545 = vst.msk [vmem:[#allocation4 + $0xc8] sm:$0xff] %vm519_vm0, %v3328_v32 }
  0x5f   : > { %546 = vst.msk [vmem:[#allocation4 + $0xd0] sm:$0xff] %vm519_vm0, %v3328_v32  ;;  %547 = vst.msk [vmem:[#allocation4 + $0xd8] sm:$0xff] %vm519_vm0, %v3328_v32 }
  0x60   : > { %548 = vst.msk [vmem:[#allocation4 + $0xe0] sm:$0xff] %vm519_vm0, %v3328_v32  ;;  %549 = vst.msk [vmem:[#allocation4 + $0xe8] sm:$0xff] %vm519_vm0, %v3328_v32 }
  0x61   : > { %550 = vst.msk [vmem:[#allocation4 + $0xf0] sm:$0xff] %vm519_vm0, %v3328_v32  ;;  %551 = vst.msk [vmem:[#allocation4 + $0xf8] sm:$0xff] %vm519_vm0, %v3328_v32 }
  0x64   : > { %2976 = vmatmul.mubr.msk.bf16.gmra.mxu0 %vm519_vm0, %v3085_v45 }
  0x65   : > { %2979 = vmatprep.mubr.msk.bf16.mxu0 %vm519_vm0, %v3086_v46 }
  0x6c   : > { %2980 = vmatmul.mubr.msk.bf16.gmra.mxu0 %vm519_vm0, %v3087_v47 }
  0x6d   : > { %2983 = vmatprep.mubr.msk.bf16.mxu0 %vm519_vm0, %v3088_v48 }
  0x74   : > { %2984 = vmatmul.mubr.msk.bf16.gmra.mxu0 %vm519_vm0, %v3089_v49 }
  0x75   : > { %2987 = vmatprep.mubr.msk.bf16.mxu0 %vm519_vm0, %v3090_v50 }
  0x7c   : > { %2988 = vmatmul.mubr.msk.bf16.gmra.mxu0 %vm519_vm0, %v3091_v51 }
 0x104   : > { %v2961_v55 = vpop.f32.mrf.mxu0 }
 0x105   : > { %v3547_v56 = vsel %vm941_vm2, %v2961_v55, -1e+30  ;;  %vm954_vm2 = vcmp.le.s32.totalorder %v3543_v54, 15 }
 0x106   : > { %4658 = vst [vmem:[#allocation6_spill] sm:$0xff] %v3547_v56  ;;  %v776_v57 = vpop.f32.mrf.mxu0  ;;  %v1105_v58 = vsel %vm519_vm0, %v3547_v56, -inf }
 0x107   : > { %v3552_v59 = vsel %vm939_vm3, %v776_v57, -1e+30  ;;  %1106 = vmax.xlane.f32.xlu1 %v1105_v58  ;;  %vm952_vm3 = vcmp.le.s32.totalorder %v3543_v54, 13 }
 0x108   : > { %v2962_v60 = vpop.f32.mrf.mxu0  ;;  %v1099_v61 = vsel %vm519_vm0, %v3552_v59, -inf }
 0x109   : > { %v3557_v62 = vsel %vm942_vm4, %v2962_v60, -1e+30  ;;  %1100 = vmax.xlane.f32.xlu0 %v1099_v61  ;;  %vm957_vm4 = vcmp.le.s32.totalorder %v3543_v54, 18 }
 0x10a   : > { %v779_v63 = vpop.f32.mrf.mxu0  ;;  %v1108_v0 = vsel %vm519_vm0, %v3557_v62, -inf }
 0x10b   : > { %v3562_v1 = vsel %vm940_vm5, %v779_v63, -1e+30  ;;  %1109 = vmax.xlane.f32.xlu1 %v1108_v0  ;;  %vm955_vm5 = vcmp.le.s32.totalorder %v3543_v54, 16 }
 0x10c   : > { %4659 = vst [vmem:[#allocation7_spill] sm:$0xff] %v3562_v1  ;;  %v2965_v2 = vpop.f32.mrf.mxu0  ;;  %v1102_v3 = vsel %vm519_vm0, %v3562_v1, -inf  ;;  %v4085_v1 = vld [vmem:[#allocation2 + $0xe8] sm:$0xff] }
 0x10d   : > { %v3566_v4 = vsel %vm945_vm6, %v2965_v2, -1e+30  ;;  %1103 = vmax.xlane.f32.xlu0 %v1102_v3  ;;  %vm958_vm6 = vcmp.le.s32.totalorder %v3543_v54, 19 }
 0x10e   : > { %4660 = vst [vmem:[#allocation8_spill] sm:$0xff] %v3566_v4  ;;  %v792_v5 = vpop.f32.mrf.mxu0  ;;  %v1117_v6 = vsel %vm519_vm0, %v3566_v4, -inf }
 0x10f   : > { %v3573_v8 = vsel %vm943_vm7, %v792_v5, -1e+30  ;;  %vm956_vm7 = vcmp.le.s32.totalorder %v3543_v54, 17 }
 0x110   : > { %v2966_v7 = vpop.f32.mrf.mxu0  ;;  %4661 = vst [vmem:[#allocation9_spill] sm:$0xff] %v3573_v8  ;;  %v1111_v15 = vsel %vm519_vm0, %v3573_v8, -inf }
 0x111   : > { %v3575_v9 = vsel %vm946_vm8, %v2966_v7, -1e+30  ;;  %1118 = vmax.xlane.f32.xlu0 %v1117_v6  ;;  %vm961_vm8 = vcmp.le.s32.totalorder %v3543_v54, 22 }
 0x112   : > { %4662 = vst [vmem:[#allocation10_spill] sm:$0xff] %v3575_v9  ;;  %v795_v10 = vpop.f32.mrf.mxu0  ;;  %v1120_v11 = vsel %vm519_vm0, %v3575_v9, -inf }
 0x113   : > { %v3580_v13 = vsel %vm944_vm9, %v795_v10, -1e+30  ;;  %1121 = vmax.xlane.f32.xlu1 %v1120_v11  ;;  %vm959_vm9 = vcmp.le.s32.totalorder %v3543_v54, 20 }
 0x114   : > { %4663 = vst [vmem:[#allocation11_spill] sm:$0xff] %v3580_v13  ;;  %v2969_v14 = vpop.f32.mrf.mxu0  ;;  %v1114_v18 = vsel %vm519_vm0, %v3580_v13, -inf  ;;  %v4065_v13 = vld [vmem:[#allocation2 + $0xf8] sm:$0xff] }
 0x115   : > { %v3585_v16 = vsel %vm949_vm10, %v2969_v14, -1e+30  ;;  %1112 = vmax.xlane.f32.xlu0 %v1111_v15  ;;  %vm962_vm10 = vcmp.le.s32.totalorder %v3543_v54, 23 }
 0x116   : > { %4664 = vst [vmem:[#allocation12_spill] sm:$0xff] %v3585_v16  ;;  %v808_v17 = vpop.f32.mrf.mxu0  ;;  %v1129_v19 = vsel %vm519_vm0, %v3585_v16, -inf }
 0x117   : > { %v3592_v20 = vsel %vm947_vm11, %v808_v17, -1e+30  ;;  %1115 = vmax.xlane.f32.xlu1 %v1114_v18  ;;  %vm960_vm11 = vcmp.le.s32.totalorder %v3543_v54, 21 }
 0x118   : > { %4665 = vst [vmem:[#allocation13_spill] sm:$0xff] %v3592_v20  ;;  %v2970_v21 = vpop.f32.mrf.mxu0  ;;  %v1123_v25 = vsel %vm519_vm0, %v3592_v20, -inf  ;;  %v4047_v20 = vld [vmem:[#allocation2 + $0xc8] sm:$0xff] }
 0x119   : > { %v3595_v22 = vsel %vm950_vm12, %v2970_v21, -1e+30  ;;  %1130 = vmax.xlane.f32.xlu0 %v1129_v19  ;;  %vm965_vm12 = vcmp.le.s32.totalorder %v3543_v54, 26 }
 0x11a   : > { %4666 = vst [vmem:[#allocation14_spill] sm:$0xff] %v3595_v22  ;;  %v1132_v23 = vsel %vm519_vm0, %v3595_v22, -inf  ;;  %v811_v24 = vpop.f32.mrf.mxu0 }
 0x11b   : > { %1133 = vmax.xlane.f32.xlu1 %v1132_v23  ;;  %v3602_v26 = vsel %vm948_vm13, %v811_v24, -1e+30  ;;  %vm963_vm13 = vcmp.le.s32.totalorder %v3543_v54, 24 }
 0x11c   : > { %4667 = vst [vmem:[#allocation15_spill] sm:$0xff] %v3602_v26  ;;  %v2973_v27 = vpop.f32.mrf.mxu0  ;;  %v3607_v28 = vsel %vm519_vm0, %v3602_v26, -inf }
 0x11d   : > { %v3609_v29 = vsel %vm953_vm14, %v2973_v27, -1e+30  ;;  %1124 = vmax.xlane.f32.xlu0 %v1123_v25  ;;  %vm966_vm14 = vcmp.le.s32.totalorder %v3543_v54, 27 }
 0x11e   : > { %4668 = vst [vmem:[#allocation16_spill] sm:$0xff] %v3609_v29  ;;  %v3611_v30 = vpop.f32.mrf.mxu0  ;;  %v3616_v31 = vsel %vm519_vm0, %v3609_v29, -inf }
 0x11f   : > { %v3749_v33 = vsel %vm951_vm15, %v3611_v30, -1e+30  ;;  %1127 = vmax.xlane.f32.xlu1 %v3607_v28  ;;  %vm964_vm15 = vcmp.le.s32.totalorder %v3543_v54, 25 }
 0x120   : > { %4669 = vst [vmem:[#allocation17_spill] sm:$0xff] %v3749_v33  ;;  %v2974_v34 = vpop.f32.mrf.mxu0  ;;  %v1135_v38 = vsel %vm519_vm0, %v3749_v33, -inf }
 0x121   : > { %v3755_v35 = vsel %vm954_vm2, %v2974_v34, -1e+30  ;;  %1142 = vmax.xlane.f32.xlu0 %v3616_v31  ;;  %vm969_vm2 = vcmp.le.s32.totalorder %v3543_v54, 30 }
 0x122   : > { %4670 = vst [vmem:[#allocation18_spill] sm:$0xff] %v3755_v35  ;;  %v827_v36 = vpop.f32.mrf.mxu0  ;;  %v1144_v37 = vsel %vm519_vm0, %v3755_v35, -inf }
 0x123   : > { %v3763_v39 = vsel %vm952_vm3, %v827_v36, -1e+30  ;;  %1145 = vmax.xlane.f32.xlu1 %v1144_v37  ;;  %vm967_vm3 = vcmp.le.s32.totalorder %v3543_v54, 28 }
 0x124   : > { %4671 = vst [vmem:[#allocation19_spill] sm:$0xff] %v3763_v39  ;;  %v2977_v40 = vpop.f32.mrf.mxu0  ;;  %v1138_v41 = vsel %vm519_vm0, %v3763_v39, -inf  ;;  %v4038_v39 = vld [vmem:[#allocation2 + $0xc0] sm:$0xff] }
 0x125   : > { %v3768_v42 = vsel %vm957_vm4, %v2977_v40, -1e+30  ;;  %1136 = vmax.xlane.f32.xlu0 %v1135_v38  ;;  %vm970_vm4 = vcmp.le.s32.totalorder %v3543_v54, 31 }
 0x126   : > { %4672 = vst [vmem:[#allocation20_spill] sm:$0xff] %v3768_v42  ;;  %v840_v43 = vpop.f32.mrf.mxu0  ;;  %v1153_v44 = vsel %vm519_vm0, %v3768_v42, -inf  ;;  %v4022_v42 = vld [vmem:[#allocation2 + $0xd0] sm:$0xff] }
 0x127   : > { %v3773_v45 = vsel %vm955_vm5, %v840_v43, -1e+30  ;;  %1139 = vmax.xlane.f32.xlu1 %v1138_v41  ;;  %vm968_vm5 = vcmp.le.s32.totalorder %v3543_v54, 29  ;;  %v3846_v43 = vld [vmem:[#allocation2 + $0x10] sm:$0xff] }
 0x128   : > { %4673 = vst [vmem:[#allocation21_spill] sm:$0xff] %v3773_v45  ;;  %v2978_v46 = vpop.f32.mrf.mxu0  ;;  %v1147_v50 = vsel %vm519_vm0, %v3773_v45, -inf  ;;  %v4013_v45 = vld [vmem:[#allocation2 + $0xa8] sm:$0xff] }
 0x129   : > { %v3776_v47 = vsel %vm958_vm6, %v2978_v46, -1e+30  ;;  %1154 = vmax.xlane.f32.xlu0 %v1153_v44  ;;  %v1067_v44 = vld [vmem:[#allocation2] sm:$0xff] }
 0x12a   : > { %4674 = vst [vmem:[#allocation22_spill] sm:$0xff] %v3776_v47  ;;  %v843_v48 = vpop.f32.mrf.mxu0  ;;  %v1156_v49 = vsel %vm519_vm0, %v3776_v47, -inf }
 0x12b   : > { %v3783_v51 = vsel %vm956_vm7, %v843_v48, -1e+30  ;;  %1157 = vmax.xlane.f32.xlu1 %v1156_v49  ;;  %v3851_v49 = vld [vmem:[#allocation2 + $0x18] sm:$0xff] }
 0x12c   : > { %4675 = vst [vmem:[#allocation23_spill] sm:$0xff] %v3783_v51  ;;  %v2981_v52 = vpop.f32.mrf.mxu0  ;;  %v1150_v53 = vsel %vm519_vm0, %v3783_v51, -inf  ;;  %v4029_v51 = vld [vmem:[#allocation2 + $0xd8] sm:$0xff] }
 0x12d   : > { %v3788_v55 = vsel %vm961_vm8, %v2981_v52, -1e+30  ;;  %1148 = vmax.xlane.f32.xlu0 %v1147_v50 }
 0x12e   : > { %4676 = vst [vmem:[#allocation24_spill] sm:$0xff] %v3788_v55  ;;  %v856_v57 = vpop.f32.mrf.mxu0  ;;  %v1165_v58 = vsel %vm519_vm0, %v3788_v55, -inf  ;;  %v4006_v55 = vld [vmem:[#allocation2 + $0xa0] sm:$0xff] }
 0x12f   : > { %v3793_v60 = vsel %vm959_vm9, %v856_v57, -1e+30  ;;  %1151 = vmax.xlane.f32.xlu1 %v1150_v53  ;;  %v1068_v53 = vld [vmem:[#allocation2 + $0x8] sm:$0xff] }
 0x130   : > { %4677 = vst [vmem:[#allocation25_spill] sm:$0xff] %v3793_v60  ;;  %v2982_v61 = vpop.f32.mrf.mxu0  ;;  %v1159_v3 = vsel %vm519_vm0, %v3793_v60, -inf  ;;  %v3997_v60 = vld [vmem:[#allocation2 + $0xb8] sm:$0xff] }
 0x131   : > { %v3796_v63 = vsel %vm962_vm10, %v2982_v61, -1e+30  ;;  %1166 = vmax.xlane.f32.xlu0 %v1165_v58 }
 0x132   : > { %4678 = vst [vmem:[#allocation26_spill] sm:$0xff] %v3796_v63  ;;  %v859_v0 = vpop.f32.mrf.mxu0  ;;  %v1168_v2 = vsel %vm519_vm0, %v3796_v63, -inf }
 0x133   : > { %v3803_v5 = vsel %vm960_vm11, %v859_v0, -1e+30  ;;  %1169 = vmax.xlane.f32.xlu1 %v1168_v2  ;;  %v3863_v2 = vld [vmem:[#allocation2 + $0x30] sm:$0xff] }
 0x134   : > { %4679 = vst [vmem:[#allocation27_spill] sm:$0xff] %v3803_v5  ;;  %v2985_v6 = vpop.f32.mrf.mxu0  ;;  %v1162_v7 = vsel %vm519_vm0, %v3803_v5, -inf }
 0x135   : > { %v3808_v10 = vsel %vm965_vm12, %v2985_v6, -1e+30  ;;  %1160 = vmax.xlane.f32.xlu0 %v1159_v3 }
 0x136   : > { %4680 = vst [vmem:[#allocation28_spill] sm:$0xff] %v3808_v10  ;;  %v872_v11 = vpop.f32.mrf.mxu0  ;;  %v1177_v12 = vsel %vm519_vm0, %v3808_v10, -inf  ;;  %v3988_v10 = vld [vmem:[#allocation2 + $0xb0] sm:$0xff] }
 0x137   : > { %v3813_v14 = vsel %vm963_vm13, %v872_v11, -1e+30  ;;  %1163 = vmax.xlane.f32.xlu1 %v1162_v7  ;;  %v3866_v7 = vld [vmem:[#allocation2 + $0x38] sm:$0xff] }
 0x138   : > { %4681 = vst [vmem:[#allocation29_spill] sm:$0xff] %v3813_v14  ;;  %v2986_v15 = vpop.f32.mrf.mxu0  ;;  %v1171_v21 = vsel %vm519_vm0, %v3813_v14, -inf }
 0x139   : > { %v3816_v17 = vsel %vm966_vm14, %v2986_v15, -1e+30  ;;  %1178 = vmax.xlane.f32.xlu0 %v1177_v12  ;;  %v3871_v15 = vld [vmem:[#allocation2 + $0x20] sm:$0xff] }
 0x13a   : > { %4682 = vst [vmem:[#allocation30_spill] sm:$0xff] %v3816_v17  ;;  %v875_v18 = vpop.f32.mrf.mxu0  ;;  %v1180_v19 = vsel %vm519_vm0, %v3816_v17, -inf }
 0x13b   : > { %v3823_v23 = vsel %vm964_vm15, %v875_v18, -1e+30  ;;  %1181 = vmax.xlane.f32.xlu1 %v1180_v19 }
 0x13c   : > { %4683 = vst [vmem:[#allocation31_spill] sm:$0xff] %v3823_v23  ;;  %v2989_v24 = vpop.f32.mrf.mxu0  ;;  %v1174_v25 = vsel %vm519_vm0, %v3823_v23, -inf }
 0x13d   : > { %v3828_v27 = vsel %vm969_vm2, %v2989_v24, -1e+30  ;;  %1172 = vmax.xlane.f32.xlu0 %v1171_v21  ;;  %v3878_v21 = vld [vmem:[#allocation2 + $0x28] sm:$0xff] }
 0x13e   : > { %4684 = vst [vmem:[#allocation32_spill] sm:$0xff] %v3828_v27  ;;  %v888_v28 = vpop.f32.mrf.mxu0  ;;  %v1189_v30 = vsel %vm519_vm0, %v3828_v27, -inf  ;;  %v3972_v27 = vld [vmem:[#allocation2 + $0x80] sm:$0xff] }
 0x13f   : > { %v3833_v31 = vsel %vm967_vm3, %v888_v28, -1e+30  ;;  %1175 = vmax.xlane.f32.xlu1 %v1174_v25  ;;  %v3886_v28 = vld [vmem:[#allocation2 + $0x50] sm:$0xff] }
 0x140   : > { %4685 = vst [vmem:[#allocation33_spill] sm:$0xff] %v3833_v31  ;;  %v2990_v32 = vpop.f32.mrf.mxu0  ;;  %v1183_v38 = vsel %vm519_vm0, %v3833_v31, -inf }
 0x141   : > { %v3836_v34 = vsel %vm970_vm4, %v2990_v32, -1e+30  ;;  %1190 = vmax.xlane.f32.xlu0 %v1189_v30  ;;  %v3893_v32 = vld [vmem:[#allocation2 + $0x58] sm:$0xff] }
 0x142   : > { %4686 = vst [vmem:[#allocation34_spill] sm:$0xff] %v3836_v34  ;;  %v1192_v36 = vsel %vm519_vm0, %v3836_v34, -inf  ;;  %v891_v37 = vpop.f32.mrf.mxu0 }
 0x143   : > { %1193 = vmax.xlane.f32.xlu1 %v1192_v36  ;;  %v3842_v40 = vsel %vm968_vm5, %v891_v37, -1e+30 }
 0x144   : > { %4687 = vst [vmem:[#allocation35_spill] sm:$0xff] %v3842_v40  ;;  %v1186_v41 = vsel %vm519_vm0, %v3842_v40, -inf }
 0x145   : > { %1184 = vmax.xlane.f32.xlu0 %v1183_v38  ;;  %v3906_v38 = vld [vmem:[#allocation2 + $0x40] sm:$0xff] }
 0x147   : > { %1187 = vmax.xlane.f32.xlu1 %v1186_v41 }
 0x190   : > { %v1107_v54 = vpop.xlane.xlu1 %1106 }
 0x191   : > { %v3849_v46 = vmax.f32 %v3846_v43, %v1107_v54  ;;  %v3092_v54 = vld [vmem:[%s435_s10 + $0x8] sm:$0xff]  }
 0x192   : > { %v1101_v48 = vpop.xlane.xlu0 %1100  ;;  %2991 = vmatprep.subr.bf16.mxu1 %v3092_v54 }
 0x193   : > { %2331 = vst.msk [vmem:[#allocation2 + $0x10] sm:$0xff] %vm454_vm1, %v3849_v46  ;;  %v1195_v50 = vmax.f32 %v1067_v44, %v1101_v48  ;;  %1335 = vperm.xlu1 %3073, %v3849_v46   ;;  %2992 = vmatpush3.bf16.msra.mxu1 %v3092_v54  ;;  %v3940_v54 = vld [vmem:[#allocation2 + $0x60] sm:$0xff] }
 0x194   : > { %v1110_v52 = vpop.xlane.xlu1 %1109 }
 0x195   : > { %v1227_v57 = vsub.f32 %v1067_v44, %v1195_v50  ;;  %2329 = vst.msk [vmem:[#allocation2] sm:$0xff] %vm454_vm1, %v1195_v50  ;;  %v3858_v58 = vmax.f32 %v3851_v49, %v1110_v52  ;;  %1325 = vperm.xlu0 %3072, %v1195_v50   ;;  %v3913_v52 = vld [vmem:[#allocation2 + $0x48] sm:$0xff] }
 0x196   : > { %v1104_v61 = vpop.xlane.xlu0 %1103 }
 0x197   : > { %2332 = vst.msk [vmem:[#allocation2 + $0x18] sm:$0xff] %vm454_vm1, %v3858_v58  ;;  %v1196_v0 = vmax.f32 %v1068_v53, %v1104_v61  ;;  %1340 = vperm.xlu1 %3073, %v3858_v58   ;;  %v1259_v3 = vmul.f32 1.442695, %v1227_v57 }
 0x199   : > { %2330 = vst.msk [vmem:[#allocation2 + $0x8] sm:$0xff] %vm454_vm1, %v1196_v0  ;;  %3094 = vpow2.f32 %v1259_v3  ;;  %v1228_v44 = vsub.f32 %v1068_v53, %v1196_v0  ;;  %v3093_v53 = vld [vmem:[%s435_s10] sm:$0xff]  }
 0x19a   : > { %v1119_v6 = vpop.xlane.xlu0 %1118  ;;  %2993 = vmatprep.subr.bf16.mxu1 %v3093_v53 }
 0x19b   : > { %v3869_v11 = vmax.f32 %v3863_v2, %v1119_v6  ;;  %1330 = vperm.xlu1 %3073, %v1196_v0   ;;  %v3922_v0 = vld [vmem:[#allocation2 + $0x70] sm:$0xff]  ;;  %v1261_v3 = vmul.f32 1.442695, %v1228_v44  ;;  %2994 = vmatpush3.bf16.msra.mxu1 %v3093_v53 }
 0x19c   : > { %v1122_v12 = vpop.xlane.xlu1 %1121 }
 0x19d   : > { %2335 = vst.msk [vmem:[#allocation2 + $0x30] sm:$0xff] %vm454_vm1, %v3869_v11  ;;  %v3876_v18 = vmax.f32 %v3866_v7, %v1122_v12  ;;  %3096 = vpow2.f32 %v1261_v3  ;;  %v3956_v3 = vld [vmem:[#allocation2 + $0x90] sm:$0xff] }
 0x19e   : > { %v1113_v19 = vpop.xlane.xlu0 %1112 }
 0x19f   : > { %2336 = vst.msk [vmem:[#allocation2 + $0x38] sm:$0xff] %vm454_vm1, %v3876_v18  ;;  %v3883_v24 = vmax.f32 %v3871_v15, %v1113_v19  ;;  %1355 = vperm.xlu1 %3073, %v3869_v11  }
 0x1a0   : > { %v1116_v25 = vpop.xlane.xlu1 %1115 }
 0x1a1   : > { %2333 = vst.msk [vmem:[#allocation2 + $0x20] sm:$0xff] %vm454_vm1, %v3883_v24  ;;  %v3891_v30 = vmax.f32 %v3878_v21, %v1116_v25  ;;  %v3931_v25 = vld [vmem:[#allocation2 + $0x78] sm:$0xff] }
 0x1a2   : > { %v1131_v36 = vpop.xlane.xlu0 %1130 }
 0x1a3   : > { %2334 = vst.msk [vmem:[#allocation2 + $0x28] sm:$0xff] %vm454_vm1, %v3891_v30  ;;  %1345 = vperm.xlu1 %3073, %v3883_v24   ;;  %v3904_v37 = vmax.f32 %v3886_v28, %v1131_v36  ;;  %v1232_v16 = vsub.f32 %v3878_v21, %v3891_v30  ;;  %v1229_v21 = vsub.f32 %v3846_v43, %v3849_v46 }
 0x1a4   : > { %v1134_v41 = vpop.xlane.xlu1 %1133 }
 0x1a5   : > { %v3909_v48 = vmax.f32 %v3893_v32, %v1134_v41  ;;  %2339 = vst.msk [vmem:[#allocation2 + $0x50] sm:$0xff] %vm454_vm1, %v3904_v37  ;;  %v1269_v8 = vmul.f32 1.442695, %v1232_v16  ;;  %v1263_v46 = vmul.f32 1.442695, %v1229_v21 }
 0x1a6   : > { %v1125_v50 = vpop.xlane.xlu0 %1124  ;;  %v3929_v12 = vpop.eup %3094 }
 0x1a7   : > { %2340 = vst.msk [vmem:[#allocation2 + $0x58] sm:$0xff] %vm454_vm1, %v3909_v48  ;;  %1380 = vperm.xlu0 %3072, %v3909_v48   ;;  %1360 = vperm.xlu1 %3073, %v3876_v18   ;;  %v3920_v57 = vmax.f32 %v3906_v38, %v1125_v50  ;;  %4688 = vst [vmem:[#allocation36_spill] sm:$0xff] %v3929_v12 }
 0x1a8   : > { %v1128_v61 = vpop.xlane.xlu1 %1127 }
 0x1a9   : > { %2337 = vst.msk [vmem:[#allocation2 + $0x40] sm:$0xff] %vm454_vm1, %v3920_v57  ;;  %v3927_v6 = vmax.f32 %v3913_v52, %v1128_v61  ;;  %v3947_v61 = vld [vmem:[#allocation2 + $0x68] sm:$0xff]  ;;  %v1235_v21 = vsub.f32 %v3906_v38, %v3920_v57 }
 0x1aa   : > { %v1143_v19 = vpop.xlane.xlu0 %1142  ;;  %v3995_v23 = vpop.eup %3096 }
 0x1ab   : > { %2075 = vperm.xlu0 %3072, %v3929_v12   ;;  %1350 = vperm.xlu1 %3073, %v3891_v30   ;;  %2338 = vst.msk [vmem:[#allocation2 + $0x48] sm:$0xff] %vm454_vm1, %v3927_v6  ;;  %v3938_v36 = vmax.f32 %v3922_v0, %v1143_v19  ;;  %v3963_v12 = vld [vmem:[#allocation2 + $0x98] sm:$0xff]  ;;  %4689 = vst [vmem:[#allocation37_spill] sm:$0xff] %v3995_v23 }
 0x1ac   : > { %v1146_v41 = vpop.xlane.xlu1 %1145 }
 0x1ad   : > { %2343 = vst.msk [vmem:[#allocation2 + $0x70] sm:$0xff] %vm454_vm1, %v3938_v36  ;;  %v3945_v44 = vmax.f32 %v3931_v25, %v1146_v41 }
 0x1ae   : > { %v1137_v50 = vpop.xlane.xlu0 %1136 }
 0x1af   : > { %1370 = vperm.xlu0 %3072, %v3927_v6   ;;  %1375 = vperm.xlu1 %3073, %v3904_v37   ;;  %2344 = vst.msk [vmem:[#allocation2 + $0x78] sm:$0xff] %vm454_vm1, %v3945_v44  ;;  %v3954_v19 = vmax.f32 %v3940_v54, %v1137_v50  ;;  %v1242_v38 = vsub.f32 %v3931_v25, %v3945_v44 }
 0x1b0   : > { %v1140_v53 = vpop.xlane.xlu1 %1139 }
 0x1b1   : > { %2341 = vst.msk [vmem:[#allocation2 + $0x60] sm:$0xff] %vm454_vm1, %v3954_v19  ;;  %v3961_v41 = vmax.f32 %v3947_v61, %v1140_v53  ;;  %v3979_v53 = vld [vmem:[#allocation2 + $0x88] sm:$0xff] }
 0x1b2   : > { %v1155_v31 = vpop.xlane.xlu0 %1154 }
 0x1b3   : > { %1400 = vperm.xlu0 %3072, %v3945_v44   ;;  %1365 = vperm.xlu1 %3073, %v3920_v57   ;;  %2342 = vst.msk [vmem:[#allocation2 + $0x68] sm:$0xff] %vm454_vm1, %v3961_v41  ;;  %v3970_v50 = vmax.f32 %v3956_v3, %v1155_v31  ;;  %v1241_v44 = vsub.f32 %v3922_v0, %v3938_v36 }
 0x1b4   : > { %v1158_v34 = vpop.xlane.xlu1 %1157 }
 0x1b5   : > { %v3975_v40 = vmax.f32 %v3963_v12, %v1158_v34  ;;  %2347 = vst.msk [vmem:[#allocation2 + $0x90] sm:$0xff] %vm454_vm1, %v3970_v50 }
 0x1b6   : > { %v1149_v14 = vpop.xlane.xlu0 %1148 }
 0x1b7   : > { %1390 = vperm.xlu0 %3072, %v3961_v41   ;;  %1395 = vperm.xlu1 %3073, %v3938_v36   ;;  %2348 = vst.msk [vmem:[#allocation2 + $0x98] sm:$0xff] %vm454_vm1, %v3975_v40  ;;  %v3986_v31 = vmax.f32 %v3972_v27, %v1149_v14 }
 0x1b8   : > { %v1152_v17 = vpop.xlane.xlu1 %1151 }
 0x1b9   : > { %v3991_v34 = vmax.f32 %v3979_v53, %v1152_v17  ;;  %2345 = vst.msk [vmem:[#allocation2 + $0x80] sm:$0xff] %vm454_vm1, %v3986_v31 }
 0x1ba   : > { %v1167_v63 = vpop.xlane.xlu0 %1166 }
 0x1bb   : > { %1420 = vperm.xlu0 %3072, %v3975_v40   ;;  %2080 = vperm.xlu1 %3073, %v3995_v23   ;;  %2346 = vst.msk [vmem:[#allocation2 + $0x88] sm:$0xff] %vm454_vm1, %v3991_v34  ;;  %v4004_v14 = vmax.f32 %v3988_v10, %v1167_v63 }
 0x1bc   : > { %v1170_v17 = vpop.xlane.xlu1 %1169 }
 0x1bd   : > { %v4009_v5 = vmax.f32 %v3997_v60, %v1170_v17  ;;  %2351 = vst.msk [vmem:[#allocation2 + $0xb0] sm:$0xff] %vm454_vm1, %v4004_v14 }
 0x1be   : > { %v1161_v47 = vpop.xlane.xlu0 %1160 }
 0x1bf   : > { %1410 = vperm.xlu0 %3072, %v3991_v34   ;;  %1385 = vperm.xlu1 %3073, %v3954_v19   ;;  %2352 = vst.msk [vmem:[#allocation2 + $0xb8] sm:$0xff] %vm454_vm1, %v4009_v5  ;;  %v4020_v63 = vmax.f32 %v4006_v55, %v1161_v47 }
 0x1c0   : > { %v1164_v23 = vpop.xlane.xlu1 %1163 }
 0x1c1   : > { %v4025_v17 = vmax.f32 %v4013_v45, %v1164_v23  ;;  %2349 = vst.msk [vmem:[#allocation2 + $0xa0] sm:$0xff] %vm454_vm1, %v4020_v63  ;;  %v1230_v23 = vsub.f32 %v3851_v49, %v3858_v58  ;;  %v4056_v58 = vld [vmem:[#allocation2 + $0xf0] sm:$0xff] }
 0x1c2   : > { %v1179_v33 = vpop.xlane.xlu0 %1178 }
 0x1c3   : > { %1440 = vperm.xlu0 %3072, %v4009_v5   ;;  %1415 = vperm.xlu1 %3073, %v3970_v50   ;;  %2350 = vst.msk [vmem:[#allocation2 + $0xa8] sm:$0xff] %vm454_vm1, %v4025_v17  ;;  %v4036_v47 = vmax.f32 %v4022_v42, %v1179_v33 }
 0x1c4   : > { %v1182_v35 = vpop.xlane.xlu1 %1181 }
 0x1c5   : > { %v4043_v29 = vmax.f32 %v4029_v51, %v1182_v35  ;;  %2355 = vst.msk [vmem:[#allocation2 + $0xd0] sm:$0xff] %vm454_vm1, %v4036_v47  ;;  %v1265_v35 = vmul.f32 1.442695, %v1230_v23  ;;  %v4076_v23 = vld [vmem:[#allocation2 + $0xe0] sm:$0xff] }
 0x1c6   : > { %v1173_v22 = vpop.xlane.xlu0 %1172 }
 0x1c7   : > { %1430 = vperm.xlu0 %3072, %v4025_v17   ;;  %1405 = vperm.xlu1 %3073, %v3986_v31   ;;  %2356 = vst.msk [vmem:[#allocation2 + $0xd8] sm:$0xff] %vm454_vm1, %v4043_v29  ;;  %v4054_v33 = vmax.f32 %v4038_v39, %v1173_v22  ;;  %3098 = vpow2.f32 %v1265_v35 }
 0x1c8   : > { %v1176_v49 = vpop.xlane.xlu1 %1175  ;;  %3100 = vpow2.f32 %v1269_v8  ;;  %v1233_v8 = vsub.f32 %v3863_v2, %v3869_v11  ;;  %v1240_v2 = vsub.f32 %v3947_v61, %v3961_v41  ;;  %v1239_v41 = vsub.f32 %v3940_v54, %v3954_v19 }
 0x1c9   : > { %v4061_v26 = vmax.f32 %v4047_v20, %v1176_v49  ;;  %2353 = vst.msk [vmem:[#allocation2 + $0xc0] sm:$0xff] %vm454_vm1, %v4054_v33  ;;  %v1234_v49 = vsub.f32 %v3866_v7, %v3876_v18  ;;  %v1231_v7 = vsub.f32 %v3871_v15, %v3883_v24  ;;  %3102 = vpow2.f32 %v1263_v46 }
 0x1ca   : > { %v1191_v9 = vpop.xlane.xlu0 %1190  ;;  %v1238_v24 = vsub.f32 %v3893_v32, %v3909_v48  ;;  %v1237_v32 = vsub.f32 %v3886_v28, %v3904_v37  ;;  %v1275_v48 = vmul.f32 1.442695, %v1235_v21  ;;  %v1285_v57 = vmul.f32 1.442695, %v1240_v2 }
 0x1cb   : > { %1460 = vperm.xlu0 %3072, %v4043_v29   ;;  %1435 = vperm.xlu1 %3073, %v4004_v14   ;;  %2354 = vst.msk [vmem:[#allocation2 + $0xc8] sm:$0xff] %vm454_vm1, %v4061_v26  ;;  %v4072_v22 = vmax.f32 %v4056_v58, %v1191_v9  ;;  %v1273_v35 = vmul.f32 1.442695, %v1234_v49  ;;  %v1267_v15 = vmul.f32 1.442695, %v1231_v7  ;;  %v1244_v37 = vsub.f32 %v3979_v53, %v3991_v34 }
 0x1cc   : > { %v1194_v30 = vpop.xlane.xlu1 %1193  ;;  %v1281_v49 = vmul.f32 1.442695, %v1238_v24  ;;  %v1279_v61 = vmul.f32 1.442695, %v1237_v32  ;;  %v1289_v28 = vmul.f32 1.442695, %v1242_v38  ;;  %v1246_v54 = vsub.f32 %v3963_v12, %v3975_v40 }
 0x1cd   : > { %v4081_v4 = vmax.f32 %v4065_v13, %v1194_v30  ;;  %2359 = vst.msk [vmem:[#allocation2 + $0xf0] sm:$0xff] %vm454_vm1, %v4072_v22  ;;  %v1236_v30 = vsub.f32 %v3913_v52, %v3927_v6  ;;  %3104 = vpow2.f32 %v1273_v35  ;;  %v1271_v6 = vmul.f32 1.442695, %v1233_v8 }
 0x1ce   : > { %v1185_v9 = vpop.xlane.xlu0 %1184  ;;  %3106 = vpow2.f32 %v1267_v15  ;;  %v1283_v7 = vmul.f32 1.442695, %v1239_v41  ;;  %v1293_v19 = vmul.f32 1.442695, %v1244_v37  ;;  %v1287_v53 = vmul.f32 1.442695, %v1241_v44 }
 0x1cf   : > { %1450 = vperm.xlu0 %3072, %v4061_v26   ;;  %1425 = vperm.xlu1 %3073, %v4020_v63   ;;  %v1258_v43 = vsub.f32 %v4065_v13, %v4081_v4  ;;  %2360 = vst.msk [vmem:[#allocation2 + $0xf8] sm:$0xff] %vm454_vm1, %v4081_v4  ;;  %v4094_v16 = vmax.f32 %v4076_v23, %v1185_v9  ;;  %v1277_v52 = vmul.f32 1.442695, %v1236_v30  ;;  %v1297_v36 = vmul.f32 1.442695, %v1246_v54 }
 0x1d0   : > { %v1188_v18 = vpop.xlane.xlu1 %1187  ;;  %v1243_v34 = vsub.f32 %v3972_v27, %v3986_v31  ;;  %v1250_v30 = vsub.f32 %v3997_v60, %v4009_v5  ;;  %v1245_v12 = vsub.f32 %v3956_v3, %v3970_v50  ;;  %v1248_v31 = vsub.f32 %v4013_v45, %v4025_v17 }
 0x1d1   : > { %v4101_v56 = vmax.f32 %v4085_v1, %v1188_v18  ;;  %2357 = vst.msk [vmem:[#allocation2 + $0xe0] sm:$0xff] %vm454_vm1, %v4094_v16  ;;  %3108 = vpow2.f32 %v1277_v52  ;;  %v1247_v5 = vsub.f32 %v4006_v55, %v4020_v63  ;;  %v1254_v52 = vsub.f32 %v4029_v51, %v4043_v29 }
 0x1d2   : > { %3110 = vpow2.f32 %v1271_v6  ;;  %v1291_v8 = vmul.f32 1.442695, %v1243_v34  ;;  %v1305_v27 = vmul.f32 1.442695, %v1250_v30  ;;  %v1295_v60 = vmul.f32 1.442695, %v1245_v12 }
 0x1d3   : > { %1480 = vperm.xlu0 %3072, %v4081_v4   ;;  %1455 = vperm.xlu1 %3073, %v4036_v47   ;;  %2358 = vst.msk [vmem:[#allocation2 + $0xe8] sm:$0xff] %vm454_vm1, %v4101_v56  ;;  %3112 = vpow2.f32 %v1281_v49  ;;  %v1301_v50 = vmul.f32 1.442695, %v1248_v31  ;;  %v1249_v45 = vsub.f32 %v3988_v10, %v4004_v14  ;;  %v1299_v17 = vmul.f32 1.442695, %v1247_v5  ;;  %v4690_v34 = vld [vmem:[#allocation6_spill] sm:$0xff] }
 0x1d4   : > { %v4119_v11 = vpop.eup %3098  ;;  %3114 = vpow2.f32 %v1275_v48  ;;  %v1313_v55 = vmul.f32 1.442695, %v1254_v52  ;;  %v1252_v63 = vsub.f32 %v4047_v20, %v4061_v26  ;;  %v1253_v51 = vsub.f32 %v4022_v42, %v4036_v47  ;;  %v4691_v31 = vld [vmem:[#allocation7_spill] sm:$0xff]  ;;  %v4692_v52 = vld [vmem:[#allocation8_spill] sm:$0xff] }
 0x1d5   : > { %v4127_v9 = vpop.eup %3100  ;;  %3116 = vpow2.f32 %v1285_v57  ;;  %v1303_v29 = vmul.f32 1.442695, %v1249_v45  ;;  %v1256_v2 = vsub.f32 %v4085_v1, %v4101_v56  ;;  %v1251_v42 = vsub.f32 %v4038_v39, %v4054_v33 }
 0x1d6   : > { %v4133_v46 = vpop.eup %3102  ;;  %3118 = vpow2.f32 %v1279_v61  ;;  %v1309_v14 = vmul.f32 1.442695, %v1252_v63  ;;  %v1311_v20 = vmul.f32 1.442695, %v1253_v51  ;;  %v1257_v38 = vsub.f32 %v4056_v58, %v4072_v22  ;;  %v4693_v63 = vld [vmem:[#allocation9_spill] sm:$0xff] }
 0x1d7   : > { %1445 = vperm.xlu1 %3073, %v4054_v33   ;;  %1470 = vperm.xlu0 %3072, %v4101_v56   ;;  %3120 = vpow2.f32 %v1289_v28  ;;  %v1317_v47 = vmul.f32 1.442695, %v1256_v2  ;;  %v1307_v1 = vmul.f32 1.442695, %v1251_v42  ;;  %v1255_v61 = vsub.f32 %v4076_v23, %v4094_v16  ;;  %v4694_v2 = vld [vmem:[#allocation10_spill] sm:$0xff] }
 0x1d8   : > { %3122 = vpow2.f32 %v1283_v7  ;;  %v1319_v33 = vmul.f32 1.442695, %v1257_v38 }
 0x1d9   : > { %3124 = vpow2.f32 %v1293_v19 }
 0x1da   : > { %v4137_v25 = vpop.eup %3104  ;;  %3126 = vpow2.f32 %v1287_v53 }
 0x1db   : > { %1475 = vperm.xlu1 %3073, %v4072_v22   ;;  %2090 = vperm.xlu0 %3072, %v4119_v11   ;;  %v4143_v18 = vpop.eup %3106  ;;  %3128 = vpow2.f32 %v1297_v36  ;;  %v1315_v22 = vmul.f32 1.442695, %v1255_v61 }
 0x1dc   : > { %3130 = vpow2.f32 %v1291_v8 }
 0x1dd   : > { %3132 = vpow2.f32 %v1305_v27 }
 0x1de   : > { %v4147_v35 = vpop.eup %3108  ;;  %3134 = vpow2.f32 %v1295_v60 }
 0x1df   : > { %1465 = vperm.xlu1 %3073, %v4094_v16   ;;  %2100 = vperm.xlu0 %3072, %v4127_v9   ;;  %v4153_v0 = vpop.eup %3110  ;;  %3136 = vpow2.f32 %v1301_v50 }
 0x1e0   : > { %v4157_v40 = vpop.eup %3112  ;;  %3138 = vpow2.f32 %v1299_v17 }
 0x1e1   : > { %v4163_v15 = vpop.eup %3114  ;;  %3140 = vpow2.f32 %v1313_v55 }
 0x1e2   : > { %v4167_v24 = vpop.eup %3116  ;;  %3142 = vpow2.f32 %v1303_v29 }
 0x1e3   : > { %2085 = vperm.xlu1 %3073, %v4133_v46   ;;  %2110 = vperm.xlu0 %3072, %v4137_v25   ;;  %v4173_v3 = vpop.eup %3118  ;;  %3144 = vpow2.f32 %v1309_v14 }
 0x1e4   : > { %v4177_v6 = vpop.eup %3120  ;;  %3146 = vpow2.f32 %v1311_v20 }
 0x1e5   : > { %v4183_v21 = vpop.eup %3122  ;;  %3148 = vpow2.f32 %v1317_v47 }
 0x1e6   : > { %v4187_v49 = vpop.eup %3124  ;;  %3150 = vpow2.f32 %v1307_v1 }
 0x1e7   : > { %2095 = vperm.xlu1 %3073, %v4143_v18   ;;  %2120 = vperm.xlu0 %3072, %v4147_v35   ;;  %v4193_v10 = vpop.eup %3126  ;;  %3152 = vpow2.f32 %v1319_v33 }
 0x1e8   : > { %v4197_v32 = vpop.eup %3128  ;;  %3154 = vpow2.f32 %v1315_v22  ;;  %v4695_v22 = vld [vmem:[#allocation11_spill] sm:$0xff] }
 0x1e9   : > { %v4201_v26 = vpop.eup %3130 }
 0x1ea   : > { %v4205_v48 = vpop.eup %3132 }
 0x1eb   : > { %2105 = vperm.xlu1 %3073, %v4153_v0   ;;  %2130 = vperm.xlu0 %3072, %v4157_v40   ;;  %v4209_v56 = vpop.eup %3134 }
 0x1ec   : > { %v4213_v57 = vpop.eup %3136 }
 0x1ed   : > { %v4217_v39 = vpop.eup %3138 }
 0x1ee   : > { %v4221_v41 = vpop.eup %3140 }
 0x1ef   : > { %2115 = vperm.xlu1 %3073, %v4163_v15   ;;  %2140 = vperm.xlu0 %3072, %v4167_v24   ;;  %v4225_v58 = vpop.eup %3142 }
 0x1f0   : > { %v4227_v28 = vpop.eup %3144 }
 0x1f1   : > { %v4231_v37 = vpop.eup %3146 }
 0x1f2   : > { %v4233_v23 = vpop.eup %3148 }
 0x1f3   : > { %2125 = vperm.xlu1 %3073, %v4173_v3   ;;  %2150 = vperm.xlu0 %3072, %v4177_v6   ;;  %v4238_v54 = vpop.eup %3150 }
 0x1f4   : > { %v4243_v12 = vpop.eup %3152 }
 0x1f5   : > { %v4247_v50 = vpop.eup %3154 }
 0x1f7   : > { %2135 = vperm.xlu1 %3073, %v4183_v21   ;;  %2160 = vperm.xlu0 %3072, %v4187_v49  }
 0x1fb   : > { %2145 = vperm.xlu1 %3073, %v4193_v10   ;;  %2170 = vperm.xlu0 %3072, %v4197_v32  }
 0x1ff   : > { %2155 = vperm.xlu1 %3073, %v4201_v26   ;;  %2190 = vperm.xlu0 %3072, %v4205_v48  }
 0x203   : > { %2165 = vperm.xlu1 %3073, %v4209_v56   ;;  %2180 = vperm.xlu0 %3072, %v4213_v57  }
 0x207   : > { %2175 = vperm.xlu1 %3073, %v4217_v39   ;;  %2210 = vperm.xlu0 %3072, %v4221_v41  }
 0x20b   : > { %2185 = vperm.xlu1 %3073, %v4225_v58   ;;  %2200 = vperm.xlu0 %3072, %v4227_v28  }
 0x20e   : > { %v1336_v16 = vpop.permute.xlu1 %1335 }
 0x20f   : > { %2205 = vperm.xlu1 %3073, %v4231_v37   ;;  %2220 = vperm.xlu0 %3072, %v4233_v23   ;;  %v1485_v36 = vsub.f32 %v4690_v34, %v1336_v16 }
 0x210   : > { %v1326_v44 = vpop.permute.xlu0 %1325 }
 0x211   : > { %v1483_v7 = vsub.f32 %v3552_v59, %v1326_v44  ;;  %v1519_v5 = vmul.f32 1.442695, %v1485_v36 }
 0x212   : > { %v1341_v19 = vpop.permute.xlu1 %1340 }
 0x213   : > { %v1486_v53 = vsub.f32 %v3557_v62, %v1341_v19  ;;  %2195 = vperm.xlu1 %3073, %v4238_v54   ;;  %v1515_v30 = vmul.f32 1.442695, %v1483_v7 }
 0x215   : > { %v1521_v8 = vmul.f32 1.442695, %v1486_v53  ;;  %3156 = vpow2.f32 %v1515_v30 }
 0x216   : > { %v1331_v27 = vpop.permute.xlu1 %1330 }
 0x217   : > { %v1484_v60 = vsub.f32 %v4691_v31, %v1331_v27  ;;  %2225 = vperm.xlu1 %3073, %v4243_v12   ;;  %3158 = vpow2.f32 %v1521_v8  ;;  %v4696_v8 = vld [vmem:[#allocation15_spill] sm:$0xff]  ;;  %v4697_v31 = vld [vmem:[#allocation12_spill] sm:$0xff] }
 0x219   : > { %v1517_v59 = vmul.f32 1.442695, %v1484_v60 }
 0x21a   : > { %v1356_v62 = vpop.permute.xlu1 %1355 }
 0x21b   : > { %3160 = vpow2.f32 %v1517_v59  ;;  %2215 = vperm.xlu1 %3073, %v4247_v50   ;;  %v1489_v45 = vsub.f32 %v4692_v52, %v1356_v62 }
 0x21c   : > { %3162 = vpow2.f32 %v1519_v5  ;;  %v4698_v5 = vld [vmem:[#allocation14_spill] sm:$0xff] }
 0x21d   : > { %v1527_v55 = vmul.f32 1.442695, %v1489_v45 }
 0x21e   : > { %v1346_v17 = vpop.permute.xlu1 %1345 }
 0x21f   : > { %v1487_v29 = vsub.f32 %v4693_v63, %v1346_v17  ;;  %3164 = vpow2.f32 %v1527_v55  ;;  %v4699_v63 = vld [vmem:[#allocation13_spill] sm:$0xff] }
 0x221   : > { %v1523_v42 = vmul.f32 1.442695, %v1487_v29 }
 0x222   : > { %v1381_v51 = vpop.permute.xlu0 %1380  ;;  %v1361_v14 = vpop.permute.xlu1 %1360 }
 0x223   : > { %v1490_v20 = vsub.f32 %v4694_v2, %v1361_v14  ;;  %v4253_v47 = vpop.eup %3156  ;;  %3166 = vpow2.f32 %v1523_v42  ;;  %v1494_v59 = vsub.f32 %v4698_v5, %v1381_v51  ;;  %v4700_v51 = vld [vmem:[#allocation16_spill] sm:$0xff] }
 0x224   : > { %v4257_v61 = vpop.eup %3158 }
 0x225   : > { %v1529_v1 = vmul.f32 1.442695, %v1490_v20  ;;  %v1537_v14 = vmul.f32 1.442695, %v1494_v59 }
 0x226   : > { %v4255_v38 = vpop.permute.xlu0 %2075  ;;  %v1351_v33 = vpop.permute.xlu1 %1350 }
 0x227   : > { %v1488_v16 = vsub.f32 %v4695_v22, %v1351_v33  ;;  %3168 = vpow2.f32 %v1529_v1 }
 0x228   : > { %v3161_v44 = vpop.eup %3160 }
 0x229   : > { %v3163_v7 = vpop.eup %3162  ;;  %v1525_v19 = vmul.f32 1.442695, %v1488_v16  ;;  %v1804_v53 = vpack.c.bf16 %v3161_v44, %v4253_v47  ;;  %v1646_v20 = vsel %vm519_vm0, %v3161_v44, 0.0 }
 0x22a   : > { %v1371_v34 = vpop.permute.xlu0 %1370  ;;  %v1376_v36 = vpop.permute.xlu1 %1375  ;;  %v1805_v30 = vpack.c.bf16 %v4257_v61, %v3163_v7  ;;  %v1649_v52 = vsel %vm519_vm0, %v3163_v7, 0.0 }
 0x22b   : > { %3170 = vpow2.f32 %v1525_v19  ;;  %v1492_v27 = vsub.f32 %v4696_v8, %v1371_v34  ;;  %v1493_v60 = vsub.f32 %v4697_v31, %v1376_v36  ;;  %2995 = vmatprep.mubr.msk.bf16.mxu1 %vm519_vm0, %v1804_v53 }
 0x22c   : > { %2996 = vmatmul.mubr.msk.bf16.vlgmr.msra.gmra.mxu1 %vm519_vm0, %v1805_v30  ;;  %v3165_v42 = vpop.eup %3164  ;;  %v4701_v30 = vld [vmem:[#allocation19_spill] sm:$0xff] }
 0x22d   : > { %v1535_v62 = vmul.f32 1.442695, %v1493_v60  ;;  %v1533_v55 = vmul.f32 1.442695, %v1492_v27  ;;  %v1661_v7 = vsel %vm519_vm0, %v3165_v42, 0.0  ;;  %v4702_v27 = vld [vmem:[#allocation18_spill] sm:$0xff] }
 0x22e   : > { %v1401_v45 = vpop.permute.xlu0 %1400  ;;  %1650 = vadd.xlane.f32.xlu0 %v1649_v52  ;;  %v1366_v17 = vpop.permute.xlu1 %1365 }
 0x22f   : > { %v1491_v29 = vsub.f32 %v4699_v63, %v1366_v17  ;;  %3172 = vpow2.f32 %v1535_v62  ;;  %v1498_v31 = vsub.f32 %v4702_v27, %v1401_v45 }
 0x230   : > { %3174 = vpow2.f32 %v1533_v55  ;;  %v3167_v19 = vpop.eup %3166  ;;  %v4703_v55 = vld [vmem:[#allocation17_spill] sm:$0xff] }
 0x231   : > { %v1531_v2 = vmul.f32 1.442695, %v1491_v29  ;;  %v1655_v60 = vsel %vm519_vm0, %v3167_v19, 0.0 }
 0x232   : > { %v1391_v1 = vpop.permute.xlu0 %1390  ;;  %1647 = vadd.xlane.f32.xlu0 %v1646_v20  ;;  %v1396_v33 = vpop.permute.xlu1 %1395 }
 0x233   : > { %v1497_v22 = vsub.f32 %v4700_v51, %v1396_v33  ;;  %3176 = vpow2.f32 %v1531_v2  ;;  %v1496_v44 = vsub.f32 %v4701_v30, %v1391_v1  ;;  %v1643_v33 = vsel %vm519_vm0, %v4253_v47, 0.0  ;;  %v4704_v51 = vld [vmem:[#allocation23_spill] sm:$0xff]  ;;  %v4706_v30 = vld [vmem:[#allocation22_spill] sm:$0xff] }
 0x234   : > { %3178 = vpow2.f32 %v1537_v14  ;;  %v3169_v36 = vpop.eup %3168  ;;  %v1545_v14 = vmul.f32 1.442695, %v1498_v31 }
 0x235   : > { %v1543_v16 = vmul.f32 1.442695, %v1497_v22  ;;  %v1807_v52 = vpack.c.bf16 %v3169_v36, %v3165_v42  ;;  %v1541_v17 = vmul.f32 1.442695, %v1496_v44  ;;  %v4705_v22 = vld [vmem:[#allocation20_spill] sm:$0xff] }
 0x236   : > { %v1421_v53 = vpop.permute.xlu0 %1420  ;;  %1662 = vadd.xlane.f32.xlu0 %v1661_v7  ;;  %v4272_v34 = vpop.permute.xlu1 %2080 }
 0x237   : > { %3180 = vpow2.f32 %v1543_v16  ;;  %v1502_v44 = vsub.f32 %v4706_v30, %v1421_v53 }
 0x238   : > { %v4275_v8 = vpop.eup %3170  ;;  %3182 = vpow2.f32 %v1541_v17  ;;  %v4707_v17 = vld [vmem:[#allocation21_spill] sm:$0xff] }
 0x239   : > { %v1806_v5 = vpack.c.bf16 %v4275_v8, %v3167_v19 }
 0x23a   : > { %v1411_v59 = vpop.permute.xlu0 %1410  ;;  %1656 = vadd.xlane.f32.xlu0 %v1655_v60  ;;  %v1386_v62 = vpop.permute.xlu1 %1385 }
 0x23b   : > { %v1495_v63 = vsub.f32 %v4703_v55, %v1386_v62  ;;  %2999 = vmatprep.mubr.msk.bf16.mxu1 %vm519_vm0, %v1806_v5  ;;  %v1500_v42 = vsub.f32 %v4704_v51, %v1411_v59  ;;  %v1652_v59 = vsel %vm519_vm0, %v4257_v61, 0.0  ;;  %v4708_v51 = vld [vmem:[#allocation27_spill] sm:$0xff] }
 0x23c   : > { %3000 = vmatmul.mubr.msk.bf16.gmra.mxu1 %vm519_vm0, %v1807_v52  ;;  %v3173_v29 = vpop.eup %3172 }
 0x23d   : > { %v1539_v2 = vmul.f32 1.442695, %v1495_v63  ;;  %v1673_v45 = vsel %vm519_vm0, %v3173_v29, 0.0  ;;  %v4288_v7 = vpop.eup %3174  ;;  %v1549_v52 = vmul.f32 1.442695, %v1500_v42 }
 0x23e   : > { %v1441_v20 = vpop.permute.xlu0 %1440  ;;  %v1416_v1 = vpop.permute.xlu1 %1415  ;;  %1674 = vadd.xlane.f32.xlu0 %v1673_v45 }
 0x23f   : > { %v1501_v16 = vsub.f32 %v4705_v22, %v1416_v1  ;;  %1644 = vadd.xlane.f32.xlu1 %v1643_v33  ;;  %3184 = vpow2.f32 %v1539_v2  ;;  %v1664_v33 = vsel %vm519_vm0, %v3169_v36, 0.0  ;;  %v4709_v22 = vld [vmem:[#allocation24_spill] sm:$0xff] }
 0x240   : > { %v3177_v19 = vpop.eup %3176  ;;  %3186 = vpow2.f32 %v1545_v14  ;;  %v1553_v14 = vmul.f32 1.442695, %v1502_v44 }
 0x241   : > { %v1551_v27 = vmul.f32 1.442695, %v1501_v16  ;;  %v3179_v31 = vpop.eup %3178  ;;  %v1667_v5 = vsel %vm519_vm0, %v3177_v19, 0.0  ;;  %v1808_v62 = vpack.c.bf16 %v4288_v7, %v3177_v19  ;;  %v4710_v16 = vld [vmem:[#allocation26_spill] sm:$0xff] }
 0x242   : > { %v1431_v60 = vpop.permute.xlu0 %1430  ;;  %v1406_v47 = vpop.permute.xlu1 %1405  ;;  %1668 = vadd.xlane.f32.xlu0 %v1667_v5  ;;  %v1809_v63 = vpack.c.bf16 %v3179_v31, %v3173_v29  ;;  %v1506_v19 = vsub.f32 %v4710_v16, %v1441_v20  ;;  %v1658_v5 = vsel %vm519_vm0, %v4275_v8, 0.0 }
 0x243   : > { %v1499_v55 = vsub.f32 %v4707_v17, %v1406_v47  ;;  %1653 = vadd.xlane.f32.xlu1 %v1652_v59  ;;  %3188 = vpow2.f32 %v1551_v27  ;;  %3003 = vmatprep.mubr.msk.bf16.mxu1 %vm519_vm0, %v1808_v62  ;;  %v1504_v42 = vsub.f32 %v4708_v51, %v1431_v60  ;;  %v4711_v59 = vld [vmem:[#allocation25_spill] sm:$0xff] }
 0x244   : > { %v3181_v53 = vpop.eup %3180  ;;  %3004 = vmatmul.mubr.msk.bf16.gmra.mxu1 %vm519_vm0, %v1809_v63  ;;  %3190 = vpow2.f32 %v1549_v52  ;;  %v1561_v52 = vmul.f32 1.442695, %v1506_v19 }
 0x245   : > { %v1547_v2 = vmul.f32 1.442695, %v1499_v55  ;;  %v1685_v1 = vsel %vm519_vm0, %v3181_v53, 0.0  ;;  %v1557_v47 = vmul.f32 1.442695, %v1504_v42  ;;  %v3183_v62 = vpop.eup %3182 }
 0x246   : > { %v1461_v45 = vpop.permute.xlu0 %1460  ;;  %v1436_v61 = vpop.permute.xlu1 %1435  ;;  %1686 = vadd.xlane.f32.xlu0 %v1685_v1 }
 0x247   : > { %v1505_v29 = vsub.f32 %v4709_v22, %v1436_v61  ;;  %1665 = vadd.xlane.f32.xlu1 %v1664_v33  ;;  %3192 = vpow2.f32 %v1547_v2  ;;  %v1676_v2 = vsel %vm519_vm0, %v3179_v31, 0.0  ;;  %v4712_v61 = vld [vmem:[#allocation31_spill] sm:$0xff]  ;;  %v4713_v33 = vld [vmem:[#allocation28_spill] sm:$0xff] }
 0x248   : > { %3194 = vpow2.f32 %v1553_v14 }
 0x249   : > { %v1559_v30 = vmul.f32 1.442695, %v1505_v29  ;;  %v4714_v29 = vld [vmem:[#allocation30_spill] sm:$0xff] }
 0x24a   : > { %v1451_v44 = vpop.permute.xlu0 %1450  ;;  %v1426_v27 = vpop.permute.xlu1 %1425  ;;  %v1510_v16 = vsub.f32 %v4714_v29, %v1461_v45 }
 0x24b   : > { %v1503_v36 = vsub.f32 %v4711_v59, %v1426_v27  ;;  %1659 = vadd.xlane.f32.xlu1 %v1658_v5  ;;  %3196 = vpow2.f32 %v1559_v30  ;;  %v1508_v8 = vsub.f32 %v4712_v61, %v1451_v44  ;;  %v1670_v44 = vsel %vm519_vm0, %v4288_v7, 0.0  ;;  %v4717_v61 = vld [vmem:[#allocation32_spill] sm:$0xff] }
 0x24c   : > { %v3185_v60 = vpop.eup %3184  ;;  %3198 = vpow2.f32 %v1557_v47 }
 0x24d   : > { %v1555_v17 = vmul.f32 1.442695, %v1503_v36  ;;  %v3187_v55 = vpop.eup %3186  ;;  %v1679_v14 = vsel %vm519_vm0, %v3185_v60, 0.0  ;;  %v1810_v1 = vpack.c.bf16 %v3183_v62, %v3185_v60  ;;  %v1565_v27 = vmul.f32 1.442695, %v1508_v8 }
 0x24e   : > { %v1481_v63 = vpop.permute.xlu0 %1480  ;;  %v1456_v20 = vpop.permute.xlu1 %1455  ;;  %1680 = vadd.xlane.f32.xlu0 %v1679_v14  ;;  %v1811_v42 = vpack.c.bf16 %v3187_v55, %v3181_v53  ;;  %v4715_v53 = vld [vmem:[#allocation29_spill] sm:$0xff]  ;;  %v1569_v60 = vmul.f32 1.442695, %v1510_v16 }
 0x24f   : > { %v1509_v51 = vsub.f32 %v4713_v33, %v1456_v20  ;;  %1677 = vadd.xlane.f32.xlu1 %v1676_v2  ;;  %3200 = vpow2.f32 %v1555_v17  ;;  %3007 = vmatprep.mubr.msk.bf16.mxu1 %vm519_vm0, %v1810_v1  ;;  %v4716_v17 = vld [vmem:[#allocation35_spill] sm:$0xff]  ;;  %v1688_v1 = vsel %vm519_vm0, %v3187_v55, 0.0 }
 0x250   : > { %v3189_v22 = vpop.eup %3188  ;;  %3202 = vpow2.f32 %v1561_v52  ;;  %3008 = vmatmul.mubr.msk.bf16.gmra.mxu1 %vm519_vm0, %v1811_v42  ;;  %v4718_v42 = vld [vmem:[#allocation34_spill] sm:$0xff] }
 0x251   : > { %v1567_v19 = vmul.f32 1.442695, %v1509_v51  ;;  %v1697_v31 = vsel %vm519_vm0, %v3189_v22, 0.0  ;;  %v3191_v59 = vpop.eup %3190  ;;  %v1514_v29 = vsub.f32 %v4718_v42, %v1481_v63 }
 0x252   : > { %v1446_v30 = vpop.permute.xlu1 %1445  ;;  %v1471_v5 = vpop.permute.xlu0 %1470  ;;  %1698 = vadd.xlane.f32.xlu0 %v1697_v31 }
 0x253   : > { %v1507_v47 = vsub.f32 %v4715_v53, %v1446_v30  ;;  %1671 = vadd.xlane.f32.xlu1 %v1670_v44  ;;  %3204 = vpow2.f32 %v1567_v19  ;;  %v1512_v14 = vsub.f32 %v4716_v17, %v1471_v5  ;;  %v1682_v30 = vsel %vm519_vm0, %v3183_v62, 0.0  ;;  %v4719_v44 = vld [vmem:[#allocation33_spill] sm:$0xff] }
 0x254   : > { %v3193_v36 = vpop.eup %3192  ;;  %3206 = vpow2.f32 %v1565_v27  ;;  %v1577_v53 = vmul.f32 1.442695, %v1514_v29 }
 0x255   : > { %v1563_v45 = vmul.f32 1.442695, %v1507_v47  ;;  %v3195_v52 = vpop.eup %3194  ;;  %v1691_v20 = vsel %vm519_vm0, %v3193_v36, 0.0  ;;  %v1812_v7 = vpack.c.bf16 %v3191_v59, %v3193_v36  ;;  %v1573_v19 = vmul.f32 1.442695, %v1512_v14 }
 0x256   : > { %v1476_v2 = vpop.permute.xlu1 %1475  ;;  %1692 = vadd.xlane.f32.xlu0 %v1691_v20  ;;  %v1813_v33 = vpack.c.bf16 %v3195_v52, %v3189_v22  ;;  %v1694_v20 = vsel %vm519_vm0, %v3191_v59, 0.0 }
 0x257   : > { %v1513_v8 = vsub.f32 %v4717_v61, %v1476_v2  ;;  %1689 = vadd.xlane.f32.xlu1 %v1688_v1  ;;  %3208 = vpow2.f32 %v1563_v45  ;;  %3011 = vmatprep.mubr.msk.bf16.mxu1 %vm519_vm0, %v1812_v7 }
 0x258   : > { %v3197_v51 = vpop.eup %3196  ;;  %3210 = vpow2.f32 %v1569_v60  ;;  %3012 = vmatmul.mubr.msk.bf16.gmra.mxu1 %vm519_vm0, %v1813_v33  ;;  %v1700_v60 = vsel %vm519_vm0, %v3195_v52, 0.0  ;;  %v4333_v52 = vpop.permute.xlu0 %2090 }
 0x259   : > { %v1575_v16 = vmul.f32 1.442695, %v1513_v8  ;;  %v1709_v55 = vsel %vm519_vm0, %v3197_v51, 0.0  ;;  %v3199_v27 = vpop.eup %3198 }
 0x25a   : > { %v1466_v31 = vpop.permute.xlu1 %1465  ;;  %1710 = vadd.xlane.f32.xlu0 %v1709_v55  ;;  %v1706_v29 = vsel %vm519_vm0, %v3199_v27, 0.0 }
 0x25b   : > { %3212 = vpow2.f32 %v1575_v16  ;;  %v1511_v22 = vsub.f32 %v4719_v44, %v1466_v31  ;;  %1683 = vadd.xlane.f32.xlu1 %v1682_v30 }
 0x25c   : > { %v3201_v5 = vpop.eup %3200  ;;  %3214 = vpow2.f32 %v1573_v19  ;;  %v4341_v19 = vpop.permute.xlu0 %2100 }
 0x25d   : > { %v1571_v47 = vmul.f32 1.442695, %v1511_v22  ;;  %v3203_v36 = vpop.eup %3202  ;;  %v1703_v63 = vsel %vm519_vm0, %v3201_v5, 0.0  ;;  %v1814_v45 = vpack.c.bf16 %v3199_v27, %v3201_v5 }
 0x25e   : > { %1704 = vadd.xlane.f32.xlu0 %v1703_v63  ;;  %v1815_v62 = vpack.c.bf16 %v3203_v36, %v3197_v51  ;;  %v1712_v8 = vsel %vm519_vm0, %v3203_v36, 0.0  ;;  %v1321_v36 = vmul.f32 1.442695, %v1258_v43 }
 0x25f   : > { %3216 = vpow2.f32 %v1571_v47  ;;  %1701 = vadd.xlane.f32.xlu1 %v1700_v60  ;;  %3015 = vmatprep.mubr.msk.bf16.mxu1 %vm519_vm0, %v1814_v45 }
 0x260   : > { %v3205_v17 = vpop.eup %3204  ;;  %3218 = vpow2.f32 %v1577_v53  ;;  %3016 = vmatmul.mubr.msk.bf16.gmra.mxu1 %vm519_vm0, %v1815_v62  ;;  %v4345_v53 = vpop.permute.xlu1 %2085 }
 0x261   : > { %v1721_v14 = vsel %vm519_vm0, %v3205_v17, 0.0  ;;  %v3207_v2 = vpop.eup %3206  ;;  %v4348_v27 = vpop.permute.xlu0 %2110  ;;  %3220 = vpow2.f32 %v1321_v36  ;;  %v1580_v36 = vld [vmem:[#allocation3 + $0x8] sm:$0xff] }
 0x262   : > { %1722 = vadd.xlane.f32.xlu0 %v1721_v14  ;;  %v1718_v47 = vsel %vm519_vm0, %v3207_v2, 0.0 }
 0x263   : > { %1695 = vadd.xlane.f32.xlu1 %v1694_v20 }
 0x264   : > { %v3209_v1 = vpop.eup %3208  ;;  %v4355_v63 = vpop.permute.xlu1 %2095 }
 0x265   : > { %v3211_v7 = vpop.eup %3210  ;;  %v1715_v61 = vsel %vm519_vm0, %v3209_v1, 0.0  ;;  %v1816_v33 = vpack.c.bf16 %v3207_v2, %v3209_v1  ;;  %v4358_v45 = vpop.permute.xlu0 %2120 }
 0x266   : > { %1716 = vadd.xlane.f32.xlu0 %v1715_v61  ;;  %v1817_v51 = vpack.c.bf16 %v3211_v7, %v3205_v17  ;;  %v1724_v22 = vsel %vm519_vm0, %v3211_v7, 0.0 }
 0x267   : > { %1713 = vadd.xlane.f32.xlu1 %v1712_v8  ;;  %3019 = vmatprep.mubr.msk.bf16.mxu1 %vm519_vm0, %v1816_v33 }
 0x268   : > { %v3213_v42 = vpop.eup %3212  ;;  %3020 = vmatmul.mubr.msk.bf16.gmra.mxu1 %vm519_vm0, %v1817_v51  ;;  %v4361_v17 = vpop.permute.xlu1 %2105 }
 0x269   : > { %v1733_v59 = vsel %vm519_vm0, %v3213_v42, 0.0  ;;  %v3215_v16 = vpop.eup %3214  ;;  %v4363_v14 = vpop.permute.xlu0 %2130 }
 0x26a   : > { %1734 = vadd.xlane.f32.xlu0 %v1733_v59  ;;  %v1730_v62 = vsel %vm519_vm0, %v3215_v16, 0.0 }
 0x26b   : > { %1707 = vadd.xlane.f32.xlu1 %v1706_v29 }
 0x26c   : > { %v3217_v55 = vpop.eup %3216  ;;  %v4365_v20 = vpop.permute.xlu1 %2115 }
 0x26d   : > { %v1727_v31 = vsel %vm519_vm0, %v3217_v55, 0.0  ;;  %v1818_v30 = vpack.c.bf16 %v3215_v16, %v3217_v55  ;;  %v3219_v44 = vpop.eup %3218  ;;  %v4367_v4 = vpop.permute.xlu0 %2140 }
 0x26e   : > { %1728 = vadd.xlane.f32.xlu0 %v1727_v31  ;;  %v1819_v5 = vpack.c.bf16 %v3219_v44, %v3213_v42  ;;  %v1736_v60 = vsel %vm519_vm0, %v3219_v44, 0.0  ;;  %v4369_v13 = vpop.eup %3220 }
 0x26f   : > { %1725 = vadd.xlane.f32.xlu1 %v1724_v22  ;;  %3023 = vmatprep.mubr.msk.bf16.mxu1 %vm519_vm0, %v1818_v30  ;;  %v1581_v22 = vld [vmem:[#allocation3 + $0x10] sm:$0xff] }
 0x270   : > { %3024 = vmatmul.mubr.msk.bf16.gmra.mxu1 %vm519_vm0, %v1819_v5  ;;  %v4372_v43 = vpop.permute.xlu1 %2125  ;;  %v1613_v5 = vmul.f32 %v4133_v46, %v1581_v22  ;;  %v1583_v46 = vld [vmem:[#allocation3 + $0x20] sm:$0xff] }
 0x271   : > { %v4374_v2 = vpop.permute.xlu0 %2150 }
 0x273   : > { %1719 = vadd.xlane.f32.xlu1 %v1718_v47 }
 0x274   : > { %v4376_v1 = vpop.permute.xlu1 %2135 }
 0x275   : > { %v4378_v7 = vpop.permute.xlu0 %2160 }
 0x276   : > { %4720 = vst [vmem:[#allocation6_spill] sm:$0xff] %v4378_v7 }
 0x277   : > { %1737 = vadd.xlane.f32.xlu1 %v1736_v60 }
 0x278   : > { %v4380_v61 = vpop.permute.xlu1 %2145 }
 0x279   : > { %v4382_v8 = vpop.permute.xlu0 %2170 }
 0x27b   : > { %1731 = vadd.xlane.f32.xlu1 %v1730_v62 }
 0x27c   : > { %v4384_v33 = vpop.permute.xlu1 %2155 }
 0x27d   : > { %v4386_v51 = vpop.permute.xlu0 %2190 }
 0x27e   : > { %4721 = vst [vmem:[#allocation7_spill] sm:$0xff] %v4386_v51 }
 0x280   : > { %v4388_v42 = vpop.permute.xlu1 %2165 }
 0x281   : > { %v4390_v59 = vpop.permute.xlu0 %2180 }
 0x282   : > { %4722 = vst [vmem:[#allocation8_spill] sm:$0xff] %v4390_v59  ;;  %v4729_v59 = vld [vmem:[#allocation37_spill] sm:$0xff] }
 0x284   : > { %2230 = vperm.xlu0 %3072, %v4369_v13   ;;  %v4392_v29 = vpop.permute.xlu1 %2175 }
 0x285   : > { %4723 = vst [vmem:[#allocation9_spill] sm:$0xff] %v4392_v29  ;;  %v4394_v16 = vpop.permute.xlu0 %2210  ;;  %v1585_v29 = vld [vmem:[#allocation3 + $0x30] sm:$0xff] }
 0x286   : > { %4724 = vst [vmem:[#allocation10_spill] sm:$0xff] %v4394_v16  ;;  %v1612_v16 = vmul.f32 %v4729_v59, %v1580_v36 }
 0x288   : > { %v4396_v55 = vpop.permute.xlu1 %2185 }
 0x289   : > { %4725 = vst [vmem:[#allocation11_spill] sm:$0xff] %v4396_v55  ;;  %v4398_v31 = vpop.permute.xlu0 %2200 }
 0x28a   : > { %4726 = vst [vmem:[#allocation15_spill] sm:$0xff] %v4398_v31 }
 0x28c   : > { %v4400_v30 = vpop.permute.xlu1 %2205 }
 0x28d   : > { %4727 = vst [vmem:[#allocation12_spill] sm:$0xff] %v4400_v30  ;;  %v4402_v44 = vpop.permute.xlu0 %2220 }
 0x28e   : > { %4728 = vst [vmem:[#allocation14_spill] sm:$0xff] %v4402_v44  ;;  %v1617_v44 = vmul.f32 %v4153_v0, %v1585_v29  ;;  %v4731_v0 = vld [vmem:[#allocation36_spill] sm:$0xff] }
 0x290   : > { %v4405_v60 = vpop.permute.xlu1 %2195 }
 0x294   : > { %v4409_v31 = vpop.permute.xlu1 %2225 }
 0x295   : > { %4730 = vst [vmem:[#allocation13_spill] sm:$0xff] %v4409_v31 }
 0x298   : > { %v4415_v59 = vpop.permute.xlu1 %2215 }
 0x2b7   : > { %v1651_v47 = vpop.xlane.xlu0 %1650 }
 0x2b8   : > { %v1741_v62 = vadd.f32 %v1651_v47, %v1613_v5  ;;  %v1615_v5 = vmul.f32 %v4143_v18, %v1583_v46 }
 0x2ba   : > { %1774 = vst.msk [vmem:[#allocation3 + $0x10] sm:$0xff] %vm454_vm1, %v1741_v62 }
 0x2bb   : > { %v1648_v51 = vpop.xlane.xlu0 %1647 }
 0x2bc   : > { %v1740_v55 = vadd.f32 %v1648_v51, %v1612_v16  ;;  %v1589_v51 = vld [vmem:[#allocation3 + $0x50] sm:$0xff]  ;;  %v1579_v16 = vld [vmem:[#allocation3] sm:$0xff] }
 0x2bd   : > { %v1611_v29 = vmul.f32 %v4731_v0, %v1579_v16 }
 0x2be   : > { %1773 = vst.msk [vmem:[#allocation3 + $0x8] sm:$0xff] %vm454_vm1, %v1740_v55  ;;  %v1621_v55 = vmul.f32 %v4173_v3, %v1589_v51  ;;  %v1586_v3 = vld [vmem:[#allocation3 + $0x38] sm:$0xff] }
 0x2bf   : > { %v1663_v30 = vpop.xlane.xlu0 %1662 }
 0x2c0   : > { %v1745_v22 = vadd.f32 %v1663_v30, %v1617_v44  ;;  %v1587_v44 = vld [vmem:[#allocation3 + $0x40] sm:$0xff] }
 0x2c1   : > { %v2398_v7 = vld [vmem:[#allocation3 + $0x10] sm:$0xff]  ;;  %v1619_v18 = vmul.f32 %v4163_v15, %v1587_v44 }
 0x2c2   : > { %3222 = vrcp.f32 %v2398_v7  ;;  %1778 = vst.msk [vmem:[#allocation3 + $0x30] sm:$0xff] %vm454_vm1, %v1745_v22  ;;  %v1582_v7 = vld [vmem:[#allocation3 + $0x18] sm:$0xff] }
 0x2c3   : > { %v1657_v47 = vpop.xlane.xlu0 %1656  ;;  %v1614_v46 = vmul.f32 %v4119_v11, %v1582_v7 }
 0x2c4   : > { %v1743_v36 = vadd.f32 %v1657_v47, %v1615_v5 }
 0x2c6   : > { %1776 = vst.msk [vmem:[#allocation3 + $0x20] sm:$0xff] %vm454_vm1, %v1743_v36  ;;  %v1593_v36 = vld [vmem:[#allocation3 + $0x70] sm:$0xff] }
 0x2c7   : > { %v1675_v62 = vpop.xlane.xlu0 %1674 }
 0x2c8   : > { %v1645_v30 = vpop.xlane.xlu1 %1644  ;;  %v1749_v31 = vadd.f32 %v1675_v62, %v1621_v55  ;;  %v1625_v55 = vmul.f32 %v4193_v10, %v1593_v36  ;;  %v1584_v62 = vld [vmem:[#allocation3 + $0x28] sm:$0xff]  ;;  %v1590_v10 = vld [vmem:[#allocation3 + $0x58] sm:$0xff] }
 0x2c9   : > { %v1739_v22 = vadd.f32 %v1645_v30, %v1611_v29  ;;  %v1616_v7 = vmul.f32 %v4127_v9, %v1584_v62  ;;  %v1622_v36 = vmul.f32 %v4157_v40, %v1590_v10  ;;  %v1588_v9 = vld [vmem:[#allocation3 + $0x48] sm:$0xff] }
 0x2ca   : > { %1782 = vst.msk [vmem:[#allocation3 + $0x50] sm:$0xff] %vm454_vm1, %v1749_v31  ;;  %v1618_v31 = vmul.f32 %v4137_v25, %v1586_v3  ;;  %v2397_v3 = vld [vmem:[#allocation3 + $0x8] sm:$0xff] }
 0x2cb   : > { %1772 = vst.msk [vmem:[#allocation3] sm:$0xff] %vm454_vm1, %v1739_v22  ;;  %v1669_v5 = vpop.xlane.xlu0 %1668  ;;  %v2402_v22 = vld [vmem:[#allocation3 + $0x30] sm:$0xff] }
 0x2cc   : > { %v1654_v47 = vpop.xlane.xlu1 %1653  ;;  %v1747_v51 = vadd.f32 %v1669_v5, %v1619_v18 }
 0x2cd   : > { %v1742_v16 = vadd.f32 %v1654_v47, %v1614_v46  ;;  %v1591_v46 = vld [vmem:[#allocation3 + $0x60] sm:$0xff] }
 0x2ce   : > { %1780 = vst.msk [vmem:[#allocation3 + $0x40] sm:$0xff] %vm454_vm1, %v1747_v51  ;;  %v1623_v47 = vmul.f32 %v4183_v21, %v1591_v46  ;;  %v1620_v21 = vmul.f32 %v4147_v35, %v1588_v9 }
 0x2cf   : > { %v3223_v0 = vpop.eup %3222  ;;  %1775 = vst.msk [vmem:[#allocation3 + $0x18] sm:$0xff] %vm454_vm1, %v1742_v16  ;;  %v1687_v29 = vpop.xlane.xlu0 %1686 }
 0x2d0   : > { %2472 = vperm.xlu1 %3073, %v3223_v0   ;;  %v1666_v15 = vpop.xlane.xlu1 %1665  ;;  %v1753_v11 = vadd.f32 %v1687_v29, %v1625_v55  ;;  %v1597_v0 = vld [vmem:[#allocation3 + $0x90] sm:$0xff]  ;;  %v2400_v55 = vld [vmem:[#allocation3 + $0x20] sm:$0xff] }
 0x2d1   : > { %v1746_v30 = vadd.f32 %v1666_v15, %v1618_v31  ;;  %v1629_v15 = vmul.f32 %v4209_v56, %v1597_v0  ;;  %v2406_v40 = vld [vmem:[#allocation3 + $0x50] sm:$0xff] }
 0x2d2   : > { %v2396_v44 = vld [vmem:[#allocation3] sm:$0xff]  ;;  %1786 = vst.msk [vmem:[#allocation3 + $0x70] sm:$0xff] %vm454_vm1, %v1753_v11 }
 0x2d3   : > { %1779 = vst.msk [vmem:[#allocation3 + $0x38] sm:$0xff] %vm454_vm1, %v1746_v30  ;;  %3224 = vrcp.f32 %v2396_v44  ;;  %v1595_v30 = vld [vmem:[#allocation3 + $0x80] sm:$0xff]  ;;  %v1594_v44 = vld [vmem:[#allocation3 + $0x78] sm:$0xff] }
 0x2d4   : > { %v1660_v18 = vpop.xlane.xlu1 %1659  ;;  %3226 = vrcp.f32 %v2402_v22  ;;  %v1627_v46 = vmul.f32 %v4201_v26, %v1595_v30  ;;  %v1626_v56 = vmul.f32 %v4177_v6, %v1594_v44  ;;  %v2043_v44 = vld [vmem:[#allocation4 + $0x10] sm:$0xff] }
 0x2d5   : > { %v1744_v5 = vadd.f32 %v1660_v18, %v1616_v7  ;;  %v2404_v10 = vld [vmem:[#allocation3 + $0x40] sm:$0xff] }
 0x2d6   : > { %v2399_v25 = vld [vmem:[#allocation3 + $0x18] sm:$0xff] }
 0x2d7   : > { %1777 = vst.msk [vmem:[#allocation3 + $0x28] sm:$0xff] %vm454_vm1, %v1744_v5  ;;  %3228 = vrcp.f32 %v2399_v25  ;;  %v1681_v51 = vpop.xlane.xlu0 %1680  ;;  %v1601_v25 = vld [vmem:[#allocation3 + $0xb0] sm:$0xff] }
 0x2d8   : > { %v1678_v16 = vpop.xlane.xlu1 %1677  ;;  %v1751_v31 = vadd.f32 %v1681_v51, %v1623_v47  ;;  %3230 = vrcp.f32 %v2397_v3  ;;  %v1592_v47 = vld [vmem:[#allocation3 + $0x68] sm:$0xff]  ;;  %v1633_v26 = vmul.f32 %v4225_v58, %v1601_v25 }
 0x2d9   : > { %v1750_v29 = vadd.f32 %v1678_v16, %v1622_v36  ;;  %3232 = vrcp.f32 %v2400_v55  ;;  %v1624_v6 = vmul.f32 %v4167_v24, %v1592_v47  ;;  %v2410_v9 = vld [vmem:[#allocation3 + $0x70] sm:$0xff]  ;;  %v1596_v25 = vld [vmem:[#allocation3 + $0x88] sm:$0xff]  ;;  %v2041_v47 = vld [vmem:[#allocation4] sm:$0xff] }
 0x2da   : > { %1784 = vst.msk [vmem:[#allocation3 + $0x60] sm:$0xff] %vm454_vm1, %v1751_v31  ;;  %v2403_v7 = vld [vmem:[#allocation3 + $0x38] sm:$0xff]  ;;  %3234 = vrcp.f32 %v2406_v40 }
 0x2db   : > { %1783 = vst.msk [vmem:[#allocation3 + $0x58] sm:$0xff] %vm454_vm1, %v1750_v29  ;;  %v1699_v62 = vpop.xlane.xlu0 %1698  ;;  %3236 = vrcp.f32 %v2403_v7  ;;  %v1599_v29 = vld [vmem:[#allocation3 + $0xa0] sm:$0xff] }
 0x2dc   : > { %v1672_v11 = vpop.xlane.xlu1 %1671  ;;  %v1757_v22 = vadd.f32 %v1699_v62, %v1629_v15  ;;  %3238 = vrcp.f32 %v2404_v10  ;;  %v1598_v15 = vld [vmem:[#allocation3 + $0x98] sm:$0xff]  ;;  %v1631_v24 = vmul.f32 %v4217_v39, %v1599_v29 }
 0x2dd   : > { %v1748_v18 = vadd.f32 %v1672_v11, %v1620_v21  ;;  %v1630_v58 = vmul.f32 %v4197_v32, %v1598_v15 }
 0x2de   : > { %1790 = vst.msk [vmem:[#allocation3 + $0x90] sm:$0xff] %vm454_vm1, %v1757_v22  ;;  %v2401_v3 = vld [vmem:[#allocation3 + $0x28] sm:$0xff] }
 0x2df   : > { %1781 = vst.msk [vmem:[#allocation3 + $0x48] sm:$0xff] %vm454_vm1, %v1748_v18  ;;  %v1693_v35 = vpop.xlane.xlu0 %1692  ;;  %3240 = vrcp.f32 %v2401_v3  ;;  %v2044_v3 = vld [vmem:[#allocation4 + $0x18] sm:$0xff] }
 0x2e0   : > { %v1690_v5 = vpop.xlane.xlu1 %1689  ;;  %v3225_v36 = vpop.eup %3224  ;;  %v1755_v51 = vadd.f32 %v1693_v35, %v1627_v46  ;;  %3242 = vrcp.f32 %v2410_v9  ;;  %v1605_v46 = vld [vmem:[#allocation3 + $0xd0] sm:$0xff] }
 0x2e1   : > { %v1754_v16 = vadd.f32 %v1690_v5, %v1626_v56  ;;  %2462 = vperm.xlu1 %3073, %v3225_v36   ;;  %v3227_v0 = vpop.eup %3226  ;;  %v2408_v7 = vld [vmem:[#allocation3 + $0x60] sm:$0xff]  ;;  %v2235_v36 = vmul.f32 %v4345_v53, %v2043_v44  ;;  %v1637_v32 = vmul.f32 %v4231_v37, %v1605_v46 }
 0x2e2   : > { %1788 = vst.msk [vmem:[#allocation3 + $0x80] sm:$0xff] %vm454_vm1, %v1755_v51  ;;  %v2407_v40 = vld [vmem:[#allocation3 + $0x58] sm:$0xff] }
 0x2e3   : > { %1787 = vst.msk [vmem:[#allocation3 + $0x78] sm:$0xff] %vm454_vm1, %v1754_v16  ;;  %v1711_v55 = vpop.xlane.xlu0 %1710  ;;  %3244 = vrcp.f32 %v2407_v40  ;;  %v2042_v40 = vld [vmem:[#allocation4 + $0x8] sm:$0xff] }
 0x2e4   : > { %v1684_v31 = vpop.xlane.xlu1 %1683  ;;  %v3229_v21 = vpop.eup %3228  ;;  %v1761_v62 = vadd.f32 %v1711_v55, %v1633_v26  ;;  %3246 = vrcp.f32 %v2408_v7  ;;  %v2233_v55 = vmul.f32 %v4255_v38, %v2041_v47 }
 0x2e5   : > { %v1752_v11 = vadd.f32 %v1684_v31, %v1624_v6  ;;  %2492 = vperm.xlu1 %3073, %v3227_v0   ;;  %2477 = vperm.xlu0 %3072, %v3229_v21   ;;  %v3231_v30 = vpop.eup %3230  ;;  %v2414_v51 = vld [vmem:[#allocation3 + $0x90] sm:$0xff]  ;;  %v1628_v6 = vmul.f32 %v4187_v49, %v1596_v25  ;;  %v1603_v0 = vld [vmem:[#allocation3 + $0xc0] sm:$0xff]  ;;  %v1602_v21 = vld [vmem:[#allocation3 + $0xb8] sm:$0xff] }
 0x2e6   : > { %1794 = vst.msk [vmem:[#allocation3 + $0xb0] sm:$0xff] %vm454_vm1, %v1761_v62  ;;  %v3233_v56 = vpop.eup %3232  ;;  %v2405_v10 = vld [vmem:[#allocation3 + $0x48] sm:$0xff]  ;;  %v1635_v38 = vmul.f32 %v4238_v54, %v1603_v0  ;;  %v1634_v7 = vmul.f32 %v4205_v48, %v1602_v21  ;;  %v1606_v0 = vld [vmem:[#allocation3 + $0xd8] sm:$0xff] }
 0x2e7   : > { %1785 = vst.msk [vmem:[#allocation3 + $0x68] sm:$0xff] %vm454_vm1, %v1752_v11  ;;  %v1705_v22 = vpop.xlane.xlu0 %1704  ;;  %v3235_v39 = vpop.eup %3234  ;;  %3248 = vrcp.f32 %v2405_v10  ;;  %v2236_v11 = vmul.f32 %v4333_v52, %v2044_v3  ;;  %v2234_v52 = vmul.f32 %v4272_v34, %v2042_v40  ;;  %v1600_v54 = vld [vmem:[#allocation3 + $0xa8] sm:$0xff]  ;;  %v1607_v3 = vld [vmem:[#allocation3 + $0xe0] sm:$0xff] }
 0x2e8   : > { %v1702_v18 = vpop.xlane.xlu1 %1701  ;;  %v1759_v35 = vadd.f32 %v1705_v22, %v1631_v24  ;;  %v3237_v9 = vpop.eup %3236  ;;  %3250 = vrcp.f32 %v2414_v51  ;;  %v1609_v22 = vld [vmem:[#allocation3 + $0xf0] sm:$0xff] }
 0x2e9   : > { %v1758_v5 = vadd.f32 %v1702_v18, %v1630_v58  ;;  %2482 = vperm.xlu1 %3073, %v3233_v56   ;;  %2467 = vperm.xlu0 %3072, %v3231_v30   ;;  %v3239_v24 = vpop.eup %3238  ;;  %v2412_v58 = vld [vmem:[#allocation3 + $0x80] sm:$0xff]  ;;  %v1641_v47 = vmul.f32 %v4243_v12, %v1609_v22  ;;  %v1639_v12 = vmul.f32 %v4247_v50, %v1607_v3 }
 0x2ea   : > { %1792 = vst.msk [vmem:[#allocation3 + $0xa0] sm:$0xff] %vm454_vm1, %v1759_v35  ;;  %v2411_v53 = vld [vmem:[#allocation3 + $0x78] sm:$0xff] }
 0x2eb   : > { %1791 = vst.msk [vmem:[#allocation3 + $0x98] sm:$0xff] %vm454_vm1, %v1758_v5  ;;  %v1723_v16 = vpop.xlane.xlu0 %1722  ;;  %3252 = vrcp.f32 %v2411_v53  ;;  %v2047_v53 = vld [vmem:[#allocation4 + $0x30] sm:$0xff] }
 0x2ec   : > { %v2997_v26 = vpop.f32.mrf.mxu1  ;;  %v1765_v31 = vadd.f32 %v1723_v16, %v1637_v32  ;;  %v1696_v15 = vpop.xlane.xlu1 %1695  ;;  %3254 = vrcp.f32 %v2412_v58  ;;  %v2239_v50 = vmul.f32 %v4361_v17, %v2047_v53  ;;  %v2046_v17 = vld [vmem:[#allocation4 + $0x28] sm:$0xff] }
 0x2ed   : > { %v2267_v29 = vadd.f32 %v2997_v26, %v2235_v36  ;;  %v1756_v62 = vadd.f32 %v1696_v15, %v1628_v6  ;;  %2512 = vperm.xlu1 %3073, %v3235_v39   ;;  %2497 = vperm.xlu0 %3072, %v3237_v9   ;;  %v3241_v18 = vpop.eup %3240  ;;  %v2418_v36 = vld [vmem:[#allocation3 + $0xb0] sm:$0xff]  ;;  %v1632_v39 = vmul.f32 %v4213_v57, %v1600_v54 }
 0x2ee   : > { %v1914_v37 = vpop.f32.mrf.mxu1  ;;  %1798 = vst.msk [vmem:[#allocation3 + $0xd0] sm:$0xff] %vm454_vm1, %v1765_v31  ;;  %v2409_v46 = vld [vmem:[#allocation3 + $0x68] sm:$0xff]  ;;  %v3243_v34 = vpop.eup %3242 }
 0x2ef   : > { %2299 = vst.msk [vmem:[#allocation4 + $0x10] sm:$0xff] %vm519_vm0, %v2267_v29  ;;  %v2265_v49 = vadd.f32 %v2233_v55, %v1914_v37  ;;  %v1717_v30 = vpop.xlane.xlu0 %1716  ;;  %3256 = vrcp.f32 %v2409_v46  ;;  %v1638_v29 = vmul.f32 %v4221_v41, %v1606_v0  ;;  %v1604_v37 = vld [vmem:[#allocation3 + $0xc8] sm:$0xff]  ;;  %v1610_v46 = vld [vmem:[#allocation3 + $0xf8] sm:$0xff] }
 0x2f0   : > { %1789 = vst.msk [vmem:[#allocation3 + $0x88] sm:$0xff] %vm454_vm1, %v1756_v62  ;;  %v2998_v44 = vpop.f32.mrf.mxu1  ;;  %v1763_v56 = vadd.f32 %v1717_v30, %v1635_v38  ;;  %v1714_v35 = vpop.xlane.xlu1 %1713  ;;  %3258 = vrcp.f32 %v2418_v36  ;;  %v1636_v30 = vmul.f32 %v4227_v28, %v1604_v37 }
 0x2f1   : > { %2297 = vst.msk [vmem:[#allocation4] sm:$0xff] %vm519_vm0, %v2265_v49  ;;  %v2268_v10 = vadd.f32 %v2998_v44, %v2236_v11  ;;  %v1762_v5 = vadd.f32 %v1714_v35, %v1634_v7  ;;  %2502 = vperm.xlu1 %3073, %v3239_v24   ;;  %2487 = vperm.xlu0 %3072, %v3241_v18   ;;  %v3245_v51 = vpop.eup %3244  ;;  %v2416_v31 = vld [vmem:[#allocation3 + $0xa0] sm:$0xff]  ;;  %v2048_v24 = vld [vmem:[#allocation4 + $0x38] sm:$0xff] }
 0x2f2   : > { %v1917_v25 = vpop.f32.mrf.mxu1  ;;  %1796 = vst.msk [vmem:[#allocation3 + $0xc0] sm:$0xff] %vm454_vm1, %v1763_v56  ;;  %v2415_v16 = vld [vmem:[#allocation3 + $0x98] sm:$0xff]  ;;  %v3247_v55 = vpop.eup %3246  ;;  %v2045_v11 = vld [vmem:[#allocation4 + $0x20] sm:$0xff]  ;;  %v2240_v35 = vmul.f32 %v4348_v27, %v2048_v24 }
 0x2f3   : > { %2300 = vst.msk [vmem:[#allocation4 + $0x18] sm:$0xff] %vm519_vm0, %v2268_v10  ;;  %v2266_v48 = vadd.f32 %v2234_v52, %v1917_v25  ;;  %v1735_v32 = vpop.xlane.xlu0 %1734  ;;  %3260 = vrcp.f32 %v2415_v16  ;;  %v2237_v7 = vmul.f32 %v4355_v63, %v2045_v11  ;;  %v1642_v25 = vmul.f32 %v4369_v13, %v1610_v46  ;;  %v2049_v16 = vld [vmem:[#allocation4 + $0x40] sm:$0xff] }
 0x2f4   : > { %1795 = vst.msk [vmem:[#allocation3 + $0xb8] sm:$0xff] %vm454_vm1, %v1762_v5  ;;  %v1769_v26 = vadd.f32 %v1735_v32, %v1641_v47  ;;  %v1708_v6 = vpop.xlane.xlu1 %1707  ;;  %v3249_v15 = vpop.eup %3248  ;;  %3262 = vrcp.f32 %v2416_v31  ;;  %v2238_v47 = vmul.f32 %v4341_v19, %v2046_v17 }
 0x2f5   : > { %2298 = vst.msk [vmem:[#allocation4 + $0x8] sm:$0xff] %vm519_vm0, %v2266_v48  ;;  %v1760_v9 = vadd.f32 %v1708_v6, %v1632_v39  ;;  %2532 = vperm.xlu1 %3073, %v3243_v34   ;;  %2517 = vperm.xlu0 %3072, %v3245_v51   ;;  %v3251_v38 = vpop.eup %3250  ;;  %v2422_v58 = vld [vmem:[#allocation3 + $0xd0] sm:$0xff]  ;;  %v1608_v39 = vld [vmem:[#allocation3 + $0xe8] sm:$0xff] }
 0x2f6   : > { %1802 = vst.msk [vmem:[#allocation3 + $0xf0] sm:$0xff] %vm454_vm1, %v1769_v26  ;;  %v2051_v34 = vld [vmem:[#allocation4 + $0x50] sm:$0xff]  ;;  %v1640_v0 = vmul.f32 %v4233_v23, %v1608_v39 }
 0x2f7   : > { %1793 = vst.msk [vmem:[#allocation3 + $0xa8] sm:$0xff] %vm454_vm1, %v1760_v9  ;;  %v1729_v57 = vpop.xlane.xlu0 %1728  ;;  %v2413_v21 = vld [vmem:[#allocation3 + $0x88] sm:$0xff]  ;;  %v2243_v6 = vmul.f32 %v4372_v43, %v2051_v34  ;;  %v2057_v34 = vld [vmem:[#allocation4 + $0x80] sm:$0xff] }
 0x2f8   : > { %v1767_v40 = vadd.f32 %v1729_v57, %v1639_v12  ;;  %v1726_v62 = vpop.xlane.xlu1 %1725  ;;  %3264 = vrcp.f32 %v2413_v21  ;;  %v3253_v44 = vpop.eup %3252  ;;  %v2052_v12 = vld [vmem:[#allocation4 + $0x58] sm:$0xff]  ;;  %v2241_v57 = vmul.f32 %v4365_v20, %v2049_v16  ;;  %v2050_v43 = vld [vmem:[#allocation4 + $0x48] sm:$0xff]  ;;  %v2249_v16 = vmul.f32 %v4384_v33, %v2057_v34 }
 0x2f9   : > { %v1766_v49 = vadd.f32 %v1726_v62, %v1638_v29  ;;  %2522 = vperm.xlu1 %3073, %v3247_v55   ;;  %2507 = vperm.xlu0 %3072, %v3249_v15   ;;  %3266 = vrcp.f32 %v2422_v58  ;;  %v3255_v5 = vpop.eup %3254  ;;  %v2420_v28 = vld [vmem:[#allocation3 + $0xc0] sm:$0xff]  ;;  %v2244_v62 = vmul.f32 %v4363_v14, %v2052_v12 }
 0x2fa   : > { %1800 = vst.msk [vmem:[#allocation3 + $0xe0] sm:$0xff] %vm454_vm1, %v1767_v40  ;;  %v4732_v12 = vld [vmem:[#allocation6_spill] sm:$0xff] }
 0x2fb   : > { %1799 = vst.msk [vmem:[#allocation3 + $0xd8] sm:$0xff] %vm454_vm1, %v1766_v49  ;;  %v2419_v22 = vld [vmem:[#allocation3 + $0xb8] sm:$0xff] }
 0x2fc   : > { %v3001_v41 = vpop.f32.mrf.mxu1  ;;  %v1720_v52 = vpop.xlane.xlu1 %1719  ;;  %3268 = vrcp.f32 %v2419_v22 }
 0x2fd   : > { %v2271_v18 = vadd.f32 %v3001_v41, %v2239_v50  ;;  %v1764_v56 = vadd.f32 %v1720_v52, %v1636_v30  ;;  %2552 = vperm.xlu1 %3073, %v3251_v38   ;;  %2537 = vperm.xlu0 %3072, %v3253_v44   ;;  %v3257_v48 = vpop.eup %3256  ;;  %3270 = vrcp.f32 %v2420_v28  ;;  %v2426_v23 = vld [vmem:[#allocation3 + $0xf0] sm:$0xff]  ;;  %v2242_v50 = vmul.f32 %v4358_v45, %v2050_v43  ;;  %v2053_v44 = vld [vmem:[#allocation4 + $0x60] sm:$0xff]  ;;  %v2056_v52 = vld [vmem:[#allocation4 + $0x78] sm:$0xff] }
 0x2fe   : > { %v1930_v10 = vpop.f32.mrf.mxu1  ;;  %v2417_v36 = vld [vmem:[#allocation3 + $0xa8] sm:$0xff]  ;;  %v3259_v13 = vpop.eup %3258  ;;  %v2055_v30 = vld [vmem:[#allocation4 + $0x70] sm:$0xff]  ;;  %v2248_v28 = vmul.f32 %v4374_v2, %v2056_v52  ;;  %v2064_v43 = vld [vmem:[#allocation4 + $0xb8] sm:$0xff] }
 0x2ff   : > { %2303 = vst.msk [vmem:[#allocation4 + $0x30] sm:$0xff] %vm519_vm0, %v2271_v18  ;;  %v2269_v54 = vadd.f32 %v2237_v7, %v1930_v10  ;;  %3272 = vrcp.f32 %v2417_v36  ;;  %v2247_v22 = vmul.f32 %v4380_v61, %v2055_v30  ;;  %v2065_v30 = vld [vmem:[#allocation4 + $0xc0] sm:$0xff] }
 0x300   : > { %1797 = vst.msk [vmem:[#allocation3 + $0xc8] sm:$0xff] %vm454_vm1, %v1764_v56  ;;  %v3002_v63 = vpop.f32.mrf.mxu1  ;;  %v1738_v32 = vpop.xlane.xlu1 %1737  ;;  %v2245_v56 = vmul.f32 %v4376_v1, %v2053_v44 }
 0x301   : > { %2301 = vst.msk [vmem:[#allocation4 + $0x20] sm:$0xff] %vm519_vm0, %v2269_v54  ;;  %v2272_v27 = vadd.f32 %v3002_v63, %v2240_v35  ;;  %v1770_v3 = vadd.f32 %v1738_v32, %v1642_v25  ;;  %2542 = vperm.xlu1 %3073, %v3255_v5   ;;  %2527 = vperm.xlu0 %3072, %v3257_v48   ;;  %v2424_v19 = vld [vmem:[#allocation3 + $0xe0] sm:$0xff]  ;;  %v3261_v9 = vpop.eup %3260  ;;  %v2054_v35 = vld [vmem:[#allocation4 + $0x68] sm:$0xff]  ;;  %v2059_v25 = vld [vmem:[#allocation4 + $0x90] sm:$0xff] }
 0x302   : > { %v1933_v51 = vpop.f32.mrf.mxu1  ;;  %v2423_v55 = vld [vmem:[#allocation3 + $0xd8] sm:$0xff]  ;;  %3274 = vrcp.f32 %v2424_v19  ;;  %v3263_v40 = vpop.eup %3262  ;;  %v2251_v32 = vmul.f32 %v4388_v42, %v2059_v25 }
 0x303   : > { %2304 = vst.msk [vmem:[#allocation4 + $0x38] sm:$0xff] %vm519_vm0, %v2272_v27  ;;  %v2270_v26 = vadd.f32 %v2238_v47, %v1933_v51  ;;  %3276 = vrcp.f32 %v2423_v55  ;;  %v2246_v47 = vmul.f32 %v4367_v4, %v2054_v35  ;;  %v4738_v35 = vld [vmem:[#allocation10_spill] sm:$0xff] }
 0x304   : > { %1803 = vst.msk [vmem:[#allocation3 + $0xf8] sm:$0xff] %vm454_vm1, %v1770_v3  ;;  %v3005_v53 = vpop.f32.mrf.mxu1  ;;  %v1732_v31 = vpop.xlane.xlu1 %1731  ;;  %3278 = vrcp.f32 %v2426_v23  ;;  %v2060_v3 = vld [vmem:[#allocation4 + $0x98] sm:$0xff] }
 0x305   : > { %2302 = vst.msk [vmem:[#allocation4 + $0x28] sm:$0xff] %vm519_vm0, %v2270_v26  ;;  %v2275_v29 = vadd.f32 %v3005_v53, %v2243_v6  ;;  %v1768_v15 = vadd.f32 %v1732_v31, %v1640_v0  ;;  %2572 = vperm.xlu1 %3073, %v3259_v13   ;;  %2557 = vperm.xlu0 %3072, %v3261_v9   ;;  %v3265_v11 = vpop.eup %3264  ;;  %v2058_v26 = vld [vmem:[#allocation4 + $0x88] sm:$0xff]  ;;  %v2063_v0 = vld [vmem:[#allocation4 + $0xb0] sm:$0xff]  ;;  %v2061_v53 = vld [vmem:[#allocation4 + $0xa0] sm:$0xff] }
 0x306   : > { %v1946_v21 = vpop.f32.mrf.mxu1  ;;  %v3267_v14 = vpop.eup %3266  ;;  %v2252_v6 = vmul.f32 %v4382_v8, %v2060_v3  ;;  %v2250_v55 = vmul.f32 %v4732_v12, %v2058_v26 }
 0x307   : > { %2307 = vst.msk [vmem:[#allocation4 + $0x50] sm:$0xff] %vm519_vm0, %v2275_v29  ;;  %v2273_v37 = vadd.f32 %v2241_v57, %v1946_v21  ;;  %v2421_v49 = vld [vmem:[#allocation3 + $0xc8] sm:$0xff] }
 0x308   : > { %1801 = vst.msk [vmem:[#allocation3 + $0xe8] sm:$0xff] %vm454_vm1, %v1768_v15  ;;  %v3006_v20 = vpop.f32.mrf.mxu1  ;;  %3280 = vrcp.f32 %v2421_v49  ;;  %v4733_v57 = vld [vmem:[#allocation11_spill] sm:$0xff]  ;;  %vm2684_vm1 = vcmask 257024  }
 0x309   : > { %2305 = vst.msk [vmem:[#allocation4 + $0x40] sm:$0xff] %vm519_vm0, %v2273_v37  ;;  %v2276_v38 = vadd.f32 %v3006_v20, %v2244_v62  ;;  %2562 = vperm.xlu1 %3073, %v3263_v40   ;;  %2547 = vperm.xlu0 %3072, %v3265_v11   ;;  %v3269_v41 = vpop.eup %3268  ;;  %v2255_v29 = vmul.f32 %v4733_v57, %v2063_v0  ;;  %v4734_v40 = vld [vmem:[#allocation9_spill] sm:$0xff]  ;;  %v2062_v37 = vld [vmem:[#allocation4 + $0xa8] sm:$0xff] }
 0x30a   : > { %v1949_v24 = vpop.f32.mrf.mxu1  ;;  %v3271_v7 = vpop.eup %3270  ;;  %v2253_v62 = vmul.f32 %v4734_v40, %v2061_v53  ;;  %v4735_v49 = vld [vmem:[#allocation7_spill] sm:$0xff]  ;;  %v2364_v53 = vld [vmem:[#allocation4] sm:$0xff] }
 0x30b   : > { %2308 = vst.msk [vmem:[#allocation4 + $0x58] sm:$0xff] %vm519_vm0, %v2276_v38  ;;  %v2274_v58 = vadd.f32 %v2242_v50, %v1949_v24  ;;  %v2427_v46 = vld [vmem:[#allocation3 + $0xf8] sm:$0xff]  ;;  %v2256_v20 = vmul.f32 %v4735_v49, %v2064_v43  ;;  %v2067_v38 = vld [vmem:[#allocation4 + $0xd0] sm:$0xff] }
 0x30c   : > { %v3273_v18 = vpop.eup %3272  ;;  %v2370_v43 = vld [vmem:[#allocation4 + $0x30] sm:$0xff] }
 0x30d   : > { %2306 = vst.msk [vmem:[#allocation4 + $0x48] sm:$0xff] %vm519_vm0, %v2274_v58  ;;  %2592 = vperm.xlu1 %3073, %v3267_v14   ;;  %2577 = vperm.xlu0 %3072, %v3269_v41   ;;  %v4736_v14 = vld [vmem:[#allocation8_spill] sm:$0xff] }
 0x30e   : > { %v2254_v58 = vmul.f32 %v4736_v14, %v2062_v37 }
 0x30f   : > { %v2425_v45 = vld [vmem:[#allocation3 + $0xe8] sm:$0xff]  ;;  %v3275_v5 = vpop.eup %3274 }
 0x310   : > { %3282 = vrcp.f32 %v2425_v45  ;;  %v3009_v17 = vpop.f32.mrf.mxu1  ;;  %v3277_v61 = vpop.eup %3276  ;;  %v4737_v45 = vld [vmem:[#allocation12_spill] sm:$0xff] }
 0x311   : > { %v2279_v10 = vadd.f32 %v3009_v17, %v2247_v22  ;;  %2582 = vperm.xlu1 %3073, %v3271_v7   ;;  %2567 = vperm.xlu0 %3072, %v3273_v18   ;;  %3284 = vrcp.f32 %v2427_v46  ;;  %v3279_v27 = vpop.eup %3278  ;;  %v2259_v7 = vmul.f32 %v4737_v45, %v2067_v38  ;;  %v2068_v18 = vld [vmem:[#allocation4 + $0xd8] sm:$0xff]  ;;  %v2257_v46 = vmul.f32 %v4405_v60, %v2065_v30 }
 0x312   : > { %v1962_v54 = vpop.f32.mrf.mxu1  ;;  %v4740_v60 = vld [vmem:[#allocation13_spill] sm:$0xff] }
 0x313   : > { %2311 = vst.msk [vmem:[#allocation4 + $0x70] sm:$0xff] %vm519_vm0, %v2279_v10  ;;  %v2277_v63 = vadd.f32 %v2245_v56, %v1962_v54  ;;  %v2066_v56 = vld [vmem:[#allocation4 + $0xc8] sm:$0xff]  ;;  %v2260_v54 = vmul.f32 %v4738_v35, %v2068_v18 }
 0x314   : > { %v3010_v48 = vpop.f32.mrf.mxu1 }
 0x315   : > { %2309 = vst.msk [vmem:[#allocation4 + $0x60] sm:$0xff] %vm519_vm0, %v2277_v63  ;;  %v2280_v1 = vadd.f32 %v3010_v48, %v2248_v28  ;;  %2602 = vperm.xlu1 %3073, %v3275_v5   ;;  %2597 = vperm.xlu0 %3072, %v3277_v61   ;;  %v3281_v39 = vpop.eup %3280  ;;  %v2071_v28 = vld [vmem:[#allocation4 + $0xf0] sm:$0xff]  ;;  %v4739_v61 = vld [vmem:[#allocation15_spill] sm:$0xff] }
 0x316   : > { %v1965_v36 = vpop.f32.mrf.mxu1  ;;  %v2258_v25 = vmul.f32 %v4739_v61, %v2066_v56  ;;  %v2263_v34 = vmul.f32 %v4740_v60, %v2071_v28  ;;  %v2372_v56 = vld [vmem:[#allocation4 + $0x40] sm:$0xff] }
 0x317   : > { %2312 = vst.msk [vmem:[#allocation4 + $0x78] sm:$0xff] %vm519_vm0, %v2280_v1  ;;  %v2278_v2 = vadd.f32 %v2246_v47, %v1965_v36  ;;  %v2069_v47 = vld [vmem:[#allocation4 + $0xe0] sm:$0xff] }
 0x318   : > { %v3013_v51 = vpop.f32.mrf.mxu1 }
 0x319   : > { %2310 = vst.msk [vmem:[#allocation4 + $0x68] sm:$0xff] %vm519_vm0, %v2278_v2  ;;  %v2283_v4 = vadd.f32 %v3013_v51, %v2251_v32  ;;  %2612 = vperm.xlu1 %3073, %v3279_v27   ;;  %2587 = vperm.xlu0 %3072, %v3281_v39   ;;  %v2072_v27 = vld [vmem:[#allocation4 + $0xf8] sm:$0xff]  ;;  %v2231_v32 = vpop.permute.xlu0 %2230  ;;  %v2261_v39 = vmul.f32 %v4415_v59, %v2069_v47  ;;  %v2070_v51 = vld [vmem:[#allocation4 + $0xe8] sm:$0xff] }
 0x31a   : > { %v1978_v13 = vpop.f32.mrf.mxu1 }
 0x31b   : > { %2315 = vst.msk [vmem:[#allocation4 + $0x90] sm:$0xff] %vm519_vm0, %v2283_v4  ;;  %v2281_v42 = vadd.f32 %v2249_v16, %v1978_v13  ;;  %v2264_v4 = vmul.f32 %v2231_v32, %v2072_v27 }
 0x31c   : > { %v3014_v9 = vpop.f32.mrf.mxu1  ;;  %v2376_v32 = vld [vmem:[#allocation4 + $0x60] sm:$0xff] }
 0x31d   : > { %v3283_v19 = vpop.eup %3282  ;;  %2313 = vst.msk [vmem:[#allocation4 + $0x80] sm:$0xff] %vm519_vm0, %v2281_v42  ;;  %v2284_v33 = vadd.f32 %v3014_v9, %v2252_v6  ;;  %v4741_v6 = vld [vmem:[#allocation14_spill] sm:$0xff]  ;;  %v2366_v9 = vld [vmem:[#allocation4 + $0x10] sm:$0xff] }
 0x31e   : > { %2607 = vperm.xlu0 %3072, %v3283_v19   ;;  %v1981_v31 = vpop.f32.mrf.mxu1  ;;  %v3285_v8 = vpop.eup %3284  ;;  %v2262_v42 = vmul.f32 %v4741_v6, %v2070_v51 }
 0x31f   : > { %2316 = vst.msk [vmem:[#allocation4 + $0x98] sm:$0xff] %vm519_vm0, %v2284_v33  ;;  %v2282_v15 = vadd.f32 %v2250_v55, %v1981_v31 }
 0x320   : > { %v3017_v21 = vpop.f32.mrf.mxu1 }
 0x321   : > { %2314 = vst.msk [vmem:[#allocation4 + $0x88] sm:$0xff] %vm519_vm0, %v2282_v15  ;;  %v2287_v23 = vadd.f32 %v3017_v21, %v2255_v29  ;;  %v2367_v15 = vld [vmem:[#allocation4 + $0x18] sm:$0xff] }
 0x322   : > { %2617 = vperm.xlu0 %3072, %v3285_v8   ;;  %v1994_v11 = vpop.f32.mrf.mxu1 }
 0x323   : > { %2319 = vst.msk [vmem:[#allocation4 + $0xb0] sm:$0xff] %vm519_vm0, %v2287_v23  ;;  %v2285_v50 = vadd.f32 %v2253_v62, %v1994_v11  ;;  %v2365_v11 = vld [vmem:[#allocation4 + $0x8] sm:$0xff] }
 0x324   : > { %v3018_v24 = vpop.f32.mrf.mxu1 }
 0x325   : > { %2317 = vst.msk [vmem:[#allocation4 + $0xa0] sm:$0xff] %vm519_vm0, %v2285_v50  ;;  %v2288_v41 = vadd.f32 %v3018_v24, %v2256_v20  ;;  %v2368_v20 = vld [vmem:[#allocation4 + $0x20] sm:$0xff] }
 0x326   : > { %v1997_v44 = vpop.f32.mrf.mxu1 }
 0x327   : > { %2320 = vst.msk [vmem:[#allocation4 + $0xb8] sm:$0xff] %vm519_vm0, %v2288_v41  ;;  %v2286_v22 = vadd.f32 %v2254_v58, %v1997_v44  ;;  %v2371_v41 = vld [vmem:[#allocation4 + $0x38] sm:$0xff]  ;;  %v2374_v44 = vld [vmem:[#allocation4 + $0x50] sm:$0xff] }
 0x328   : > { %v3021_v52 = vpop.f32.mrf.mxu1 }
 0x329   : > { %2318 = vst.msk [vmem:[#allocation4 + $0xa8] sm:$0xff] %vm519_vm0, %v2286_v22  ;;  %v2291_v17 = vadd.f32 %v3021_v52, %v2259_v7 }
 0x32a   : > { %v2010_v10 = vpop.f32.mrf.mxu1 }
 0x32b   : > { %2323 = vst.msk [vmem:[#allocation4 + $0xd0] sm:$0xff] %vm519_vm0, %v2291_v17  ;;  %v2289_v5 = vadd.f32 %v2257_v46, %v2010_v10  ;;  %v2369_v46 = vld [vmem:[#allocation4 + $0x28] sm:$0xff] }
 0x32c   : > { %v3022_v63 = vpop.f32.mrf.mxu1 }
 0x32d   : > { %2321 = vst.msk [vmem:[#allocation4 + $0xc0] sm:$0xff] %vm519_vm0, %v2289_v5  ;;  %v2292_v48 = vadd.f32 %v3022_v63, %v2260_v54  ;;  %v2375_v63 = vld [vmem:[#allocation4 + $0x58] sm:$0xff] }
 0x32e   : > { %v2013_v1 = vpop.f32.mrf.mxu1 }
 0x32f   : > { %2324 = vst.msk [vmem:[#allocation4 + $0xd8] sm:$0xff] %vm519_vm0, %v2292_v48  ;;  %v2290_v36 = vadd.f32 %v2258_v25, %v2013_v1  ;;  %v2378_v25 = vld [vmem:[#allocation4 + $0x70] sm:$0xff] }
 0x330   : > { %v3025_v2 = vpop.f32.mrf.mxu1 }
 0x331   : > { %2322 = vst.msk [vmem:[#allocation4 + $0xc8] sm:$0xff] %vm519_vm0, %v2290_v36  ;;  %v2295_v3 = vadd.f32 %v3025_v2, %v2263_v34  ;;  %v2373_v36 = vld [vmem:[#allocation4 + $0x48] sm:$0xff] }
 0x332   : > { %v2026_v16 = vpop.f32.mrf.mxu1 }
 0x333   : > { %2327 = vst.msk [vmem:[#allocation4 + $0xf0] sm:$0xff] %vm519_vm0, %v2295_v3  ;;  %v2293_v26 = vadd.f32 %v2261_v39, %v2026_v16 }
 0x334   : > { %v3026_v13 = vpop.f32.mrf.mxu1 }
 0x335   : > { %2325 = vst.msk [vmem:[#allocation4 + $0xe0] sm:$0xff] %vm519_vm0, %v2293_v26  ;;  %v2296_v19 = vadd.f32 %v3026_v13, %v2264_v4  ;;  %v2379_v4 = vld [vmem:[#allocation4 + $0x78] sm:$0xff]  ;;  %v2382_v13 = vld [vmem:[#allocation4 + $0x90] sm:$0xff] }
 0x336   : > { %v2029_v0 = vpop.f32.mrf.mxu1 }
 0x337   : > { %2328 = vst.msk [vmem:[#allocation4 + $0xf8] sm:$0xff] %vm519_vm0, %v2296_v19  ;;  %v2294_v59 = vadd.f32 %v2262_v42, %v2029_v0 }
 0x339   : > { %2326 = vst.msk [vmem:[#allocation4 + $0xe8] sm:$0xff] %vm519_vm0, %v2294_v59 }
 0x34b   : > { %v2473_v12 = vpop.permute.xlu1 %2472 }
 0x34c   : > { %v2622_v55 = vmul.f32 %v2473_v12, %v2366_v9  ;;  %v2377_v9 = vld [vmem:[#allocation4 + $0x68] sm:$0xff] }
 0x34e   : > { %v2654_v33 = vpack.c.bf16 %v2622_v55, %v2622_v55  ;;  %v2380_v55 = vld [vmem:[#allocation4 + $0x80] sm:$0xff] }
 0x350   : > { %2687 = vst.msk [vmem:[%s4541_s19 + $0x8] sm:$0xf] %vm2684_vm1, %v2654_v33 }
 0x35c   : > { %v2463_v31 = vpop.permute.xlu1 %2462 }
 0x35d   : > { %v2620_v57 = vmul.f32 %v2463_v31, %v2364_v53 }
 0x35f   : > { %v2652_v29 = vpack.c.bf16 %v2620_v57, %v2620_v57 }
 0x360   : > { %v2478_v8 = vpop.permute.xlu0 %2477  ;;  %v2493_v21 = vpop.permute.xlu1 %2492 }
 0x361   : > { %2685 = vst.msk [vmem:[%s4541_s19] sm:$0xf] %vm2684_vm1, %v2652_v29  ;;  %v2623_v40 = vmul.f32 %v2478_v8, %v2367_v15  ;;  %v2626_v62 = vmul.f32 %v2493_v21, %v2370_v43  ;;  %v2383_v15 = vld [vmem:[#allocation4 + $0x98] sm:$0xff]  ;;  %v2386_v43 = vld [vmem:[#allocation4 + $0xb0] sm:$0xff] }
 0x363   : > { %v2655_v23 = vpack.c.bf16 %v2623_v40, %v2623_v40  ;;  %v2658_v37 = vpack.c.bf16 %v2626_v62, %v2626_v62 }
 0x364   : > { %v2468_v49 = vpop.permute.xlu0 %2467  ;;  %v2483_v50 = vpop.permute.xlu1 %2482 }
 0x365   : > { %2688 = vst.msk [vmem:[%s4541_s19 + $0xc] sm:$0xf] %vm2684_vm1, %v2655_v23  ;;  %2691 = vst.msk [vmem:[%s4541_s19 + $0x18] sm:$0xf] %vm2684_vm1, %v2658_v37  ;;  %v2621_v38 = vmul.f32 %v2468_v49, %v2365_v11  ;;  %v2624_v24 = vmul.f32 %v2483_v50, %v2368_v20  ;;  %v2381_v11 = vld [vmem:[#allocation4 + $0x88] sm:$0xff]  ;;  %v2384_v20 = vld [vmem:[#allocation4 + $0xa0] sm:$0xff] }
 0x367   : > { %v2653_v14 = vpack.c.bf16 %v2621_v38, %v2621_v38  ;;  %v2656_v58 = vpack.c.bf16 %v2624_v24, %v2624_v24 }
 0x368   : > { %v2498_v30 = vpop.permute.xlu0 %2497  ;;  %v2513_v45 = vpop.permute.xlu1 %2512 }
 0x369   : > { %2686 = vst.msk [vmem:[%s4541_s19 + $0x4] sm:$0xf] %vm2684_vm1, %v2653_v14  ;;  %2689 = vst.msk [vmem:[%s4541_s19 + $0x10] sm:$0xf] %vm2684_vm1, %v2656_v58  ;;  %v2627_v7 = vmul.f32 %v2498_v30, %v2371_v41  ;;  %v2630_v22 = vmul.f32 %v2513_v45, %v2374_v44  ;;  %v2387_v41 = vld [vmem:[#allocation4 + $0xb8] sm:$0xff]  ;;  %v2390_v44 = vld [vmem:[#allocation4 + $0xd0] sm:$0xff] }
 0x36b   : > { %v2659_v18 = vpack.c.bf16 %v2627_v7, %v2627_v7  ;;  %v2662_v52 = vpack.c.bf16 %v2630_v22, %v2630_v22 }
 0x36c   : > { %v2488_v17 = vpop.permute.xlu0 %2487  ;;  %v2503_v10 = vpop.permute.xlu1 %2502 }
 0x36d   : > { %2692 = vst.msk [vmem:[%s4541_s19 + $0x1c] sm:$0xf] %vm2684_vm1, %v2659_v18  ;;  %2695 = vst.msk [vmem:[%s4541_s19 + $0x28] sm:$0xf] %vm2684_vm1, %v2662_v52  ;;  %v2625_v35 = vmul.f32 %v2488_v17, %v2369_v46  ;;  %v2628_v54 = vmul.f32 %v2503_v10, %v2372_v56  ;;  %v2385_v46 = vld [vmem:[#allocation4 + $0xa8] sm:$0xff]  ;;  %v2388_v56 = vld [vmem:[#allocation4 + $0xc0] sm:$0xff] }
 0x36f   : > { %v2657_v5 = vpack.c.bf16 %v2625_v35, %v2625_v35  ;;  %v2660_v28 = vpack.c.bf16 %v2628_v54, %v2628_v54 }
 0x370   : > { %v2518_v61 = vpop.permute.xlu0 %2517  ;;  %v2533_v48 = vpop.permute.xlu1 %2532 }
 0x371   : > { %2690 = vst.msk [vmem:[%s4541_s19 + $0x14] sm:$0xf] %vm2684_vm1, %v2657_v5  ;;  %2693 = vst.msk [vmem:[%s4541_s19 + $0x20] sm:$0xf] %vm2684_vm1, %v2660_v28  ;;  %v2631_v47 = vmul.f32 %v2518_v61, %v2375_v63  ;;  %v2634_v1 = vmul.f32 %v2533_v48, %v2378_v25  ;;  %v2391_v63 = vld [vmem:[#allocation4 + $0xd8] sm:$0xff]  ;;  %v2392_v25 = vld [vmem:[#allocation4 + $0xe0] sm:$0xff] }
 0x373   : > { %v2663_v60 = vpack.c.bf16 %v2631_v47, %v2631_v47  ;;  %v2666_v34 = vpack.c.bf16 %v2634_v1, %v2634_v1 }
 0x374   : > { %v2508_v27 = vpop.permute.xlu0 %2507  ;;  %v2523_v2 = vpop.permute.xlu1 %2522 }
 0x375   : > { %2696 = vst.msk [vmem:[%s4541_s19 + $0x2c] sm:$0xf] %vm2684_vm1, %v2663_v60  ;;  %2699 = vst.msk [vmem:[%s4541_s19 + $0x38] sm:$0xf] %vm2684_vm1, %v2666_v34  ;;  %v2629_v39 = vmul.f32 %v2508_v27, %v2373_v36  ;;  %v2632_v3 = vmul.f32 %v2523_v2, %v2376_v32  ;;  %v2389_v36 = vld [vmem:[#allocation4 + $0xc8] sm:$0xff]  ;;  %v2394_v32 = vld [vmem:[#allocation4 + $0xf0] sm:$0xff] }
 0x377   : > { %v2661_v51 = vpack.c.bf16 %v2629_v39, %v2629_v39  ;;  %v2664_v16 = vpack.c.bf16 %v2632_v3, %v2632_v3 }
 0x378   : > { %v2538_v26 = vpop.permute.xlu0 %2537  ;;  %v2553_v6 = vpop.permute.xlu1 %2552 }
 0x379   : > { %2694 = vst.msk [vmem:[%s4541_s19 + $0x24] sm:$0xf] %vm2684_vm1, %v2661_v51  ;;  %2697 = vst.msk [vmem:[%s4541_s19 + $0x30] sm:$0xf] %vm2684_vm1, %v2664_v16  ;;  %v2635_v42 = vmul.f32 %v2538_v26, %v2379_v4  ;;  %v2638_v19 = vmul.f32 %v2553_v6, %v2382_v13  ;;  %v2393_v4 = vld [vmem:[#allocation4 + $0xe8] sm:$0xff] }
 0x37b   : > { %v2667_v0 = vpack.c.bf16 %v2635_v42, %v2635_v42  ;;  %v2670_v59 = vpack.c.bf16 %v2638_v19, %v2638_v19  ;;  %v2395_v42 = vld [vmem:[#allocation4 + $0xf8] sm:$0xff] }
 0x37c   : > { %v2528_v12 = vpop.permute.xlu0 %2527  ;;  %v2543_v33 = vpop.permute.xlu1 %2542 }
 0x37d   : > { %2700 = vst.msk [vmem:[%s4541_s19 + $0x3c] sm:$0xf] %vm2684_vm1, %v2667_v0  ;;  %2703 = vst.msk [vmem:[%s4541_s19 + $0x48] sm:$0xf] %vm2684_vm1, %v2670_v59  ;;  %v2633_v53 = vmul.f32 %v2528_v12, %v2377_v9  ;;  %v2636_v31 = vmul.f32 %v2543_v33, %v2380_v55 }
 0x37f   : > { %v2665_v57 = vpack.c.bf16 %v2633_v53, %v2633_v53  ;;  %v2668_v29 = vpack.c.bf16 %v2636_v31, %v2636_v31 }
 0x380   : > { %v2558_v8 = vpop.permute.xlu0 %2557  ;;  %v2573_v21 = vpop.permute.xlu1 %2572 }
 0x381   : > { %2698 = vst.msk [vmem:[%s4541_s19 + $0x34] sm:$0xf] %vm2684_vm1, %v2665_v57  ;;  %2701 = vst.msk [vmem:[%s4541_s19 + $0x40] sm:$0xf] %vm2684_vm1, %v2668_v29  ;;  %v2639_v40 = vmul.f32 %v2558_v8, %v2383_v15  ;;  %v2642_v62 = vmul.f32 %v2573_v21, %v2386_v43 }
 0x383   : > { %v2671_v23 = vpack.c.bf16 %v2639_v40, %v2639_v40  ;;  %v2674_v37 = vpack.c.bf16 %v2642_v62, %v2642_v62 }
 0x384   : > { %v2548_v49 = vpop.permute.xlu0 %2547  ;;  %v2563_v50 = vpop.permute.xlu1 %2562 }
 0x385   : > { %2704 = vst.msk [vmem:[%s4541_s19 + $0x4c] sm:$0xf] %vm2684_vm1, %v2671_v23  ;;  %2707 = vst.msk [vmem:[%s4541_s19 + $0x58] sm:$0xf] %vm2684_vm1, %v2674_v37  ;;  %v2637_v38 = vmul.f32 %v2548_v49, %v2381_v11  ;;  %v2640_v24 = vmul.f32 %v2563_v50, %v2384_v20 }
 0x387   : > { %v2669_v14 = vpack.c.bf16 %v2637_v38, %v2637_v38  ;;  %v2672_v58 = vpack.c.bf16 %v2640_v24, %v2640_v24 }
 0x388   : > { %v2578_v30 = vpop.permute.xlu0 %2577  ;;  %v2593_v45 = vpop.permute.xlu1 %2592 }
 0x389   : > { %2702 = vst.msk [vmem:[%s4541_s19 + $0x44] sm:$0xf] %vm2684_vm1, %v2669_v14  ;;  %2705 = vst.msk [vmem:[%s4541_s19 + $0x50] sm:$0xf] %vm2684_vm1, %v2672_v58  ;;  %v2643_v7 = vmul.f32 %v2578_v30, %v2387_v41  ;;  %v2646_v22 = vmul.f32 %v2593_v45, %v2390_v44 }
 0x38b   : > { %v2675_v18 = vpack.c.bf16 %v2643_v7, %v2643_v7  ;;  %v2678_v52 = vpack.c.bf16 %v2646_v22, %v2646_v22 }
 0x38c   : > { %v2568_v17 = vpop.permute.xlu0 %2567  ;;  %v2583_v10 = vpop.permute.xlu1 %2582 }
 0x38d   : > { %2708 = vst.msk [vmem:[%s4541_s19 + $0x5c] sm:$0xf] %vm2684_vm1, %v2675_v18  ;;  %2711 = vst.msk [vmem:[%s4541_s19 + $0x68] sm:$0xf] %vm2684_vm1, %v2678_v52  ;;  %v2641_v35 = vmul.f32 %v2568_v17, %v2385_v46  ;;  %v2644_v54 = vmul.f32 %v2583_v10, %v2388_v56 }
 0x38f   : > { %v2673_v5 = vpack.c.bf16 %v2641_v35, %v2641_v35  ;;  %v2676_v28 = vpack.c.bf16 %v2644_v54, %v2644_v54 }
 0x390   : > { %v2598_v61 = vpop.permute.xlu0 %2597  ;;  %v2603_v48 = vpop.permute.xlu1 %2602 }
 0x391   : > { %2706 = vst.msk [vmem:[%s4541_s19 + $0x54] sm:$0xf] %vm2684_vm1, %v2673_v5  ;;  %2709 = vst.msk [vmem:[%s4541_s19 + $0x60] sm:$0xf] %vm2684_vm1, %v2676_v28  ;;  %v2647_v47 = vmul.f32 %v2598_v61, %v2391_v63  ;;  %v2648_v1 = vmul.f32 %v2603_v48, %v2392_v25 }
 0x393   : > { %v2679_v60 = vpack.c.bf16 %v2647_v47, %v2647_v47  ;;  %v2680_v34 = vpack.c.bf16 %v2648_v1, %v2648_v1 }
 0x394   : > { %v2588_v27 = vpop.permute.xlu0 %2587  ;;  %v2613_v2 = vpop.permute.xlu1 %2612 }
 0x395   : > { %2712 = vst.msk [vmem:[%s4541_s19 + $0x6c] sm:$0xf] %vm2684_vm1, %v2679_v60  ;;  %2713 = vst.msk [vmem:[%s4541_s19 + $0x70] sm:$0xf] %vm2684_vm1, %v2680_v34  ;;  %v2645_v39 = vmul.f32 %v2588_v27, %v2389_v36  ;;  %v2650_v3 = vmul.f32 %v2613_v2, %v2394_v32 }
 0x397   : > { %v2677_v51 = vpack.c.bf16 %v2645_v39, %v2645_v39  ;;  %v2682_v16 = vpack.c.bf16 %v2650_v3, %v2650_v3 }
 0x399   : > { %v2608_v26 = vpop.permute.xlu0 %2607  ;;  %2710 = vst.msk [vmem:[%s4541_s19 + $0x64] sm:$0xf] %vm2684_vm1, %v2677_v51  ;;  %2715 = vst.msk [vmem:[%s4541_s19 + $0x78] sm:$0xf] %vm2684_vm1, %v2682_v16 }
 0x39a   : > { %v2649_v13 = vmul.f32 %v2608_v26, %v2393_v4 }
 0x39c   : > { %v2681_v6 = vpack.c.bf16 %v2649_v13, %v2649_v13 }
 0x39d   : > { %v2618_v19 = vpop.permute.xlu0 %2617 }
 0x39e   : > { %2714 = vst.msk [vmem:[%s4541_s19 + $0x74] sm:$0xf] %vm2684_vm1, %v2681_v6  ;;  %v2651_v0 = vmul.f32 %v2618_v19, %v2395_v42 }
 0x3a0   : > { %v2683_v59 = vpack.c.bf16 %v2651_v0, %v2651_v0 }
 0x3a2   : > { %2716 = vst.msk [vmem:[%s4541_s19 + $0x7c] sm:$0xf] %vm2684_vm1, %v2683_v59 }
 0x3a3 PF: > { %s13_s16 = sadd.s32 1, %s3324_s16   ;;  %s4742_s12 = smov %s3312_s13 }
 0x3a4   : > { %p10_p10 = scmp.ge.s32.totalorder %s13_s16, 4   ;;  %s4743_s13 = smov %s3384_s20 }
 0x3a5   : > { %s4744_s14 = smov %s3320_s15  ;;  %s4745_s15 = smov %s4747_s17 }
 0x3a6   :  { %12 = sbr.rel (!%p10_p10) target bundleno = 3 (0x3), region = 126 }

// kernel: _lambda_.7
= control target key start
LH: loop header
LB: loop body
LE: loop exit
PB: predicated region body
PF: predicated region fallthrough
CT: control target
= control target key end

     0   :  { %s6160_s0 = inlined_call_operand.vmem [shape: bf16[64,256], index: 0, kind: input, shape index: {}, may-alias: {0,7}]   ;;  %s6161_s1 = inlined_call_operand.vmem [shape: f32[1,256], index: 1, kind: input, shape index: {}]   ;;  %s6162_s2 = inlined_call_operand.vmem [shape: f32[1,256], index: 2, kind: input, shape index: {}]   ;;  %s6163_s3 = inlined_call_operand.vmem [shape: bf16[256,1024], index: 3, kind: input, shape index: {}]   ;;  %s6164_s4 = inlined_call_operand.vmem [shape: f32[1,1024], index: 4, kind: input, shape index: {}]   ;;  %s6165_s5 = inlined_call_operand.vmem [shape: bf16[1024,256], index: 5, kind: input, shape index: {}]   ;;  %s6166_s6 = inlined_call_operand.vmem [shape: f32[1,256], index: 6, kind: input, shape index: {}]   ;;  %s6167_s7 = inlined_call_operand.vmem [shape: bf16[64,256], index: 7, kind: input, shape index: {}, may-alias: {0,7}]   ;;  %s6168_s8 = inlined_call_operand.hbm [shape: bf16[64,256], index: 8, kind: output, shape index: {}]  }
   0x1   :  { %v4040_v0 = vld [vmem:[%s6160_s0] sm:$0xff]  ;;  %v4045_v1 = vld [vmem:[%s6160_s0 + $0x10] sm:$0xff]  ;;  %v4050_v2 = vld [vmem:[%s6160_s0 + $0x8] sm:$0xff] }
   0x2   :  { %v42_v3 = vunpack.c.l.bf16 %v4040_v0  ;;  %v43_v4 = vunpack.c.h.bf16 %v4040_v0  ;;  %v46_v5 = vunpack.c.l.bf16 %v4045_v1  ;;  %v47_v6 = vunpack.c.h.bf16 %v4045_v1  ;;  %v4059_v7 = vld [vmem:[%s6160_s0 + $0x18] sm:$0xff]  ;;  %v4064_v8 = vld [vmem:[%s6160_s0 + $0x20] sm:$0xff]  ;;  %v4073_v13 = vld [vmem:[%s6160_s0 + $0x28] sm:$0xff] }
   0x3   :  { %v44_v9 = vunpack.c.l.bf16 %v4050_v2  ;;  %v45_v10 = vunpack.c.h.bf16 %v4050_v2  ;;  %v48_v11 = vunpack.c.l.bf16 %v4059_v7  ;;  %v49_v12 = vunpack.c.h.bf16 %v4059_v7  ;;  %v4086_v16 = vld [vmem:[%s6160_s0 + $0x30] sm:$0xff]  ;;  %v4093_v19 = vld [vmem:[%s6160_s0 + $0x38] sm:$0xff]  ;;  %v431_v32 = vld [vmem:[%s6163_s3 + $0x1c0] sm:$0xff] }
   0x4   :  { %v58_v14 = vadd.f32 %v43_v4, %v42_v3  ;;  %v64_v15 = vadd.f32 %v47_v6, %v46_v5  ;;  %v50_v17 = vunpack.c.l.bf16 %v4064_v8  ;;  %v51_v18 = vunpack.c.h.bf16 %v4064_v8  ;;  %v435_v33 = vld [vmem:[%s6163_s3 + $0x1e0] sm:$0xff]  ;;  %v432_v34 = vld [vmem:[%s6163_s3 + $0x1c8] sm:$0xff] }
   0x5   :  { %v61_v20 = vadd.f32 %v45_v10, %v44_v9  ;;  %v67_v21 = vadd.f32 %v49_v12, %v48_v11  ;;  %v52_v22 = vunpack.c.l.bf16 %v4073_v13  ;;  %v53_v23 = vunpack.c.h.bf16 %v4073_v13  ;;  %v436_v36 = vld [vmem:[%s6163_s3 + $0x1e8] sm:$0xff]  ;;  %v423_v38 = vld [vmem:[%s6163_s3 + $0x180] sm:$0xff] }
   0x6   :  { %59 = vadd.xlane.f32.xlu0 %v58_v14  ;;  %65 = vadd.xlane.f32.xlu1 %v64_v15  ;;  %v70_v24 = vadd.f32 %v51_v18, %v50_v17  ;;  %v54_v25 = vunpack.c.l.bf16 %v4086_v16  ;;  %v55_v27 = vunpack.c.h.bf16 %v4086_v16  ;;  %v56_v28 = vunpack.c.l.bf16 %v4093_v19  ;;  %v427_v39 = vld [vmem:[%s6163_s3 + $0x1a0] sm:$0xff]  ;;  %v424_v43 = vld [vmem:[%s6163_s3 + $0x188] sm:$0xff] }
   0x7   :  { %v73_v26 = vadd.f32 %v53_v23, %v52_v22  ;;  %v57_v29 = vunpack.c.h.bf16 %v4093_v19  ;;  %v3397_v35 = vcombine.high %v431_v32, %v435_v33  ;;  %v3396_v37 = vcombine.low %v431_v32, %v435_v33  ;;  %v428_v44 = vld [vmem:[%s6163_s3 + $0x1a8] sm:$0xff]  ;;  %v415_v45 = vld [vmem:[%s6163_s3 + $0x140] sm:$0xff] }
   0x8   :  { %v76_v30 = vadd.f32 %v55_v27, %v54_v25  ;;  %v3399_v40 = vcombine.high %v432_v34, %v436_v36  ;;  %v3398_v41 = vcombine.low %v432_v34, %v436_v36  ;;  %v3389_v42 = vcombine.high %v423_v38, %v427_v39  ;;  %v419_v47 = vld [vmem:[%s6163_s3 + $0x160] sm:$0xff]  ;;  %v416_v48 = vld [vmem:[%s6163_s3 + $0x148] sm:$0xff] }
   0x9   :  { %v79_v31 = vadd.f32 %v57_v29, %v56_v28  ;;  %1225 = vmatprep.subr.bf16.mxu0 %v3397_v35  ;;  %v3391_v46 = vcombine.high %v424_v43, %v428_v44  ;;  %v420_v49 = vld [vmem:[%s6163_s3 + $0x168] sm:$0xff]  ;;  %v3388_v50 = vcombine.low %v423_v38, %v427_v39  ;;  %v3390_v51 = vcombine.low %v424_v43, %v428_v44  ;;  %v407_v54 = vld [vmem:[%s6163_s3 + $0x100] sm:$0xff] }
   0xa   :  { %62 = vadd.xlane.f32.xlu0 %v61_v20  ;;  %68 = vadd.xlane.f32.xlu1 %v67_v21  ;;  %v3381_v52 = vcombine.high %v415_v45, %v419_v47  ;;  %v3383_v53 = vcombine.high %v416_v48, %v420_v49  ;;  %v411_v55 = vld [vmem:[%s6163_s3 + $0x120] sm:$0xff]  ;;  %v408_v56 = vld [vmem:[%s6163_s3 + $0x108] sm:$0xff]  ;;  %v3380_v58 = vcombine.low %v415_v45, %v419_v47 }
   0xb   :  { %1298 = vmatprep.subr.bf16.mxu1 %v3399_v40  ;;  %1226 = vmatpush1.bf16.msra.mxu0 %v3396_v37  ;;  %v412_v57 = vld [vmem:[%s6163_s3 + $0x128] sm:$0xff]  ;;  %v3382_v59 = vcombine.low %v416_v48, %v420_v49  ;;  %v3373_v60 = vcombine.high %v407_v54, %v411_v55  ;;  %v399_v62 = vld [vmem:[%s6163_s3 + $0xc0] sm:$0xff]  ;;  %v3372_v20 = vcombine.low %v407_v54, %v411_v55 }
   0xc   :  { %1299 = vmatpush1.bf16.msra.mxu1 %v3398_v41  ;;  %1227 = vmatprep.subr.bf16.mxu0 %v3389_v42  ;;  %v3375_v61 = vcombine.high %v408_v56, %v412_v57  ;;  %v403_v63 = vld [vmem:[%s6163_s3 + $0xe0] sm:$0xff]  ;;  %v400_v14 = vld [vmem:[%s6163_s3 + $0xc8] sm:$0xff] }
   0xd   :  { %1300 = vmatprep.subr.bf16.mxu1 %v3391_v46  ;;  %v404_v15 = vld [vmem:[%s6163_s3 + $0xe8] sm:$0xff]  ;;  %v391_v21 = vld [vmem:[%s6163_s3 + $0x80] sm:$0xff]  ;;  %v3364_v34 = vcombine.low %v399_v62, %v403_v63 }
   0xe   :  { %71 = vadd.xlane.f32.xlu0 %v70_v24  ;;  %74 = vadd.xlane.f32.xlu1 %v73_v26  ;;  %v395_v24 = vld [vmem:[%s6163_s3 + $0xa0] sm:$0xff]  ;;  %v3374_v26 = vcombine.low %v408_v56, %v412_v57  ;;  %v396_v32 = vld [vmem:[%s6163_s3 + $0xa8] sm:$0xff]  ;;  %v3367_v33 = vcombine.high %v400_v14, %v404_v15  ;;  %v3366_v35 = vcombine.low %v400_v14, %v404_v15 }
   0xf   :  { %1228 = vmatpush1.bf16.msra.mxu0 %v3388_v50  ;;  %v3357_v36 = vcombine.high %v391_v21, %v395_v24 }
  0x10   :  { %1301 = vmatpush1.bf16.msra.mxu1 %v3390_v51  ;;  %1229 = vmatprep.subr.bf16.mxu0 %v3381_v52 }
  0x11   :  { %1302 = vmatprep.subr.bf16.mxu1 %v3383_v53 }
  0x12   :  { %77 = vadd.xlane.f32.xlu0 %v76_v30  ;;  %80 = vadd.xlane.f32.xlu1 %v79_v31  ;;  %v3365_v30 = vcombine.high %v399_v62, %v403_v63  ;;  %v392_v31 = vld [vmem:[%s6163_s3 + $0x88] sm:$0xff] }
  0x13   :  { %1230 = vmatpush1.bf16.msra.mxu0 %v3380_v58 }
  0x14   :  { %1303 = vmatpush1.bf16.msra.mxu1 %v3382_v59  ;;  %1231 = vmatprep.subr.bf16.mxu0 %v3373_v60 }
  0x15   :  { %1304 = vmatprep.subr.bf16.mxu1 %v3375_v61 }
  0x17   :  { %1232 = vmatpush1.bf16.msra.mxu0 %v3372_v20 }
  0x18   :  { %1305 = vmatpush1.bf16.msra.mxu1 %v3374_v26  ;;  %1233 = vmatprep.subr.bf16.mxu0 %v3365_v30 }
  0x19   :  { %13 = vsyncpa [#allocation5], 0  ;;  %1306 = vmatprep.subr.bf16.mxu1 %v3367_v33  ;;  %v3359_v37 = vcombine.high %v392_v31, %v396_v32  ;;  %v383_v38 = vld [vmem:[%s6163_s3 + $0x40] sm:$0xff]  ;;  %v384_v40 = vld [vmem:[%s6163_s3 + $0x48] sm:$0xff]  ;;  %v3356_v42 = vcombine.low %v391_v21, %v395_v24  ;;  %v3358_v43 = vcombine.low %v392_v31, %v396_v32 }
  0x1a   :  { %v387_v39 = vld [vmem:[%s6163_s3 + $0x60] sm:$0xff]  ;;  %v388_v41 = vld [vmem:[%s6163_s3 + $0x68] sm:$0xff] }
  0x1b   :  { %1234 = vmatpush1.bf16.msra.mxu0 %v3364_v34  ;;  %v3349_v44 = vcombine.high %v383_v38, %v387_v39  ;;  %v3351_v45 = vcombine.high %v384_v40, %v388_v41  ;;  %v375_v46 = vld [vmem:[%s6163_s3] sm:$0xff]  ;;  %v376_v48 = vld [vmem:[%s6163_s3 + $0x8] sm:$0xff]  ;;  %v3348_v50 = vcombine.low %v383_v38, %v387_v39  ;;  %v3350_v51 = vcombine.low %v384_v40, %v388_v41 }
  0x1c   :  { %1307 = vmatpush1.bf16.msra.mxu1 %v3366_v35  ;;  %1235 = vmatprep.subr.bf16.mxu0 %v3357_v36  ;;  %v379_v47 = vld [vmem:[%s6163_s3 + $0x20] sm:$0xff]  ;;  %v380_v49 = vld [vmem:[%s6163_s3 + $0x28] sm:$0xff] }
  0x1d   :  { %1308 = vmatprep.subr.bf16.mxu1 %v3359_v37  ;;  %v3341_v52 = vcombine.high %v375_v46, %v379_v47  ;;  %v3343_v53 = vcombine.high %v376_v48, %v380_v49  ;;  %v495_v54 = vld [vmem:[%s6163_s3 + $0x3c0] sm:$0xff]  ;;  %v496_v56 = vld [vmem:[%s6163_s3 + $0x3c8] sm:$0xff]  ;;  %v3340_v58 = vcombine.low %v375_v46, %v379_v47  ;;  %v3342_v59 = vcombine.low %v376_v48, %v380_v49 }
  0x1e   :  { %v499_v55 = vld [vmem:[%s6163_s3 + $0x3e0] sm:$0xff]  ;;  %v500_v57 = vld [vmem:[%s6163_s3 + $0x3e8] sm:$0xff] }
  0x1f   :  { %1236 = vmatpush1.bf16.msra.mxu0 %v3356_v42  ;;  %v3461_v60 = vcombine.high %v495_v54, %v499_v55  ;;  %v3463_v61 = vcombine.high %v496_v56, %v500_v57  ;;  %v3460_v62 = vcombine.low %v495_v54, %v499_v55  ;;  %v3462_v63 = vcombine.low %v496_v56, %v500_v57  ;;  %v487_v19 = vld [vmem:[%s6163_s3 + $0x380] sm:$0xff]  ;;  %v488_v57 = vld [vmem:[%s6163_s3 + $0x388] sm:$0xff] }
  0x20   :  { %1309 = vmatpush1.bf16.msra.mxu1 %v3358_v43  ;;  %1237 = vmatprep.subr.bf16.mxu0 %v3349_v44 }
  0x21   :  { %1310 = vmatprep.subr.bf16.mxu1 %v3351_v45 }
  0x23   :  { %1238 = vmatpush1.bf16.msra.mxu0 %v3348_v50 }
  0x24   :  { %1311 = vmatpush1.bf16.msra.mxu1 %v3350_v51  ;;  %1239 = vmatprep.subr.bf16.mxu0 %v3341_v52 }
  0x25   :  { %1312 = vmatprep.subr.bf16.mxu1 %v3343_v53 }
  0x27   :  { %1240 = vmatpush1.bf16.msra.mxu0 %v3340_v58 }
  0x28   :  { %1313 = vmatpush1.bf16.msra.mxu1 %v3342_v59  ;;  %1241 = vmatprep.subr.bf16.mxu0 %v3461_v60  ;;  %v492_v59 = vld [vmem:[%s6163_s3 + $0x3a8] sm:$0xff] }
  0x29   :  { %1314 = vmatprep.subr.bf16.mxu1 %v3463_v61  ;;  %v3455_v60 = vcombine.high %v488_v57, %v492_v59 }
  0x2b   :  { %1242 = vmatpush2.bf16.msra.mxu0 %v3460_v62  ;;  %v3454_v62 = vcombine.low %v488_v57, %v492_v59  ;;  %v440_v59 = vld [vmem:[%s6163_s3 + $0x208] sm:$0xff] }
  0x2c   :  { %1315 = vmatpush2.bf16.msra.mxu1 %v3462_v63 }
  0x2d   :  { %1316 = vmatprep.subr.bf16.mxu1 %v3455_v60  ;;  %v444_v60 = vld [vmem:[%s6163_s3 + $0x228] sm:$0xff] }
  0x30   :  { %1317 = vmatpush2.bf16.msra.mxu1 %v3454_v62 }
  0x8f   :  { %v60_v14 = vpop.xlane.xlu0 %59  ;;  %v66_v15 = vpop.xlane.xlu1 %65 }
  0x90   :  { %v83_v20 = vmul.f32 0.00390625, %v60_v14  ;;  %v85_v21 = vmul.f32 0.00390625, %v66_v15  ;;  %v479_v14 = vld [vmem:[%s6163_s3 + $0x340] sm:$0xff] }
  0x91   :  { %v483_v15 = vld [vmem:[%s6163_s3 + $0x360] sm:$0xff] }
  0x92   :  { %v4235_v24 = vsub.f32 %v42_v3, %v83_v20  ;;  %v4239_v26 = vsub.f32 %v43_v4, %v83_v20  ;;  %v4243_v30 = vsub.f32 %v46_v5, %v85_v21  ;;  %v4247_v31 = vsub.f32 %v47_v6, %v85_v21  ;;  %v480_v20 = vld [vmem:[%s6163_s3 + $0x348] sm:$0xff] }
  0x93   :  { %v63_v32 = vpop.xlane.xlu0 %62  ;;  %v69_v33 = vpop.xlane.xlu1 %68  ;;  %v3445_v21 = vcombine.high %v479_v14, %v483_v15 }
  0x94   :  { %v84_v34 = vmul.f32 0.00390625, %v63_v32  ;;  %v86_v35 = vmul.f32 0.00390625, %v69_v33  ;;  %v107_v3 = vmul.f32 %v4235_v24, %v4235_v24  ;;  %v108_v0 = vmul.f32 %v4239_v26, %v4239_v26  ;;  %v484_v32 = vld [vmem:[%s6163_s3 + $0x368] sm:$0xff] }
  0x95   :  { %v111_v4 = vmul.f32 %v4243_v30, %v4243_v30  ;;  %v112_v5 = vmul.f32 %v4247_v31, %v4247_v31  ;;  %v3447_v33 = vcombine.high %v480_v20, %v484_v32 }
  0x96   :  { %v4259_v1 = vsub.f32 %v44_v9, %v84_v34  ;;  %v4263_v6 = vsub.f32 %v45_v10, %v84_v34  ;;  %v4267_v36 = vsub.f32 %v48_v11, %v86_v35  ;;  %v4271_v37 = vsub.f32 %v49_v12, %v86_v35 }
  0x97   :  { %v72_v38 = vpop.xlane.xlu0 %71  ;;  %v123_v39 = vadd.f32 %v108_v0, %v107_v3  ;;  %v75_v40 = vpop.xlane.xlu1 %74  ;;  %v129_v10 = vadd.f32 %v112_v5, %v111_v4  ;;  %v3444_v34 = vcombine.low %v479_v14, %v483_v15  ;;  %v3446_v35 = vcombine.low %v480_v20, %v484_v32  ;;  %1318 = vmatprep.subr.bf16.mxu1 %v3447_v33  ;;  %v471_v3 = vld [vmem:[%s6163_s3 + $0x300] sm:$0xff]  ;;  %v472_v4 = vld [vmem:[%s6163_s3 + $0x308] sm:$0xff]  ;;  %v4416_v14 = vld [vmem:[%s6163_s3 + $0x1d0] sm:$0xff] }
  0x98   :  { %v87_v41 = vmul.f32 0.00390625, %v72_v38  ;;  %v88_v42 = vmul.f32 0.00390625, %v75_v40  ;;  %v109_v9 = vmul.f32 %v4259_v1, %v4259_v1  ;;  %v110_v2 = vmul.f32 %v4263_v6, %v4263_v6  ;;  %v475_v0 = vld [vmem:[%s6163_s3 + $0x320] sm:$0xff]  ;;  %v476_v38 = vld [vmem:[%s6163_s3 + $0x328] sm:$0xff]  ;;  %v4421_v15 = vld [vmem:[%s6163_s3 + $0x1f0] sm:$0xff] }
  0x99   :  { %124 = vadd.xlane.f32.xlu0 %v123_v39  ;;  %v113_v11 = vmul.f32 %v4267_v36, %v4267_v36  ;;  %v114_v7 = vmul.f32 %v4271_v37, %v4271_v37  ;;  %1319 = vmatpush2.bf16.msra.mxu1 %v3446_v35  ;;  %v3437_v5 = vcombine.high %v471_v3, %v475_v0  ;;  %v4426_v20 = vld [vmem:[%s6163_s3 + $0x1d8] sm:$0xff] }
  0x9a   :  { %v4283_v12 = vsub.f32 %v50_v17, %v87_v41  ;;  %v4287_v43 = vsub.f32 %v51_v18, %v87_v41  ;;  %v4291_v44 = vsub.f32 %v52_v22, %v88_v42  ;;  %v4295_v45 = vsub.f32 %v53_v23, %v88_v42  ;;  %v463_v42 = vld [vmem:[%s6163_s3 + $0x2c0] sm:$0xff]  ;;  %v4433_v32 = vld [vmem:[%s6163_s3 + $0x1f8] sm:$0xff] }
  0x9b   :  { %v78_v46 = vpop.xlane.xlu0 %77  ;;  %v126_v47 = vadd.f32 %v110_v2, %v109_v9  ;;  %v81_v48 = vpop.xlane.xlu1 %80  ;;  %v132_v18 = vadd.f32 %v114_v7, %v113_v11  ;;  %v3439_v39 = vcombine.high %v472_v4, %v476_v38  ;;  %v3436_v40 = vcombine.low %v471_v3, %v475_v0  ;;  %v467_v9 = vld [vmem:[%s6163_s3 + $0x2e0] sm:$0xff]  ;;  %v464_v2 = vld [vmem:[%s6163_s3 + $0x2c8] sm:$0xff] }
  0x9c   :  { %v89_v49 = vmul.f32 0.00390625, %v78_v46  ;;  %v90_v50 = vmul.f32 0.00390625, %v81_v48  ;;  %v115_v17 = vmul.f32 %v4283_v12, %v4283_v12  ;;  %v116_v8 = vmul.f32 %v4287_v43, %v4287_v43  ;;  %v468_v11 = vld [vmem:[%s6163_s3 + $0x2e8] sm:$0xff]  ;;  %v455_v48 = vld [vmem:[%s6163_s3 + $0x280] sm:$0xff] }
  0x9d   :  { %130 = vadd.xlane.f32.xlu0 %v129_v10  ;;  %127 = vadd.xlane.f32.xlu1 %v126_v47  ;;  %v117_v22 = vmul.f32 %v4291_v44, %v4291_v44  ;;  %v118_v13 = vmul.f32 %v4295_v45, %v4295_v45  ;;  %v3438_v41 = vcombine.low %v472_v4, %v476_v38 }
  0x9e   :  { %v4307_v23 = vsub.f32 %v54_v25, %v89_v49  ;;  %v4311_v51 = vsub.f32 %v55_v27, %v89_v49  ;;  %v4315_v52 = vsub.f32 %v56_v28, %v90_v50  ;;  %v4319_v53 = vsub.f32 %v57_v29, %v90_v50  ;;  %v491_v29 = vld [vmem:[%s6163_s3 + $0x3a0] sm:$0xff]  ;;  %1320 = vmatprep.subr.bf16.mxu1 %v3439_v39  ;;  %v456_v50 = vld [vmem:[%s6163_s3 + $0x288] sm:$0xff] }
  0x9f   :  { %v135_v54 = vadd.f32 %v116_v8, %v115_v17  ;;  %v138_v16 = vadd.f32 %v118_v13, %v117_v22  ;;  %v3453_v58 = vcombine.high %v487_v19, %v491_v29  ;;  %v3452_v61 = vcombine.low %v487_v19, %v491_v29  ;;  %1321 = vmatpush2.bf16.msra.mxu1 %v3438_v41  ;;  %v459_v49 = vld [vmem:[%s6163_s3 + $0x2a0] sm:$0xff]  ;;  %v460_v8 = vld [vmem:[%s6163_s3 + $0x2a8] sm:$0xff] }
  0xa0   :  { %v119_v55 = vmul.f32 %v4307_v23, %v4307_v23  ;;  %v120_v25 = vmul.f32 %v4311_v51, %v4311_v51  ;;  %v121_v27 = vmul.f32 %v4315_v52, %v4315_v52  ;;  %v122_v28 = vmul.f32 %v4319_v53, %v4319_v53  ;;  %v443_v19 = vld [vmem:[%s6163_s3 + $0x220] sm:$0xff] }
  0xa1   :  { %133 = vadd.xlane.f32.xlu1 %v132_v18  ;;  %136 = vadd.xlane.f32.xlu0 %v135_v54  ;;  %v3429_v10 = vcombine.high %v463_v42, %v467_v9  ;;  %v3431_v7 = vcombine.high %v464_v2, %v468_v11  ;;  %v3428_v46 = vcombine.low %v463_v42, %v467_v9  ;;  %v447_v54 = vld [vmem:[%s6163_s3 + $0x240] sm:$0xff]  ;;  %v189_v41 = vlaneseq }
  0xa2   :  { %v141_v56 = vadd.f32 %v120_v25, %v119_v55  ;;  %v144_v63 = vadd.f32 %v122_v28, %v121_v27  ;;  %1243 = vmatprep.subr.bf16.mxu0 %v3453_v58  ;;  %v3430_v47 = vcombine.low %v464_v2, %v468_v11  ;;  %v3421_v17 = vcombine.high %v455_v48, %v459_v49  ;;  %v451_v55 = vld [vmem:[%s6163_s3 + $0x260] sm:$0xff]  ;;  %v448_v25 = vld [vmem:[%s6163_s3 + $0x248] sm:$0xff] }
  0xa3   :  { %1244 = vmatpush2.bf16.msra.mxu0 %v3452_v61  ;;  %1322 = vmatprep.subr.bf16.mxu1 %v3431_v7  ;;  %v3423_v18 = vcombine.high %v456_v50, %v460_v8  ;;  %v3420_v22 = vcombine.low %v455_v48, %v459_v49  ;;  %v3422_v13 = vcombine.low %v456_v50, %v460_v8  ;;  %v452_v27 = vld [vmem:[%s6163_s3 + $0x268] sm:$0xff] }
  0xa4   :  { %1245 = vmatprep.subr.bf16.mxu0 %v3445_v21  ;;  %1323 = vmatpush2.bf16.msra.mxu1 %v3430_v47  ;;  %v3412_v28 = vcombine.low %v447_v54, %v451_v55  ;;  %v3415_v29 = vcombine.high %v448_v25, %v452_v27  ;;  %v3414_v57 = vcombine.low %v448_v25, %v452_v27 }
  0xa5   :  { %139 = vadd.xlane.f32.xlu1 %v138_v16  ;;  %142 = vadd.xlane.f32.xlu0 %v141_v56  ;;  %v3413_v16 = vcombine.high %v447_v54, %v451_v55  ;;  %v439_v56 = vld [vmem:[%s6163_s3 + $0x200] sm:$0xff]  ;;  %v3407_v61 = vcombine.high %v440_v59, %v444_v60  ;;  %v3401_v21 = vcombine.high %v4416_v14, %v4421_v15 }
  0xa6   :  { %1324 = vmatprep.subr.bf16.mxu1 %v3423_v18  ;;  %v3405_v58 = vcombine.high %v439_v56, %v443_v19  ;;  %v3404_v62 = vcombine.low %v439_v56, %v443_v19  ;;  %v3400_v33 = vcombine.low %v4416_v14, %v4421_v15  ;;  %v3403_v35 = vcombine.high %v4426_v20, %v4433_v32  ;;  %v187_v54 = vld [vmem:[%s6161_s1] sm:$0x3]  ;;  %v409_v15 = vld [vmem:[%s6163_s3 + $0x110] sm:$0xff] }
  0xa7   :  { %1246 = vmatpush2.bf16.msra.mxu0 %v3444_v34  ;;  %v3402_v34 = vcombine.low %v4426_v20, %v4433_v32  ;;  %v215_v56 = vld [vmem:[%s6162_s2] sm:$0x3] }
  0xa8   :  { %1247 = vmatprep.subr.bf16.mxu0 %v3437_v5  ;;  %1325 = vmatpush2.bf16.msra.mxu1 %v3422_v13 }
  0xa9   :  { %145 = vadd.xlane.f32.xlu1 %v144_v63  ;;  %1326 = vmatprep.subr.bf16.mxu1 %v3415_v29  ;;  %v3406_v63 = vcombine.low %v440_v59, %v444_v60 }
  0xab   :  { %1248 = vmatpush2.bf16.msra.mxu0 %v3436_v40 }
  0xac   :  { %1249 = vmatprep.subr.bf16.mxu0 %v3429_v10  ;;  %1327 = vmatpush2.bf16.msra.mxu1 %v3414_v57 }
  0xad   :  { %1328 = vmatprep.subr.bf16.mxu1 %v3407_v61 }
  0xaf   :  { %1250 = vmatpush2.bf16.msra.mxu0 %v3428_v46  ;;  %v4441_v46 = vshrl.u32 %v189_v41, 7 }
  0xb0   :  { %1251 = vmatprep.subr.bf16.mxu0 %v3421_v17  ;;  %1329 = vmatpush2.bf16.msra.mxu1 %v3406_v63 }
  0xb1   :  { %1444 = vmatprep.subr.bf16.mxu1 %v3403_v35  ;;  %v4444_v18 = vsub.s32 1, %v4441_v46 }
  0xb3   :  { %1252 = vmatpush2.bf16.msra.mxu0 %v3420_v22  ;;  %6191 = vst [vmem:[#allocation7_spill] sm:$0xff] %v4444_v18  ;;  %v4447_v22 = vsub.s32 0, %v4441_v46  ;;  %v4464_v59 = vrot.slane %v215_v56, %v4444_v18 }
  0xb4   :  { %1253 = vmatprep.subr.bf16.mxu0 %v3413_v16 }
  0xb5   :  { %6192 = vst [vmem:[#allocation8_spill] sm:$0xff] %v4447_v22  ;;  %v4459_v19 = vrot.slane %v187_v54, %v4447_v22  ;;  %v4469_v63 = vrot.slane %v215_v56, %v4447_v22 }
  0xb7   :  { %1254 = vmatpush2.bf16.msra.mxu0 %v3412_v28  ;;  %v4453_v28 = vrot.slane %v187_v54, %v4444_v18 }
  0xb8   :  { %1255 = vmatprep.subr.bf16.mxu0 %v3405_v58 }
  0xbb   :  { %1256 = vmatpush2.bf16.msra.mxu0 %v3404_v62 }
  0xbc   :  { %1371 = vmatprep.subr.bf16.mxu0 %v3401_v21 }
 0x122   :  { %v125_v3 = vpop.xlane.xlu0 %124 }
 0x123   :  { %v147_v0 = vmul.f32 0.00390625, %v125_v3 }
 0x125   :  { %v155_v4 = vadd.f32 1e-05, %v147_v0 }
 0x126   :  { %v128_v5 = vpop.xlane.xlu1 %127  ;;  %v131_v38 = vpop.xlane.xlu0 %130 }
 0x127   :  { %3823 = vrsqrt.f32 %v155_v4  ;;  %v148_v39 = vmul.f32 0.00390625, %v128_v5  ;;  %v149_v40 = vmul.f32 0.00390625, %v131_v38 }
 0x129   :  { %v156_v42 = vadd.f32 1e-05, %v148_v39  ;;  %v157_v9 = vadd.f32 1e-05, %v149_v40  ;;  %v425_v40 = vld [vmem:[%s6163_s3 + $0x190] sm:$0xff] }
 0x12a   :  { %v134_v2 = vpop.xlane.xlu1 %133  ;;  %v137_v10 = vpop.xlane.xlu0 %136 }
 0x12b   :  { %3825 = vrsqrt.f32 %v156_v42  ;;  %v150_v11 = vmul.f32 0.00390625, %v134_v2  ;;  %v151_v7 = vmul.f32 0.00390625, %v137_v10  ;;  %v429_v42 = vld [vmem:[%s6163_s3 + $0x1b0] sm:$0xff]  ;;  %v430_v2 = vld [vmem:[%s6163_s3 + $0x1b8] sm:$0xff] }
 0x12c   :  { %3827 = vrsqrt.f32 %v157_v9  ;;  %v426_v9 = vld [vmem:[%s6163_s3 + $0x198] sm:$0xff] }
 0x12d   :  { %v158_v47 = vadd.f32 1e-05, %v150_v11  ;;  %v159_v48 = vadd.f32 1e-05, %v151_v7 }
 0x12e   :  { %v140_v49 = vpop.xlane.xlu1 %139  ;;  %v143_v50 = vpop.xlane.xlu0 %142 }
 0x12f   :  { %3829 = vrsqrt.f32 %v158_v47  ;;  %v152_v17 = vmul.f32 0.00390625, %v140_v49  ;;  %v153_v8 = vmul.f32 0.00390625, %v143_v50  ;;  %v4509_v49 = vld [vmem:[%s6163_s3 + $0x170] sm:$0xff] }
 0x130   :  { %3831 = vrsqrt.f32 %v159_v48  ;;  %v4504_v48 = vld [vmem:[%s6163_s3 + $0x150] sm:$0xff] }
 0x131   :  { %v160_v13 = vadd.f32 1e-05, %v152_v17  ;;  %v161_v27 = vadd.f32 1e-05, %v153_v8  ;;  %v3393_v17 = vcombine.high %v425_v40, %v429_v42  ;;  %v3395_v8 = vcombine.high %v426_v9, %v430_v2 }
 0x132   :  { %v146_v55 = vpop.xlane.xlu1 %145  ;;  %v3385_v56 = vcombine.high %v4504_v48, %v4509_v49 }
 0x133   :  { %3833 = vrsqrt.f32 %v160_v13  ;;  %v154_v25 = vmul.f32 0.00390625, %v146_v55 }
 0x134   :  { %v3824_v16 = vpop.eup %3823 }
 0x135   :  { %v162_v29 = vadd.f32 1e-05, %v154_v25  ;;  %v172_v57 = vmul.f32 %v3824_v16, %v4239_v26  ;;  %v171_v58 = vmul.f32 %v3824_v16, %v4235_v24  ;;  %v418_v25 = vld [vmem:[%s6163_s3 + $0x158] sm:$0xff] }
 0x137   :  { %3835 = vrsqrt.f32 %v162_v29  ;;  %v200_v61 = vmul.f32 %v4453_v28, %v172_v57  ;;  %v199_v62 = vmul.f32 %v4459_v19, %v171_v58 }
 0x138   :  { %v3826_v60 = vpop.eup %3825  ;;  %3837 = vrsqrt.f32 %v161_v27  ;;  %v3394_v27 = vcombine.low %v426_v9, %v430_v2 }
 0x139   :  { %v3828_v21 = vpop.eup %3827  ;;  %v174_v35 = vmul.f32 %v3826_v60, %v4263_v6  ;;  %v173_v26 = vmul.f32 %v3826_v60, %v4259_v1  ;;  %v228_v5 = vadd.f32 %v4464_v59, %v200_v61  ;;  %v227_v38 = vadd.f32 %v4469_v63, %v199_v62 }
 0x13a   :  { %v176_v24 = vmul.f32 %v3828_v21, %v4247_v31  ;;  %v175_v11 = vmul.f32 %v3828_v21, %v4243_v30  ;;  %v3392_v30 = vcombine.low %v425_v40, %v429_v42 }
 0x13b   :  { %v202_v3 = vmul.f32 %v4453_v28, %v174_v35  ;;  %v201_v0 = vmul.f32 %v4459_v19, %v173_v26 }
 0x13c   :  { %v3830_v4 = vpop.eup %3829  ;;  %v204_v39 = vmul.f32 %v4453_v28, %v176_v24  ;;  %v203_v29 = vmul.f32 %v4459_v19, %v175_v11  ;;  %v3384_v24 = vcombine.low %v4504_v48, %v4509_v49  ;;  %v393_v49 = vld [vmem:[%s6163_s3 + $0x90] sm:$0xff] }
 0x13d   :  { %v3832_v6 = vpop.eup %3831  ;;  %v230_v1 = vadd.f32 %v4464_v59, %v202_v3  ;;  %v229_v31 = vadd.f32 %v4469_v63, %v201_v0  ;;  %v178_v41 = vmul.f32 %v3830_v4, %v4271_v37  ;;  %v177_v10 = vmul.f32 %v3830_v4, %v4267_v36  ;;  %v401_v4 = vld [vmem:[%s6163_s3 + $0xd0] sm:$0xff] }
 0x13e   :  { %v180_v36 = vmul.f32 %v3832_v6, %v4287_v43  ;;  %v232_v54 = vadd.f32 %v4464_v59, %v204_v39  ;;  %v422_v43 = vld [vmem:[%s6163_s3 + $0x178] sm:$0xff]  ;;  %v231_v20 = vadd.f32 %v4469_v63, %v203_v29  ;;  %v179_v35 = vmul.f32 %v3832_v6, %v4283_v12  ;;  %v405_v12 = vld [vmem:[%s6163_s3 + $0xf0] sm:$0xff] }
 0x13f   :  { %v4496_v7 = vpack.c.bf16 %v230_v1, %v228_v5  ;;  %v4498_v47 = vpack.c.bf16 %v229_v31, %v227_v38  ;;  %v206_v37 = vmul.f32 %v4453_v28, %v178_v41  ;;  %v205_v13 = vmul.f32 %v4459_v19, %v177_v10  ;;  %v406_v38 = vld [vmem:[%s6163_s3 + $0xf8] sm:$0xff] }
 0x140   :  { %v3834_v50 = vpop.eup %3833  ;;  %v3387_v61 = vcombine.high %v418_v25, %v422_v43  ;;  %v3386_v3 = vcombine.low %v418_v25, %v422_v43  ;;  %v207_v42 = vmul.f32 %v4459_v19, %v179_v35  ;;  %v3369_v10 = vcombine.high %v401_v4, %v405_v12  ;;  %v385_v25 = vld [vmem:[%s6163_s3 + $0x50] sm:$0xff] }
 0x141   :  { %1257 = vmatprep.mubr.bf16.mxu0 %v4496_v7  ;;  %1330 = vmatprep.mubr.bf16.mxu1 %v4496_v7  ;;  %v234_v55 = vadd.f32 %v4464_v59, %v206_v37  ;;  %v182_v16 = vmul.f32 %v3834_v50, %v4295_v45  ;;  %v208_v45 = vmul.f32 %v4453_v28, %v180_v36 }
 0x142   :  { %1258 = vmatmul.mubr.bf16.vlgmr.msra.gmra.mxu0 %v4498_v47  ;;  %1331 = vmatmul.mubr.bf16.vlgmr.msra.gmra.mxu1 %v4498_v47  ;;  %v233_v62 = vadd.f32 %v4469_v63, %v205_v13  ;;  %v181_v21 = vmul.f32 %v3834_v50, %v4291_v44  ;;  %v410_v44 = vld [vmem:[%s6163_s3 + $0x118] sm:$0xff]  ;;  %v235_v36 = vadd.f32 %v4469_v63, %v207_v42 }
 0x143   :  { %1372 = vmatpush1.bf16.msra.mxu0 %v3400_v33  ;;  %1445 = vmatpush1.bf16.msra.mxu1 %v3402_v34  ;;  %v4535_v57 = vpack.c.bf16 %v234_v55, %v232_v54  ;;  %v210_v58 = vmul.f32 %v4453_v28, %v182_v16  ;;  %v413_v33 = vld [vmem:[%s6163_s3 + $0x130] sm:$0xff]  ;;  %v414_v34 = vld [vmem:[%s6163_s3 + $0x138] sm:$0xff]  ;;  %v236_v0 = vadd.f32 %v4464_v59, %v208_v45 }
 0x144   :  { %v3836_v60 = vpop.eup %3835  ;;  %1373 = vmatprep.subr.bf16.mxu0 %v3393_v17  ;;  %1446 = vmatprep.subr.bf16.mxu1 %v3395_v8  ;;  %v4565_v5 = vpack.c.bf16 %v233_v62, %v231_v20  ;;  %v209_v39 = vmul.f32 %v4459_v19, %v181_v21  ;;  %v3376_v6 = vcombine.low %v409_v15, %v413_v33  ;;  %v378_v20 = vld [vmem:[%s6163_s3 + $0x18] sm:$0xff] }
 0x145   :  { %v3838_v14 = vpop.eup %3837  ;;  %1267 = vmatprep.mubr.bf16.mxu0 %v4535_v57  ;;  %1340 = vmatprep.mubr.bf16.mxu1 %v4535_v57  ;;  %v238_v32 = vadd.f32 %v4464_v59, %v210_v58  ;;  %v186_v26 = vmul.f32 %v3836_v60, %v4319_v53  ;;  %v402_v53 = vld [vmem:[%s6163_s3 + $0xd8] sm:$0xff]  ;;  %v3377_v1 = vcombine.high %v409_v15, %v413_v33  ;;  %v381_v15 = vld [vmem:[%s6163_s3 + $0x30] sm:$0xff] }
 0x146   :  { %v184_v40 = vmul.f32 %v3838_v14, %v4311_v51  ;;  %v3379_v31 = vcombine.high %v410_v44, %v414_v34  ;;  %v3378_v2 = vcombine.low %v410_v44, %v414_v34  ;;  %v3371_v11 = vcombine.high %v402_v53, %v406_v38 }
 0x147   :  { %1374 = vmatpush1.bf16.msra.mxu0 %v3392_v30  ;;  %1447 = vmatpush1.bf16.msra.mxu1 %v3394_v27  ;;  %v4580_v41 = vpack.c.bf16 %v238_v32, %v236_v0  ;;  %v214_v9 = vmul.f32 %v4453_v28, %v186_v26  ;;  %v237_v51 = vadd.f32 %v4469_v63, %v209_v39  ;;  %v397_v30 = vld [vmem:[%s6163_s3 + $0xb0] sm:$0xff]  ;;  %v382_v32 = vld [vmem:[%s6163_s3 + $0x38] sm:$0xff] }
 0x148   :  { %1375 = vmatprep.subr.bf16.mxu0 %v3385_v56  ;;  %1448 = vmatprep.subr.bf16.mxu1 %v3387_v61  ;;  %v212_v37 = vmul.f32 %v4453_v28, %v184_v40  ;;  %v185_v48 = vmul.f32 %v3836_v60, %v4315_v52  ;;  %v394_v28 = vld [vmem:[%s6163_s3 + $0x98] sm:$0xff]  ;;  %v183_v17 = vmul.f32 %v3838_v14, %v4307_v23  ;;  %v389_v23 = vld [vmem:[%s6163_s3 + $0x70] sm:$0xff] }
 0x149   :  { %v242_v50 = vadd.f32 %v4464_v59, %v214_v9  ;;  %v398_v52 = vld [vmem:[%s6163_s3 + $0xb8] sm:$0xff]  ;;  %v3368_v8 = vcombine.low %v401_v4, %v405_v12  ;;  %v3370_v13 = vcombine.low %v402_v53, %v406_v38  ;;  %v4604_v54 = vpack.c.bf16 %v237_v51, %v235_v36  ;;  %v377_v14 = vld [vmem:[%s6163_s3 + $0x10] sm:$0xff] }
 0x14a   :  { %1268 = vmatmul.mubr.bf16.gmra.mxu0 %v4565_v5  ;;  %1341 = vmatmul.mubr.bf16.gmra.mxu1 %v4565_v5  ;;  %v240_v55 = vadd.f32 %v4464_v59, %v212_v37  ;;  %v213_v43 = vmul.f32 %v4459_v19, %v185_v48  ;;  %v3361_v16 = vcombine.high %v393_v49, %v397_v30  ;;  %v386_v56 = vld [vmem:[%s6163_s3 + $0x58] sm:$0xff]  ;;  %v489_v39 = vld [vmem:[%s6163_s3 + $0x390] sm:$0xff] }
 0x14b   :  { %1376 = vmatpush1.bf16.msra.mxu0 %v3384_v24  ;;  %1449 = vmatpush1.bf16.msra.mxu1 %v3386_v3  ;;  %v3363_v27 = vcombine.high %v394_v28, %v398_v52  ;;  %v390_v59 = vld [vmem:[%s6163_s3 + $0x78] sm:$0xff]  ;;  %v211_v45 = vmul.f32 %v4459_v19, %v183_v17  ;;  %v3360_v58 = vcombine.low %v393_v49, %v397_v30  ;;  %v501_v24 = vld [vmem:[%s6163_s3 + $0x3f0] sm:$0xff] }
 0x14c   :  { %1277 = vmatprep.mubr.bf16.mxu0 %v4580_v41  ;;  %1350 = vmatprep.mubr.bf16.mxu1 %v4580_v41  ;;  %v4622_v29 = vpack.c.bf16 %v242_v50, %v240_v55  ;;  %v3362_v60 = vcombine.low %v394_v28, %v398_v52  ;;  %v3353_v61 = vcombine.high %v385_v25, %v389_v23  ;;  %v498_v3 = vld [vmem:[%s6163_s3 + $0x3d8] sm:$0xff]  ;;  %v493_v40 = vld [vmem:[%s6163_s3 + $0x3b0] sm:$0xff] }
 0x14d   :  { %1377 = vmatprep.subr.bf16.mxu0 %v3377_v1  ;;  %1450 = vmatprep.subr.bf16.mxu1 %v3379_v31  ;;  %v3355_v62 = vcombine.high %v386_v56, %v390_v59  ;;  %v241_v21 = vadd.f32 %v4469_v63, %v213_v43  ;;  %v239_v19 = vadd.f32 %v4469_v63, %v211_v45  ;;  %v497_v63 = vld [vmem:[%s6163_s3 + $0x3d0] sm:$0xff]  ;;  %v502_v0 = vld [vmem:[%s6163_s3 + $0x3f8] sm:$0xff] }
 0x14e   :  { %v3352_v33 = vcombine.low %v385_v25, %v389_v23  ;;  %v3354_v44 = vcombine.low %v386_v56, %v390_v59  ;;  %v3345_v35 = vcombine.high %v377_v14, %v381_v15  ;;  %v3347_v26 = vcombine.high %v378_v20, %v382_v32  ;;  %v486_v51 = vld [vmem:[%s6163_s3 + $0x378] sm:$0xff]  ;;  %v473_v50 = vld [vmem:[%s6163_s3 + $0x310] sm:$0xff] }
 0x14f   :  { %1378 = vmatpush1.bf16.msra.mxu0 %v3376_v6  ;;  %1451 = vmatpush1.bf16.msra.mxu1 %v3378_v2  ;;  %v4641_v34 = vpack.c.bf16 %v241_v21, %v239_v19  ;;  %v3344_v4 = vcombine.low %v377_v14, %v381_v15  ;;  %v3346_v12 = vcombine.low %v378_v20, %v382_v32  ;;  %v490_v6 = vld [vmem:[%s6163_s3 + $0x398] sm:$0xff]  ;;  %v481_v2 = vld [vmem:[%s6163_s3 + $0x350] sm:$0xff] }
 0x150   :  { %1379 = vmatprep.subr.bf16.mxu0 %v3369_v10  ;;  %1452 = vmatprep.subr.bf16.mxu1 %v3371_v11  ;;  %v3465_v53 = vcombine.high %v497_v63, %v501_v24  ;;  %v3467_v38 = vcombine.high %v498_v3, %v502_v0  ;;  %v3464_v1 = vcombine.low %v497_v63, %v501_v24  ;;  %v485_v10 = vld [vmem:[%s6163_s3 + $0x370] sm:$0xff]  ;;  %v482_v11 = vld [vmem:[%s6163_s3 + $0x358] sm:$0xff] }
 0x151   :  { %v3466_v31 = vcombine.low %v498_v3, %v502_v0  ;;  %v3457_v42 = vcombine.high %v489_v39, %v493_v40  ;;  %v3456_v37 = vcombine.low %v489_v39, %v493_v40  ;;  %v3449_v49 = vcombine.high %v481_v2, %v485_v10  ;;  %v477_v30 = vld [vmem:[%s6163_s3 + $0x330] sm:$0xff]  ;;  %v474_v28 = vld [vmem:[%s6163_s3 + $0x318] sm:$0xff] }
 0x152   :  { %1278 = vmatmul.mubr.bf16.gmra.mxu0 %v4604_v54  ;;  %1351 = vmatmul.mubr.bf16.gmra.mxu1 %v4604_v54  ;;  %v3451_v36 = vcombine.high %v482_v11, %v486_v51  ;;  %v478_v52 = vld [vmem:[%s6163_s3 + $0x338] sm:$0xff]  ;;  %v3448_v17 = vcombine.low %v481_v2, %v485_v10  ;;  %v465_v25 = vld [vmem:[%s6163_s3 + $0x2d0] sm:$0xff]  ;;  %v3440_v23 = vcombine.low %v473_v50, %v477_v30  ;;  %v3639_v2 = vld [vmem:[%s6165_s5 + $0x64] ss:$8 sps:$4 sm:$0xff]  }
 0x153   :  { %1380 = vmatpush1.bf16.msra.mxu0 %v3368_v8  ;;  %1453 = vmatpush1.bf16.msra.mxu1 %v3370_v13  ;;  %v3450_v8 = vcombine.low %v482_v11, %v486_v51  ;;  %v3441_v13 = vcombine.high %v473_v50, %v477_v30  ;;  %v3443_v55 = vcombine.high %v474_v28, %v478_v52  ;;  %v469_v43 = vld [vmem:[%s6163_s3 + $0x2f0] sm:$0xff]  ;;  %v3642_v10 = vld [vmem:[%s6165_s5 + $0x164] ss:$8 sps:$4 sm:$0xff]   ;;  %v3637_v11 = vld [vmem:[%s6165_s5 + $0x60] ss:$8 sps:$4 sm:$0xff]  }
 0x154   :  { %1287 = vmatprep.mubr.bf16.mxu0 %v4622_v29  ;;  %1360 = vmatprep.mubr.bf16.mxu1 %v4622_v29  ;;  %v3442_v56 = vcombine.low %v474_v28, %v478_v52  ;;  %v3433_v59 = vcombine.high %v465_v25, %v469_v43  ;;  %v3432_v21 = vcombine.low %v465_v25, %v469_v43  ;;  %v449_v20 = vld [vmem:[%s6163_s3 + $0x250] sm:$0xff]  ;;  %v3640_v51 = vld [vmem:[%s6165_s5 + $0x160] ss:$8 sps:$4 sm:$0xff]  }
 0x155   :  { %1381 = vmatprep.subr.bf16.mxu0 %v3361_v16  ;;  %1454 = vmatprep.subr.bf16.mxu1 %v3363_v27  ;;  %v466_v16 = vld [vmem:[%s6163_s3 + $0x2d8] sm:$0xff]  ;;  %v453_v32 = vld [vmem:[%s6163_s3 + $0x270] sm:$0xff]  ;;  %v3649_v50 = vld [vmem:[%s6165_s5 + $0x40] ss:$8 sps:$4 sm:$0xff]  }
 0x156   :  { %v470_v27 = vld [vmem:[%s6163_s3 + $0x2f8] sm:$0xff]  ;;  %v441_v3 = vld [vmem:[%s6163_s3 + $0x210] sm:$0xff]  ;;  %v3652_v30 = vld [vmem:[%s6165_s5 + $0x140] ss:$8 sps:$4 sm:$0xff]  }
 0x157   :  { %1382 = vmatpush1.bf16.msra.mxu0 %v3360_v58  ;;  %1455 = vmatpush1.bf16.msra.mxu1 %v3362_v60  ;;  %v3435_v45 = vcombine.high %v466_v16, %v470_v27  ;;  %v457_v58 = vld [vmem:[%s6163_s3 + $0x290] sm:$0xff]  ;;  %v3434_v14 = vcombine.low %v466_v16, %v470_v27  ;;  %v3675_v16 = vld [vmem:[%s6165_s5 + $0x4] ss:$8 sps:$4 sm:$0xff]  }
 0x158   :  { %1383 = vmatprep.subr.bf16.mxu0 %v3353_v61  ;;  %1456 = vmatprep.subr.bf16.mxu1 %v3355_v62  ;;  %v461_v60 = vld [vmem:[%s6163_s3 + $0x2b0] sm:$0xff]  ;;  %v458_v61 = vld [vmem:[%s6163_s3 + $0x298] sm:$0xff]  ;;  %v3678_v27 = vld [vmem:[%s6165_s5 + $0x104] ss:$8 sps:$4 sm:$0xff]  }
 0x159   :  { %v462_v62 = vld [vmem:[%s6163_s3 + $0x2b8] sm:$0xff]  ;;  %v3425_v19 = vcombine.high %v457_v58, %v461_v60  ;;  %v3424_v63 = vcombine.low %v457_v58, %v461_v60  ;;  %v445_v0 = vld [vmem:[%s6163_s3 + $0x230] sm:$0xff]  ;;  %v3687_v60 = vld [vmem:[%s6165_s5 + $0xe4] ss:$8 sps:$4 sm:$0xff]  }
 0x15a   :  { %1288 = vmatmul.mubr.bf16.gmra.mxu0 %v4641_v34  ;;  %1361 = vmatmul.mubr.bf16.gmra.mxu1 %v4641_v34  ;;  %v3427_v15 = vcombine.high %v458_v61, %v462_v62  ;;  %v3409_v39 = vcombine.high %v441_v3, %v445_v0  ;;  %v3655_v28 = vld [vmem:[%s6165_s5 + $0x30] ss:$8 sps:$4 sm:$0xff]  }
 0x15b   :  { %1384 = vmatpush1.bf16.msra.mxu0 %v3352_v33  ;;  %1457 = vmatpush1.bf16.msra.mxu1 %v3354_v44  ;;  %v450_v33 = vld [vmem:[%s6163_s3 + $0x258] sm:$0xff] }
 0x15c   :  { %1403 = vmatprep.mubr.bf16.mxu0 %v4496_v7  ;;  %1476 = vmatprep.mubr.bf16.mxu1 %v4496_v7  ;;  %v494_v7 = vld [vmem:[%s6163_s3 + $0x3b8] sm:$0xff] }
 0x15d   :  { %1385 = vmatprep.subr.bf16.mxu0 %v3345_v35  ;;  %1458 = vmatprep.subr.bf16.mxu1 %v3347_v26  ;;  %v3459_v9 = vcombine.high %v490_v6, %v494_v7  ;;  %v3458_v48 = vcombine.low %v490_v6, %v494_v7  ;;  %v454_v44 = vld [vmem:[%s6163_s3 + $0x278] sm:$0xff]  ;;  %v3426_v35 = vcombine.low %v458_v61, %v462_v62  ;;  %v3690_v61 = vld [vmem:[%s6165_s5 + $0x1e4] ss:$8 sps:$4 sm:$0xff]   ;;  %v3685_v62 = vld [vmem:[%s6165_s5 + $0xe0] ss:$8 sps:$4 sm:$0xff]  }
 0x15e   :  { %v3417_v26 = vcombine.high %v449_v20, %v453_v32  ;;  %v3419_v24 = vcombine.high %v450_v33, %v454_v44  ;;  %v3408_v6 = vcombine.low %v441_v3, %v445_v0  ;;  %v3658_v52 = vld [vmem:[%s6165_s5 + $0x130] ss:$8 sps:$4 sm:$0xff]   ;;  %v3711_v0 = vld [vmem:[%s6165_s5 + $0xa4] ss:$8 sps:$4 sm:$0xff]  }
 0x15f   :  { %1386 = vmatpush1.bf16.msra.mxu0 %v3344_v4  ;;  %1459 = vmatpush1.bf16.msra.mxu1 %v3346_v12  ;;  %v442_v4 = vld [vmem:[%s6163_s3 + $0x218] sm:$0xff] }
 0x160   :  { %1387 = vmatprep.subr.bf16.mxu0 %v3465_v53  ;;  %1460 = vmatprep.subr.bf16.mxu1 %v3467_v38  ;;  %v446_v12 = vld [vmem:[%s6163_s3 + $0x238] sm:$0xff]  ;;  %v3416_v53 = vcombine.low %v449_v20, %v453_v32  ;;  %v3418_v38 = vcombine.low %v450_v33, %v454_v44  ;;  %v3699_v32 = vld [vmem:[%s6165_s5 + $0xc4] ss:$8 sps:$4 sm:$0xff]   ;;  %v3697_v44 = vld [vmem:[%s6165_s5 + $0xc0] ss:$8 sps:$4 sm:$0xff]  }
 0x161   :  { %v3411_v40 = vcombine.high %v442_v4, %v446_v12  ;;  %v3410_v7 = vcombine.low %v442_v4, %v446_v12  ;;  %v3667_v25 = vld [vmem:[%s6165_s5 + $0x10] ss:$8 sps:$4 sm:$0xff]   ;;  %v3702_v33 = vld [vmem:[%s6165_s5 + $0x1c4] ss:$8 sps:$4 sm:$0xff]   ;;  %v3709_v12 = vld [vmem:[%s6165_s5 + $0xa0] ss:$8 sps:$4 sm:$0xff]  }
 0x162   :  { %v3670_v43 = vld [vmem:[%s6165_s5 + $0x110] ss:$8 sps:$4 sm:$0xff]   ;;  %v3714_v4 = vld [vmem:[%s6165_s5 + $0x1a4] ss:$8 sps:$4 sm:$0xff]  }
 0x163   :  { %1388 = vmatpush2.bf16.msra.mxu0 %v3464_v1  ;;  %1461 = vmatpush2.bf16.msra.mxu1 %v3466_v31  ;;  %v3633_v1 = vld [vmem:[%s6165_s5 + $0x74] ss:$8 sps:$4 sm:$0xff]   ;;  %v3682_v58 = vld [vmem:[%s6165_s5 + $0x1f0] ss:$8 sps:$4 sm:$0xff]  }
 0x164   :  { %1389 = vmatprep.subr.bf16.mxu0 %v3457_v42  ;;  %1462 = vmatprep.subr.bf16.mxu1 %v3459_v9  ;;  %v3636_v31 = vld [vmem:[%s6165_s5 + $0x174] ss:$8 sps:$4 sm:$0xff]   ;;  %v3631_v42 = vld [vmem:[%s6165_s5 + $0x70] ss:$8 sps:$4 sm:$0xff]  }
 0x165   :  { %v3634_v9 = vld [vmem:[%s6165_s5 + $0x170] ss:$8 sps:$4 sm:$0xff]  }
 0x166   :  { %v3694_v20 = vld [vmem:[%s6165_s5 + $0x1d0] ss:$8 sps:$4 sm:$0xff]  }
 0x167   :  { %1390 = vmatpush2.bf16.msra.mxu0 %v3456_v37  ;;  %1463 = vmatpush2.bf16.msra.mxu1 %v3458_v48  ;;  %v3643_v37 = vld [vmem:[%s6165_s5 + $0x50] ss:$8 sps:$4 sm:$0xff]  }
 0x168   :  { %1391 = vmatprep.subr.bf16.mxu0 %v3449_v49  ;;  %1464 = vmatprep.subr.bf16.mxu1 %v3451_v36  ;;  %v3646_v48 = vld [vmem:[%s6165_s5 + $0x150] ss:$8 sps:$4 sm:$0xff]   ;;  %v3651_v49 = vld [vmem:[%s6165_s5 + $0x44] ss:$8 sps:$4 sm:$0xff]  }
 0x169   :  { %v3654_v36 = vld [vmem:[%s6165_s5 + $0x144] ss:$8 sps:$4 sm:$0xff]   ;;  %v3706_v3 = vld [vmem:[%s6165_s5 + $0x1b0] ss:$8 sps:$4 sm:$0xff]  }
 0x16b   :  { %1392 = vmatpush2.bf16.msra.mxu0 %v3448_v17  ;;  %1465 = vmatpush2.bf16.msra.mxu1 %v3450_v8  ;;  %v3663_v17 = vld [vmem:[%s6165_s5 + $0x24] ss:$8 sps:$4 sm:$0xff]  }
 0x16c   :  { %1393 = vmatprep.subr.bf16.mxu0 %v3441_v13  ;;  %1466 = vmatprep.subr.bf16.mxu1 %v3443_v55  ;;  %v3666_v8 = vld [vmem:[%s6165_s5 + $0x124] ss:$8 sps:$4 sm:$0xff]   ;;  %v3661_v13 = vld [vmem:[%s6165_s5 + $0x20] ss:$8 sps:$4 sm:$0xff]  }
 0x16d   :  { %v3664_v55 = vld [vmem:[%s6165_s5 + $0x120] ss:$8 sps:$4 sm:$0xff]  }
 0x16f   :  { %1394 = vmatpush2.bf16.msra.mxu0 %v3440_v23  ;;  %1467 = vmatpush2.bf16.msra.mxu1 %v3442_v56  ;;  %v3673_v23 = vld [vmem:[%s6165_s5] ss:$8 sps:$4 sm:$0xff]  }
 0x170   :  { %1395 = vmatprep.subr.bf16.mxu0 %v3433_v59  ;;  %1468 = vmatprep.subr.bf16.mxu1 %v3435_v45  ;;  %v3676_v56 = vld [vmem:[%s6165_s5 + $0x100] ss:$8 sps:$4 sm:$0xff]   ;;  %v3681_v59 = vld [vmem:[%s6165_s5 + $0xf4] ss:$8 sps:$4 sm:$0xff]   ;;  %v3679_v45 = vld [vmem:[%s6165_s5 + $0xf0] ss:$8 sps:$4 sm:$0xff]  }
 0x173   :  { %1396 = vmatpush2.bf16.msra.mxu0 %v3432_v21  ;;  %1469 = vmatpush2.bf16.msra.mxu1 %v3434_v14  ;;  %v3688_v21 = vld [vmem:[%s6165_s5 + $0x1e0] ss:$8 sps:$4 sm:$0xff]   ;;  %v3693_v14 = vld [vmem:[%s6165_s5 + $0xd4] ss:$8 sps:$4 sm:$0xff]  }
 0x174   :  { %1397 = vmatprep.subr.bf16.mxu0 %v3425_v19  ;;  %1470 = vmatprep.subr.bf16.mxu1 %v3427_v15  ;;  %v3696_v19 = vld [vmem:[%s6165_s5 + $0x1d4] ss:$8 sps:$4 sm:$0xff]   ;;  %v3691_v15 = vld [vmem:[%s6165_s5 + $0xd0] ss:$8 sps:$4 sm:$0xff]  }
 0x177   :  { %1398 = vmatpush2.bf16.msra.mxu0 %v3424_v63  ;;  %1471 = vmatpush2.bf16.msra.mxu1 %v3426_v35  ;;  %v3700_v63 = vld [vmem:[%s6165_s5 + $0x1c0] ss:$8 sps:$4 sm:$0xff]   ;;  %v3705_v35 = vld [vmem:[%s6165_s5 + $0xb4] ss:$8 sps:$4 sm:$0xff]  }
 0x178   :  { %1399 = vmatprep.subr.bf16.mxu0 %v3417_v26  ;;  %1472 = vmatprep.subr.bf16.mxu1 %v3419_v24  ;;  %v3708_v26 = vld [vmem:[%s6165_s5 + $0x1b4] ss:$8 sps:$4 sm:$0xff]   ;;  %v3703_v24 = vld [vmem:[%s6165_s5 + $0xb0] ss:$8 sps:$4 sm:$0xff]  }
 0x17b   :  { %1400 = vmatpush2.bf16.msra.mxu0 %v3416_v53  ;;  %1473 = vmatpush2.bf16.msra.mxu1 %v3418_v38  ;;  %v3712_v53 = vld [vmem:[%s6165_s5 + $0x1a0] ss:$8 sps:$4 sm:$0xff]   ;;  %v3717_v38 = vld [vmem:[%s6165_s5 + $0x94] ss:$8 sps:$4 sm:$0xff]  }
 0x17c   :  { %1401 = vmatprep.subr.bf16.mxu0 %v3409_v39  ;;  %1474 = vmatprep.subr.bf16.mxu1 %v3411_v40  ;;  %v3720_v39 = vld [vmem:[%s6165_s5 + $0x194] ss:$8 sps:$4 sm:$0xff]   ;;  %v3715_v40 = vld [vmem:[%s6165_s5 + $0x90] ss:$8 sps:$4 sm:$0xff]  }
 0x17f   :  { %1402 = vmatpush2.bf16.msra.mxu0 %v3408_v6  ;;  %1475 = vmatpush2.bf16.msra.mxu1 %v3410_v7  ;;  %v3718_v6 = vld [vmem:[%s6165_s5 + $0x190] ss:$8 sps:$4 sm:$0xff]   ;;  %v3723_v7 = vld [vmem:[%s6165_s5 + $0x84] ss:$8 sps:$4 sm:$0xff]  }
 0x180   :  { %2909 = vmatprep.subr.bf16.mxu0 %v3633_v1  ;;  %2982 = vmatprep.subr.bf16.mxu1 %v3636_v31  ;;  %v3726_v1 = vld [vmem:[%s6165_s5 + $0x184] ss:$8 sps:$4 sm:$0xff]   ;;  %v3721_v31 = vld [vmem:[%s6165_s5 + $0x80] ss:$8 sps:$4 sm:$0xff]  }
 0x182   :  { %1404 = vmatmul.mubr.bf16.vlgmr.msra.gmra.mxu0 %v4498_v47  ;;  %1477 = vmatmul.mubr.bf16.vlgmr.msra.gmra.mxu1 %v4498_v47  ;;  %v3645_v47 = vld [vmem:[%s6165_s5 + $0x54] ss:$8 sps:$4 sm:$0xff]  }
 0x183   :  { %1413 = vmatprep.mubr.bf16.mxu0 %v4535_v57  ;;  %1486 = vmatprep.mubr.bf16.mxu1 %v4535_v57  ;;  %v3648_v57 = vld [vmem:[%s6165_s5 + $0x154] ss:$8 sps:$4 sm:$0xff]  }
 0x184   :  { %2910 = vmatpush1.bf16.msra.mxu0 %v3631_v42  ;;  %2983 = vmatpush1.bf16.msra.mxu1 %v3634_v9  ;;  %v3724_v42 = vld [vmem:[%s6165_s5 + $0x180] ss:$8 sps:$4 sm:$0xff]   ;;  %v3729_v9 = vld [vmem:[%s6165_s5 + $0x274] ss:$8 sps:$4 sm:$0xff]  }
 0x185   :  { %2911 = vmatprep.subr.bf16.mxu0 %v3639_v2  ;;  %2984 = vmatprep.subr.bf16.mxu1 %v3642_v10  ;;  %v3732_v2 = vld [vmem:[%s6165_s5 + $0x374] ss:$8 sps:$4 sm:$0xff]   ;;  %v515_v10 = vsub.s32 2, %v4441_v46 }
 0x188   :  { %2912 = vmatpush1.bf16.msra.mxu0 %v3637_v11  ;;  %2985 = vmatpush1.bf16.msra.mxu1 %v3640_v51  ;;  %v503_v11 = vld [vmem:[%s6164_s4] sm:$0xff]  ;;  %v519_v51 = vsub.s32 3, %v4441_v46 }
 0x189   :  { %2913 = vmatprep.subr.bf16.mxu0 %v3645_v47  ;;  %2986 = vmatprep.subr.bf16.mxu1 %v3648_v57  ;;  %v4961_v47 = vrot.slane %v503_v11, %v4447_v22  ;;  %v4963_v57 = vrot.slane %v503_v11, %v515_v10 }
 0x18a   :  { %1414 = vmatmul.mubr.bf16.gmra.mxu0 %v4565_v5  ;;  %1487 = vmatmul.mubr.bf16.gmra.mxu1 %v4565_v5  ;;  %v3657_v5 = vld [vmem:[%s6165_s5 + $0x34] ss:$8 sps:$4 sm:$0xff]  }
 0x18b   :  { %1423 = vmatprep.mubr.bf16.mxu0 %v4580_v41  ;;  %1496 = vmatprep.mubr.bf16.mxu1 %v4580_v41  ;;  %v3660_v41 = vld [vmem:[%s6165_s5 + $0x134] ss:$8 sps:$4 sm:$0xff]  }
 0x18c   :  { %2914 = vmatpush1.bf16.msra.mxu0 %v3643_v37  ;;  %2987 = vmatpush1.bf16.msra.mxu1 %v3646_v48 }
 0x18d   :  { %2915 = vmatprep.subr.bf16.mxu0 %v3651_v49  ;;  %2988 = vmatprep.subr.bf16.mxu1 %v3654_v36  ;;  %v4966_v49 = vrot.slane %v503_v11, %v4444_v18  ;;  %v4968_v36 = vrot.slane %v503_v11, %v519_v51 }
 0x190   :  { %2916 = vmatpush1.bf16.msra.mxu0 %v3649_v50  ;;  %2989 = vmatpush1.bf16.msra.mxu1 %v3652_v30 }
 0x191   :  { %2917 = vmatprep.subr.bf16.mxu0 %v3657_v5  ;;  %2990 = vmatprep.subr.bf16.mxu1 %v3660_v41 }
 0x192   :  { %1424 = vmatmul.mubr.bf16.gmra.mxu0 %v4604_v54  ;;  %1497 = vmatmul.mubr.bf16.gmra.mxu1 %v4604_v54  ;;  %v3669_v54 = vld [vmem:[%s6165_s5 + $0x14] ss:$8 sps:$4 sm:$0xff]  }
 0x193   :  { %1433 = vmatprep.mubr.bf16.mxu0 %v4622_v29  ;;  %1506 = vmatprep.mubr.bf16.mxu1 %v4622_v29  ;;  %v3672_v29 = vld [vmem:[%s6165_s5 + $0x114] ss:$8 sps:$4 sm:$0xff]  }
 0x194   :  { %2918 = vmatpush1.bf16.msra.mxu0 %v3655_v28  ;;  %2991 = vmatpush1.bf16.msra.mxu1 %v3658_v52  ;;  %v523_v28 = vsub.s32 4, %v4441_v46 }
 0x195   :  { %2919 = vmatprep.subr.bf16.mxu0 %v3663_v17  ;;  %2992 = vmatprep.subr.bf16.mxu1 %v3666_v8  ;;  %v531_v8 = vsub.s32 6, %v4441_v46 }
 0x198   :  { %2920 = vmatpush1.bf16.msra.mxu0 %v3661_v13  ;;  %2993 = vmatpush1.bf16.msra.mxu1 %v3664_v55 }
 0x199   :  { %2921 = vmatprep.subr.bf16.mxu0 %v3669_v54  ;;  %2994 = vmatprep.subr.bf16.mxu1 %v3672_v29 }
 0x19a   :  { %1434 = vmatmul.mubr.bf16.gmra.mxu0 %v4641_v34  ;;  %1507 = vmatmul.mubr.bf16.gmra.mxu1 %v4641_v34  ;;  %v3684_v34 = vld [vmem:[%s6165_s5 + $0x1f4] ss:$8 sps:$4 sm:$0xff]  }
 0x19c   :  { %2922 = vmatpush1.bf16.msra.mxu0 %v3667_v25  ;;  %2995 = vmatpush1.bf16.msra.mxu1 %v3670_v43  ;;  %v527_v25 = vsub.s32 5, %v4441_v46 }
 0x19d   :  { %2923 = vmatprep.subr.bf16.mxu0 %v3675_v16  ;;  %2996 = vmatprep.subr.bf16.mxu1 %v3678_v27 }
 0x1a0   :  { %2924 = vmatpush1.bf16.msra.mxu0 %v3673_v23  ;;  %2997 = vmatpush1.bf16.msra.mxu1 %v3676_v56 }
 0x1a1   :  { %2925 = vmatprep.subr.bf16.mxu0 %v3681_v59  ;;  %2998 = vmatprep.subr.bf16.mxu1 %v3684_v34  ;;  %v4983_v34 = vrot.slane %v503_v11, %v523_v28 }
 0x1a3   :  { %6193 = vst [vmem:[#allocation9_spill] sm:$0xff] %v4983_v34 }
 0x1a4   :  { %2926 = vmatpush2.bf16.msra.mxu0 %v3679_v45  ;;  %2999 = vmatpush2.bf16.msra.mxu1 %v3682_v58  ;;  %v535_v45 = vsub.s32 7, %v4441_v46 }
 0x1a5   :  { %2927 = vmatprep.subr.bf16.mxu0 %v3687_v60  ;;  %3000 = vmatprep.subr.bf16.mxu1 %v3690_v61 }
 0x1a8   :  { %2928 = vmatpush2.bf16.msra.mxu0 %v3685_v62  ;;  %3001 = vmatpush2.bf16.msra.mxu1 %v3688_v21  ;;  %v4986_v62 = vrot.slane %v503_v11, %v531_v8 }
 0x1a9   :  { %2929 = vmatprep.subr.bf16.mxu0 %v3693_v14  ;;  %3002 = vmatprep.subr.bf16.mxu1 %v3696_v19 }
 0x1aa   :  { %6194 = vst [vmem:[#allocation10_spill] sm:$0xff] %v4986_v62 }
 0x1ac   :  { %2930 = vmatpush2.bf16.msra.mxu0 %v3691_v15  ;;  %3003 = vmatpush2.bf16.msra.mxu1 %v3694_v20 }
 0x1ad   :  { %2931 = vmatprep.subr.bf16.mxu0 %v3699_v32  ;;  %3004 = vmatprep.subr.bf16.mxu1 %v3702_v33  ;;  %v4990_v32 = vrot.slane %v503_v11, %v527_v25 }
 0x1af   :  { %6195 = vst [vmem:[#allocation11_spill] sm:$0xff] %v4990_v32 }
 0x1b0   :  { %2932 = vmatpush2.bf16.msra.mxu0 %v3697_v44  ;;  %3005 = vmatpush2.bf16.msra.mxu1 %v3700_v63 }
 0x1b1   :  { %2933 = vmatprep.subr.bf16.mxu0 %v3705_v35  ;;  %3006 = vmatprep.subr.bf16.mxu1 %v3708_v26 }
 0x1b4   :  { %2934 = vmatpush2.bf16.msra.mxu0 %v3703_v24  ;;  %3007 = vmatpush2.bf16.msra.mxu1 %v3706_v3 }
 0x1b5   :  { %2935 = vmatprep.subr.bf16.mxu0 %v3711_v0  ;;  %3008 = vmatprep.subr.bf16.mxu1 %v3714_v4  ;;  %v5000_v4 = vrot.slane %v503_v11, %v535_v45 }
 0x1b7   :  { %6196 = vst [vmem:[#allocation12_spill] sm:$0xff] %v5000_v4 }
 0x1b8   :  { %2936 = vmatpush2.bf16.msra.mxu0 %v3709_v12  ;;  %3009 = vmatpush2.bf16.msra.mxu1 %v3712_v53 }
 0x1b9   :  { %2937 = vmatprep.subr.bf16.mxu0 %v3717_v38  ;;  %3010 = vmatprep.subr.bf16.mxu1 %v3720_v39 }
 0x1bc   :  { %2938 = vmatpush2.bf16.msra.mxu0 %v3715_v40  ;;  %3011 = vmatpush2.bf16.msra.mxu1 %v3718_v6 }
 0x1bd   :  { %2939 = vmatprep.subr.bf16.mxu0 %v3723_v7  ;;  %3012 = vmatprep.subr.bf16.mxu1 %v3726_v1 }
 0x1c0   :  { %2940 = vmatpush2.bf16.msra.mxu0 %v3721_v31  ;;  %3013 = vmatpush2.bf16.msra.mxu1 %v3724_v42 }
 0x1c1   :  { %3055 = vmatprep.subr.bf16.mxu0 %v3729_v9  ;;  %3128 = vmatprep.subr.bf16.mxu1 %v3732_v2 }
 0x202   :  { %v1259_v37 = vpop.f32.mrf.mxu0  ;;  %v1332_v48 = vpop.f32.mrf.mxu1 }
 0x203   :  { %v1260_v50 = vadd.f32 %v1259_v37, %v4961_v47  ;;  %v1333_v30 = vadd.f32 %v1332_v48, %v4963_v57 }
 0x204   :  { %v1261_v5 = vpop.f32.mrf.mxu0  ;;  %v1334_v41 = vpop.f32.mrf.mxu1 }
 0x205   :  { %v1581_v52 = vmul.f32 0.044715, %v1260_v50  ;;  %v1583_v17 = vmul.f32 0.044715, %v1333_v30  ;;  %v4975_v13 = vadd.f32 %v1261_v5, %v4966_v49  ;;  %v4978_v55 = vadd.f32 %v1334_v41, %v4968_v36 }
 0x206   :  { %v1263_v54 = vpop.f32.mrf.mxu0  ;;  %v1336_v29 = vpop.f32.mrf.mxu1  ;;  %v4995_v46 = vmul.f32 0.5, %v1260_v50  ;;  %v5002_v12 = vmul.f32 0.5, %v1333_v30 }
 0x207   :  { %v1645_v43 = vmul.f32 %v1581_v52, %v1260_v50  ;;  %v1647_v16 = vmul.f32 %v1583_v17, %v1333_v30  ;;  %v1264_v27 = vadd.f32 %v1263_v54, %v4961_v47  ;;  %v1337_v23 = vadd.f32 %v1336_v29, %v4963_v57 }
 0x208   :  { %v1265_v56 = vpop.f32.mrf.mxu0  ;;  %v1338_v59 = vpop.f32.mrf.mxu1  ;;  %v1582_v21 = vmul.f32 0.044715, %v4975_v13  ;;  %v1584_v14 = vmul.f32 0.044715, %v4978_v55  ;;  %v5006_v39 = vmul.f32 0.5, %v4975_v13  ;;  %v5023_v5 = vmul.f32 0.5, %v4978_v55 }
 0x209   :  { %v1709_v58 = vmul.f32 %v1645_v43, %v1260_v50  ;;  %v1711_v60 = vmul.f32 %v1647_v16, %v1333_v30  ;;  %v1589_v61 = vmul.f32 0.044715, %v1264_v27  ;;  %v1591_v19 = vmul.f32 0.044715, %v1337_v23 }
 0x20a   :  { %v1269_v15 = vpop.f32.mrf.mxu0  ;;  %v1342_v20 = vpop.f32.mrf.mxu1  ;;  %v4993_v35 = vadd.f32 %v1265_v56, %v4966_v49  ;;  %v4998_v24 = vadd.f32 %v1338_v59, %v4968_v36  ;;  %6197 = vst [vmem:[#allocation13_spill] sm:$0xff] %v5006_v39  ;;  %v1646_v2 = vmul.f32 %v1582_v21, %v4975_v13  ;;  %v1648_v10 = vmul.f32 %v1584_v14, %v4978_v55 }
 0x20b   :  { %v1773_v33 = vadd.f32 %v1709_v58, %v1260_v50  ;;  %v1775_v44 = vadd.f32 %v1711_v60, %v1333_v30  ;;  %v1653_v63 = vmul.f32 %v1589_v61, %v1264_v27  ;;  %v1655_v26 = vmul.f32 %v1591_v19, %v1337_v23  ;;  %6198 = vst [vmem:[#allocation14_spill] sm:$0xff] %v5023_v5 }
 0x20c   :  { %v1271_v3 = vpop.f32.mrf.mxu0  ;;  %v1344_v0 = vpop.f32.mrf.mxu1  ;;  %v1590_v38 = vmul.f32 0.044715, %v4993_v35  ;;  %v5009_v7 = vadd.f32 %v1269_v15, %v4961_v47  ;;  %v5012_v1 = vadd.f32 %v1342_v20, %v4963_v57  ;;  %v5019_v51 = vmul.f32 0.5, %v1264_v27 }
 0x20d   :  { %v1717_v53 = vmul.f32 %v1653_v63, %v1264_v27  ;;  %v1837_v40 = vmul.f32 0.7978846, %v1773_v33  ;;  %v1719_v6 = vmul.f32 %v1655_v26, %v1337_v23  ;;  %v1839_v9 = vmul.f32 0.7978846, %v1775_v44 }
 0x20e   :  { %v1273_v31 = vpop.f32.mrf.mxu0  ;;  %v1346_v42 = vpop.f32.mrf.mxu1  ;;  %v5017_v11 = vadd.f32 %v1271_v3, %v4966_v49  ;;  %v1592_v48 = vmul.f32 0.044715, %v4998_v24  ;;  %v5025_v41 = vmul.f32 0.5, %v1337_v23  ;;  %v1654_v52 = vmul.f32 %v1590_v38, %v4993_v35 }
 0x20f   :  { %v1781_v37 = vadd.f32 %v1717_v53, %v1264_v27  ;;  %v1783_v28 = vadd.f32 %v1719_v6, %v1337_v23  ;;  %v1597_v17 = vmul.f32 0.044715, %v5009_v7  ;;  %3839 = vtanh.f32 %v1837_v40 }
 0x210   :  { %v1275_v50 = vpop.f32.mrf.mxu0  ;;  %v1348_v30 = vpop.f32.mrf.mxu1  ;;  %6199 = vst [vmem:[#allocation15_spill] sm:$0xff] %v5025_v41  ;;  %v1599_v8 = vmul.f32 0.044715, %v5012_v1  ;;  %v1598_v54 = vmul.f32 0.044715, %v5017_v11  ;;  %v5032_v29 = vadd.f32 %v1344_v0, %v4968_v36  ;;  %3841 = vtanh.f32 %v1839_v9 }
 0x211   :  { %v5035_v16 = vmul.f32 %v1646_v2, %v4975_v13  ;;  %v5038_v27 = vmul.f32 %v1648_v10, %v4978_v55  ;;  %v5041_v23 = vadd.f32 %v1273_v31, %v4961_v47  ;;  %v1845_v56 = vmul.f32 0.7978846, %v1781_v37 }
 0x212   :  { %v1279_v25 = vpop.f32.mrf.mxu0  ;;  %v1352_v43 = vpop.f32.mrf.mxu1  ;;  %v1656_v59 = vmul.f32 %v1592_v48, %v4998_v24  ;;  %v1600_v45 = vmul.f32 0.044715, %v5032_v29  ;;  %v5046_v58 = vadd.f32 %v1346_v42, %v4963_v57  ;;  %v1847_v21 = vmul.f32 0.7978846, %v1783_v28 }
 0x213   :  { %v5049_v14 = vmul.f32 %v1654_v52, %v4993_v35  ;;  %v1661_v19 = vmul.f32 %v1597_v17, %v5009_v7  ;;  %v5053_v15 = vadd.f32 %v1275_v50, %v4966_v49  ;;  %v1663_v20 = vmul.f32 %v1599_v8, %v5012_v1 }
 0x214   :  { %v1281_v60 = vpop.f32.mrf.mxu0  ;;  %v1354_v61 = vpop.f32.mrf.mxu1  ;;  %v1662_v33 = vmul.f32 %v1598_v54, %v5017_v11  ;;  %v5058_v44 = vadd.f32 %v1348_v30, %v4968_v36  ;;  %v5061_v63 = vadd.f32 %v1279_v25, %v4961_v47  ;;  %v1664_v0 = vmul.f32 %v1600_v45, %v5032_v29 }
 0x215   :  { %v1605_v53 = vmul.f32 0.044715, %v5041_v23  ;;  %v5066_v38 = vadd.f32 %v1352_v43, %v4963_v57  ;;  %v5069_v40 = vadd.f32 %v1281_v60, %v4966_v49  ;;  %3843 = vtanh.f32 %v1845_v56 }
 0x216   :  { %6200 = vst [vmem:[#allocation16_spill] sm:$0xff] %v5061_v63  ;;  %v1283_v26 = vpop.f32.mrf.mxu0  ;;  %v1356_v3 = vpop.f32.mrf.mxu1  ;;  %v5072_v6 = vmul.f32 %v1656_v59, %v4998_v24  ;;  %v1607_v31 = vmul.f32 0.044715, %v5046_v58  ;;  %v1606_v42 = vmul.f32 0.044715, %v5053_v15  ;;  %3845 = vtanh.f32 %v1847_v21 }
 0x217   :  { %6201 = vst [vmem:[#allocation17_spill] sm:$0xff] %v5066_v38  ;;  %v5077_v10 = vmul.f32 %v1661_v19, %v5009_v7  ;;  %v1608_v37 = vmul.f32 0.044715, %v5058_v44  ;;  %v1613_v48 = vmul.f32 0.044715, %v5061_v63  ;;  %v5082_v50 = vmul.f32 %v1663_v20, %v5012_v1 }
 0x218   :  { %v1285_v9 = vpop.f32.mrf.mxu0  ;;  %v1358_v2 = vpop.f32.mrf.mxu1  ;;  %v5085_v30 = vmul.f32 %v1662_v33, %v5017_v11  ;;  %v1615_v28 = vmul.f32 0.044715, %v5066_v38  ;;  %v5089_v52 = vadd.f32 %v1354_v61, %v4968_v36  ;;  %v5092_v54 = vmul.f32 %v1664_v0, %v5032_v29 }
 0x219   :  { %v1669_v25 = vmul.f32 %v1605_v53, %v5041_v23  ;;  %v1614_v43 = vmul.f32 0.044715, %v5069_v40  ;;  %v5097_v56 = vadd.f32 %v1283_v26, %v4961_v47  ;;  %v1671_v59 = vmul.f32 %v1607_v31, %v5046_v58 }
 0x21a   :  { %v1289_v17 = vpop.f32.mrf.mxu0  ;;  %v1362_v8 = vpop.f32.mrf.mxu1  ;;  %v1670_v45 = vmul.f32 %v1606_v42, %v5053_v15  ;;  %v1616_v60 = vmul.f32 0.044715, %v5089_v52  ;;  %v5103_v61 = vadd.f32 %v1356_v3, %v4963_v57  ;;  %v1672_v20 = vmul.f32 %v1608_v37, %v5058_v44 }
 0x21b   :  { %6202 = vst [vmem:[#allocation18_spill] sm:$0xff] %v5097_v56  ;;  %v1677_v33 = vmul.f32 %v1613_v48, %v5061_v63  ;;  %v1621_v0 = vmul.f32 0.044715, %v5097_v56  ;;  %v5109_v26 = vadd.f32 %v1285_v9, %v4966_v49  ;;  %v1679_v53 = vmul.f32 %v1615_v28, %v5066_v38 }
 0x21c   :  { %6203 = vst [vmem:[#allocation19_spill] sm:$0xff] %v5103_v61  ;;  %v1291_v21 = vpop.f32.mrf.mxu0  ;;  %v1364_v19 = vpop.f32.mrf.mxu1  ;;  %v1623_v31 = vmul.f32 0.044715, %v5103_v61  ;;  %v5114_v42 = vadd.f32 %v1358_v2, %v4968_v36  ;;  %v5117_v3 = vadd.f32 %v1289_v17, %v4961_v47  ;;  %v5120_v37 = vmul.f32 %v1669_v25, %v5041_v23 }
 0x21d   :  { %v3840_v22 = vpop.eup %3839  ;;  %v1678_v48 = vmul.f32 %v1614_v43, %v5069_v40  ;;  %v1680_v9 = vmul.f32 %v1616_v60, %v5089_v52  ;;  %v1622_v4 = vmul.f32 0.044715, %v5109_v26  ;;  %v5128_v2 = vmul.f32 %v1671_v59, %v5046_v58 }
 0x21e   :  { %v1293_v18 = vpop.f32.mrf.mxu0  ;;  %v1366_v28 = vpop.f32.mrf.mxu1  ;;  %v1624_v17 = vmul.f32 0.044715, %v5114_v42  ;;  %v5132_v62 = vadd.f32 %v1362_v8, %v4963_v57  ;;  %v5135_v25 = vadd.f32 %v1291_v21, %v4966_v49  ;;  %v5138_v43 = vmul.f32 %v1670_v45, %v5053_v15 }
 0x21f   :  { %v5125_v32 = vpop.eup %3841  ;;  %v5141_v60 = vmul.f32 %v1672_v20, %v5058_v44  ;;  %v1685_v34 = vmul.f32 %v1621_v0, %v5097_v56  ;;  %v1629_v5 = vmul.f32 0.044715, %v5117_v3  ;;  %v5146_v59 = vmul.f32 %v1677_v33, %v5061_v63 }
 0x220   :  { %v5149_v39 = vmul.f32 %v1679_v53, %v5066_v38  ;;  %v1687_v8 = vmul.f32 %v1623_v31, %v5103_v61  ;;  %v5153_v21 = vadd.f32 %v1364_v19, %v4968_v36  ;;  %v1295_v45 = vpop.f32.mrf.mxu0  ;;  %v5156_v41 = vmul.f32 %v1678_v48, %v5069_v40 }
 0x221   :  { %6204 = vst [vmem:[#allocation20_spill] sm:$0xff] %v5146_v59  ;;  %v5159_v20 = vmul.f32 %v1680_v9, %v5089_v52  ;;  %v1686_v0 = vmul.f32 %v1622_v4, %v5109_v26  ;;  %v5163_v33 = vadd.f32 %v1293_v18, %v4961_v47  ;;  %v1368_v59 = vpop.f32.mrf.mxu1  ;;  %v1688_v53 = vmul.f32 %v1624_v17, %v5114_v42 }
 0x222   :  { %6205 = vst [vmem:[#allocation21_spill] sm:$0xff] %v5149_v39  ;;  %v1631_v31 = vmul.f32 0.044715, %v5132_v62  ;;  %v1630_v19 = vmul.f32 0.044715, %v5135_v25  ;;  %v5169_v39 = vadd.f32 %v1366_v28, %v4963_v57  ;;  %v3844_v48 = vpop.eup %3843  ;;  %v5172_v38 = vmul.f32 %v1685_v34, %v5097_v56 }
 0x223   :  { %v1693_v9 = vmul.f32 %v1629_v5, %v5117_v3  ;;  %v1632_v4 = vmul.f32 0.044715, %v5153_v21  ;;  %v5177_v18 = vadd.f32 %v1295_v45, %v4966_v49  ;;  %v3846_v47 = vpop.eup %3845  ;;  %v5180_v17 = vmul.f32 %v1687_v8, %v5103_v61 }
 0x224   :  { %6206 = vst [vmem:[#allocation22_spill] sm:$0xff] %v5172_v38  ;;  %v1637_v63 = vmul.f32 0.044715, %v5163_v33  ;;  %v1639_v57 = vmul.f32 0.044715, %v5169_v39  ;;  %v5185_v28 = vadd.f32 %v1368_v59, %v4968_v36  ;;  %v5188_v34 = vmul.f32 %v1686_v0, %v5109_v26 }
 0x225   :  { %6207 = vst [vmem:[#allocation23_spill] sm:$0xff] %v5180_v17  ;;  %v1638_v5 = vmul.f32 0.044715, %v5177_v18  ;;  %v1774_v49 = vadd.f32 %v5035_v16, %v4975_v13  ;;  %v1782_v45 = vadd.f32 %v5049_v14, %v4993_v35  ;;  %v5196_v8 = vmul.f32 %v1688_v53, %v5114_v42 }
 0x226   :  { %v1695_v17 = vmul.f32 %v1631_v31, %v5132_v62  ;;  %v1694_v61 = vmul.f32 %v1630_v19, %v5135_v25  ;;  %v1640_v36 = vmul.f32 0.044715, %v5185_v28  ;;  %v5202_v59 = vmul.f32 %v1693_v9, %v5117_v3 }
 0x227   :  { %v1696_v0 = vmul.f32 %v1632_v4, %v5153_v21  ;;  %v1838_v38 = vmul.f32 0.7978846, %v1774_v49  ;;  %v1846_v56 = vmul.f32 0.7978846, %v1782_v45  ;;  %v1701_v13 = vmul.f32 %v1637_v63, %v5163_v33 }
 0x228   :  { %v1703_v16 = vmul.f32 %v1639_v57, %v5169_v39  ;;  %v1776_v14 = vadd.f32 %v5038_v27, %v4978_v55  ;;  %v1784_v53 = vadd.f32 %v5072_v6, %v4998_v24  ;;  %v1702_v31 = vmul.f32 %v1638_v5, %v5177_v18 }
 0x229   :  { %v1704_v19 = vmul.f32 %v1640_v36, %v5185_v28  ;;  %3847 = vtanh.f32 %v1838_v38  ;;  %v1965_v9 = vadd.f32 1.0, %v3840_v22  ;;  %v1973_v45 = vadd.f32 1.0, %v3844_v48 }
 0x22a   :  { %3849 = vtanh.f32 %v1846_v56  ;;  %v1840_v4 = vmul.f32 0.7978846, %v1776_v14  ;;  %v1848_v49 = vmul.f32 0.7978846, %v1784_v53  ;;  %v5214_v63 = vmul.f32 %v1695_v17, %v5132_v62 }
 0x22b   :  { %v5217_v57 = vmul.f32 %v1694_v61, %v5135_v25  ;;  %v5220_v55 = vmul.f32 %v1696_v0, %v5153_v21  ;;  %v1526_v27 = vmul.f32 0.5, %v4993_v35  ;;  %v5224_v6 = vmul.f32 %v1701_v13, %v5163_v33 }
 0x22c   :  { %v5227_v22 = vmul.f32 0.5, %v4998_v24  ;;  %3851 = vtanh.f32 %v1840_v4  ;;  %v1790_v38 = vadd.f32 %v5085_v30, %v5017_v11  ;;  %v5232_v56 = vmul.f32 %v1703_v16, %v5169_v39 }
 0x22d   :  { %v5235_v61 = vmul.f32 %v1702_v31, %v5177_v18  ;;  %v5238_v48 = vmul.f32 %v1704_v19, %v5185_v28  ;;  %3853 = vtanh.f32 %v1848_v49  ;;  %v5241_v35 = vmul.f32 %v1965_v9, %v4995_v46  ;;  %v6208_v31 = vld [vmem:[#allocation15_spill] sm:$0xff] }
 0x22e   :  { %v5244_v24 = vmul.f32 %v1973_v45, %v5019_v51  ;;  %v1798_v17 = vadd.f32 %v5138_v43, %v5053_v15  ;;  %v1854_v30 = vmul.f32 0.7978846, %v1790_v38  ;;  %v1967_v5 = vadd.f32 1.0, %v5125_v32 }
 0x22f   :  { %v1975_v36 = vadd.f32 1.0, %v3846_v47  ;;  %v1792_v0 = vadd.f32 %v5092_v54, %v5032_v29  ;;  %v1800_v13 = vadd.f32 %v5141_v60, %v5058_v44  ;;  %v5254_v16 = vmul.f32 0.5, %v5017_v11 }
 0x230   :  { %v1862_v46 = vmul.f32 0.7978846, %v1798_v17  ;;  %3855 = vtanh.f32 %v1854_v30  ;;  %v1789_v51 = vadd.f32 %v5077_v10, %v5009_v7  ;;  %v5259_v43 = vmul.f32 0.5, %v5053_v15 }
 0x231   :  { %v1856_v14 = vmul.f32 0.7978846, %v1792_v0  ;;  %v1864_v32 = vmul.f32 0.7978846, %v1800_v13  ;;  %v1797_v47 = vadd.f32 %v5120_v37, %v5041_v23  ;;  %v2109_v54 = vpack.c.bf16 %v5244_v24, %v5241_v35  ;;  %v6209_v0 = vld [vmem:[#allocation13_spill] sm:$0xff] }
 0x232   :  { %3857 = vtanh.f32 %v1862_v46  ;;  %v1853_v60 = vmul.f32 0.7978846, %v1789_v51  ;;  %v1791_v11 = vadd.f32 %v5082_v50, %v5012_v1  ;;  %v5268_v53 = vmul.f32 %v1967_v5, %v5002_v12 }
 0x233   :  { %3859 = vtanh.f32 %v1856_v14  ;;  %v1861_v10 = vmul.f32 0.7978846, %v1797_v47  ;;  %v1799_v15 = vadd.f32 %v5128_v2, %v5046_v58  ;;  %v5273_v19 = vmul.f32 %v1975_v36, %v6208_v31  ;;  %v6210_v47 = vld [vmem:[#allocation16_spill] sm:$0xff] }
 0x234   :  { %3861 = vtanh.f32 %v1864_v32  ;;  %v1855_v37 = vmul.f32 0.7978846, %v1791_v11  ;;  %v1806_v9 = vadd.f32 %v5156_v41, %v5069_v40  ;;  %v5278_v4 = vmul.f32 0.5, %v5032_v29 }
 0x235   :  { %3863 = vtanh.f32 %v1853_v60  ;;  %v1863_v50 = vmul.f32 0.7978846, %v1799_v15  ;;  %v1814_v12 = vadd.f32 %v5188_v34, %v5109_v26  ;;  %v5283_v45 = vmul.f32 0.5, %v5058_v44  ;;  %v6213_v15 = vld [vmem:[#allocation22_spill] sm:$0xff] }
 0x236   :  { %v3848_v49 = vpop.eup %3847  ;;  %3865 = vtanh.f32 %v1861_v10  ;;  %v1870_v2 = vmul.f32 0.7978846, %v1806_v9  ;;  %v1808_v38 = vadd.f32 %v5159_v20, %v5089_v52  ;;  %v1816_v29 = vadd.f32 %v5196_v8, %v5114_v42  ;;  %v6211_v8 = vld [vmem:[#allocation20_spill] sm:$0xff]  ;;  %v6212_v10 = vld [vmem:[#allocation18_spill] sm:$0xff] }
 0x237   :  { %v3850_v17 = vpop.eup %3849  ;;  %v1966_v30 = vadd.f32 1.0, %v3848_v49  ;;  %3867 = vtanh.f32 %v1855_v37  ;;  %v1878_v41 = vmul.f32 0.7978846, %v1814_v12  ;;  %v2111_v34 = vpack.c.bf16 %v5273_v19, %v5268_v53  ;;  %v3735_v49 = vld [vmem:[%s6165_s5 + $0x264] ss:$8 sps:$4 sm:$0xff]  }
 0x238   :  { %v1974_v5 = vadd.f32 1.0, %v3850_v17  ;;  %3869 = vtanh.f32 %v1863_v50  ;;  %v1872_v36 = vmul.f32 0.7978846, %v1808_v38  ;;  %v5293_v46 = vmul.f32 0.5, %v5009_v7  ;;  %v3727_v7 = vld [vmem:[%s6165_s5 + $0x270] ss:$8 sps:$4 sm:$0xff]  }
 0x239   :  { %v3852_v44 = vpop.eup %3851  ;;  %v2030_v13 = vmul.f32 %v1966_v30, %v6209_v0  ;;  %3871 = vtanh.f32 %v1870_v2  ;;  %v1880_v20 = vmul.f32 0.7978846, %v1816_v29  ;;  %v1805_v60 = vadd.f32 %v6211_v8, %v6210_v47  ;;  %v6214_v50 = vld [vmem:[#allocation14_spill] sm:$0xff]  ;;  %v6215_v38 = vld [vmem:[#allocation17_spill] sm:$0xff] }
 0x23a   :  { %v3854_v51 = vpop.eup %3853  ;;  %v2038_v14 = vmul.f32 %v1974_v5, %v1526_v27  ;;  %v1968_v32 = vadd.f32 1.0, %v3852_v44  ;;  %3873 = vtanh.f32 %v1878_v41  ;;  %v5298_v53 = vmul.f32 0.5, %v5041_v23  ;;  %v6216_v17 = vld [vmem:[#allocation21_spill] sm:$0xff]  ;;  %v6217_v5 = vld [vmem:[#allocation19_spill] sm:$0xff] }
 0x23b   :  { %v1976_v11 = vadd.f32 1.0, %v3854_v51  ;;  %3875 = vtanh.f32 %v1872_v36  ;;  %v1813_v31 = vadd.f32 %v6213_v15, %v6212_v10  ;;  %v5306_v27 = vmul.f32 0.5, %v5012_v1  ;;  %v3730_v1 = vld [vmem:[%s6165_s5 + $0x370] ss:$8 sps:$4 sm:$0xff]   ;;  %v3741_v15 = vld [vmem:[%s6165_s5 + $0x254] ss:$8 sps:$4 sm:$0xff]  }
 0x23c   :  { %v2110_v19 = vpack.c.bf16 %v2038_v14, %v2030_v13  ;;  %3877 = vtanh.f32 %v1880_v20  ;;  %v1869_v37 = vmul.f32 0.7978846, %v1805_v60  ;;  %v2032_v12 = vmul.f32 %v1968_v32, %v6214_v50  ;;  %v3733_v13 = vld [vmem:[%s6165_s5 + $0x260] ss:$8 sps:$4 sm:$0xff]   ;;  %v3738_v14 = vld [vmem:[%s6165_s5 + $0x364] ss:$8 sps:$4 sm:$0xff]  }
 0x23d   :  { %v3856_v9 = vpop.eup %3855  ;;  %v2040_v23 = vmul.f32 %v1976_v11, %v5227_v22  ;;  %v1877_v2 = vmul.f32 0.7978846, %v1813_v31  ;;  %v1807_v30 = vadd.f32 %v6216_v17, %v6215_v38  ;;  %v5319_v29 = vmul.f32 0.5, %v5046_v58  ;;  %v6218_v22 = vld [vmem:[#allocation23_spill] sm:$0xff]  ;;  %v6219_v31 = vld [vmem:[#allocation9_spill] sm:$0xff] }
 0x23e   :  { %2941 = vmatprep.mubr.bf16.mxu0 %v2110_v19  ;;  %v1982_v41 = vadd.f32 1.0, %v3856_v9  ;;  %3879 = vtanh.f32 %v1869_v37  ;;  %v1815_v36 = vadd.f32 %v6218_v22, %v6217_v5  ;;  %v5330_v20 = vmul.f32 0.5, %v5069_v40 }
 0x23f   :  { %v3858_v44 = vpop.eup %3857  ;;  %v2112_v0 = vpack.c.bf16 %v2040_v23, %v2032_v12  ;;  %2942 = vmatmul.mubr.bf16.vlgmr.msra.gmra.mxu0 %v2109_v54  ;;  %3881 = vtanh.f32 %v1877_v2  ;;  %v1871_v58 = vmul.f32 0.7978846, %v1807_v30  ;;  %v5337_v35 = vmul.f32 0.5, %v5109_v26  ;;  %v3736_v2 = vld [vmem:[%s6165_s5 + $0x360] ss:$8 sps:$4 sm:$0xff]  }
 0x240   :  { %v3860_v51 = vpop.eup %3859  ;;  %3056 = vmatpush1.bf16.msra.mxu0 %v3727_v7  ;;  %v1990_v32 = vadd.f32 1.0, %v3858_v44  ;;  %v2046_v8 = vmul.f32 %v1982_v41, %v5254_v16  ;;  %v1879_v24 = vmul.f32 0.7978846, %v1815_v36  ;;  %v6220_v7 = vld [vmem:[#allocation10_spill] sm:$0xff]  ;;  %v1822_v50 = vadd.f32 %v5217_v57, %v5135_v25 }
 0x241   :  { %v3862_v11 = vpop.eup %3861  ;;  %3014 = vmatprep.mubr.bf16.mxu1 %v2112_v0  ;;  %3057 = vmatprep.subr.bf16.mxu0 %v3735_v49  ;;  %v1984_v40 = vadd.f32 1.0, %v3860_v51  ;;  %3883 = vtanh.f32 %v1871_v58  ;;  %v1830_v30 = vadd.f32 %v5235_v61, %v5177_v18  ;;  %v3744_v36 = vld [vmem:[%s6165_s5 + $0x354] ss:$8 sps:$4 sm:$0xff]   ;;  %v3739_v61 = vld [vmem:[%s6165_s5 + $0x250] ss:$8 sps:$4 sm:$0xff]  }
 0x242   :  { %v1405_v54 = vpop.f32.mrf.mxu0  ;;  %v1478_v60 = vpop.f32.mrf.mxu1  ;;  %3015 = vmatmul.mubr.bf16.vlgmr.msra.gmra.mxu1 %v2111_v34  ;;  %v2054_v37 = vmul.f32 %v1990_v32, %v5259_v43  ;;  %v1992_v9 = vadd.f32 1.0, %v3862_v11  ;;  %3885 = vtanh.f32 %v1879_v24  ;;  %v5359_v34 = vmul.f32 0.5, %v5089_v52 }
 0x243   :  { %v5343_v19 = vadd.f32 %v1405_v54, %v6219_v31  ;;  %v5346_v16 = vadd.f32 %v1478_v60, %v6220_v7  ;;  %v3864_v26 = vpop.eup %3863  ;;  %3129 = vmatpush1.bf16.msra.mxu1 %v3730_v1  ;;  %v2048_v22 = vmul.f32 %v1984_v40, %v5278_v4  ;;  %v3747_v54 = vld [vmem:[%s6165_s5 + $0x244] ss:$8 sps:$4 sm:$0xff]   ;;  %v1886_v60 = vmul.f32 0.7978846, %v1822_v50 }
 0x244   :  { %v5351_v12 = vpop.f32.mrf.mxu0  ;;  %v5353_v23 = vpop.f32.mrf.mxu1  ;;  %v1981_v17 = vadd.f32 1.0, %v3864_v26  ;;  %3130 = vmatprep.subr.bf16.mxu1 %v3738_v14  ;;  %3058 = vmatpush1.bf16.msra.mxu0 %v3733_v13  ;;  %v2118_v41 = vpack.c.bf16 %v2054_v37, %v2046_v8  ;;  %v2056_v1 = vmul.f32 %v1992_v9, %v5283_v45 }
 0x245   :  { %v3866_v49 = vpop.eup %3865  ;;  %v1585_v43 = vmul.f32 0.044715, %v5343_v19  ;;  %3059 = vmatprep.subr.bf16.mxu0 %v3741_v15  ;;  %v1587_v51 = vmul.f32 0.044715, %v5346_v16  ;;  %v3742_v15 = vld [vmem:[%s6165_s5 + $0x350] ss:$8 sps:$4 sm:$0xff]   ;;  %3887 = vtanh.f32 %v1886_v60 }
 0x246   :  { %v3868_v57 = vpop.eup %3867  ;;  %v1989_v44 = vadd.f32 1.0, %v3866_v49  ;;  %v5369_v52 = vpop.f32.mrf.mxu0  ;;  %v2045_v13 = vmul.f32 %v1981_v17, %v5293_v46  ;;  %2951 = vmatprep.mubr.bf16.mxu0 %v2118_v41  ;;  %v2120_v32 = vpack.c.bf16 %v2056_v1, %v2048_v22  ;;  %v3751_v60 = vld [vmem:[%s6165_s5 + $0x230] ss:$8 sps:$4 sm:$0xff]  }
 0x247   :  { %v5371_v0 = vpop.f32.mrf.mxu1  ;;  %v3870_v58 = vpop.eup %3869  ;;  %v1983_v4 = vadd.f32 1.0, %v3868_v57  ;;  %v1649_v45 = vmul.f32 %v1585_v43, %v5343_v19  ;;  %3131 = vmatpush1.bf16.msra.mxu1 %v3736_v2  ;;  %v3750_v2 = vld [vmem:[%s6165_s5 + $0x344] ss:$8 sps:$4 sm:$0xff]   ;;  %v1894_v57 = vmul.f32 0.7978846, %v1830_v30 }
 0x248   :  { %v3872_v14 = vpop.eup %3871  ;;  %v2053_v8 = vmul.f32 %v1989_v44, %v5298_v53  ;;  %v1991_v24 = vadd.f32 1.0, %v3870_v58  ;;  %v5383_v11 = vpop.f32.mrf.mxu0  ;;  %v1560_v53 = vmul.f32 0.5, %v5114_v42  ;;  %3024 = vmatprep.mubr.bf16.mxu1 %v2120_v32  ;;  %3132 = vmatprep.subr.bf16.mxu1 %v3744_v36  ;;  %v3745_v42 = vld [vmem:[%s6165_s5 + $0x240] ss:$8 sps:$4 sm:$0xff]   ;;  %v1651_v44 = vmul.f32 %v1587_v51, %v5346_v16 }
 0x249   :  { %v5385_v40 = vpop.f32.mrf.mxu1  ;;  %v3874_v46 = vpop.eup %3873  ;;  %v2047_v26 = vmul.f32 %v1983_v4, %v5306_v27  ;;  %v1998_v37 = vadd.f32 1.0, %v3872_v14  ;;  %v1713_v9 = vmul.f32 %v1649_v45, %v5343_v19  ;;  %3060 = vmatpush1.bf16.msra.mxu0 %v3739_v61  ;;  %v3753_v61 = vld [vmem:[%s6165_s5 + $0x234] ss:$8 sps:$4 sm:$0xff]   ;;  %v1549_v51 = vmul.f32 0.5, %v6210_v47 }
 0x24a   :  { %v3876_v49 = vpop.eup %3875  ;;  %v2117_v50 = vpack.c.bf16 %v2053_v8, %v2045_v13  ;;  %v2055_v17 = vmul.f32 %v1991_v24, %v5319_v29  ;;  %v2006_v43 = vadd.f32 1.0, %v3874_v46  ;;  %v5397_v41 = vpop.f32.mrf.mxu0  ;;  %3061 = vmatprep.subr.bf16.mxu0 %v3747_v54  ;;  %v1557_v14 = vmul.f32 0.5, %v6212_v10  ;;  %v3756_v47 = vld [vmem:[%s6165_s5 + $0x334] ss:$8 sps:$4 sm:$0xff]  }
 0x24b   :  { %v5399_v27 = vpop.f32.mrf.mxu1  ;;  %v3878_v22 = vpop.eup %3877  ;;  %v2062_v1 = vmul.f32 %v1998_v37, %v5330_v20  ;;  %v2000_v36 = vadd.f32 1.0, %v3876_v49  ;;  %v1777_v29 = vadd.f32 %v1713_v9, %v5343_v19  ;;  %3133 = vmatpush1.bf16.msra.mxu1 %v3742_v15  ;;  %v3748_v20 = vld [vmem:[%s6165_s5 + $0x340] ss:$8 sps:$4 sm:$0xff]   ;;  %3889 = vtanh.f32 %v1894_v57  ;;  %v3759_v9 = vld [vmem:[%s6165_s5 + $0x224] ss:$8 sps:$4 sm:$0xff]  }
 0x24c   :  { %2952 = vmatmul.mubr.bf16.gmra.mxu0 %v2117_v50  ;;  %v2119_v58 = vpack.c.bf16 %v2055_v17, %v2047_v26  ;;  %v2070_v30 = vmul.f32 %v2006_v43, %v5337_v35  ;;  %v2008_v13 = vadd.f32 1.0, %v3878_v22  ;;  %v5411_v4 = vpop.f32.mrf.mxu0  ;;  %v3880_v45 = vpop.eup %3879  ;;  %v1551_v35 = vmul.f32 0.5, %v6215_v38  ;;  %3134 = vmatprep.subr.bf16.mxu1 %v3750_v2  ;;  %v3754_v2 = vld [vmem:[%s6165_s5 + $0x330] ss:$8 sps:$4 sm:$0xff]  }
 0x24d   :  { %v3882_v32 = vpop.eup %3881  ;;  %v2064_v24 = vmul.f32 %v2000_v36, %v5359_v34  ;;  %v1997_v46 = vadd.f32 1.0, %v3880_v45  ;;  %v5426_v10 = vpop.f32.mrf.mxu1  ;;  %3062 = vmatpush1.bf16.msra.mxu0 %v3745_v42  ;;  %v1559_v15 = vmul.f32 0.5, %v6217_v5  ;;  %v1841_v26 = vmul.f32 0.7978846, %v1777_v29 }
 0x24e   :  { %3025 = vmatmul.mubr.bf16.gmra.mxu1 %v2119_v58  ;;  %v2126_v8 = vpack.c.bf16 %v2070_v30, %v2062_v1  ;;  %v2072_v54 = vmul.f32 %v2008_v13, %v1560_v53  ;;  %v2005_v38 = vadd.f32 1.0, %v3882_v32  ;;  %v5430_v37 = vmul.f32 0.5, %v5135_v25  ;;  %v3884_v34 = vpop.eup %3883  ;;  %3063 = vmatprep.subr.bf16.mxu0 %v3753_v61  ;;  %v5441_v17 = vpop.f32.mrf.mxu0 }
 0x24f   :  { %v1715_v49 = vmul.f32 %v1651_v44, %v5346_v16  ;;  %v5437_v50 = vmul.f32 0.5, %v5177_v18  ;;  %v1824_v5 = vadd.f32 %v5220_v55, %v5153_v21  ;;  %v3886_v25 = vpop.eup %3885  ;;  %3135 = vmatpush1.bf16.msra.mxu1 %v3748_v20  ;;  %v2061_v43 = vmul.f32 %v1997_v46, %v1549_v51  ;;  %v3762_v55 = vld [vmem:[%s6165_s5 + $0x324] ss:$8 sps:$4 sm:$0xff]   ;;  %v5456_v44 = vpop.f32.mrf.mxu1  ;;  %v3760_v51 = vld [vmem:[%s6165_s5 + $0x320] ss:$8 sps:$4 sm:$0xff]  }
 0x250   :  { %2961 = vmatprep.mubr.bf16.mxu0 %v2126_v8  ;;  %v2128_v53 = vpack.c.bf16 %v2072_v54, %v2064_v24  ;;  %v2069_v57 = vmul.f32 %v2005_v38, %v1557_v14  ;;  %v1999_v22 = vadd.f32 1.0, %v3884_v34  ;;  %v1832_v42 = vadd.f32 %v5238_v48, %v5185_v28  ;;  %3136 = vmatprep.subr.bf16.mxu1 %v3756_v47  ;;  %v3757_v48 = vld [vmem:[%s6165_s5 + $0x220] ss:$8 sps:$4 sm:$0xff]   ;;  %v5466_v20 = vpop.f32.mrf.mxu0  ;;  %v3768_v8 = vld [vmem:[%s6165_s5 + $0x314] ss:$8 sps:$4 sm:$0xff]  }
 0x251   :  { %v2007_v18 = vadd.f32 1.0, %v3886_v25  ;;  %v5452_v1 = vmul.f32 0.5, %v5343_v19  ;;  %v1888_v36 = vmul.f32 0.7978846, %v1824_v5  ;;  %v1821_v29 = vadd.f32 %v5202_v59, %v5117_v3  ;;  %3064 = vmatpush1.bf16.msra.mxu0 %v3751_v60  ;;  %v3765_v59 = vld [vmem:[%s6165_s5 + $0x214] ss:$8 sps:$4 sm:$0xff]   ;;  %v5483_v47 = vpop.f32.mrf.mxu1 }
 0x252   :  { %3034 = vmatprep.mubr.bf16.mxu1 %v2128_v53  ;;  %v2125_v58 = vpack.c.bf16 %v2069_v57, %v2061_v43  ;;  %3891 = vtanh.f32 %v1841_v26  ;;  %v1896_v30 = vmul.f32 0.7978846, %v1832_v42  ;;  %v1829_v13 = vadd.f32 %v5224_v6, %v5163_v33  ;;  %3065 = vmatprep.subr.bf16.mxu0 %v3759_v9  ;;  %v6221_v54 = vld [vmem:[#allocation11_spill] sm:$0xff]  ;;  %v3766_v46 = vld [vmem:[%s6165_s5 + $0x310] ss:$8 sps:$4 sm:$0xff]  }
 0x253   :  { %v2063_v61 = vmul.f32 %v1999_v22, %v1551_v35  ;;  %v2071_v19 = vmul.f32 %v2007_v18, %v1559_v15  ;;  %3893 = vtanh.f32 %v1888_v36  ;;  %v1885_v45 = vmul.f32 0.7978846, %v1821_v29  ;;  %3137 = vmatpush1.bf16.msra.mxu1 %v3754_v2  ;;  %v6222_v15 = vld [vmem:[#allocation12_spill] sm:$0xff]  ;;  %v5524_v42 = vpop.f32.mrf.mxu1 }
 0x254   :  { %2962 = vmatmul.mubr.bf16.gmra.mxu0 %v2125_v58  ;;  %v1779_v14 = vadd.f32 %v1715_v49, %v5346_v16  ;;  %3895 = vtanh.f32 %v1896_v30  ;;  %v1893_v6 = vmul.f32 0.7978846, %v1829_v13  ;;  %v1823_v35 = vadd.f32 %v5214_v63, %v5132_v62  ;;  %3138 = vmatprep.subr.bf16.mxu1 %v3762_v55  ;;  %v3763_v63 = vld [vmem:[%s6165_s5 + $0x210] ss:$8 sps:$4 sm:$0xff]   ;;  %v3771_v9 = vld [vmem:[%s6165_s5 + $0x204] ss:$8 sps:$4 sm:$0xff]   ;;  %v5511_v49 = vpop.f32.mrf.mxu0 }
 0x255   :  { %v2127_v32 = vpack.c.bf16 %v2071_v19, %v2063_v61  ;;  %3897 = vtanh.f32 %v1885_v45  ;;  %v1831_v24 = vadd.f32 %v5232_v56, %v5169_v39  ;;  %v5481_v60 = vadd.f32 %v5351_v12, %v6221_v54  ;;  %3066 = vmatpush1.bf16.msra.mxu0 %v3757_v48  ;;  %v3774_v2 = vld [vmem:[%s6165_s5 + $0x304] ss:$8 sps:$4 sm:$0xff]   ;;  %v3769_v36 = vld [vmem:[%s6165_s5 + $0x200] ss:$8 sps:$4 sm:$0xff]   ;;  %v3777_v30 = vld [vmem:[%s6165_s5 + $0x2f4] ss:$8 sps:$4 sm:$0xff]  }
 0x256   :  { %3899 = vtanh.f32 %v1893_v6  ;;  %v1887_v38 = vmul.f32 0.7978846, %v1823_v35  ;;  %v5493_v56 = vadd.f32 %v5353_v23, %v6222_v15  ;;  %v5497_v12 = vadd.f32 %v5369_v52, %v6219_v31  ;;  %3067 = vmatprep.subr.bf16.mxu0 %v3765_v59  ;;  %v3888_v52 = vpop.eup %3887  ;;  %v5546_v13 = vpop.f32.mrf.mxu0 }
 0x257   :  { %3035 = vmatmul.mubr.bf16.gmra.mxu1 %v2127_v32  ;;  %v1895_v26 = vmul.f32 0.7978846, %v1831_v24  ;;  %v1586_v34 = vmul.f32 0.044715, %v5481_v60  ;;  %v5502_v53 = vadd.f32 %v5371_v0, %v6220_v7  ;;  %v5509_v23 = vadd.f32 %v5383_v11, %v6221_v54  ;;  %v5568_v6 = vpop.f32.mrf.mxu1 }
 0x258   :  { %3139 = vmatpush1.bf16.msra.mxu1 %v3760_v51  ;;  %v5514_v5 = vmul.f32 0.5, %v5346_v16  ;;  %v5517_v25 = vmul.f32 0.5, %v5153_v21  ;;  %3901 = vtanh.f32 %v1887_v38  ;;  %v1593_v0 = vmul.f32 0.044715, %v5497_v12  ;;  %v3890_v43 = vpop.eup %3889  ;;  %v3778_v38 = vld [vmem:[%s6165_s5 + $0x3f0] ss:$8 sps:$4 sm:$0xff]  }
 0x259   :  { %v1843_v11 = vmul.f32 0.7978846, %v1779_v14  ;;  %v2014_v57 = vadd.f32 1.0, %v3888_v52  ;;  %3140 = vmatprep.subr.bf16.mxu1 %v3768_v8  ;;  %3903 = vtanh.f32 %v1895_v26  ;;  %v1588_v22 = vmul.f32 0.044715, %v5493_v56  ;;  %3068 = vmatpush1.bf16.msra.mxu0 %v3763_v63 }
 0x25a   :  { %v2022_v16 = vadd.f32 1.0, %v3890_v43  ;;  %v5527_v21 = vmul.f32 0.5, %v5185_v28  ;;  %v1657_v18 = vmul.f32 %v1593_v0, %v5497_v12  ;;  %v1595_v55 = vmul.f32 0.044715, %v5502_v53  ;;  %3069 = vmatprep.subr.bf16.mxu0 %v3771_v9  ;;  %v5590_v9 = vpop.f32.mrf.mxu0 }
 0x25b   :  { %v5535_v29 = vmul.f32 0.5, %v5117_v3  ;;  %v1650_v58 = vmul.f32 %v1586_v34, %v5481_v60  ;;  %v1594_v48 = vmul.f32 0.044715, %v5509_v23  ;;  %v5541_v28 = vadd.f32 %v5385_v40, %v6222_v15  ;;  %v3772_v40 = vld [vmem:[%s6165_s5 + $0x300] ss:$8 sps:$4 sm:$0xff]  }
 0x25c   :  { %v2078_v61 = vmul.f32 %v2014_v57, %v5430_v37  ;;  %v2086_v3 = vmul.f32 %v2022_v16, %v5437_v50  ;;  %3141 = vmatpush1.bf16.msra.mxu1 %v3766_v46  ;;  %v1721_v19 = vmul.f32 %v1657_v18, %v5497_v12  ;;  %v1659_v59 = vmul.f32 %v1595_v55, %v5502_v53  ;;  %v3780_v50 = vld [vmem:[%s6165_s5 + $0x3f4] ss:$8 sps:$4 sm:$0xff]   ;;  %v3783_v34 = vld [vmem:[%s6165_s5 + $0x2e4] ss:$8 sps:$4 sm:$0xff]  }
 0x25d   :  { %v1652_v45 = vmul.f32 %v1588_v22, %v5493_v56  ;;  %3142 = vmatprep.subr.bf16.mxu1 %v3774_v2  ;;  %v1596_v51 = vmul.f32 0.044715, %v5541_v28  ;;  %v5559_v14 = vadd.f32 %v5397_v41, %v6219_v31  ;;  %v5563_v37 = vadd.f32 %v5399_v27, %v6220_v7  ;;  %3070 = vmatpush1.bf16.msra.mxu0 %v3769_v36  ;;  %v3775_v41 = vld [vmem:[%s6165_s5 + $0x2f0] ss:$8 sps:$4 sm:$0xff]  }
 0x25e   :  { %v2134_v35 = vpack.c.bf16 %v2086_v3, %v2078_v61  ;;  %v1785_v32 = vadd.f32 %v1721_v19, %v5497_v12  ;;  %v1723_v8 = vmul.f32 %v1659_v59, %v5502_v53  ;;  %v1658_v24 = vmul.f32 %v1594_v48, %v5509_v23  ;;  %3071 = vmatprep.subr.bf16.mxu0 %v3777_v30  ;;  %v3781_v48 = vld [vmem:[%s6165_s5 + $0x2e0] ss:$8 sps:$4 sm:$0xff]  }
 0x25f   :  { %6223 = vst [vmem:[#allocation15_spill] sm:$0xff] %v5563_v37  ;;  %v5576_v27 = vpop.eup %3891  ;;  %3905 = vtanh.f32 %v1843_v11  ;;  %v1573_v63 = vmul.f32 0.5, %v5163_v33  ;;  %v1660_v46 = vmul.f32 %v1596_v51, %v5541_v28  ;;  %v5585_v26 = vadd.f32 %v5411_v4, %v6221_v54 }
 0x260   :  { %v3894_v52 = vpop.eup %3893  ;;  %2971 = vmatprep.mubr.bf16.mxu0 %v2134_v35  ;;  %v5593_v33 = vmul.f32 0.5, %v5132_v62  ;;  %v5596_v0 = vmul.f32 0.5, %v5169_v39  ;;  %v5599_v2 = vmul.f32 0.5, %v5497_v12  ;;  %3143 = vmatpush1.bf16.msra.mxu1 %v3772_v40  ;;  %v1601_v4 = vmul.f32 0.044715, %v5559_v14  ;;  %v5612_v12 = vpop.f32.mrf.mxu1 }
 0x261   :  { %v3896_v43 = vpop.eup %3895  ;;  %v2016_v11 = vadd.f32 1.0, %v3894_v52  ;;  %v5603_v57 = vmul.f32 %v1650_v58, %v5481_v60  ;;  %v5606_v22 = vmul.f32 %v1652_v45, %v5493_v56  ;;  %v1603_v62 = vmul.f32 0.044715, %v5563_v37  ;;  %3144 = vmatprep.subr.bf16.mxu1 %v3780_v50  ;;  %v3786_v39 = vld [vmem:[%s6165_s5 + $0x3e4] ss:$8 sps:$4 sm:$0xff]   ;;  %3072 = vmatpush2.bf16.msra.mxu0 %v3775_v41  ;;  %v5632_v45 = vpop.f32.mrf.mxu0 }
 0x262   :  { %v3898_v16 = vpop.eup %3897  ;;  %v2024_v18 = vadd.f32 1.0, %v3896_v43  ;;  %v1849_v55 = vmul.f32 0.7978846, %v1785_v32  ;;  %v1787_v36 = vadd.f32 %v1723_v8, %v5502_v53  ;;  %v5616_v58 = vmul.f32 %v1658_v24, %v5509_v23  ;;  %3073 = vmatprep.subr.bf16.mxu0 %v3783_v34  ;;  %v3789_v40 = vld [vmem:[%s6165_s5 + $0x2d4] ss:$8 sps:$4 sm:$0xff]  }
 0x263   :  { %v3900_v30 = vpop.eup %3899  ;;  %v2013_v61 = vadd.f32 1.0, %v3898_v16  ;;  %v5622_v3 = vmul.f32 %v1660_v46, %v5541_v28  ;;  %v1602_v19 = vmul.f32 0.044715, %v5585_v26  ;;  %v5627_v59 = vadd.f32 %v5426_v10, %v6222_v15  ;;  %v3784_v10 = vld [vmem:[%s6165_s5 + $0x3e0] ss:$8 sps:$4 sm:$0xff]  }
 0x264   :  { %v2080_v51 = vmul.f32 %v2016_v11, %v5517_v25  ;;  %v2088_v50 = vmul.f32 %v2024_v18, %v5527_v21  ;;  %v2021_v35 = vadd.f32 1.0, %v3900_v30  ;;  %v1665_v32 = vmul.f32 %v1601_v4, %v5559_v14  ;;  %3145 = vmatpush2.bf16.msra.mxu1 %v3778_v38  ;;  %v3792_v21 = vld [vmem:[%s6165_s5 + $0x3d4] ss:$8 sps:$4 sm:$0xff]   ;;  %v5655_v38 = vpop.f32.mrf.mxu1  ;;  %v3790_v43 = vld [vmem:[%s6165_s5 + $0x3d0] ss:$8 sps:$4 sm:$0xff]  }
 0x265   :  { %v3902_v8 = vpop.eup %3901  ;;  %v2077_v24 = vmul.f32 %v2013_v61, %v5535_v29  ;;  %v5642_v41 = vmul.f32 %v1603_v62, %v5563_v37  ;;  %v5646_v46 = vadd.f32 %v5441_v17, %v6219_v31  ;;  %v5650_v25 = vadd.f32 %v5456_v44, %v6220_v7  ;;  %3146 = vmatprep.subr.bf16.mxu1 %v3786_v39  ;;  %v3787_v44 = vld [vmem:[%s6165_s5 + $0x2d0] ss:$8 sps:$4 sm:$0xff]   ;;  %v5669_v39 = vpop.f32.mrf.mxu0 }
 0x266   :  { %v3904_v34 = vpop.eup %3903  ;;  %v2136_v29 = vpack.c.bf16 %v2088_v50, %v2080_v51  ;;  %v2085_v52 = vmul.f32 %v2021_v35, %v1573_v63  ;;  %v2015_v4 = vadd.f32 1.0, %v3902_v8  ;;  %3074 = vmatpush2.bf16.msra.mxu0 %v3781_v48  ;;  %v5659_v17 = vadd.f32 %v5466_v20, %v6221_v54  ;;  %v3798_v50 = vld [vmem:[%s6165_s5 + $0x3c4] ss:$8 sps:$4 sm:$0xff]   ;;  %v1508_v35 = vpop.f32.mrf.mxu1 }
 0x267   :  { %6224 = vst [vmem:[#allocation13_spill] sm:$0xff] %v5646_v46  ;;  %6225 = vst [vmem:[#allocation16_spill] sm:$0xff] %v5650_v25  ;;  %v2023_v11 = vadd.f32 1.0, %v3904_v34  ;;  %3907 = vtanh.f32 %v1849_v55  ;;  %v1604_v62 = vmul.f32 0.044715, %v5627_v59  ;;  %3075 = vmatprep.subr.bf16.mxu0 %v3789_v40  ;;  %v5675_v48 = vadd.f32 %v5483_v47, %v6222_v15 }
 0x268   :  { %v1609_v63 = vmul.f32 0.044715, %v5646_v46  ;;  %3044 = vmatprep.mubr.bf16.mxu1 %v2136_v29  ;;  %v2133_v20 = vpack.c.bf16 %v2085_v52, %v2077_v24  ;;  %v1611_v16 = vmul.f32 0.044715, %v5650_v25  ;;  %3147 = vmatpush2.bf16.msra.mxu1 %v3784_v10  ;;  %v1610_v18 = vmul.f32 0.044715, %v5659_v17 }
 0x269   :  { %v3795_v55 = vld [vmem:[%s6165_s5 + $0x2c4] ss:$8 sps:$4 sm:$0xff]   ;;  %v2079_v30 = vmul.f32 %v2015_v4, %v5593_v33  ;;  %v2087_v61 = vmul.f32 %v2023_v11, %v5596_v0  ;;  %v1851_v40 = vmul.f32 0.7978846, %v1787_v36  ;;  %v1666_v51 = vmul.f32 %v1602_v19, %v5585_v26  ;;  %3148 = vmatprep.subr.bf16.mxu1 %v3792_v21  ;;  %v3793_v24 = vld [vmem:[%s6165_s5 + $0x2c0] ss:$8 sps:$4 sm:$0xff]  }
 0x26a   :  { %2972 = vmatmul.mubr.bf16.gmra.mxu0 %v2133_v20  ;;  %v5687_v47 = vmul.f32 %v1665_v32, %v5559_v14  ;;  %v1612_v10 = vmul.f32 0.044715, %v5675_v48  ;;  %v5692_v33 = vadd.f32 %v5511_v49, %v6219_v31  ;;  %v5696_v0 = vadd.f32 %v5524_v42, %v6220_v7  ;;  %v1437_v49 = vpop.f32.mrf.mxu0  ;;  %v3801_v4 = vld [vmem:[%s6165_s5 + $0x2b4] ss:$8 sps:$4 sm:$0xff]   ;;  %v1510_v20 = vpop.f32.mrf.mxu1 }
 0x26b   :  { %v2135_v36 = vpack.c.bf16 %v2087_v61, %v2079_v30  ;;  %v1668_v19 = vmul.f32 %v1604_v62, %v5627_v59  ;;  %v1673_v8 = vmul.f32 %v1609_v63, %v5646_v46  ;;  %3076 = vmatpush2.bf16.msra.mxu0 %v3787_v44  ;;  %v5702_v32 = vadd.f32 %v5546_v13, %v6221_v54  ;;  %v3796_v13 = vld [vmem:[%s6165_s5 + $0x3c0] ss:$8 sps:$4 sm:$0xff]   ;;  %v3804_v63 = vld [vmem:[%s6165_s5 + $0x3b4] ss:$8 sps:$4 sm:$0xff]   ;;  %v3802_v61 = vld [vmem:[%s6165_s5 + $0x3b0] ss:$8 sps:$4 sm:$0xff]  }
 0x26c   :  { %6226 = vst [vmem:[#allocation20_spill] sm:$0xff] %v5687_v47  ;;  %6227 = vst [vmem:[#allocation18_spill] sm:$0xff] %v5692_v33  ;;  %v5707_v21 = vpop.eup %3905  ;;  %v1675_v42 = vmul.f32 %v1611_v16, %v5650_v25  ;;  %v1674_v34 = vmul.f32 %v1610_v18, %v5659_v17  ;;  %v1676_v29 = vmul.f32 %v1612_v10, %v5675_v48  ;;  %v1617_v52 = vmul.f32 0.044715, %v5692_v33 }
 0x26d   :  { %3149 = vmatpush2.bf16.msra.mxu1 %v3790_v43  ;;  %3077 = vmatprep.subr.bf16.mxu0 %v3795_v55  ;;  %v1619_v44 = vmul.f32 0.044715, %v5696_v0  ;;  %v5722_v11 = vadd.f32 %v5568_v6, %v6222_v15  ;;  %v5726_v62 = vadd.f32 %v5590_v9, %v6219_v31  ;;  %v5730_v43 = vadd.f32 %v5612_v12, %v6220_v7  ;;  %v3799_v12 = vld [vmem:[%s6165_s5 + $0x2b0] ss:$8 sps:$4 sm:$0xff]  }
 0x26e   :  { %3045 = vmatmul.mubr.bf16.gmra.mxu1 %v2135_v36  ;;  %3150 = vmatprep.subr.bf16.mxu1 %v3798_v50  ;;  %3909 = vtanh.f32 %v1851_v40  ;;  %v5737_v16 = vmul.f32 %v5642_v41, %v5563_v37  ;;  %v5740_v6 = vmul.f32 %v1666_v51, %v5585_v26  ;;  %v5744_v9 = vadd.f32 %v5632_v45, %v6221_v54  ;;  %v1439_v45 = vpop.f32.mrf.mxu0  ;;  %v3807_v36 = vld [vmem:[%s6165_s5 + $0x2a4] ss:$8 sps:$4 sm:$0xff]  }
 0x26f   :  { %v5750_v18 = vmul.f32 %v1668_v19, %v5627_v59  ;;  %v1681_v55 = vmul.f32 %v1617_v52, %v5692_v33  ;;  %v1618_v30 = vmul.f32 0.044715, %v5702_v32  ;;  %v1620_v41 = vmul.f32 0.044715, %v5722_v11  ;;  %3078 = vmatpush2.bf16.msra.mxu0 %v3793_v24 }
 0x270   :  { %6228 = vst [vmem:[#allocation22_spill] sm:$0xff] %v5737_v16  ;;  %v5759_v40 = vmul.f32 %v1673_v8, %v5646_v46  ;;  %v1625_v51 = vmul.f32 0.044715, %v5726_v62  ;;  %v1627_v50 = vmul.f32 0.044715, %v5730_v43  ;;  %v5765_v10 = vadd.f32 %v5655_v38, %v6222_v15  ;;  %3079 = vmatprep.subr.bf16.mxu0 %v3801_v4 }
 0x271   :  { %3151 = vmatpush2.bf16.msra.mxu1 %v3796_v13  ;;  %v5771_v19 = vmul.f32 %v1675_v42, %v5650_v25  ;;  %v5774_v8 = vmul.f32 %v1674_v34, %v5659_v17  ;;  %v5777_v24 = vmul.f32 %v1676_v29, %v5675_v48  ;;  %v1683_v52 = vmul.f32 %v1619_v44, %v5696_v0  ;;  %v1512_v13 = vpop.f32.mrf.mxu1  ;;  %v3810_v38 = vld [vmem:[%s6165_s5 + $0x3a4] ss:$8 sps:$4 sm:$0xff]   ;;  %v3805_v25 = vld [vmem:[%s6165_s5 + $0x2a0] ss:$8 sps:$4 sm:$0xff]  }
 0x272   :  { %6229 = vst [vmem:[#allocation14_spill] sm:$0xff] %v5759_v40  ;;  %3152 = vmatprep.subr.bf16.mxu1 %v3804_v63  ;;  %v1626_v4 = vmul.f32 0.044715, %v5744_v9  ;;  %v1628_v16 = vmul.f32 0.044715, %v5765_v10  ;;  %v5787_v42 = vadd.f32 %v5669_v39, %v6219_v31  ;;  %v5790_v34 = vadd.f32 %v1508_v35, %v6220_v7  ;;  %v1441_v35 = vpop.f32.mrf.mxu0 }
 0x273   :  { %6230 = vst [vmem:[#allocation17_spill] sm:$0xff] %v5771_v19  ;;  %v5793_v29 = vmul.f32 %v1681_v55, %v5692_v33  ;;  %v1682_v44 = vmul.f32 %v1618_v30, %v5702_v32  ;;  %v1684_v63 = vmul.f32 %v1620_v41, %v5722_v11  ;;  %3080 = vmatpush2.bf16.msra.mxu0 %v3799_v12  ;;  %v3808_v39 = vld [vmem:[%s6165_s5 + $0x3a0] ss:$8 sps:$4 sm:$0xff]   ;;  %v3813_v41 = vld [vmem:[%s6165_s5 + $0x294] ss:$8 sps:$4 sm:$0xff]  }
 0x274   :  { %v5798_v19 = vadd.f32 %v1437_v49, %v6221_v54  ;;  %v5806_v37 = vpop.eup %3907  ;;  %v1689_v55 = vmul.f32 %v1625_v51, %v5726_v62  ;;  %v1691_v30 = vmul.f32 %v1627_v50, %v5730_v43  ;;  %v1633_v12 = vmul.f32 0.044715, %v5787_v42  ;;  %3081 = vmatprep.subr.bf16.mxu0 %v3807_v36  ;;  %v1514_v50 = vpop.f32.mrf.mxu1 }
 0x275   :  { %6231 = vst [vmem:[#allocation21_spill] sm:$0xff] %v5793_v29  ;;  %v1635_v49 = vmul.f32 0.044715, %v5790_v34  ;;  %3153 = vmatpush2.bf16.msra.mxu1 %v3802_v61  ;;  %v5817_v33 = vadd.f32 %v1510_v20, %v6222_v15  ;;  %v5820_v40 = vadd.f32 %v1439_v45, %v6219_v31  ;;  %v5823_v51 = vadd.f32 %v1512_v13, %v6220_v7  ;;  %v3816_v61 = vld [vmem:[%s6165_s5 + $0x394] ss:$8 sps:$4 sm:$0xff]  }
 0x276   :  { %v1634_v29 = vmul.f32 0.044715, %v5798_v19  ;;  %3154 = vmatprep.subr.bf16.mxu1 %v3810_v38  ;;  %v1690_v36 = vmul.f32 %v1626_v4, %v5744_v9  ;;  %v1692_v46 = vmul.f32 %v1628_v16, %v5765_v10  ;;  %v1697_v47 = vmul.f32 %v1633_v12, %v5787_v42  ;;  %v3811_v38 = vld [vmem:[%s6165_s5 + $0x290] ss:$8 sps:$4 sm:$0xff]  }
 0x277   :  { %v5832_v20 = vadd.f32 %v1441_v35, %v6221_v54  ;;  %v5835_v31 = vmul.f32 %v1683_v52, %v5696_v0  ;;  %v1699_v7 = vmul.f32 %v1635_v49, %v5790_v34  ;;  %v1636_v13 = vmul.f32 0.044715, %v5817_v33  ;;  %3082 = vmatpush2.bf16.msra.mxu0 %v3805_v25  ;;  %v3814_v16 = vld [vmem:[%s6165_s5 + $0x390] ss:$8 sps:$4 sm:$0xff]   ;;  %v3819_v25 = vld [vmem:[%s6165_s5 + $0x284] ss:$8 sps:$4 sm:$0xff]  }
 0x278   :  { %v1698_v45 = vmul.f32 %v1634_v29, %v5798_v19  ;;  %v5847_v54 = vmul.f32 %v1682_v44, %v5702_v32  ;;  %v1641_v52 = vmul.f32 0.044715, %v5820_v40  ;;  %v1643_v4 = vmul.f32 0.044715, %v5823_v51  ;;  %3083 = vmatprep.subr.bf16.mxu0 %v3813_v41 }
 0x279   :  { %3155 = vmatpush2.bf16.msra.mxu1 %v3808_v39  ;;  %v5852_v29 = vadd.f32 %v1514_v50, %v6222_v15  ;;  %v5858_v35 = vmul.f32 %v1684_v63, %v5722_v11  ;;  %v5861_v12 = vmul.f32 %v1689_v55, %v5726_v62  ;;  %v5864_v44 = vmul.f32 %v1691_v30, %v5730_v43  ;;  %v3822_v15 = vld [vmem:[%s6165_s5 + $0x384] ss:$8 sps:$4 sm:$0xff]  }
 0x27a   :  { %v1642_v49 = vmul.f32 0.044715, %v5832_v20  ;;  %3156 = vmatprep.subr.bf16.mxu1 %v3816_v61  ;;  %v5871_v39 = vmul.f32 %v1690_v36, %v5744_v9  ;;  %v5874_v41 = vmul.f32 %v1692_v46, %v5765_v10  ;;  %v5877_v63 = vmul.f32 %v1697_v47, %v5787_v42  ;;  %v3817_v46 = vld [vmem:[%s6165_s5 + $0x280] ss:$8 sps:$4 sm:$0xff]  }
 0x27b   :  { %6232 = vst [vmem:[#allocation19_spill] sm:$0xff] %v5864_v44  ;;  %v1644_v55 = vmul.f32 0.044715, %v5852_v29  ;;  %v3910_v30 = vpop.eup %3909  ;;  %v5881_v50 = vmul.f32 %v1699_v7, %v5790_v34  ;;  %v5884_v61 = vmul.f32 %v1698_v45, %v5798_v19  ;;  %v1700_v44 = vmul.f32 %v1636_v13, %v5817_v33  ;;  %3084 = vmatpush2.bf16.msra.mxu0 %v3811_v38  ;;  %v3820_v45 = vld [vmem:[%s6165_s5 + $0x380] ss:$8 sps:$4 sm:$0xff]  }
 0x27c   :  { %6233 = vst [vmem:[#allocation23_spill] sm:$0xff] %v5877_v63  ;;  %v1778_v47 = vadd.f32 %v5603_v57, %v5481_v60  ;;  %v1531_v36 = vmul.f32 0.5, %v5502_v53  ;;  %v1705_v63 = vmul.f32 %v1641_v52, %v5820_v40  ;;  %v1707_v7 = vmul.f32 %v1643_v4, %v5823_v51  ;;  %3085 = vmatprep.subr.bf16.mxu0 %v3819_v25 }
 0x27d   :  { %6234 = vst [vmem:[#allocation9_spill] sm:$0xff] %v5881_v50  ;;  %3157 = vmatpush2.bf16.msra.mxu1 %v3814_v16  ;;  %v1786_v13 = vadd.f32 %v5616_v58, %v5509_v23  ;;  %v1706_v38 = vmul.f32 %v1642_v49, %v5832_v20  ;;  %v1780_v53 = vadd.f32 %v5606_v22, %v5493_v56  ;;  %v5907_v52 = vmul.f32 0.5, %v5481_v60 }
 0x27e   :  { %3158 = vmatprep.subr.bf16.mxu1 %v3822_v15  ;;  %v1842_v50 = vmul.f32 0.7978846, %v1778_v47  ;;  %v1788_v57 = vadd.f32 %v5622_v3, %v5541_v28  ;;  %v1708_v16 = vmul.f32 %v1644_v55, %v5852_v29  ;;  %v5910_v4 = vmul.f32 0.5, %v5509_v23 }
 0x27f   :  { %v1850_v25 = vmul.f32 0.7978846, %v1786_v13  ;;  %3086 = vmatpush2.bf16.msra.mxu0 %v3817_v46  ;;  %v1844_v58 = vmul.f32 0.7978846, %v1780_v53  ;;  %v1969_v15 = vadd.f32 1.0, %v5576_v27  ;;  %v5914_v22 = vmul.f32 %v1700_v44, %v5817_v33 }
 0x280   :  { %3911 = vtanh.f32 %v1842_v50  ;;  %v1852_v49 = vmul.f32 0.7978846, %v1788_v57  ;;  %v5917_v3 = vmul.f32 %v1705_v63, %v5820_v40  ;;  %v1977_v60 = vadd.f32 1.0, %v5806_v37  ;;  %v6237_v57 = vld [vmem:[#allocation14_spill] sm:$0xff] }
 0x281   :  { %3159 = vmatpush2.bf16.msra.mxu1 %v3820_v45  ;;  %3913 = vtanh.f32 %v1850_v25  ;;  %v5921_v23 = vmul.f32 %v1707_v7, %v5823_v51  ;;  %v5924_v55 = vmul.f32 %v1706_v38, %v5832_v20  ;;  %v1971_v50 = vadd.f32 1.0, %v5707_v21  ;;  %v6235_v38 = vld [vmem:[#allocation20_spill] sm:$0xff]  ;;  %v6239_v25 = vld [vmem:[#allocation22_spill] sm:$0xff] }
 0x282   :  { %3915 = vtanh.f32 %v1844_v58  ;;  %v5928_v27 = vmul.f32 0.5, %v5493_v56  ;;  %v5931_v44 = vmul.f32 0.5, %v5541_v28  ;;  %v1794_v63 = vadd.f32 %v5740_v6, %v5585_v26 }
 0x283   :  { %3917 = vtanh.f32 %v1852_v49  ;;  %v5936_v37 = vmul.f32 %v1708_v16, %v5852_v29  ;;  %v5939_v46 = vmul.f32 %v1969_v15, %v5452_v1  ;;  %v1802_v47 = vadd.f32 %v5774_v8, %v5659_v17 }
 0x284   :  { %v1796_v56 = vadd.f32 %v5750_v18, %v5627_v59  ;;  %v5946_v21 = vmul.f32 %v1977_v60, %v5599_v2  ;;  %v1979_v28 = vadd.f32 1.0, %v3910_v30  ;;  %v1858_v7 = vmul.f32 0.7978846, %v1794_v63  ;;  %v6236_v2 = vld [vmem:[#allocation13_spill] sm:$0xff]  ;;  %v6240_v60 = vld [vmem:[#allocation16_spill] sm:$0xff] }
 0x285   :  { %v1804_v6 = vadd.f32 %v5777_v24, %v5675_v48  ;;  %v5951_v45 = vmul.f32 %v1971_v50, %v5514_v5  ;;  %v1866_v13 = vmul.f32 0.7978846, %v1802_v47  ;;  %v1793_v53 = vadd.f32 %v6235_v38, %v5559_v14  ;;  %v6238_v5 = vld [vmem:[#allocation15_spill] sm:$0xff] }
 0x286   :  { %v1860_v1 = vmul.f32 0.7978846, %v1796_v56  ;;  %v5956_v8 = vmul.f32 0.5, %v5585_v26  ;;  %3919 = vtanh.f32 %v1858_v7  ;;  %v1801_v30 = vadd.f32 %v6237_v57, %v6236_v2  ;;  %v6241_v26 = vld [vmem:[#allocation17_spill] sm:$0xff]  ;;  %v6242_v57 = vld [vmem:[#allocation18_spill] sm:$0xff] }
 0x287   :  { %v1868_v18 = vmul.f32 0.7978846, %v1804_v6  ;;  %v5961_v16 = vmul.f32 0.5, %v5659_v17  ;;  %3921 = vtanh.f32 %v1866_v13  ;;  %v1857_v24 = vmul.f32 0.7978846, %v1793_v53 }
 0x288   :  { %v1795_v58 = vadd.f32 %v6239_v25, %v6238_v5  ;;  %v5965_v49 = vmul.f32 %v1979_v28, %v1531_v36  ;;  %3923 = vtanh.f32 %v1860_v1  ;;  %v1865_v15 = vmul.f32 0.7978846, %v1801_v30  ;;  %v6243_v30 = vld [vmem:[#allocation21_spill] sm:$0xff] }
 0x289   :  { %v1803_v50 = vadd.f32 %v6241_v26, %v6240_v60  ;;  %v2113_v63 = vpack.c.bf16 %v5946_v21, %v5939_v46  ;;  %3925 = vtanh.f32 %v1868_v18  ;;  %v1810_v17 = vadd.f32 %v5847_v54, %v5702_v32 }
 0x28a   :  { %v1859_v47 = vmul.f32 0.7978846, %v1795_v58  ;;  %v5974_v56 = vmul.f32 0.5, %v5627_v59  ;;  %3927 = vtanh.f32 %v1857_v24  ;;  %v1818_v36 = vadd.f32 %v5871_v39, %v5744_v9 }
 0x28b   :  { %v1867_v7 = vmul.f32 0.7978846, %v1803_v50  ;;  %v5979_v28 = vmul.f32 0.5, %v5675_v48  ;;  %3929 = vtanh.f32 %v1865_v15  ;;  %v1874_v6 = vmul.f32 0.7978846, %v1810_v17 }
 0x28c   :  { %v1812_v46 = vadd.f32 %v5858_v35, %v5722_v11  ;;  %v2115_v54 = vpack.c.bf16 %v5965_v49, %v5951_v45  ;;  %3931 = vtanh.f32 %v1859_v47  ;;  %v1882_v59 = vmul.f32 0.7978846, %v1818_v36 }
 0x28d   :  { %v3912_v21 = vpop.eup %3911  ;;  %v1820_v13 = vadd.f32 %v5874_v41, %v5765_v10  ;;  %v5988_v39 = vmul.f32 0.5, %v5559_v14  ;;  %3933 = vtanh.f32 %v1867_v7  ;;  %v1809_v24 = vadd.f32 %v6243_v30, %v6242_v57 }
 0x28e   :  { %v3914_v1 = vpop.eup %3913  ;;  %v1970_v38 = vadd.f32 1.0, %v3912_v21  ;;  %v1876_v48 = vmul.f32 0.7978846, %v1812_v46  ;;  %3935 = vtanh.f32 %v1874_v6  ;;  %v1817_v41 = vadd.f32 %v5861_v12, %v5726_v62  ;;  %v6244_v6 = vld [vmem:[#allocation19_spill] sm:$0xff] }
 0x28f   :  { %v3916_v53 = vpop.eup %3915  ;;  %v1978_v18 = vadd.f32 1.0, %v3914_v1  ;;  %v1884_v35 = vmul.f32 0.7978846, %v1820_v13  ;;  %3937 = vtanh.f32 %v1882_v59  ;;  %v1873_v15 = vmul.f32 0.7978846, %v1809_v24 }
 0x290   :  { %v3918_v45 = vpop.eup %3917  ;;  %v2034_v25 = vmul.f32 %v1970_v38, %v5907_v52  ;;  %v1972_v58 = vadd.f32 1.0, %v3916_v53  ;;  %3939 = vtanh.f32 %v1876_v48  ;;  %v1545_v26 = vmul.f32 0.5, %v6236_v2 }
 0x291   :  { %v2042_v14 = vmul.f32 %v1978_v18, %v5910_v4  ;;  %v1980_v49 = vadd.f32 1.0, %v3918_v45  ;;  %v1539_v50 = vmul.f32 0.5, %v6238_v5  ;;  %3941 = vtanh.f32 %v1884_v35 }
 0x292   :  { %v1881_v47 = vmul.f32 0.7978846, %v1817_v41  ;;  %v2036_v7 = vmul.f32 %v1972_v58, %v5928_v27  ;;  %3943 = vtanh.f32 %v1873_v15  ;;  %v1547_v12 = vmul.f32 0.5, %v6240_v60 }
 0x293   :  { %v2114_v17 = vpack.c.bf16 %v2042_v14, %v2034_v25  ;;  %v2044_v52 = vmul.f32 %v1980_v49, %v5931_v44  ;;  %v3920_v36 = vpop.eup %3919  ;;  %v1811_v4 = vadd.f32 %v5835_v31, %v5696_v0  ;;  %v1819_v2 = vadd.f32 %v6244_v6, %v5730_v43 }
 0x294   :  { %3945 = vtanh.f32 %v1881_v47  ;;  %v3922_v46 = vpop.eup %3921  ;;  %v1986_v21 = vadd.f32 1.0, %v3920_v36  ;;  %v1554_v59 = vmul.f32 0.5, %v5702_v32  ;;  %v1826_v27 = vadd.f32 %v5884_v61, %v5798_v19 }
 0x295   :  { %3087 = vmatprep.mubr.bf16.mxu0 %v2114_v17  ;;  %v2116_v5 = vpack.c.bf16 %v2044_v52, %v2036_v7  ;;  %v3924_v44 = vpop.eup %3923  ;;  %v1994_v13 = vadd.f32 1.0, %v3922_v46  ;;  %v1875_v60 = vmul.f32 0.7978846, %v1811_v4  ;;  %v1883_v1 = vmul.f32 0.7978846, %v1819_v2 }
 0x296   :  { %3088 = vmatmul.mubr.bf16.vlgmr.msra.gmra.mxu0 %v2113_v63  ;;  %v1834_v31 = vadd.f32 %v5924_v55, %v5832_v20  ;;  %v3926_v38 = vpop.eup %3925  ;;  %v2050_v48 = vmul.f32 %v1986_v21, %v5956_v8  ;;  %v1988_v53 = vadd.f32 1.0, %v3924_v44  ;;  %v1562_v18 = vmul.f32 0.5, %v5744_v9 }
 0x297   :  { %3160 = vmatprep.mubr.bf16.mxu1 %v2116_v5  ;;  %v1890_v35 = vmul.f32 0.7978846, %v1826_v27  ;;  %v3928_v32 = vpop.eup %3927  ;;  %v2058_v61 = vmul.f32 %v1994_v13, %v5961_v16  ;;  %v1996_v30 = vadd.f32 1.0, %v3926_v38  ;;  %3947 = vtanh.f32 %v1875_v60 }
 0x298   :  { %3161 = vmatmul.mubr.bf16.vlgmr.msra.gmra.mxu1 %v2115_v54  ;;  %v1898_v63 = vmul.f32 0.7978846, %v1834_v31  ;;  %v3930_v24 = vpop.eup %3929  ;;  %v2052_v45 = vmul.f32 %v1988_v53, %v5974_v56  ;;  %v1985_v25 = vadd.f32 1.0, %v3928_v32  ;;  %v1556_v55 = vmul.f32 0.5, %v5722_v11 }
 0x299   :  { %3949 = vtanh.f32 %v1883_v1  ;;  %v3932_v58 = vpop.eup %3931  ;;  %v2122_v8 = vpack.c.bf16 %v2058_v61, %v2050_v48  ;;  %v2060_v41 = vmul.f32 %v1996_v30, %v5979_v28  ;;  %v1993_v9 = vadd.f32 1.0, %v3930_v24 }
 0x29a   :  { %3951 = vtanh.f32 %v1890_v35  ;;  %v3934_v14 = vpop.eup %3933  ;;  %v2049_v54 = vmul.f32 %v1985_v25, %v5988_v39  ;;  %v1987_v16 = vadd.f32 1.0, %v3932_v58  ;;  %v1828_v49 = vadd.f32 %v5914_v22, %v5817_v33 }
 0x29b   :  { %3953 = vtanh.f32 %v1898_v63  ;;  %v3936_v15 = vpop.eup %3935  ;;  %3097 = vmatprep.mubr.bf16.mxu0 %v2122_v8  ;;  %v2124_v56 = vpack.c.bf16 %v2060_v41, %v2052_v45  ;;  %v2057_v47 = vmul.f32 %v1993_v9, %v1545_v26  ;;  %v1995_v11 = vadd.f32 1.0, %v3934_v14 }
 0x29c   :  { %v1836_v17 = vadd.f32 %v5936_v37, %v5852_v29  ;;  %v3938_v7 = vpop.eup %3937  ;;  %v2051_v28 = vmul.f32 %v1987_v16, %v1539_v50  ;;  %v2002_v52 = vadd.f32 1.0, %v3936_v15  ;;  %v1564_v36 = vmul.f32 0.5, %v5765_v10 }
 0x29d   :  { %v1892_v4 = vmul.f32 0.7978846, %v1828_v49  ;;  %v3940_v39 = vpop.eup %3939  ;;  %3170 = vmatprep.mubr.bf16.mxu1 %v2124_v56  ;;  %v2121_v6 = vpack.c.bf16 %v2057_v47, %v2049_v54  ;;  %v2059_v2 = vmul.f32 %v1995_v11, %v1547_v12  ;;  %v2010_v46 = vadd.f32 1.0, %v3938_v7  ;;  %v6245_v12 = vld [vmem:[#allocation23_spill] sm:$0xff] }
 0x29e   :  { %v1900_v22 = vmul.f32 0.7978846, %v1836_v17  ;;  %v3942_v5 = vpop.eup %3941  ;;  %v2066_v21 = vmul.f32 %v2002_v52, %v1554_v59  ;;  %v2004_v27 = vadd.f32 1.0, %v3940_v39  ;;  %v1553_v26 = vmul.f32 0.5, %v6242_v57 }
 0x29f   :  { %3955 = vtanh.f32 %v1892_v4  ;;  %v3944_v44 = vpop.eup %3943  ;;  %3098 = vmatmul.mubr.bf16.gmra.mxu0 %v2121_v6  ;;  %v2123_v37 = vpack.c.bf16 %v2059_v2, %v2051_v28  ;;  %v2074_v50 = vmul.f32 %v2010_v46, %v1562_v18  ;;  %v2012_v13 = vadd.f32 1.0, %v3942_v5 }
 0x2a0   :  { %3957 = vtanh.f32 %v1900_v22  ;;  %v1561_v60 = vmul.f32 0.5, %v5726_v62  ;;  %v2001_v1 = vadd.f32 1.0, %v3944_v44  ;;  %v1825_v31 = vadd.f32 %v6245_v12, %v5787_v42  ;;  %v6246_v62 = vld [vmem:[#allocation9_spill] sm:$0xff] }
 0x2a1   :  { %v3946_v10 = vpop.eup %3945  ;;  %v1833_v59 = vadd.f32 %v5917_v3, %v5820_v40  ;;  %3171 = vmatmul.mubr.bf16.gmra.mxu1 %v2123_v37  ;;  %v2130_v38 = vpack.c.bf16 %v2074_v50, %v2066_v21  ;;  %v2068_v57 = vmul.f32 %v2004_v27, %v1556_v55  ;;  %v2076_v48 = vmul.f32 %v2012_v13, %v1564_v36 }
 0x2a2   :  { %v2009_v53 = vadd.f32 1.0, %v3946_v10  ;;  %v2065_v35 = vmul.f32 %v2001_v1, %v1553_v26  ;;  %v1889_v32 = vmul.f32 0.7978846, %v1825_v31  ;;  %v1827_v63 = vadd.f32 %v6246_v62, %v5790_v34 }
 0x2a3   :  { %v1897_v18 = vmul.f32 0.7978846, %v1833_v59  ;;  %3107 = vmatprep.mubr.bf16.mxu0 %v2130_v38  ;;  %v2132_v61 = vpack.c.bf16 %v2076_v48, %v2068_v57  ;;  %v1835_v24 = vadd.f32 %v5921_v23, %v5823_v51  ;;  %v1555_v41 = vmul.f32 0.5, %v5696_v0 }
 0x2a4   :  { %v2073_v30 = vmul.f32 %v2009_v53, %v1561_v60  ;;  %v3948_v45 = vpop.eup %3947  ;;  %3959 = vtanh.f32 %v1889_v32  ;;  %v1891_v58 = vmul.f32 0.7978846, %v1827_v63  ;;  %v1563_v9 = vmul.f32 0.5, %v5730_v43 }
 0x2a5   :  { %3180 = vmatprep.mubr.bf16.mxu1 %v2132_v61  ;;  %v2003_v55 = vadd.f32 1.0, %v3948_v45  ;;  %3961 = vtanh.f32 %v1897_v18  ;;  %v1899_v54 = vmul.f32 0.7978846, %v1835_v24  ;;  %v1570_v49 = vmul.f32 0.5, %v5798_v19 }
 0x2a6   :  { %v3950_v3 = vpop.eup %3949  ;;  %v2129_v25 = vpack.c.bf16 %v2073_v30, %v2065_v35  ;;  %v1578_v23 = vmul.f32 0.5, %v5832_v20  ;;  %3963 = vtanh.f32 %v1891_v58  ;;  %v1572_v4 = vmul.f32 0.5, %v5817_v33 }
 0x2a7   :  { %v3952_v8 = vpop.eup %3951  ;;  %v2011_v14 = vadd.f32 1.0, %v3950_v3  ;;  %v2067_v56 = vmul.f32 %v2003_v55, %v1555_v41  ;;  %3965 = vtanh.f32 %v1899_v54  ;;  %v1580_v19 = vmul.f32 0.5, %v5852_v29 }
 0x2a8   :  { %v3954_v16 = vpop.eup %3953  ;;  %3108 = vmatmul.mubr.bf16.gmra.mxu0 %v2129_v25  ;;  %v2018_v15 = vadd.f32 1.0, %v3952_v8  ;;  %v1569_v21 = vmul.f32 0.5, %v5787_v42  ;;  %v1577_v27 = vmul.f32 0.5, %v5820_v40  ;;  %v1571_v29 = vmul.f32 0.5, %v5790_v34 }
 0x2a9   :  { %v2075_v47 = vmul.f32 %v2011_v14, %v1563_v9  ;;  %v2026_v11 = vadd.f32 1.0, %v3954_v16  ;;  %v1579_v10 = vmul.f32 0.5, %v5823_v51 }
 0x2aa   :  { %v2082_v7 = vmul.f32 %v2018_v15, %v1570_v49  ;;  %v299_v15 = vld [vmem:[%s6167_s7] sm:$0xff] }
 0x2ab   :  { %v2131_v17 = vpack.c.bf16 %v2075_v47, %v2067_v56  ;;  %v2090_v28 = vmul.f32 %v2026_v11, %v1578_v23  ;;  %v323_v56 = vld [vmem:[%s6166_s6] sm:$0x3] }
 0x2ac   :  { %v3956_v0 = vpop.eup %3955 }
 0x2ad   :  { %v3958_v52 = vpop.eup %3957  ;;  %3181 = vmatmul.mubr.bf16.gmra.mxu1 %v2131_v17  ;;  %v2138_v43 = vpack.c.bf16 %v2090_v28, %v2082_v7  ;;  %v2020_v36 = vadd.f32 1.0, %v3956_v0  ;;  %v307_v17 = vunpack.c.l.bf16 %v299_v15  ;;  %v6247_v7 = vld [vmem:[#allocation8_spill] sm:$0xff] }
 0x2ae   :  { %v2028_v39 = vadd.f32 1.0, %v3958_v52  ;;  %v6091_v28 = vrot.slane %v323_v56, %v6247_v7  ;;  %v308_v52 = vunpack.c.h.bf16 %v299_v15 }
 0x2af   :  { %3117 = vmatprep.mubr.bf16.mxu0 %v2138_v43  ;;  %v2084_v20 = vmul.f32 %v2020_v36, %v1572_v4  ;;  %v6248_v43 = vld [vmem:[#allocation7_spill] sm:$0xff]  ;;  %v300_v4 = vld [vmem:[%s6167_s7 + $0x8] sm:$0xff] }
 0x2b0   :  { %v2092_v6 = vmul.f32 %v2028_v39, %v1580_v19  ;;  %v6094_v36 = vrot.slane %v323_v56, %v6248_v43 }
 0x2b1   :  { %v3960_v2 = vpop.eup %3959 }
 0x2b2   :  { %v2140_v46 = vpack.c.bf16 %v2092_v6, %v2084_v20  ;;  %v3962_v22 = vpop.eup %3961  ;;  %v2017_v5 = vadd.f32 1.0, %v3960_v2  ;;  %v335_v2 = vadd.f32 %v6091_v28, %v307_v17  ;;  %v302_v17 = vld [vmem:[%s6167_s7 + $0x18] sm:$0xff] }
 0x2b3   :  { %v2025_v26 = vadd.f32 1.0, %v3962_v22  ;;  %v3964_v44 = vpop.eup %3963 }
 0x2b4   :  { %3190 = vmatprep.mubr.bf16.mxu1 %v2140_v46  ;;  %v3966_v37 = vpop.eup %3965  ;;  %v2081_v50 = vmul.f32 %v2017_v5, %v1569_v21  ;;  %v2019_v13 = vadd.f32 1.0, %v3964_v44  ;;  %v309_v5 = vunpack.c.l.bf16 %v300_v4  ;;  %v310_v21 = vunpack.c.h.bf16 %v300_v4 }
 0x2b5   :  { %v2089_v33 = vmul.f32 %v2025_v26, %v1577_v27  ;;  %v2027_v60 = vadd.f32 1.0, %v3966_v37  ;;  %v336_v37 = vadd.f32 %v6094_v36, %v308_v52 }
 0x2b6   :  { %v2083_v12 = vmul.f32 %v2019_v13, %v1571_v29 }
 0x2b7   :  { %v2137_v1 = vpack.c.bf16 %v2089_v33, %v2081_v50  ;;  %v2091_v31 = vmul.f32 %v2027_v60, %v1579_v10  ;;  %v301_v60 = vld [vmem:[%s6167_s7 + $0x10] sm:$0xff] }
 0x2b8   :  { %v312_v15 = vunpack.c.h.bf16 %v301_v60 }
 0x2b9   :  { %3118 = vmatmul.mubr.bf16.gmra.mxu0 %v2137_v1  ;;  %v2139_v59 = vpack.c.bf16 %v2091_v31, %v2083_v12  ;;  %v337_v1 = vadd.f32 %v6091_v28, %v309_v5 }
 0x2bb   :  { %3191 = vmatmul.mubr.bf16.gmra.mxu1 %v2139_v59  ;;  %v338_v59 = vadd.f32 %v6094_v36, %v310_v21 }
 0x2ff   :  { %v2943_v42 = vpop.f32.mrf.mxu0 }
 0x301   :  { %v2945_v40 = vpop.f32.mrf.mxu0 }
 0x302   :  { %v3016_v38 = vpop.f32.mrf.mxu1 }
 0x303   :  { %v2947_v48 = vpop.f32.mrf.mxu0  ;;  %v3017_v0 = vadd.f32 %v3016_v38, %v2943_v42 }
 0x304   :  { %v3018_v57 = vpop.f32.mrf.mxu1 }
 0x305   :  { %v2949_v35 = vpop.f32.mrf.mxu0  ;;  %v3019_v20 = vadd.f32 %v3018_v57, %v2945_v40 }
 0x306   :  { %v3020_v53 = vpop.f32.mrf.mxu1 }
 0x307   :  { %v3021_v27 = vadd.f32 %v3020_v53, %v2947_v48  ;;  %v311_v53 = vunpack.c.l.bf16 %v301_v60 }
 0x308   :  { %v3022_v32 = vpop.f32.mrf.mxu1 }
 0x309   :  { %v3023_v13 = vadd.f32 %v3022_v32, %v2949_v35 }
 0x30c   :  { %v2953_v18 = vpop.f32.mrf.mxu0 }
 0x30e   :  { %v3026_v61 = vpop.f32.mrf.mxu1  ;;  %v6042_v34 = vpop.f32.mrf.mxu0 }
 0x30f   :  { %v3027_v35 = vadd.f32 %v3026_v61, %v2953_v18  ;;  %v340_v18 = vadd.f32 %v6094_v36, %v312_v15  ;;  %v313_v61 = vunpack.c.l.bf16 %v302_v17 }
 0x310   :  { %v6044_v51 = vpop.f32.mrf.mxu1  ;;  %v6046_v30 = vpop.f32.mrf.mxu0 }
 0x312   :  { %v6048_v62 = vpop.f32.mrf.mxu1  ;;  %v6050_v63 = vpop.f32.mrf.mxu0 }
 0x314   :  { %v6052_v24 = vpop.f32.mrf.mxu1  ;;  %v6054_v45 = vpop.f32.mrf.mxu0 }
 0x316   :  { %v6058_v25 = vpop.f32.mrf.mxu0 }
 0x317   :  { %v6056_v3 = vpop.f32.mrf.mxu1 }
 0x318   :  { %v6062_v58 = vpop.f32.mrf.mxu0 }
 0x319   :  { %v6060_v55 = vpop.f32.mrf.mxu1 }
 0x31a   :  { %v6066_v41 = vpop.f32.mrf.mxu0 }
 0x31b   :  { %v6064_v8 = vpop.f32.mrf.mxu1 }
 0x31d   :  { %v6068_v9 = vpop.f32.mrf.mxu1 }
 0x32a   :  { %v6070_v14 = vpop.f32.mrf.mxu0 }
 0x32c   :  { %v6074_v16 = vpop.f32.mrf.mxu0 }
 0x32e   :  { %v6072_v54 = vpop.f32.mrf.mxu1  ;;  %v6078_v23 = vpop.f32.mrf.mxu0 }
 0x330   :  { %v6076_v49 = vpop.f32.mrf.mxu1  ;;  %v6088_v11 = vpop.f32.mrf.mxu0 }
 0x332   :  { %v6086_v47 = vpop.f32.mrf.mxu1 }
 0x334   :  { %v6099_v19 = vpop.f32.mrf.mxu1 }
 0x356   :  { %v3089_v39 = vpop.f32.mrf.mxu0 }
 0x357   :  { %v3090_v6 = vadd.f32 %v3089_v39, %v3017_v0  ;;  %v3029_v0 = vadd.f32 %v6044_v51, %v6042_v34  ;;  %v339_v39 = vadd.f32 %v6091_v28, %v311_v53  ;;  %v3033_v51 = vadd.f32 %v6052_v24, %v6050_v63 }
 0x358   :  { %v3162_v46 = vpop.f32.mrf.mxu1  ;;  %v3091_v22 = vpop.f32.mrf.mxu0  ;;  %v3037_v63 = vadd.f32 %v6056_v3, %v6054_v45  ;;  %v3041_v45 = vadd.f32 %v6064_v8, %v6062_v58 }
 0x359   :  { %v3163_v26 = vadd.f32 %v3162_v46, %v3090_v6  ;;  %v3092_v44 = vadd.f32 %v3091_v22, %v3019_v20  ;;  %v3031_v46 = vadd.f32 %v6048_v62, %v6046_v30  ;;  %v303_v30 = vld [vmem:[%s6167_s7 + $0x20] sm:$0xff] }
 0x35a   :  { %v3164_v50 = vpop.f32.mrf.mxu1  ;;  %v3093_v33 = vpop.f32.mrf.mxu0 }
 0x35b   :  { %v3165_v29 = vadd.f32 %v3164_v50, %v3092_v44  ;;  %v3094_v10 = vadd.f32 %v3093_v33, %v3021_v27  ;;  %v3201_v42 = vadd.f32 %v3163_v26, %v335_v2  ;;  %v314_v2 = vunpack.c.h.bf16 %v302_v17 }
 0x35c   :  { %v3166_v12 = vpop.f32.mrf.mxu1  ;;  %v3095_v31 = vpop.f32.mrf.mxu0 }
 0x35d   :  { %v3202_v38 = vadd.f32 %v3165_v29, %v336_v37  ;;  %v3167_v40 = vadd.f32 %v3166_v12, %v3094_v10  ;;  %v3096_v57 = vadd.f32 %v3095_v31, %v3023_v13  ;;  %v341_v37 = vadd.f32 %v6091_v28, %v313_v61 }
 0x35e   :  { %v3168_v48 = vpop.f32.mrf.mxu1  ;;  %v342_v13 = vadd.f32 %v6094_v36, %v314_v2 }
 0x35f   :  { %v3612_v32 = vpack.c.bf16 %v3202_v38, %v3201_v42  ;;  %v3169_v56 = vadd.f32 %v3168_v48, %v3096_v57  ;;  %v3099_v7 = vpop.f32.mrf.mxu0  ;;  %v3203_v52 = vadd.f32 %v3167_v40, %v337_v1  ;;  %v316_v42 = vunpack.c.h.bf16 %v303_v30  ;;  %v304_v48 = vld [vmem:[%s6167_s7 + $0x28] sm:$0xff] }
 0x360   :  { %v3100_v4 = vadd.f32 %v3099_v7, %v3027_v35  ;;  %v3039_v38 = vadd.f32 %v6060_v55, %v6058_v25  ;;  %v317_v55 = vunpack.c.l.bf16 %v304_v48  ;;  %v3043_v7 = vadd.f32 %v6068_v9, %v6066_v41 }
 0x361   :  { %3300 = vst [vmem:[#allocation4] sm:$0xff] %v3612_v32  ;;  %v3204_v43 = vadd.f32 %v3169_v56, %v338_v59  ;;  %v3172_v20 = vpop.f32.mrf.mxu1  ;;  %v3101_v6 = vpop.f32.mrf.mxu0  ;;  %v315_v59 = vunpack.c.l.bf16 %v303_v30  ;;  %v344_v25 = vadd.f32 %v6094_v36, %v316_v42 }
 0x362   :  { %v3173_v5 = vadd.f32 %v3172_v20, %v3100_v4  ;;  %v3102_v21 = vadd.f32 %v3101_v6, %v3029_v0  ;;  %v318_v4 = vunpack.c.h.bf16 %v304_v48  ;;  %v345_v8 = vadd.f32 %v6091_v28, %v317_v55 }
 0x363   :  { %v3613_v22 = vpack.c.bf16 %v3204_v43, %v3203_v52  ;;  %v3174_v27 = vpop.f32.mrf.mxu1  ;;  %v3103_v34 = vpop.f32.mrf.mxu0  ;;  %v343_v56 = vadd.f32 %v6091_v28, %v315_v59 }
 0x364   :  { %v3175_v26 = vadd.f32 %v3174_v27, %v3102_v21  ;;  %v3104_v44 = vadd.f32 %v3103_v34, %v3031_v46  ;;  %v3205_v62 = vadd.f32 %v3173_v5, %v339_v39  ;;  %v346_v46 = vadd.f32 %v6094_v36, %v318_v4  ;;  %v305_v27 = vld [vmem:[%s6167_s7 + $0x30] sm:$0xff] }
 0x365   :  { %3301 = vst [vmem:[#allocation4 + $0x8] sm:$0xff] %v3613_v22  ;;  %v3176_v50 = vpop.f32.mrf.mxu1  ;;  %v3105_v33 = vpop.f32.mrf.mxu0 }
 0x366   :  { %v3206_v29 = vadd.f32 %v3175_v26, %v340_v18  ;;  %v3177_v10 = vadd.f32 %v3176_v50, %v3104_v44  ;;  %v3106_v60 = vadd.f32 %v3105_v33, %v3033_v51  ;;  %v3047_v51 = vadd.f32 %v6072_v54, %v6070_v14  ;;  %v306_v50 = vld [vmem:[%s6167_s7 + $0x38] sm:$0xff]  ;;  %s3989_s7 = smov [#allocation4]  }
 0x367   :  { %v3178_v24 = vpop.f32.mrf.mxu1  ;;  %v319_v44 = vunpack.c.l.bf16 %v305_v27  ;;  %v3049_v33 = vadd.f32 %v6076_v49, %v6074_v16  ;;  %s3313_s22 = sshll.u32 %s3989_s7, 4  ;;  %s3314_s22 = int_to_ptr.vmem [resolvable:$true] %s3313_s22 }
 0x368   :  { %v3109_v1 = vpop.f32.mrf.mxu0  ;;  %v3614_v12 = vpack.c.bf16 %v3206_v29, %v3205_v62  ;;  %v3179_v31 = vadd.f32 %v3178_v24, %v3106_v60  ;;  %v3207_v53 = vadd.f32 %v3177_v10, %v341_v37  ;;  %v320_v37 = vunpack.c.h.bf16 %v305_v27  ;;  %s3967_s23 = scalar_lea.vmem %s3314_s22, 1024  ;;  %p3972_p1 = scmp.lt.s32.totalorder %s3314_s22, %s3314_s22 }
 0x369   :  { %v3110_v40 = vadd.f32 %v3109_v1, %v3037_v63  ;;  %v3051_v62 = vadd.f32 %v6086_v47, %v6078_v23  ;;  %v321_v60 = vunpack.c.l.bf16 %v306_v50  ;;  %v347_v14 = vadd.f32 %v6091_v28, %v319_v44  ;;  %p3968_p0 = scmp.ne.s32.totalorder %s3314_s22, %s3967_s23  ;;  %p3973_p2 = scmp.lt.s32.totalorder %s3967_s23, %s3967_s23 }
 0x36a   :  { %v3111_v57 = vpop.f32.mrf.mxu0  ;;  %3302 = vst [vmem:[#allocation4 + $0x10] sm:$0xff] %v3614_v12  ;;  %v3208_v15 = vadd.f32 %v3179_v31, %v342_v13  ;;  %v348_v63 = vadd.f32 %v6094_v36, %v320_v37  ;;  %v322_v1 = vunpack.c.h.bf16 %v306_v50  ;;  %v3053_v12 = vadd.f32 %v6099_v19, %v6088_v11 }
 0x36b   :  { %v3112_v3 = vadd.f32 %v3111_v57, %v3039_v38  ;;  %v349_v42 = vadd.f32 %v6091_v28, %v321_v60  ;;  %p3974_p3 = por %p3973_p2, %p3972_p1 }
 0x36c   :  { %v3113_v35 = vpop.f32.mrf.mxu0  ;;  %v3615_v32 = vpack.c.bf16 %v3208_v15, %v3207_v53  ;;  %v350_v48 = vadd.f32 %v6094_v36, %v322_v1 }
 0x36d   :  { %v3182_v17 = vpop.f32.mrf.mxu1  ;;  %v3114_v52 = vadd.f32 %v3113_v35, %v3041_v45  ;;  %p3975_p4 = pnand %p3974_p3, %p3968_p0 }
 0x36e   :  { %v3183_v0 = vadd.f32 %v3182_v17, %v3110_v40  ;;  %v3115_v43 = vpop.f32.mrf.mxu0  ;;  %3303 = vst [vmem:[#allocation4 + $0x18] sm:$0xff] %v3615_v32 }
 0x36f   :  { %v3184_v39 = vpop.f32.mrf.mxu1  ;;  %v3116_v58 = vadd.f32 %v3115_v43, %v3043_v7 }
 0x370   :  { %v3185_v20 = vadd.f32 %v3184_v39, %v3112_v3  ;;  %v3209_v18 = vadd.f32 %v3183_v0, %v343_v56 }
 0x371   :  { %v3186_v6 = vpop.f32.mrf.mxu1 }
 0x372   :  { %v3210_v61 = vadd.f32 %v3185_v20, %v344_v25  ;;  %v3187_v2 = vadd.f32 %v3186_v6, %v3114_v52 }
 0x373   :  { %v3188_v22 = vpop.f32.mrf.mxu1 }
 0x374   :  { %v3616_v5 = vpack.c.bf16 %v3210_v61, %v3209_v18  ;;  %v3189_v21 = vadd.f32 %v3188_v22, %v3116_v58  ;;  %v3211_v41 = vadd.f32 %v3187_v2, %v345_v8 }
 0x376   :  { %3304 = vst [vmem:[#allocation4 + $0x20] sm:$0xff] %v3616_v5  ;;  %v3212_v9 = vadd.f32 %v3189_v21, %v346_v46 }
 0x378   :  { %v3617_v34 = vpack.c.bf16 %v3212_v9, %v3211_v41 }
 0x379   :  { %v3119_v26 = vpop.f32.mrf.mxu0 }
 0x37a   :  { %3305 = vst [vmem:[#allocation4 + $0x28] sm:$0xff] %v3617_v34  ;;  %v3120_v13 = vadd.f32 %v3119_v26, %v3047_v51 }
 0x37b   :  { %v3121_v30 = vpop.f32.mrf.mxu0  ;;  %v3192_v29 = vpop.f32.mrf.mxu1 }
 0x37c   :  { %v3122_v10 = vadd.f32 %v3121_v30, %v3049_v33  ;;  %v3193_v54 = vadd.f32 %v3192_v29, %v3120_v13 }
 0x37d   :  { %v3123_v24 = vpop.f32.mrf.mxu0  ;;  %v3194_v31 = vpop.f32.mrf.mxu1 }
 0x37e   :  { %v3124_v16 = vadd.f32 %v3123_v24, %v3051_v62  ;;  %v3195_v49 = vadd.f32 %v3194_v31, %v3122_v10  ;;  %v3213_v38 = vadd.f32 %v3193_v54, %v347_v14 }
 0x37f   :  { %v3125_v59 = vpop.f32.mrf.mxu0  ;;  %v3196_v23 = vpop.f32.mrf.mxu1 }
 0x380   :  { %v3126_v47 = vadd.f32 %v3125_v59, %v3053_v12  ;;  %v3214_v40 = vadd.f32 %v3195_v49, %v348_v63  ;;  %v3197_v57 = vadd.f32 %v3196_v23, %v3124_v16 }
 0x381   :  { %v3198_v53 = vpop.f32.mrf.mxu1 }
 0x382   :  { %v3618_v15 = vpack.c.bf16 %v3214_v40, %v3213_v38  ;;  %v3199_v45 = vadd.f32 %v3198_v53, %v3126_v47  ;;  %v3215_v11 = vadd.f32 %v3197_v57, %v349_v42 }
 0x384   :  { %3306 = vst [vmem:[#allocation4 + $0x30] sm:$0xff] %v3618_v15  ;;  %v3216_v19 = vadd.f32 %v3199_v45, %v350_v48 }
 0x386   :  { %v3619_v3 = vpack.c.bf16 %v3216_v19, %v3215_v11 }
 0x388   :  { %3307 = vst [vmem:[#allocation4 + $0x38] sm:$0xff] %v3619_v3 }
 0x389   :  { %3978 = shalt.err (!%p3975_p4)
}
 0x38a   :  { %s3990_s24 = smov 128   ;;  %s3991_s25 = smov 8  }
 0x38b   :  { %3319 = dma.vmem_to_hbm [thread:$0]  %s3314_s22, 1024, %s6168_s8, [#allocation5], %s3990_s24, %s3990_s24, %s3991_s25  }
 0x38c   :  { %3987 = dma.done.wait [#allocation5], 1024  }
 0x38d   :  { %3988 = vsyncadd [#allocation5], 4294966272 }
 0x38e   :  { %3323 = vsyncpa [#allocation5], 1 }

</bundles_post_ra>
